<compile_context>
chip_gen: v7x
topology: tpu7x:2x2x1
jax: 0.10.0
libtpu: 0.0.40
codegen_flags: <defaults>
</compile_context>

<pallas_src>
import jax
import jax.numpy as jnp
import numpy as np
from jax.experimental import pallas as pl
from jax.experimental.pallas import tpu as pltpu

GRID_SIZE = 5
SPLINE_ORDER = 3
NUM_BASES = GRID_SIZE + SPLINE_ORDER              # 8 B-spline bases per feature
NUM_GRID_PTS = GRID_SIZE + 2 * SPLINE_ORDER + 1   # 12 knots per feature
GRID_RANGE = (-1.0, 1.0)
H = (GRID_RANGE[1] - GRID_RANGE[0]) / GRID_SIZE   # uniform knot spacing (0.4)
# Trace-time constant knots (identical for every feature in efficient-KAN).
KNOTS = [(i - SPLINE_ORDER) * H + GRID_RANGE[0] for i in range(NUM_GRID_PTS)]
BN_EPS = 1e-5


# ---------------------------------------------------------------------------
# in-kernel math (constant-knot, lane-dense layout: channels on the lane axis)
# ---------------------------------------------------------------------------
def _b_spline_bases(x):
    """Cox-de Boor with scalar knots. x: (N, C) f32 -> list of NUM_BASES (N, C)."""
    bases = [
        jnp.logical_and(x >= KNOTS[i], x < KNOTS[i + 1]).astype(x.dtype)
        for i in range(NUM_GRID_PTS - 1)
    ]
    for k in range(1, SPLINE_ORDER + 1):
        inv = 1.0 / (k * H)  # uniform grid: both denominators are k*h (constant)
        bases = [
            (x - KNOTS[i]) * inv * bases[i]
            + (KNOTS[i + k + 1] - x) * inv * bases[i + 1]
            for i in range(len(bases) - 1)
        ]
    return bases  # NUM_BASES arrays, each (N, C)


def _kan_linear_fused(x, w_fused):
    """One fused MXU matmul: [silu(x) | bases_0..bases_7] @ w_fused.

    x: (N, C_in) f32, w_fused: (9*C_in, C_out) f32 -> (N, C_out) f32.
    """
    feats = [jax.nn.silu(x)] + _b_spline_bases(x)
    z = jnp.concatenate(feats, axis=-1)                       # (N, 9*C_in)
    return jnp.dot(z, w_fused, preferred_element_type=jnp.float32)


def kan_blocks_kernel(*refs):
    """refs = (x_ref, [w1, s1, b1, w2, s2, b2] * n_blocks, o_ref)."""
    x_ref = refs[0]
    o_ref = refs[-1]
    param_refs = refs[1:-1]
    n_blocks = len(param_refs) // 6

    x = x_ref[...].astype(jnp.float32)
    for b in range(n_blocks):  # trace-time unroll; activations stay in VMEM
        w1, s1, b1, w2, s2, b2 = param_refs[6 * b: 6 * b + 6]
        h = _kan_linear_fused(x, w1[...])          # KANLinear(C -> ch)
        h = h * s1[...] + b1[...]                  # BatchNorm1d (folded, eval)
        h = _kan_linear_fused(h, w2[...])          # KANLinear(ch -> C)
        h = h * s2[...] + b2[...]                  # BatchNorm1d (folded, eval)
        x = x + h                                  # residual
    o_ref[...] = x.astype(o_ref.dtype)


# ---------------------------------------------------------------------------
# wrapper: weight prep + pallas_call
# ---------------------------------------------------------------------------
def _fuse_kan_weights(base_w, spline_w):
    """(out,in) base weight + (out,in*8) feature-major spline weight ->
    single (9*in, out) matrix matching [silu(x) | bases(basis-major)]."""
    out_f, in_f = base_w.shape
    sw = spline_w.reshape(out_f, in_f, NUM_BASES)     # (out, in, 8)
    sw = jnp.transpose(sw, (2, 1, 0)).reshape(NUM_BASES * in_f, out_f)
    return jnp.concatenate([base_w.T, sw], axis=0)    # (9*in, out)


def prepare_block_params(blocks_params):
    flat = []
    for p in blocks_params:
        flat.extend([
            _fuse_kan_weights(p["base_w1"], p["spline_w1"]),
            p["bn1_scale"], p["bn1_bias"],
            _fuse_kan_weights(p["base_w2"], p["spline_w2"]),
            p["bn2_scale"], p["bn2_bias"],
        ])
    return flat


def kan_blocks_apply(x2d, flat_params, tile_n):
    Np, C = x2d.shape

    in_specs = [pl.BlockSpec((tile_n, C), lambda i: (i, 0))]
    for arr in flat_params:  # weights / BN params: full array, constant block
        in_specs.append(pl.BlockSpec(arr.shape, lambda i: (0, 0)))

    return pl.pallas_call(
        kan_blocks_kernel,
        out_shape=jax.ShapeDtypeStruct((Np, C), x2d.dtype),
        grid_spec=pltpu.PrefetchScalarGridSpec(
            num_scalar_prefetch=0,
            grid=(Np // tile_n,),
            in_specs=in_specs,
            out_specs=pl.BlockSpec((tile_n, C), lambda i: (i, 0)),
        ),
        compiler_params=pltpu.CompilerParams(
            dimension_semantics=("parallel",),
            vmem_limit_bytes=32 * 1024 * 1024,  # safe on v5e/v6e/v7x
        ),
    )(x2d, *flat_params)


def kan_sub_extraction(x, blocks_params, tile_n=512):
    """x: (B, C, G) -> (B, C, G), matching KANSubExtraction.forward (eval BN)."""
    B, C, G = x.shape
    N = B * G
    x2d = jnp.transpose(x, (0, 2, 1)).reshape(N, C)

    # clamp the tile to the (8-aligned) problem size, then pad the tail rows
    tile_n = int(min(tile_n, max(8, pl.cdiv(N, 8) * 8)))
    Np = int(pl.cdiv(N, tile_n)) * tile_n
    if Np != N:
        x2d = jnp.pad(x2d, ((0, Np - N), (0, 0)))

    flat_params = prepare_block_params(blocks_params)
    out2d = kan_blocks_apply(x2d, flat_params, tile_n)
    out2d = out2d[:N]
    return jnp.transpose(out2d.reshape(B, G, C), (0, 2, 1))


# ---------------------------------------------------------------------------
# deterministic parameter construction (PyTorch-layout weights)
# ---------------------------------------------------------------------------
def make_kan_grid(features):
    pts = jnp.asarray(KNOTS, jnp.float32)
    return jnp.tile(pts[None, :], (features, 1))  # (features, NUM_GRID_PTS)


def init_bn(key, n):
    k1, k2, k3, k4 = jax.random.split(key, 4)
    gamma = 1.0 + 0.1 * jax.random.normal(k1, (n,), jnp.float32)
    beta = 0.1 * jax.random.normal(k2, (n,), jnp.float32)
    mean = 0.1 * jax.random.normal(k3, (n,), jnp.float32)
    var = 1.0 + 0.1 * jax.random.uniform(k4, (n,), jnp.float32)
    scale = gamma / jnp.sqrt(var + BN_EPS)
    bias = beta - mean * scale
    return scale[None, :], bias[None, :]


def init_block_params(key, channel, res_expansion=1.0):
    ch = int(channel * res_expansion)
    ks = jax.random.split(key, 6)
    bn1_scale, bn1_bias = init_bn(ks[4], ch)
    bn2_scale, bn2_bias = init_bn(ks[5], channel)
    return dict(
        base_w1=0.3 * jax.random.normal(ks[0], (ch, channel), jnp.float32),
        spline_w1=0.1 * jax.random.normal(ks[1], (ch, channel * NUM_BASES), jnp.float32),
        grid1=make_kan_grid(channel),
        bn1_scale=bn1_scale, bn1_bias=bn1_bias,
        base_w2=0.3 * jax.random.normal(ks[2], (channel, ch), jnp.float32),
        spline_w2=0.1 * jax.random.normal(ks[3], (channel, ch * NUM_BASES), jnp.float32),
        grid2=make_kan_grid(ch),
        bn2_scale=bn2_scale, bn2_bias=bn2_bias,
    )


# ---------------------------------------------------------------------------
# pure-JAX reference (original PyTorch formulation: grid arrays, two matmuls)
# ---------------------------------------------------------------------------
def _ref_b_splines(x, grid):
    xg = x[:, :, None]
    g = grid[None, :, :]
    bases = jnp.logical_and(xg >= g[:, :, :-1], xg < g[:, :, 1:]).astype(x.dtype)
    for k in range(1, SPLINE_ORDER + 1):
        left = (xg - g[:, :, : -(k + 1)]) / (g[:, :, k:-1] - g[:, :, : -(k + 1)])
        right = (g[:, :, k + 1:] - xg) / (g[:, :, k + 1:] - g[:, :, 1:-k])
        bases = left * bases[:, :, :-1] + right * bases[:, :, 1:]
    return bases


def _ref_kan_linear(x, base_w, spline_w, grid):
    base_out = jnp.dot(jax.nn.silu(x), base_w.T, preferred_element_type=jnp.float32)
    bs = _ref_b_splines(x, grid).reshape(x.shape[0], -1)
    spline_out = jnp.dot(bs, spline_w.T, preferred_element_type=jnp.float32)
    return base_out + spline_out


def ref_block(x2d, p):
    h = _ref_kan_linear(x2d, p["base_w1"], p["spline_w1"], p["grid1"])
    h = h * p["bn1_scale"] + p["bn1_bias"]
    h = _ref_kan_linear(h, p["base_w2"], p["spline_w2"], p["grid2"])
    h = h * p["bn2_scale"] + p["bn2_bias"]
    return h + x2d


def ref_forward(x, blocks_params):
    B, C, G = x.shape
    x2d = jnp.transpose(x, (0, 2, 1)).reshape(B * G, C)
    for p in blocks_params:
        x2d = ref_block(x2d, p)
    return jnp.transpose(x2d.reshape(B, G, -1), (0, 2, 1))


if __name__ == "__main__":
    B, C, G = 2, 16, 9          # out_channels=16, G=9 points -> N=18 (tests tail pad)
    blocks = 2                  # >1 to exercise in-kernel block fusion
    res_expansion = 1.0

    key = jax.random.PRNGKey(0)
    kx, kp = jax.random.split(key)
    x = jax.random.uniform(kx, (B, C, G), jnp.float32, minval=-1.0, maxval=1.0)

    blocks_params = [init_block_params(k, C, res_expansion)
                     for k in jax.random.split(kp, blocks)]

    out = kan_sub_extraction(x, blocks_params)
    out = jax.block_until_ready(out)

    ref = jax.block_until_ready(ref_forward(x, blocks_params))
    assert out.shape == (B, C, G)
    np.testing.assert_allclose(np.asarray(out), np.asarray(ref), rtol=1e-4, atol=1e-4)

    print("KERNEL_OK")
</pallas_src>

<mosaic_0001>
module attributes {stable_mosaic.version = 11 : i64} {
  func.func @kan_blocks_kernel(%arg0: i32, %arg1: memref<24x16xf32, #tpu.memory_space<vmem>>, %arg2: memref<144x16xf32, #tpu.memory_space<vmem>>, %arg3: memref<1x16xf32, #tpu.memory_space<vmem>>, %arg4: memref<1x16xf32, #tpu.memory_space<vmem>>, %arg5: memref<144x16xf32, #tpu.memory_space<vmem>>, %arg6: memref<1x16xf32, #tpu.memory_space<vmem>>, %arg7: memref<1x16xf32, #tpu.memory_space<vmem>>, %arg8: memref<144x16xf32, #tpu.memory_space<vmem>>, %arg9: memref<1x16xf32, #tpu.memory_space<vmem>>, %arg10: memref<1x16xf32, #tpu.memory_space<vmem>>, %arg11: memref<144x16xf32, #tpu.memory_space<vmem>>, %arg12: memref<1x16xf32, #tpu.memory_space<vmem>>, %arg13: memref<1x16xf32, #tpu.memory_space<vmem>>, %arg14: memref<24x16xf32, #tpu.memory_space<vmem>>) attributes {dimension_semantics = [#tpu.dimension_semantics<parallel>], iteration_bounds = array<i64: 1>, scalar_prefetch = 0 : i64, scratch_operands = 0 : i64, tpu.core_type = #tpu.core_type<tc>, window_params = [{transform_indices = @transform_0, window_bounds = array<i64: 24, 16>}, {pipeline_mode = #tpu.pipeline_mode<synchronous>, transform_indices = @transform_1, window_bounds = array<i64: 144, 16>}, {pipeline_mode = #tpu.pipeline_mode<synchronous>, transform_indices = @transform_2, window_bounds = array<i64: 1, 16>}, {pipeline_mode = #tpu.pipeline_mode<synchronous>, transform_indices = @transform_3, window_bounds = array<i64: 1, 16>}, {pipeline_mode = #tpu.pipeline_mode<synchronous>, transform_indices = @transform_4, window_bounds = array<i64: 144, 16>}, {pipeline_mode = #tpu.pipeline_mode<synchronous>, transform_indices = @transform_5, window_bounds = array<i64: 1, 16>}, {pipeline_mode = #tpu.pipeline_mode<synchronous>, transform_indices = @transform_6, window_bounds = array<i64: 1, 16>}, {pipeline_mode = #tpu.pipeline_mode<synchronous>, transform_indices = @transform_7, window_bounds = array<i64: 144, 16>}, {pipeline_mode = #tpu.pipeline_mode<synchronous>, transform_indices = @transform_8, window_bounds = array<i64: 1, 16>}, {pipeline_mode = #tpu.pipeline_mode<synchronous>, transform_indices = @transform_9, window_bounds = array<i64: 1, 16>}, {pipeline_mode = #tpu.pipeline_mode<synchronous>, transform_indices = @transform_10, window_bounds = array<i64: 144, 16>}, {pipeline_mode = #tpu.pipeline_mode<synchronous>, transform_indices = @transform_11, window_bounds = array<i64: 1, 16>}, {pipeline_mode = #tpu.pipeline_mode<synchronous>, transform_indices = @transform_12, window_bounds = array<i64: 1, 16>}, {transform_indices = @transform_13, window_bounds = array<i64: 24, 16>}]} {
    %c0 = arith.constant 0 : index
    %c0_0 = arith.constant 0 : index
    %0 = vector.load %arg1[%c0, %c0_0] : memref<24x16xf32, #tpu.memory_space<vmem>>, vector<24x16xf32>
    %c0_1 = arith.constant 0 : index
    %c0_2 = arith.constant 0 : index
    %1 = vector.load %arg2[%c0_1, %c0_2] : memref<144x16xf32, #tpu.memory_space<vmem>>, vector<144x16xf32>
    %2 = arith.negf %0 : vector<24x16xf32>
    %3 = math.exp %2 : vector<24x16xf32>
    %cst = arith.constant 1.000000e+00 : f32
    %4 = vector.broadcast %cst : f32 to vector<24x16xf32>
    %5 = arith.addf %4, %3 : vector<24x16xf32>
    %6 = arith.divf %4, %5 : vector<24x16xf32>
    %7 = arith.mulf %0, %6 : vector<24x16xf32>
    %cst_3 = arith.constant -2.200000e+00 : f32
    %8 = vector.broadcast %cst_3 : f32 to vector<24x16xf32>
    %9 = arith.cmpf oge, %0, %8 : vector<24x16xf32>
    %cst_4 = arith.constant -1.800000e+00 : f32
    %10 = vector.broadcast %cst_4 : f32 to vector<24x16xf32>
    %11 = arith.cmpf olt, %0, %10 : vector<24x16xf32>
    %12 = arith.andi %9, %11 : vector<24x16xi1>
    %13 = arith.extui %12 : vector<24x16xi1> to vector<24x16xi32>
    %14 = arith.sitofp %13 : vector<24x16xi32> to vector<24x16xf32>
    %cst_5 = arith.constant -1.800000e+00 : f32
    %15 = vector.broadcast %cst_5 : f32 to vector<24x16xf32>
    %16 = arith.cmpf oge, %0, %15 : vector<24x16xf32>
    %cst_6 = arith.constant -1.400000e+00 : f32
    %17 = vector.broadcast %cst_6 : f32 to vector<24x16xf32>
    %18 = arith.cmpf olt, %0, %17 : vector<24x16xf32>
    %19 = arith.andi %16, %18 : vector<24x16xi1>
    %20 = arith.extui %19 : vector<24x16xi1> to vector<24x16xi32>
    %21 = arith.sitofp %20 : vector<24x16xi32> to vector<24x16xf32>
    %cst_7 = arith.constant -1.400000e+00 : f32
    %22 = vector.broadcast %cst_7 : f32 to vector<24x16xf32>
    %23 = arith.cmpf oge, %0, %22 : vector<24x16xf32>
    %cst_8 = arith.constant -1.000000e+00 : f32
    %24 = vector.broadcast %cst_8 : f32 to vector<24x16xf32>
    %25 = arith.cmpf olt, %0, %24 : vector<24x16xf32>
    %26 = arith.andi %23, %25 : vector<24x16xi1>
    %27 = arith.extui %26 : vector<24x16xi1> to vector<24x16xi32>
    %28 = arith.sitofp %27 : vector<24x16xi32> to vector<24x16xf32>
    %cst_9 = arith.constant -1.000000e+00 : f32
    %29 = vector.broadcast %cst_9 : f32 to vector<24x16xf32>
    %30 = arith.cmpf oge, %0, %29 : vector<24x16xf32>
    %cst_10 = arith.constant -6.000000e-01 : f32
    %31 = vector.broadcast %cst_10 : f32 to vector<24x16xf32>
    %32 = arith.cmpf olt, %0, %31 : vector<24x16xf32>
    %33 = arith.andi %30, %32 : vector<24x16xi1>
    %34 = arith.extui %33 : vector<24x16xi1> to vector<24x16xi32>
    %35 = arith.sitofp %34 : vector<24x16xi32> to vector<24x16xf32>
    %cst_11 = arith.constant -6.000000e-01 : f32
    %36 = vector.broadcast %cst_11 : f32 to vector<24x16xf32>
    %37 = arith.cmpf oge, %0, %36 : vector<24x16xf32>
    %cst_12 = arith.constant -2.000000e-01 : f32
    %38 = vector.broadcast %cst_12 : f32 to vector<24x16xf32>
    %39 = arith.cmpf olt, %0, %38 : vector<24x16xf32>
    %40 = arith.andi %37, %39 : vector<24x16xi1>
    %41 = arith.extui %40 : vector<24x16xi1> to vector<24x16xi32>
    %42 = arith.sitofp %41 : vector<24x16xi32> to vector<24x16xf32>
    %cst_13 = arith.constant -2.000000e-01 : f32
    %43 = vector.broadcast %cst_13 : f32 to vector<24x16xf32>
    %44 = arith.cmpf oge, %0, %43 : vector<24x16xf32>
    %cst_14 = arith.constant 2.000000e-01 : f32
    %45 = vector.broadcast %cst_14 : f32 to vector<24x16xf32>
    %46 = arith.cmpf olt, %0, %45 : vector<24x16xf32>
    %47 = arith.andi %44, %46 : vector<24x16xi1>
    %48 = arith.extui %47 : vector<24x16xi1> to vector<24x16xi32>
    %49 = arith.sitofp %48 : vector<24x16xi32> to vector<24x16xf32>
    %cst_15 = arith.constant 2.000000e-01 : f32
    %50 = vector.broadcast %cst_15 : f32 to vector<24x16xf32>
    %51 = arith.cmpf oge, %0, %50 : vector<24x16xf32>
    %cst_16 = arith.constant 6.000000e-01 : f32
    %52 = vector.broadcast %cst_16 : f32 to vector<24x16xf32>
    %53 = arith.cmpf olt, %0, %52 : vector<24x16xf32>
    %54 = arith.andi %51, %53 : vector<24x16xi1>
    %55 = arith.extui %54 : vector<24x16xi1> to vector<24x16xi32>
    %56 = arith.sitofp %55 : vector<24x16xi32> to vector<24x16xf32>
    %cst_17 = arith.constant 6.000000e-01 : f32
    %57 = vector.broadcast %cst_17 : f32 to vector<24x16xf32>
    %58 = arith.cmpf oge, %0, %57 : vector<24x16xf32>
    %cst_18 = arith.constant 1.000000e+00 : f32
    %59 = vector.broadcast %cst_18 : f32 to vector<24x16xf32>
    %60 = arith.cmpf olt, %0, %59 : vector<24x16xf32>
    %61 = arith.andi %58, %60 : vector<24x16xi1>
    %62 = arith.extui %61 : vector<24x16xi1> to vector<24x16xi32>
    %63 = arith.sitofp %62 : vector<24x16xi32> to vector<24x16xf32>
    %cst_19 = arith.constant 1.000000e+00 : f32
    %64 = vector.broadcast %cst_19 : f32 to vector<24x16xf32>
    %65 = arith.cmpf oge, %0, %64 : vector<24x16xf32>
    %cst_20 = arith.constant 1.400000e+00 : f32
    %66 = vector.broadcast %cst_20 : f32 to vector<24x16xf32>
    %67 = arith.cmpf olt, %0, %66 : vector<24x16xf32>
    %68 = arith.andi %65, %67 : vector<24x16xi1>
    %69 = arith.extui %68 : vector<24x16xi1> to vector<24x16xi32>
    %70 = arith.sitofp %69 : vector<24x16xi32> to vector<24x16xf32>
    %cst_21 = arith.constant 1.400000e+00 : f32
    %71 = vector.broadcast %cst_21 : f32 to vector<24x16xf32>
    %72 = arith.cmpf oge, %0, %71 : vector<24x16xf32>
    %cst_22 = arith.constant 1.800000e+00 : f32
    %73 = vector.broadcast %cst_22 : f32 to vector<24x16xf32>
    %74 = arith.cmpf olt, %0, %73 : vector<24x16xf32>
    %75 = arith.andi %72, %74 : vector<24x16xi1>
    %76 = arith.extui %75 : vector<24x16xi1> to vector<24x16xi32>
    %77 = arith.sitofp %76 : vector<24x16xi32> to vector<24x16xf32>
    %cst_23 = arith.constant 1.800000e+00 : f32
    %78 = vector.broadcast %cst_23 : f32 to vector<24x16xf32>
    %79 = arith.cmpf oge, %0, %78 : vector<24x16xf32>
    %cst_24 = arith.constant 2.200000e+00 : f32
    %80 = vector.broadcast %cst_24 : f32 to vector<24x16xf32>
    %81 = arith.cmpf olt, %0, %80 : vector<24x16xf32>
    %82 = arith.andi %79, %81 : vector<24x16xi1>
    %83 = arith.extui %82 : vector<24x16xi1> to vector<24x16xi32>
    %84 = arith.sitofp %83 : vector<24x16xi32> to vector<24x16xf32>
    %cst_25 = arith.constant -2.200000e+00 : f32
    %85 = vector.broadcast %cst_25 : f32 to vector<24x16xf32>
    %86 = arith.subf %0, %85 : vector<24x16xf32>
    %cst_26 = arith.constant 2.500000e+00 : f32
    %87 = vector.broadcast %cst_26 : f32 to vector<24x16xf32>
    %88 = arith.mulf %86, %87 : vector<24x16xf32>
    %89 = arith.mulf %88, %14 : vector<24x16xf32>
    %cst_27 = arith.constant -1.400000e+00 : f32
    %90 = vector.broadcast %cst_27 : f32 to vector<24x16xf32>
    %91 = arith.subf %90, %0 : vector<24x16xf32>
    %cst_28 = arith.constant 2.500000e+00 : f32
    %92 = vector.broadcast %cst_28 : f32 to vector<24x16xf32>
    %93 = arith.mulf %91, %92 : vector<24x16xf32>
    %94 = arith.mulf %93, %21 : vector<24x16xf32>
    %95 = arith.addf %89, %94 : vector<24x16xf32>
    %cst_29 = arith.constant -1.800000e+00 : f32
    %96 = vector.broadcast %cst_29 : f32 to vector<24x16xf32>
    %97 = arith.subf %0, %96 : vector<24x16xf32>
    %cst_30 = arith.constant 2.500000e+00 : f32
    %98 = vector.broadcast %cst_30 : f32 to vector<24x16xf32>
    %99 = arith.mulf %97, %98 : vector<24x16xf32>
    %100 = arith.mulf %99, %21 : vector<24x16xf32>
    %cst_31 = arith.constant -1.000000e+00 : f32
    %101 = vector.broadcast %cst_31 : f32 to vector<24x16xf32>
    %102 = arith.subf %101, %0 : vector<24x16xf32>
    %cst_32 = arith.constant 2.500000e+00 : f32
    %103 = vector.broadcast %cst_32 : f32 to vector<24x16xf32>
    %104 = arith.mulf %102, %103 : vector<24x16xf32>
    %105 = arith.mulf %104, %28 : vector<24x16xf32>
    %106 = arith.addf %100, %105 : vector<24x16xf32>
    %cst_33 = arith.constant -1.400000e+00 : f32
    %107 = vector.broadcast %cst_33 : f32 to vector<24x16xf32>
    %108 = arith.subf %0, %107 : vector<24x16xf32>
    %cst_34 = arith.constant 2.500000e+00 : f32
    %109 = vector.broadcast %cst_34 : f32 to vector<24x16xf32>
    %110 = arith.mulf %108, %109 : vector<24x16xf32>
    %111 = arith.mulf %110, %28 : vector<24x16xf32>
    %cst_35 = arith.constant -6.000000e-01 : f32
    %112 = vector.broadcast %cst_35 : f32 to vector<24x16xf32>
    %113 = arith.subf %112, %0 : vector<24x16xf32>
    %cst_36 = arith.constant 2.500000e+00 : f32
    %114 = vector.broadcast %cst_36 : f32 to vector<24x16xf32>
    %115 = arith.mulf %113, %114 : vector<24x16xf32>
    %116 = arith.mulf %115, %35 : vector<24x16xf32>
    %117 = arith.addf %111, %116 : vector<24x16xf32>
    %cst_37 = arith.constant -1.000000e+00 : f32
    %118 = vector.broadcast %cst_37 : f32 to vector<24x16xf32>
    %119 = arith.subf %0, %118 : vector<24x16xf32>
    %cst_38 = arith.constant 2.500000e+00 : f32
    %120 = vector.broadcast %cst_38 : f32 to vector<24x16xf32>
    %121 = arith.mulf %119, %120 : vector<24x16xf32>
    %122 = arith.mulf %121, %35 : vector<24x16xf32>
    %cst_39 = arith.constant -2.000000e-01 : f32
    %123 = vector.broadcast %cst_39 : f32 to vector<24x16xf32>
    %124 = arith.subf %123, %0 : vector<24x16xf32>
    %cst_40 = arith.constant 2.500000e+00 : f32
    %125 = vector.broadcast %cst_40 : f32 to vector<24x16xf32>
    %126 = arith.mulf %124, %125 : vector<24x16xf32>
    %127 = arith.mulf %126, %42 : vector<24x16xf32>
    %128 = arith.addf %122, %127 : vector<24x16xf32>
    %cst_41 = arith.constant -6.000000e-01 : f32
    %129 = vector.broadcast %cst_41 : f32 to vector<24x16xf32>
    %130 = arith.subf %0, %129 : vector<24x16xf32>
    %cst_42 = arith.constant 2.500000e+00 : f32
    %131 = vector.broadcast %cst_42 : f32 to vector<24x16xf32>
    %132 = arith.mulf %130, %131 : vector<24x16xf32>
    %133 = arith.mulf %132, %42 : vector<24x16xf32>
    %cst_43 = arith.constant 2.000000e-01 : f32
    %134 = vector.broadcast %cst_43 : f32 to vector<24x16xf32>
    %135 = arith.subf %134, %0 : vector<24x16xf32>
    %cst_44 = arith.constant 2.500000e+00 : f32
    %136 = vector.broadcast %cst_44 : f32 to vector<24x16xf32>
    %137 = arith.mulf %135, %136 : vector<24x16xf32>
    %138 = arith.mulf %137, %49 : vector<24x16xf32>
    %139 = arith.addf %133, %138 : vector<24x16xf32>
    %cst_45 = arith.constant -2.000000e-01 : f32
    %140 = vector.broadcast %cst_45 : f32 to vector<24x16xf32>
    %141 = arith.subf %0, %140 : vector<24x16xf32>
    %cst_46 = arith.constant 2.500000e+00 : f32
    %142 = vector.broadcast %cst_46 : f32 to vector<24x16xf32>
    %143 = arith.mulf %141, %142 : vector<24x16xf32>
    %144 = arith.mulf %143, %49 : vector<24x16xf32>
    %cst_47 = arith.constant 6.000000e-01 : f32
    %145 = vector.broadcast %cst_47 : f32 to vector<24x16xf32>
    %146 = arith.subf %145, %0 : vector<24x16xf32>
    %cst_48 = arith.constant 2.500000e+00 : f32
    %147 = vector.broadcast %cst_48 : f32 to vector<24x16xf32>
    %148 = arith.mulf %146, %147 : vector<24x16xf32>
    %149 = arith.mulf %148, %56 : vector<24x16xf32>
    %150 = arith.addf %144, %149 : vector<24x16xf32>
    %cst_49 = arith.constant 2.000000e-01 : f32
    %151 = vector.broadcast %cst_49 : f32 to vector<24x16xf32>
    %152 = arith.subf %0, %151 : vector<24x16xf32>
    %cst_50 = arith.constant 2.500000e+00 : f32
    %153 = vector.broadcast %cst_50 : f32 to vector<24x16xf32>
    %154 = arith.mulf %152, %153 : vector<24x16xf32>
    %155 = arith.mulf %154, %56 : vector<24x16xf32>
    %cst_51 = arith.constant 1.000000e+00 : f32
    %156 = vector.broadcast %cst_51 : f32 to vector<24x16xf32>
    %157 = arith.subf %156, %0 : vector<24x16xf32>
    %cst_52 = arith.constant 2.500000e+00 : f32
    %158 = vector.broadcast %cst_52 : f32 to vector<24x16xf32>
    %159 = arith.mulf %157, %158 : vector<24x16xf32>
    %160 = arith.mulf %159, %63 : vector<24x16xf32>
    %161 = arith.addf %155, %160 : vector<24x16xf32>
    %cst_53 = arith.constant 6.000000e-01 : f32
    %162 = vector.broadcast %cst_53 : f32 to vector<24x16xf32>
    %163 = arith.subf %0, %162 : vector<24x16xf32>
    %cst_54 = arith.constant 2.500000e+00 : f32
    %164 = vector.broadcast %cst_54 : f32 to vector<24x16xf32>
    %165 = arith.mulf %163, %164 : vector<24x16xf32>
    %166 = arith.mulf %165, %63 : vector<24x16xf32>
    %cst_55 = arith.constant 1.400000e+00 : f32
    %167 = vector.broadcast %cst_55 : f32 to vector<24x16xf32>
    %168 = arith.subf %167, %0 : vector<24x16xf32>
    %cst_56 = arith.constant 2.500000e+00 : f32
    %169 = vector.broadcast %cst_56 : f32 to vector<24x16xf32>
    %170 = arith.mulf %168, %169 : vector<24x16xf32>
    %171 = arith.mulf %170, %70 : vector<24x16xf32>
    %172 = arith.addf %166, %171 : vector<24x16xf32>
    %cst_57 = arith.constant 1.000000e+00 : f32
    %173 = vector.broadcast %cst_57 : f32 to vector<24x16xf32>
    %174 = arith.subf %0, %173 : vector<24x16xf32>
    %cst_58 = arith.constant 2.500000e+00 : f32
    %175 = vector.broadcast %cst_58 : f32 to vector<24x16xf32>
    %176 = arith.mulf %174, %175 : vector<24x16xf32>
    %177 = arith.mulf %176, %70 : vector<24x16xf32>
    %cst_59 = arith.constant 1.800000e+00 : f32
    %178 = vector.broadcast %cst_59 : f32 to vector<24x16xf32>
    %179 = arith.subf %178, %0 : vector<24x16xf32>
    %cst_60 = arith.constant 2.500000e+00 : f32
    %180 = vector.broadcast %cst_60 : f32 to vector<24x16xf32>
    %181 = arith.mulf %179, %180 : vector<24x16xf32>
    %182 = arith.mulf %181, %77 : vector<24x16xf32>
    %183 = arith.addf %177, %182 : vector<24x16xf32>
    %cst_61 = arith.constant 1.400000e+00 : f32
    %184 = vector.broadcast %cst_61 : f32 to vector<24x16xf32>
    %185 = arith.subf %0, %184 : vector<24x16xf32>
    %cst_62 = arith.constant 2.500000e+00 : f32
    %186 = vector.broadcast %cst_62 : f32 to vector<24x16xf32>
    %187 = arith.mulf %185, %186 : vector<24x16xf32>
    %188 = arith.mulf %187, %77 : vector<24x16xf32>
    %cst_63 = arith.constant 2.200000e+00 : f32
    %189 = vector.broadcast %cst_63 : f32 to vector<24x16xf32>
    %190 = arith.subf %189, %0 : vector<24x16xf32>
    %cst_64 = arith.constant 2.500000e+00 : f32
    %191 = vector.broadcast %cst_64 : f32 to vector<24x16xf32>
    %192 = arith.mulf %190, %191 : vector<24x16xf32>
    %193 = arith.mulf %192, %84 : vector<24x16xf32>
    %194 = arith.addf %188, %193 : vector<24x16xf32>
    %cst_65 = arith.constant -2.200000e+00 : f32
    %195 = vector.broadcast %cst_65 : f32 to vector<24x16xf32>
    %196 = arith.subf %0, %195 : vector<24x16xf32>
    %cst_66 = arith.constant 1.250000e+00 : f32
    %197 = vector.broadcast %cst_66 : f32 to vector<24x16xf32>
    %198 = arith.mulf %196, %197 : vector<24x16xf32>
    %199 = arith.mulf %198, %95 : vector<24x16xf32>
    %cst_67 = arith.constant -1.000000e+00 : f32
    %200 = vector.broadcast %cst_67 : f32 to vector<24x16xf32>
    %201 = arith.subf %200, %0 : vector<24x16xf32>
    %cst_68 = arith.constant 1.250000e+00 : f32
    %202 = vector.broadcast %cst_68 : f32 to vector<24x16xf32>
    %203 = arith.mulf %201, %202 : vector<24x16xf32>
    %204 = arith.mulf %203, %106 : vector<24x16xf32>
    %205 = arith.addf %199, %204 : vector<24x16xf32>
    %cst_69 = arith.constant -1.800000e+00 : f32
    %206 = vector.broadcast %cst_69 : f32 to vector<24x16xf32>
    %207 = arith.subf %0, %206 : vector<24x16xf32>
    %cst_70 = arith.constant 1.250000e+00 : f32
    %208 = vector.broadcast %cst_70 : f32 to vector<24x16xf32>
    %209 = arith.mulf %207, %208 : vector<24x16xf32>
    %210 = arith.mulf %209, %106 : vector<24x16xf32>
    %cst_71 = arith.constant -6.000000e-01 : f32
    %211 = vector.broadcast %cst_71 : f32 to vector<24x16xf32>
    %212 = arith.subf %211, %0 : vector<24x16xf32>
    %cst_72 = arith.constant 1.250000e+00 : f32
    %213 = vector.broadcast %cst_72 : f32 to vector<24x16xf32>
    %214 = arith.mulf %212, %213 : vector<24x16xf32>
    %215 = arith.mulf %214, %117 : vector<24x16xf32>
    %216 = arith.addf %210, %215 : vector<24x16xf32>
    %cst_73 = arith.constant -1.400000e+00 : f32
    %217 = vector.broadcast %cst_73 : f32 to vector<24x16xf32>
    %218 = arith.subf %0, %217 : vector<24x16xf32>
    %cst_74 = arith.constant 1.250000e+00 : f32
    %219 = vector.broadcast %cst_74 : f32 to vector<24x16xf32>
    %220 = arith.mulf %218, %219 : vector<24x16xf32>
    %221 = arith.mulf %220, %117 : vector<24x16xf32>
    %cst_75 = arith.constant -2.000000e-01 : f32
    %222 = vector.broadcast %cst_75 : f32 to vector<24x16xf32>
    %223 = arith.subf %222, %0 : vector<24x16xf32>
    %cst_76 = arith.constant 1.250000e+00 : f32
    %224 = vector.broadcast %cst_76 : f32 to vector<24x16xf32>
    %225 = arith.mulf %223, %224 : vector<24x16xf32>
    %226 = arith.mulf %225, %128 : vector<24x16xf32>
    %227 = arith.addf %221, %226 : vector<24x16xf32>
    %cst_77 = arith.constant -1.000000e+00 : f32
    %228 = vector.broadcast %cst_77 : f32 to vector<24x16xf32>
    %229 = arith.subf %0, %228 : vector<24x16xf32>
    %cst_78 = arith.constant 1.250000e+00 : f32
    %230 = vector.broadcast %cst_78 : f32 to vector<24x16xf32>
    %231 = arith.mulf %229, %230 : vector<24x16xf32>
    %232 = arith.mulf %231, %128 : vector<24x16xf32>
    %cst_79 = arith.constant 2.000000e-01 : f32
    %233 = vector.broadcast %cst_79 : f32 to vector<24x16xf32>
    %234 = arith.subf %233, %0 : vector<24x16xf32>
    %cst_80 = arith.constant 1.250000e+00 : f32
    %235 = vector.broadcast %cst_80 : f32 to vector<24x16xf32>
    %236 = arith.mulf %234, %235 : vector<24x16xf32>
    %237 = arith.mulf %236, %139 : vector<24x16xf32>
    %238 = arith.addf %232, %237 : vector<24x16xf32>
    %cst_81 = arith.constant -6.000000e-01 : f32
    %239 = vector.broadcast %cst_81 : f32 to vector<24x16xf32>
    %240 = arith.subf %0, %239 : vector<24x16xf32>
    %cst_82 = arith.constant 1.250000e+00 : f32
    %241 = vector.broadcast %cst_82 : f32 to vector<24x16xf32>
    %242 = arith.mulf %240, %241 : vector<24x16xf32>
    %243 = arith.mulf %242, %139 : vector<24x16xf32>
    %cst_83 = arith.constant 6.000000e-01 : f32
    %244 = vector.broadcast %cst_83 : f32 to vector<24x16xf32>
    %245 = arith.subf %244, %0 : vector<24x16xf32>
    %cst_84 = arith.constant 1.250000e+00 : f32
    %246 = vector.broadcast %cst_84 : f32 to vector<24x16xf32>
    %247 = arith.mulf %245, %246 : vector<24x16xf32>
    %248 = arith.mulf %247, %150 : vector<24x16xf32>
    %249 = arith.addf %243, %248 : vector<24x16xf32>
    %cst_85 = arith.constant -2.000000e-01 : f32
    %250 = vector.broadcast %cst_85 : f32 to vector<24x16xf32>
    %251 = arith.subf %0, %250 : vector<24x16xf32>
    %cst_86 = arith.constant 1.250000e+00 : f32
    %252 = vector.broadcast %cst_86 : f32 to vector<24x16xf32>
    %253 = arith.mulf %251, %252 : vector<24x16xf32>
    %254 = arith.mulf %253, %150 : vector<24x16xf32>
    %cst_87 = arith.constant 1.000000e+00 : f32
    %255 = vector.broadcast %cst_87 : f32 to vector<24x16xf32>
    %256 = arith.subf %255, %0 : vector<24x16xf32>
    %cst_88 = arith.constant 1.250000e+00 : f32
    %257 = vector.broadcast %cst_88 : f32 to vector<24x16xf32>
    %258 = arith.mulf %256, %257 : vector<24x16xf32>
    %259 = arith.mulf %258, %161 : vector<24x16xf32>
    %260 = arith.addf %254, %259 : vector<24x16xf32>
    %cst_89 = arith.constant 2.000000e-01 : f32
    %261 = vector.broadcast %cst_89 : f32 to vector<24x16xf32>
    %262 = arith.subf %0, %261 : vector<24x16xf32>
    %cst_90 = arith.constant 1.250000e+00 : f32
    %263 = vector.broadcast %cst_90 : f32 to vector<24x16xf32>
    %264 = arith.mulf %262, %263 : vector<24x16xf32>
    %265 = arith.mulf %264, %161 : vector<24x16xf32>
    %cst_91 = arith.constant 1.400000e+00 : f32
    %266 = vector.broadcast %cst_91 : f32 to vector<24x16xf32>
    %267 = arith.subf %266, %0 : vector<24x16xf32>
    %cst_92 = arith.constant 1.250000e+00 : f32
    %268 = vector.broadcast %cst_92 : f32 to vector<24x16xf32>
    %269 = arith.mulf %267, %268 : vector<24x16xf32>
    %270 = arith.mulf %269, %172 : vector<24x16xf32>
    %271 = arith.addf %265, %270 : vector<24x16xf32>
    %cst_93 = arith.constant 6.000000e-01 : f32
    %272 = vector.broadcast %cst_93 : f32 to vector<24x16xf32>
    %273 = arith.subf %0, %272 : vector<24x16xf32>
    %cst_94 = arith.constant 1.250000e+00 : f32
    %274 = vector.broadcast %cst_94 : f32 to vector<24x16xf32>
    %275 = arith.mulf %273, %274 : vector<24x16xf32>
    %276 = arith.mulf %275, %172 : vector<24x16xf32>
    %cst_95 = arith.constant 1.800000e+00 : f32
    %277 = vector.broadcast %cst_95 : f32 to vector<24x16xf32>
    %278 = arith.subf %277, %0 : vector<24x16xf32>
    %cst_96 = arith.constant 1.250000e+00 : f32
    %279 = vector.broadcast %cst_96 : f32 to vector<24x16xf32>
    %280 = arith.mulf %278, %279 : vector<24x16xf32>
    %281 = arith.mulf %280, %183 : vector<24x16xf32>
    %282 = arith.addf %276, %281 : vector<24x16xf32>
    %cst_97 = arith.constant 1.000000e+00 : f32
    %283 = vector.broadcast %cst_97 : f32 to vector<24x16xf32>
    %284 = arith.subf %0, %283 : vector<24x16xf32>
    %cst_98 = arith.constant 1.250000e+00 : f32
    %285 = vector.broadcast %cst_98 : f32 to vector<24x16xf32>
    %286 = arith.mulf %284, %285 : vector<24x16xf32>
    %287 = arith.mulf %286, %183 : vector<24x16xf32>
    %cst_99 = arith.constant 2.200000e+00 : f32
    %288 = vector.broadcast %cst_99 : f32 to vector<24x16xf32>
    %289 = arith.subf %288, %0 : vector<24x16xf32>
    %cst_100 = arith.constant 1.250000e+00 : f32
    %290 = vector.broadcast %cst_100 : f32 to vector<24x16xf32>
    %291 = arith.mulf %289, %290 : vector<24x16xf32>
    %292 = arith.mulf %291, %194 : vector<24x16xf32>
    %293 = arith.addf %287, %292 : vector<24x16xf32>
    %cst_101 = arith.constant -2.200000e+00 : f32
    %294 = vector.broadcast %cst_101 : f32 to vector<24x16xf32>
    %295 = arith.subf %0, %294 : vector<24x16xf32>
    %cst_102 = arith.constant 0.833333313 : f32
    %296 = vector.broadcast %cst_102 : f32 to vector<24x16xf32>
    %297 = arith.mulf %295, %296 : vector<24x16xf32>
    %298 = arith.mulf %297, %205 : vector<24x16xf32>
    %cst_103 = arith.constant -6.000000e-01 : f32
    %299 = vector.broadcast %cst_103 : f32 to vector<24x16xf32>
    %300 = arith.subf %299, %0 : vector<24x16xf32>
    %cst_104 = arith.constant 0.833333313 : f32
    %301 = vector.broadcast %cst_104 : f32 to vector<24x16xf32>
    %302 = arith.mulf %300, %301 : vector<24x16xf32>
    %303 = arith.mulf %302, %216 : vector<24x16xf32>
    %304 = arith.addf %298, %303 : vector<24x16xf32>
    %cst_105 = arith.constant -1.800000e+00 : f32
    %305 = vector.broadcast %cst_105 : f32 to vector<24x16xf32>
    %306 = arith.subf %0, %305 : vector<24x16xf32>
    %cst_106 = arith.constant 0.833333313 : f32
    %307 = vector.broadcast %cst_106 : f32 to vector<24x16xf32>
    %308 = arith.mulf %306, %307 : vector<24x16xf32>
    %309 = arith.mulf %308, %216 : vector<24x16xf32>
    %cst_107 = arith.constant -2.000000e-01 : f32
    %310 = vector.broadcast %cst_107 : f32 to vector<24x16xf32>
    %311 = arith.subf %310, %0 : vector<24x16xf32>
    %cst_108 = arith.constant 0.833333313 : f32
    %312 = vector.broadcast %cst_108 : f32 to vector<24x16xf32>
    %313 = arith.mulf %311, %312 : vector<24x16xf32>
    %314 = arith.mulf %313, %227 : vector<24x16xf32>
    %315 = arith.addf %309, %314 : vector<24x16xf32>
    %cst_109 = arith.constant -1.400000e+00 : f32
    %316 = vector.broadcast %cst_109 : f32 to vector<24x16xf32>
    %317 = arith.subf %0, %316 : vector<24x16xf32>
    %cst_110 = arith.constant 0.833333313 : f32
    %318 = vector.broadcast %cst_110 : f32 to vector<24x16xf32>
    %319 = arith.mulf %317, %318 : vector<24x16xf32>
    %320 = arith.mulf %319, %227 : vector<24x16xf32>
    %cst_111 = arith.constant 2.000000e-01 : f32
    %321 = vector.broadcast %cst_111 : f32 to vector<24x16xf32>
    %322 = arith.subf %321, %0 : vector<24x16xf32>
    %cst_112 = arith.constant 0.833333313 : f32
    %323 = vector.broadcast %cst_112 : f32 to vector<24x16xf32>
    %324 = arith.mulf %322, %323 : vector<24x16xf32>
    %325 = arith.mulf %324, %238 : vector<24x16xf32>
    %326 = arith.addf %320, %325 : vector<24x16xf32>
    %cst_113 = arith.constant -1.000000e+00 : f32
    %327 = vector.broadcast %cst_113 : f32 to vector<24x16xf32>
    %328 = arith.subf %0, %327 : vector<24x16xf32>
    %cst_114 = arith.constant 0.833333313 : f32
    %329 = vector.broadcast %cst_114 : f32 to vector<24x16xf32>
    %330 = arith.mulf %328, %329 : vector<24x16xf32>
    %331 = arith.mulf %330, %238 : vector<24x16xf32>
    %cst_115 = arith.constant 6.000000e-01 : f32
    %332 = vector.broadcast %cst_115 : f32 to vector<24x16xf32>
    %333 = arith.subf %332, %0 : vector<24x16xf32>
    %cst_116 = arith.constant 0.833333313 : f32
    %334 = vector.broadcast %cst_116 : f32 to vector<24x16xf32>
    %335 = arith.mulf %333, %334 : vector<24x16xf32>
    %336 = arith.mulf %335, %249 : vector<24x16xf32>
    %337 = arith.addf %331, %336 : vector<24x16xf32>
    %cst_117 = arith.constant -6.000000e-01 : f32
    %338 = vector.broadcast %cst_117 : f32 to vector<24x16xf32>
    %339 = arith.subf %0, %338 : vector<24x16xf32>
    %cst_118 = arith.constant 0.833333313 : f32
    %340 = vector.broadcast %cst_118 : f32 to vector<24x16xf32>
    %341 = arith.mulf %339, %340 : vector<24x16xf32>
    %342 = arith.mulf %341, %249 : vector<24x16xf32>
    %cst_119 = arith.constant 1.000000e+00 : f32
    %343 = vector.broadcast %cst_119 : f32 to vector<24x16xf32>
    %344 = arith.subf %343, %0 : vector<24x16xf32>
    %cst_120 = arith.constant 0.833333313 : f32
    %345 = vector.broadcast %cst_120 : f32 to vector<24x16xf32>
    %346 = arith.mulf %344, %345 : vector<24x16xf32>
    %347 = arith.mulf %346, %260 : vector<24x16xf32>
    %348 = arith.addf %342, %347 : vector<24x16xf32>
    %cst_121 = arith.constant -2.000000e-01 : f32
    %349 = vector.broadcast %cst_121 : f32 to vector<24x16xf32>
    %350 = arith.subf %0, %349 : vector<24x16xf32>
    %cst_122 = arith.constant 0.833333313 : f32
    %351 = vector.broadcast %cst_122 : f32 to vector<24x16xf32>
    %352 = arith.mulf %350, %351 : vector<24x16xf32>
    %353 = arith.mulf %352, %260 : vector<24x16xf32>
    %cst_123 = arith.constant 1.400000e+00 : f32
    %354 = vector.broadcast %cst_123 : f32 to vector<24x16xf32>
    %355 = arith.subf %354, %0 : vector<24x16xf32>
    %cst_124 = arith.constant 0.833333313 : f32
    %356 = vector.broadcast %cst_124 : f32 to vector<24x16xf32>
    %357 = arith.mulf %355, %356 : vector<24x16xf32>
    %358 = arith.mulf %357, %271 : vector<24x16xf32>
    %359 = arith.addf %353, %358 : vector<24x16xf32>
    %cst_125 = arith.constant 2.000000e-01 : f32
    %360 = vector.broadcast %cst_125 : f32 to vector<24x16xf32>
    %361 = arith.subf %0, %360 : vector<24x16xf32>
    %cst_126 = arith.constant 0.833333313 : f32
    %362 = vector.broadcast %cst_126 : f32 to vector<24x16xf32>
    %363 = arith.mulf %361, %362 : vector<24x16xf32>
    %364 = arith.mulf %363, %271 : vector<24x16xf32>
    %cst_127 = arith.constant 1.800000e+00 : f32
    %365 = vector.broadcast %cst_127 : f32 to vector<24x16xf32>
    %366 = arith.subf %365, %0 : vector<24x16xf32>
    %cst_128 = arith.constant 0.833333313 : f32
    %367 = vector.broadcast %cst_128 : f32 to vector<24x16xf32>
    %368 = arith.mulf %366, %367 : vector<24x16xf32>
    %369 = arith.mulf %368, %282 : vector<24x16xf32>
    %370 = arith.addf %364, %369 : vector<24x16xf32>
    %cst_129 = arith.constant 6.000000e-01 : f32
    %371 = vector.broadcast %cst_129 : f32 to vector<24x16xf32>
    %372 = arith.subf %0, %371 : vector<24x16xf32>
    %cst_130 = arith.constant 0.833333313 : f32
    %373 = vector.broadcast %cst_130 : f32 to vector<24x16xf32>
    %374 = arith.mulf %372, %373 : vector<24x16xf32>
    %375 = arith.mulf %374, %282 : vector<24x16xf32>
    %cst_131 = arith.constant 2.200000e+00 : f32
    %376 = vector.broadcast %cst_131 : f32 to vector<24x16xf32>
    %377 = arith.subf %376, %0 : vector<24x16xf32>
    %cst_132 = arith.constant 0.833333313 : f32
    %378 = vector.broadcast %cst_132 : f32 to vector<24x16xf32>
    %379 = arith.mulf %377, %378 : vector<24x16xf32>
    %380 = arith.mulf %379, %293 : vector<24x16xf32>
    %381 = arith.addf %375, %380 : vector<24x16xf32>
    %382 = tpu.concatenate %7, %304, %315, %326, %337, %348, %359, %370, %381 in 1 : vector<24x16xf32>, vector<24x16xf32>, vector<24x16xf32>, vector<24x16xf32>, vector<24x16xf32>, vector<24x16xf32>, vector<24x16xf32>, vector<24x16xf32>, vector<24x16xf32> -> vector<24x144xf32>
    %cst_133 = arith.constant dense<0.000000e+00> : vector<24x16xf32>
    %383 = tpu.matmul %382, %1, %cst_133 {dimension_numbers = #tpu.dot_dimension_numbers<[1], [0], [0], [1], [0, 0, 1, 1], [], []>} : vector<24x144xf32>, vector<144x16xf32>, vector<24x16xf32> -> vector<24x16xf32>
    %c0_134 = arith.constant 0 : index
    %c0_135 = arith.constant 0 : index
    %384 = vector.load %arg3[%c0_134, %c0_135] : memref<1x16xf32, #tpu.memory_space<vmem>>, vector<1x16xf32>
    %385 = vector.broadcast %384 : vector<1x16xf32> to vector<24x16xf32>
    %386 = arith.mulf %383, %385 : vector<24x16xf32>
    %c0_136 = arith.constant 0 : index
    %c0_137 = arith.constant 0 : index
    %387 = vector.load %arg4[%c0_136, %c0_137] : memref<1x16xf32, #tpu.memory_space<vmem>>, vector<1x16xf32>
    %388 = vector.broadcast %387 : vector<1x16xf32> to vector<24x16xf32>
    %389 = arith.addf %386, %388 : vector<24x16xf32>
    %c0_138 = arith.constant 0 : index
    %c0_139 = arith.constant 0 : index
    %390 = vector.load %arg5[%c0_138, %c0_139] : memref<144x16xf32, #tpu.memory_space<vmem>>, vector<144x16xf32>
    %391 = arith.negf %389 : vector<24x16xf32>
    %392 = math.exp %391 : vector<24x16xf32>
    %cst_140 = arith.constant 1.000000e+00 : f32
    %393 = vector.broadcast %cst_140 : f32 to vector<24x16xf32>
    %394 = arith.addf %393, %392 : vector<24x16xf32>
    %395 = arith.divf %393, %394 : vector<24x16xf32>
    %396 = arith.mulf %389, %395 : vector<24x16xf32>
    %cst_141 = arith.constant -2.200000e+00 : f32
    %397 = vector.broadcast %cst_141 : f32 to vector<24x16xf32>
    %398 = arith.cmpf oge, %389, %397 : vector<24x16xf32>
    %cst_142 = arith.constant -1.800000e+00 : f32
    %399 = vector.broadcast %cst_142 : f32 to vector<24x16xf32>
    %400 = arith.cmpf olt, %389, %399 : vector<24x16xf32>
    %401 = arith.andi %398, %400 : vector<24x16xi1>
    %402 = arith.extui %401 : vector<24x16xi1> to vector<24x16xi32>
    %403 = arith.sitofp %402 : vector<24x16xi32> to vector<24x16xf32>
    %cst_143 = arith.constant -1.800000e+00 : f32
    %404 = vector.broadcast %cst_143 : f32 to vector<24x16xf32>
    %405 = arith.cmpf oge, %389, %404 : vector<24x16xf32>
    %cst_144 = arith.constant -1.400000e+00 : f32
    %406 = vector.broadcast %cst_144 : f32 to vector<24x16xf32>
    %407 = arith.cmpf olt, %389, %406 : vector<24x16xf32>
    %408 = arith.andi %405, %407 : vector<24x16xi1>
    %409 = arith.extui %408 : vector<24x16xi1> to vector<24x16xi32>
    %410 = arith.sitofp %409 : vector<24x16xi32> to vector<24x16xf32>
    %cst_145 = arith.constant -1.400000e+00 : f32
    %411 = vector.broadcast %cst_145 : f32 to vector<24x16xf32>
    %412 = arith.cmpf oge, %389, %411 : vector<24x16xf32>
    %cst_146 = arith.constant -1.000000e+00 : f32
    %413 = vector.broadcast %cst_146 : f32 to vector<24x16xf32>
    %414 = arith.cmpf olt, %389, %413 : vector<24x16xf32>
    %415 = arith.andi %412, %414 : vector<24x16xi1>
    %416 = arith.extui %415 : vector<24x16xi1> to vector<24x16xi32>
    %417 = arith.sitofp %416 : vector<24x16xi32> to vector<24x16xf32>
    %cst_147 = arith.constant -1.000000e+00 : f32
    %418 = vector.broadcast %cst_147 : f32 to vector<24x16xf32>
    %419 = arith.cmpf oge, %389, %418 : vector<24x16xf32>
    %cst_148 = arith.constant -6.000000e-01 : f32
    %420 = vector.broadcast %cst_148 : f32 to vector<24x16xf32>
    %421 = arith.cmpf olt, %389, %420 : vector<24x16xf32>
    %422 = arith.andi %419, %421 : vector<24x16xi1>
    %423 = arith.extui %422 : vector<24x16xi1> to vector<24x16xi32>
    %424 = arith.sitofp %423 : vector<24x16xi32> to vector<24x16xf32>
    %cst_149 = arith.constant -6.000000e-01 : f32
    %425 = vector.broadcast %cst_149 : f32 to vector<24x16xf32>
    %426 = arith.cmpf oge, %389, %425 : vector<24x16xf32>
    %cst_150 = arith.constant -2.000000e-01 : f32
    %427 = vector.broadcast %cst_150 : f32 to vector<24x16xf32>
    %428 = arith.cmpf olt, %389, %427 : vector<24x16xf32>
    %429 = arith.andi %426, %428 : vector<24x16xi1>
    %430 = arith.extui %429 : vector<24x16xi1> to vector<24x16xi32>
    %431 = arith.sitofp %430 : vector<24x16xi32> to vector<24x16xf32>
    %cst_151 = arith.constant -2.000000e-01 : f32
    %432 = vector.broadcast %cst_151 : f32 to vector<24x16xf32>
    %433 = arith.cmpf oge, %389, %432 : vector<24x16xf32>
    %cst_152 = arith.constant 2.000000e-01 : f32
    %434 = vector.broadcast %cst_152 : f32 to vector<24x16xf32>
    %435 = arith.cmpf olt, %389, %434 : vector<24x16xf32>
    %436 = arith.andi %433, %435 : vector<24x16xi1>
    %437 = arith.extui %436 : vector<24x16xi1> to vector<24x16xi32>
    %438 = arith.sitofp %437 : vector<24x16xi32> to vector<24x16xf32>
    %cst_153 = arith.constant 2.000000e-01 : f32
    %439 = vector.broadcast %cst_153 : f32 to vector<24x16xf32>
    %440 = arith.cmpf oge, %389, %439 : vector<24x16xf32>
    %cst_154 = arith.constant 6.000000e-01 : f32
    %441 = vector.broadcast %cst_154 : f32 to vector<24x16xf32>
    %442 = arith.cmpf olt, %389, %441 : vector<24x16xf32>
    %443 = arith.andi %440, %442 : vector<24x16xi1>
    %444 = arith.extui %443 : vector<24x16xi1> to vector<24x16xi32>
    %445 = arith.sitofp %444 : vector<24x16xi32> to vector<24x16xf32>
    %cst_155 = arith.constant 6.000000e-01 : f32
    %446 = vector.broadcast %cst_155 : f32 to vector<24x16xf32>
    %447 = arith.cmpf oge, %389, %446 : vector<24x16xf32>
    %cst_156 = arith.constant 1.000000e+00 : f32
    %448 = vector.broadcast %cst_156 : f32 to vector<24x16xf32>
    %449 = arith.cmpf olt, %389, %448 : vector<24x16xf32>
    %450 = arith.andi %447, %449 : vector<24x16xi1>
    %451 = arith.extui %450 : vector<24x16xi1> to vector<24x16xi32>
    %452 = arith.sitofp %451 : vector<24x16xi32> to vector<24x16xf32>
    %cst_157 = arith.constant 1.000000e+00 : f32
    %453 = vector.broadcast %cst_157 : f32 to vector<24x16xf32>
    %454 = arith.cmpf oge, %389, %453 : vector<24x16xf32>
    %cst_158 = arith.constant 1.400000e+00 : f32
    %455 = vector.broadcast %cst_158 : f32 to vector<24x16xf32>
    %456 = arith.cmpf olt, %389, %455 : vector<24x16xf32>
    %457 = arith.andi %454, %456 : vector<24x16xi1>
    %458 = arith.extui %457 : vector<24x16xi1> to vector<24x16xi32>
    %459 = arith.sitofp %458 : vector<24x16xi32> to vector<24x16xf32>
    %cst_159 = arith.constant 1.400000e+00 : f32
    %460 = vector.broadcast %cst_159 : f32 to vector<24x16xf32>
    %461 = arith.cmpf oge, %389, %460 : vector<24x16xf32>
    %cst_160 = arith.constant 1.800000e+00 : f32
    %462 = vector.broadcast %cst_160 : f32 to vector<24x16xf32>
    %463 = arith.cmpf olt, %389, %462 : vector<24x16xf32>
    %464 = arith.andi %461, %463 : vector<24x16xi1>
    %465 = arith.extui %464 : vector<24x16xi1> to vector<24x16xi32>
    %466 = arith.sitofp %465 : vector<24x16xi32> to vector<24x16xf32>
    %cst_161 = arith.constant 1.800000e+00 : f32
    %467 = vector.broadcast %cst_161 : f32 to vector<24x16xf32>
    %468 = arith.cmpf oge, %389, %467 : vector<24x16xf32>
    %cst_162 = arith.constant 2.200000e+00 : f32
    %469 = vector.broadcast %cst_162 : f32 to vector<24x16xf32>
    %470 = arith.cmpf olt, %389, %469 : vector<24x16xf32>
    %471 = arith.andi %468, %470 : vector<24x16xi1>
    %472 = arith.extui %471 : vector<24x16xi1> to vector<24x16xi32>
    %473 = arith.sitofp %472 : vector<24x16xi32> to vector<24x16xf32>
    %cst_163 = arith.constant -2.200000e+00 : f32
    %474 = vector.broadcast %cst_163 : f32 to vector<24x16xf32>
    %475 = arith.subf %389, %474 : vector<24x16xf32>
    %cst_164 = arith.constant 2.500000e+00 : f32
    %476 = vector.broadcast %cst_164 : f32 to vector<24x16xf32>
    %477 = arith.mulf %475, %476 : vector<24x16xf32>
    %478 = arith.mulf %477, %403 : vector<24x16xf32>
    %cst_165 = arith.constant -1.400000e+00 : f32
    %479 = vector.broadcast %cst_165 : f32 to vector<24x16xf32>
    %480 = arith.subf %479, %389 : vector<24x16xf32>
    %cst_166 = arith.constant 2.500000e+00 : f32
    %481 = vector.broadcast %cst_166 : f32 to vector<24x16xf32>
    %482 = arith.mulf %480, %481 : vector<24x16xf32>
    %483 = arith.mulf %482, %410 : vector<24x16xf32>
    %484 = arith.addf %478, %483 : vector<24x16xf32>
    %cst_167 = arith.constant -1.800000e+00 : f32
    %485 = vector.broadcast %cst_167 : f32 to vector<24x16xf32>
    %486 = arith.subf %389, %485 : vector<24x16xf32>
    %cst_168 = arith.constant 2.500000e+00 : f32
    %487 = vector.broadcast %cst_168 : f32 to vector<24x16xf32>
    %488 = arith.mulf %486, %487 : vector<24x16xf32>
    %489 = arith.mulf %488, %410 : vector<24x16xf32>
    %cst_169 = arith.constant -1.000000e+00 : f32
    %490 = vector.broadcast %cst_169 : f32 to vector<24x16xf32>
    %491 = arith.subf %490, %389 : vector<24x16xf32>
    %cst_170 = arith.constant 2.500000e+00 : f32
    %492 = vector.broadcast %cst_170 : f32 to vector<24x16xf32>
    %493 = arith.mulf %491, %492 : vector<24x16xf32>
    %494 = arith.mulf %493, %417 : vector<24x16xf32>
    %495 = arith.addf %489, %494 : vector<24x16xf32>
    %cst_171 = arith.constant -1.400000e+00 : f32
    %496 = vector.broadcast %cst_171 : f32 to vector<24x16xf32>
    %497 = arith.subf %389, %496 : vector<24x16xf32>
    %cst_172 = arith.constant 2.500000e+00 : f32
    %498 = vector.broadcast %cst_172 : f32 to vector<24x16xf32>
    %499 = arith.mulf %497, %498 : vector<24x16xf32>
    %500 = arith.mulf %499, %417 : vector<24x16xf32>
    %cst_173 = arith.constant -6.000000e-01 : f32
    %501 = vector.broadcast %cst_173 : f32 to vector<24x16xf32>
    %502 = arith.subf %501, %389 : vector<24x16xf32>
    %cst_174 = arith.constant 2.500000e+00 : f32
    %503 = vector.broadcast %cst_174 : f32 to vector<24x16xf32>
    %504 = arith.mulf %502, %503 : vector<24x16xf32>
    %505 = arith.mulf %504, %424 : vector<24x16xf32>
    %506 = arith.addf %500, %505 : vector<24x16xf32>
    %cst_175 = arith.constant -1.000000e+00 : f32
    %507 = vector.broadcast %cst_175 : f32 to vector<24x16xf32>
    %508 = arith.subf %389, %507 : vector<24x16xf32>
    %cst_176 = arith.constant 2.500000e+00 : f32
    %509 = vector.broadcast %cst_176 : f32 to vector<24x16xf32>
    %510 = arith.mulf %508, %509 : vector<24x16xf32>
    %511 = arith.mulf %510, %424 : vector<24x16xf32>
    %cst_177 = arith.constant -2.000000e-01 : f32
    %512 = vector.broadcast %cst_177 : f32 to vector<24x16xf32>
    %513 = arith.subf %512, %389 : vector<24x16xf32>
    %cst_178 = arith.constant 2.500000e+00 : f32
    %514 = vector.broadcast %cst_178 : f32 to vector<24x16xf32>
    %515 = arith.mulf %513, %514 : vector<24x16xf32>
    %516 = arith.mulf %515, %431 : vector<24x16xf32>
    %517 = arith.addf %511, %516 : vector<24x16xf32>
    %cst_179 = arith.constant -6.000000e-01 : f32
    %518 = vector.broadcast %cst_179 : f32 to vector<24x16xf32>
    %519 = arith.subf %389, %518 : vector<24x16xf32>
    %cst_180 = arith.constant 2.500000e+00 : f32
    %520 = vector.broadcast %cst_180 : f32 to vector<24x16xf32>
    %521 = arith.mulf %519, %520 : vector<24x16xf32>
    %522 = arith.mulf %521, %431 : vector<24x16xf32>
    %cst_181 = arith.constant 2.000000e-01 : f32
    %523 = vector.broadcast %cst_181 : f32 to vector<24x16xf32>
    %524 = arith.subf %523, %389 : vector<24x16xf32>
    %cst_182 = arith.constant 2.500000e+00 : f32
    %525 = vector.broadcast %cst_182 : f32 to vector<24x16xf32>
    %526 = arith.mulf %524, %525 : vector<24x16xf32>
    %527 = arith.mulf %526, %438 : vector<24x16xf32>
    %528 = arith.addf %522, %527 : vector<24x16xf32>
    %cst_183 = arith.constant -2.000000e-01 : f32
    %529 = vector.broadcast %cst_183 : f32 to vector<24x16xf32>
    %530 = arith.subf %389, %529 : vector<24x16xf32>
    %cst_184 = arith.constant 2.500000e+00 : f32
    %531 = vector.broadcast %cst_184 : f32 to vector<24x16xf32>
    %532 = arith.mulf %530, %531 : vector<24x16xf32>
    %533 = arith.mulf %532, %438 : vector<24x16xf32>
    %cst_185 = arith.constant 6.000000e-01 : f32
    %534 = vector.broadcast %cst_185 : f32 to vector<24x16xf32>
    %535 = arith.subf %534, %389 : vector<24x16xf32>
    %cst_186 = arith.constant 2.500000e+00 : f32
    %536 = vector.broadcast %cst_186 : f32 to vector<24x16xf32>
    %537 = arith.mulf %535, %536 : vector<24x16xf32>
    %538 = arith.mulf %537, %445 : vector<24x16xf32>
    %539 = arith.addf %533, %538 : vector<24x16xf32>
    %cst_187 = arith.constant 2.000000e-01 : f32
    %540 = vector.broadcast %cst_187 : f32 to vector<24x16xf32>
    %541 = arith.subf %389, %540 : vector<24x16xf32>
    %cst_188 = arith.constant 2.500000e+00 : f32
    %542 = vector.broadcast %cst_188 : f32 to vector<24x16xf32>
    %543 = arith.mulf %541, %542 : vector<24x16xf32>
    %544 = arith.mulf %543, %445 : vector<24x16xf32>
    %cst_189 = arith.constant 1.000000e+00 : f32
    %545 = vector.broadcast %cst_189 : f32 to vector<24x16xf32>
    %546 = arith.subf %545, %389 : vector<24x16xf32>
    %cst_190 = arith.constant 2.500000e+00 : f32
    %547 = vector.broadcast %cst_190 : f32 to vector<24x16xf32>
    %548 = arith.mulf %546, %547 : vector<24x16xf32>
    %549 = arith.mulf %548, %452 : vector<24x16xf32>
    %550 = arith.addf %544, %549 : vector<24x16xf32>
    %cst_191 = arith.constant 6.000000e-01 : f32
    %551 = vector.broadcast %cst_191 : f32 to vector<24x16xf32>
    %552 = arith.subf %389, %551 : vector<24x16xf32>
    %cst_192 = arith.constant 2.500000e+00 : f32
    %553 = vector.broadcast %cst_192 : f32 to vector<24x16xf32>
    %554 = arith.mulf %552, %553 : vector<24x16xf32>
    %555 = arith.mulf %554, %452 : vector<24x16xf32>
    %cst_193 = arith.constant 1.400000e+00 : f32
    %556 = vector.broadcast %cst_193 : f32 to vector<24x16xf32>
    %557 = arith.subf %556, %389 : vector<24x16xf32>
    %cst_194 = arith.constant 2.500000e+00 : f32
    %558 = vector.broadcast %cst_194 : f32 to vector<24x16xf32>
    %559 = arith.mulf %557, %558 : vector<24x16xf32>
    %560 = arith.mulf %559, %459 : vector<24x16xf32>
    %561 = arith.addf %555, %560 : vector<24x16xf32>
    %cst_195 = arith.constant 1.000000e+00 : f32
    %562 = vector.broadcast %cst_195 : f32 to vector<24x16xf32>
    %563 = arith.subf %389, %562 : vector<24x16xf32>
    %cst_196 = arith.constant 2.500000e+00 : f32
    %564 = vector.broadcast %cst_196 : f32 to vector<24x16xf32>
    %565 = arith.mulf %563, %564 : vector<24x16xf32>
    %566 = arith.mulf %565, %459 : vector<24x16xf32>
    %cst_197 = arith.constant 1.800000e+00 : f32
    %567 = vector.broadcast %cst_197 : f32 to vector<24x16xf32>
    %568 = arith.subf %567, %389 : vector<24x16xf32>
    %cst_198 = arith.constant 2.500000e+00 : f32
    %569 = vector.broadcast %cst_198 : f32 to vector<24x16xf32>
    %570 = arith.mulf %568, %569 : vector<24x16xf32>
    %571 = arith.mulf %570, %466 : vector<24x16xf32>
    %572 = arith.addf %566, %571 : vector<24x16xf32>
    %cst_199 = arith.constant 1.400000e+00 : f32
    %573 = vector.broadcast %cst_199 : f32 to vector<24x16xf32>
    %574 = arith.subf %389, %573 : vector<24x16xf32>
    %cst_200 = arith.constant 2.500000e+00 : f32
    %575 = vector.broadcast %cst_200 : f32 to vector<24x16xf32>
    %576 = arith.mulf %574, %575 : vector<24x16xf32>
    %577 = arith.mulf %576, %466 : vector<24x16xf32>
    %cst_201 = arith.constant 2.200000e+00 : f32
    %578 = vector.broadcast %cst_201 : f32 to vector<24x16xf32>
    %579 = arith.subf %578, %389 : vector<24x16xf32>
    %cst_202 = arith.constant 2.500000e+00 : f32
    %580 = vector.broadcast %cst_202 : f32 to vector<24x16xf32>
    %581 = arith.mulf %579, %580 : vector<24x16xf32>
    %582 = arith.mulf %581, %473 : vector<24x16xf32>
    %583 = arith.addf %577, %582 : vector<24x16xf32>
    %cst_203 = arith.constant -2.200000e+00 : f32
    %584 = vector.broadcast %cst_203 : f32 to vector<24x16xf32>
    %585 = arith.subf %389, %584 : vector<24x16xf32>
    %cst_204 = arith.constant 1.250000e+00 : f32
    %586 = vector.broadcast %cst_204 : f32 to vector<24x16xf32>
    %587 = arith.mulf %585, %586 : vector<24x16xf32>
    %588 = arith.mulf %587, %484 : vector<24x16xf32>
    %cst_205 = arith.constant -1.000000e+00 : f32
    %589 = vector.broadcast %cst_205 : f32 to vector<24x16xf32>
    %590 = arith.subf %589, %389 : vector<24x16xf32>
    %cst_206 = arith.constant 1.250000e+00 : f32
    %591 = vector.broadcast %cst_206 : f32 to vector<24x16xf32>
    %592 = arith.mulf %590, %591 : vector<24x16xf32>
    %593 = arith.mulf %592, %495 : vector<24x16xf32>
    %594 = arith.addf %588, %593 : vector<24x16xf32>
    %cst_207 = arith.constant -1.800000e+00 : f32
    %595 = vector.broadcast %cst_207 : f32 to vector<24x16xf32>
    %596 = arith.subf %389, %595 : vector<24x16xf32>
    %cst_208 = arith.constant 1.250000e+00 : f32
    %597 = vector.broadcast %cst_208 : f32 to vector<24x16xf32>
    %598 = arith.mulf %596, %597 : vector<24x16xf32>
    %599 = arith.mulf %598, %495 : vector<24x16xf32>
    %cst_209 = arith.constant -6.000000e-01 : f32
    %600 = vector.broadcast %cst_209 : f32 to vector<24x16xf32>
    %601 = arith.subf %600, %389 : vector<24x16xf32>
    %cst_210 = arith.constant 1.250000e+00 : f32
    %602 = vector.broadcast %cst_210 : f32 to vector<24x16xf32>
    %603 = arith.mulf %601, %602 : vector<24x16xf32>
    %604 = arith.mulf %603, %506 : vector<24x16xf32>
    %605 = arith.addf %599, %604 : vector<24x16xf32>
    %cst_211 = arith.constant -1.400000e+00 : f32
    %606 = vector.broadcast %cst_211 : f32 to vector<24x16xf32>
    %607 = arith.subf %389, %606 : vector<24x16xf32>
    %cst_212 = arith.constant 1.250000e+00 : f32
    %608 = vector.broadcast %cst_212 : f32 to vector<24x16xf32>
    %609 = arith.mulf %607, %608 : vector<24x16xf32>
    %610 = arith.mulf %609, %506 : vector<24x16xf32>
    %cst_213 = arith.constant -2.000000e-01 : f32
    %611 = vector.broadcast %cst_213 : f32 to vector<24x16xf32>
    %612 = arith.subf %611, %389 : vector<24x16xf32>
    %cst_214 = arith.constant 1.250000e+00 : f32
    %613 = vector.broadcast %cst_214 : f32 to vector<24x16xf32>
    %614 = arith.mulf %612, %613 : vector<24x16xf32>
    %615 = arith.mulf %614, %517 : vector<24x16xf32>
    %616 = arith.addf %610, %615 : vector<24x16xf32>
    %cst_215 = arith.constant -1.000000e+00 : f32
    %617 = vector.broadcast %cst_215 : f32 to vector<24x16xf32>
    %618 = arith.subf %389, %617 : vector<24x16xf32>
    %cst_216 = arith.constant 1.250000e+00 : f32
    %619 = vector.broadcast %cst_216 : f32 to vector<24x16xf32>
    %620 = arith.mulf %618, %619 : vector<24x16xf32>
    %621 = arith.mulf %620, %517 : vector<24x16xf32>
    %cst_217 = arith.constant 2.000000e-01 : f32
    %622 = vector.broadcast %cst_217 : f32 to vector<24x16xf32>
    %623 = arith.subf %622, %389 : vector<24x16xf32>
    %cst_218 = arith.constant 1.250000e+00 : f32
    %624 = vector.broadcast %cst_218 : f32 to vector<24x16xf32>
    %625 = arith.mulf %623, %624 : vector<24x16xf32>
    %626 = arith.mulf %625, %528 : vector<24x16xf32>
    %627 = arith.addf %621, %626 : vector<24x16xf32>
    %cst_219 = arith.constant -6.000000e-01 : f32
    %628 = vector.broadcast %cst_219 : f32 to vector<24x16xf32>
    %629 = arith.subf %389, %628 : vector<24x16xf32>
    %cst_220 = arith.constant 1.250000e+00 : f32
    %630 = vector.broadcast %cst_220 : f32 to vector<24x16xf32>
    %631 = arith.mulf %629, %630 : vector<24x16xf32>
    %632 = arith.mulf %631, %528 : vector<24x16xf32>
    %cst_221 = arith.constant 6.000000e-01 : f32
    %633 = vector.broadcast %cst_221 : f32 to vector<24x16xf32>
    %634 = arith.subf %633, %389 : vector<24x16xf32>
    %cst_222 = arith.constant 1.250000e+00 : f32
    %635 = vector.broadcast %cst_222 : f32 to vector<24x16xf32>
    %636 = arith.mulf %634, %635 : vector<24x16xf32>
    %637 = arith.mulf %636, %539 : vector<24x16xf32>
    %638 = arith.addf %632, %637 : vector<24x16xf32>
    %cst_223 = arith.constant -2.000000e-01 : f32
    %639 = vector.broadcast %cst_223 : f32 to vector<24x16xf32>
    %640 = arith.subf %389, %639 : vector<24x16xf32>
    %cst_224 = arith.constant 1.250000e+00 : f32
    %641 = vector.broadcast %cst_224 : f32 to vector<24x16xf32>
    %642 = arith.mulf %640, %641 : vector<24x16xf32>
    %643 = arith.mulf %642, %539 : vector<24x16xf32>
    %cst_225 = arith.constant 1.000000e+00 : f32
    %644 = vector.broadcast %cst_225 : f32 to vector<24x16xf32>
    %645 = arith.subf %644, %389 : vector<24x16xf32>
    %cst_226 = arith.constant 1.250000e+00 : f32
    %646 = vector.broadcast %cst_226 : f32 to vector<24x16xf32>
    %647 = arith.mulf %645, %646 : vector<24x16xf32>
    %648 = arith.mulf %647, %550 : vector<24x16xf32>
    %649 = arith.addf %643, %648 : vector<24x16xf32>
    %cst_227 = arith.constant 2.000000e-01 : f32
    %650 = vector.broadcast %cst_227 : f32 to vector<24x16xf32>
    %651 = arith.subf %389, %650 : vector<24x16xf32>
    %cst_228 = arith.constant 1.250000e+00 : f32
    %652 = vector.broadcast %cst_228 : f32 to vector<24x16xf32>
    %653 = arith.mulf %651, %652 : vector<24x16xf32>
    %654 = arith.mulf %653, %550 : vector<24x16xf32>
    %cst_229 = arith.constant 1.400000e+00 : f32
    %655 = vector.broadcast %cst_229 : f32 to vector<24x16xf32>
    %656 = arith.subf %655, %389 : vector<24x16xf32>
    %cst_230 = arith.constant 1.250000e+00 : f32
    %657 = vector.broadcast %cst_230 : f32 to vector<24x16xf32>
    %658 = arith.mulf %656, %657 : vector<24x16xf32>
    %659 = arith.mulf %658, %561 : vector<24x16xf32>
    %660 = arith.addf %654, %659 : vector<24x16xf32>
    %cst_231 = arith.constant 6.000000e-01 : f32
    %661 = vector.broadcast %cst_231 : f32 to vector<24x16xf32>
    %662 = arith.subf %389, %661 : vector<24x16xf32>
    %cst_232 = arith.constant 1.250000e+00 : f32
    %663 = vector.broadcast %cst_232 : f32 to vector<24x16xf32>
    %664 = arith.mulf %662, %663 : vector<24x16xf32>
    %665 = arith.mulf %664, %561 : vector<24x16xf32>
    %cst_233 = arith.constant 1.800000e+00 : f32
    %666 = vector.broadcast %cst_233 : f32 to vector<24x16xf32>
    %667 = arith.subf %666, %389 : vector<24x16xf32>
    %cst_234 = arith.constant 1.250000e+00 : f32
    %668 = vector.broadcast %cst_234 : f32 to vector<24x16xf32>
    %669 = arith.mulf %667, %668 : vector<24x16xf32>
    %670 = arith.mulf %669, %572 : vector<24x16xf32>
    %671 = arith.addf %665, %670 : vector<24x16xf32>
    %cst_235 = arith.constant 1.000000e+00 : f32
    %672 = vector.broadcast %cst_235 : f32 to vector<24x16xf32>
    %673 = arith.subf %389, %672 : vector<24x16xf32>
    %cst_236 = arith.constant 1.250000e+00 : f32
    %674 = vector.broadcast %cst_236 : f32 to vector<24x16xf32>
    %675 = arith.mulf %673, %674 : vector<24x16xf32>
    %676 = arith.mulf %675, %572 : vector<24x16xf32>
    %cst_237 = arith.constant 2.200000e+00 : f32
    %677 = vector.broadcast %cst_237 : f32 to vector<24x16xf32>
    %678 = arith.subf %677, %389 : vector<24x16xf32>
    %cst_238 = arith.constant 1.250000e+00 : f32
    %679 = vector.broadcast %cst_238 : f32 to vector<24x16xf32>
    %680 = arith.mulf %678, %679 : vector<24x16xf32>
    %681 = arith.mulf %680, %583 : vector<24x16xf32>
    %682 = arith.addf %676, %681 : vector<24x16xf32>
    %cst_239 = arith.constant -2.200000e+00 : f32
    %683 = vector.broadcast %cst_239 : f32 to vector<24x16xf32>
    %684 = arith.subf %389, %683 : vector<24x16xf32>
    %cst_240 = arith.constant 0.833333313 : f32
    %685 = vector.broadcast %cst_240 : f32 to vector<24x16xf32>
    %686 = arith.mulf %684, %685 : vector<24x16xf32>
    %687 = arith.mulf %686, %594 : vector<24x16xf32>
    %cst_241 = arith.constant -6.000000e-01 : f32
    %688 = vector.broadcast %cst_241 : f32 to vector<24x16xf32>
    %689 = arith.subf %688, %389 : vector<24x16xf32>
    %cst_242 = arith.constant 0.833333313 : f32
    %690 = vector.broadcast %cst_242 : f32 to vector<24x16xf32>
    %691 = arith.mulf %689, %690 : vector<24x16xf32>
    %692 = arith.mulf %691, %605 : vector<24x16xf32>
    %693 = arith.addf %687, %692 : vector<24x16xf32>
    %cst_243 = arith.constant -1.800000e+00 : f32
    %694 = vector.broadcast %cst_243 : f32 to vector<24x16xf32>
    %695 = arith.subf %389, %694 : vector<24x16xf32>
    %cst_244 = arith.constant 0.833333313 : f32
    %696 = vector.broadcast %cst_244 : f32 to vector<24x16xf32>
    %697 = arith.mulf %695, %696 : vector<24x16xf32>
    %698 = arith.mulf %697, %605 : vector<24x16xf32>
    %cst_245 = arith.constant -2.000000e-01 : f32
    %699 = vector.broadcast %cst_245 : f32 to vector<24x16xf32>
    %700 = arith.subf %699, %389 : vector<24x16xf32>
    %cst_246 = arith.constant 0.833333313 : f32
    %701 = vector.broadcast %cst_246 : f32 to vector<24x16xf32>
    %702 = arith.mulf %700, %701 : vector<24x16xf32>
    %703 = arith.mulf %702, %616 : vector<24x16xf32>
    %704 = arith.addf %698, %703 : vector<24x16xf32>
    %cst_247 = arith.constant -1.400000e+00 : f32
    %705 = vector.broadcast %cst_247 : f32 to vector<24x16xf32>
    %706 = arith.subf %389, %705 : vector<24x16xf32>
    %cst_248 = arith.constant 0.833333313 : f32
    %707 = vector.broadcast %cst_248 : f32 to vector<24x16xf32>
    %708 = arith.mulf %706, %707 : vector<24x16xf32>
    %709 = arith.mulf %708, %616 : vector<24x16xf32>
    %cst_249 = arith.constant 2.000000e-01 : f32
    %710 = vector.broadcast %cst_249 : f32 to vector<24x16xf32>
    %711 = arith.subf %710, %389 : vector<24x16xf32>
    %cst_250 = arith.constant 0.833333313 : f32
    %712 = vector.broadcast %cst_250 : f32 to vector<24x16xf32>
    %713 = arith.mulf %711, %712 : vector<24x16xf32>
    %714 = arith.mulf %713, %627 : vector<24x16xf32>
    %715 = arith.addf %709, %714 : vector<24x16xf32>
    %cst_251 = arith.constant -1.000000e+00 : f32
    %716 = vector.broadcast %cst_251 : f32 to vector<24x16xf32>
    %717 = arith.subf %389, %716 : vector<24x16xf32>
    %cst_252 = arith.constant 0.833333313 : f32
    %718 = vector.broadcast %cst_252 : f32 to vector<24x16xf32>
    %719 = arith.mulf %717, %718 : vector<24x16xf32>
    %720 = arith.mulf %719, %627 : vector<24x16xf32>
    %cst_253 = arith.constant 6.000000e-01 : f32
    %721 = vector.broadcast %cst_253 : f32 to vector<24x16xf32>
    %722 = arith.subf %721, %389 : vector<24x16xf32>
    %cst_254 = arith.constant 0.833333313 : f32
    %723 = vector.broadcast %cst_254 : f32 to vector<24x16xf32>
    %724 = arith.mulf %722, %723 : vector<24x16xf32>
    %725 = arith.mulf %724, %638 : vector<24x16xf32>
    %726 = arith.addf %720, %725 : vector<24x16xf32>
    %cst_255 = arith.constant -6.000000e-01 : f32
    %727 = vector.broadcast %cst_255 : f32 to vector<24x16xf32>
    %728 = arith.subf %389, %727 : vector<24x16xf32>
    %cst_256 = arith.constant 0.833333313 : f32
    %729 = vector.broadcast %cst_256 : f32 to vector<24x16xf32>
    %730 = arith.mulf %728, %729 : vector<24x16xf32>
    %731 = arith.mulf %730, %638 : vector<24x16xf32>
    %cst_257 = arith.constant 1.000000e+00 : f32
    %732 = vector.broadcast %cst_257 : f32 to vector<24x16xf32>
    %733 = arith.subf %732, %389 : vector<24x16xf32>
    %cst_258 = arith.constant 0.833333313 : f32
    %734 = vector.broadcast %cst_258 : f32 to vector<24x16xf32>
    %735 = arith.mulf %733, %734 : vector<24x16xf32>
    %736 = arith.mulf %735, %649 : vector<24x16xf32>
    %737 = arith.addf %731, %736 : vector<24x16xf32>
    %cst_259 = arith.constant -2.000000e-01 : f32
    %738 = vector.broadcast %cst_259 : f32 to vector<24x16xf32>
    %739 = arith.subf %389, %738 : vector<24x16xf32>
    %cst_260 = arith.constant 0.833333313 : f32
    %740 = vector.broadcast %cst_260 : f32 to vector<24x16xf32>
    %741 = arith.mulf %739, %740 : vector<24x16xf32>
    %742 = arith.mulf %741, %649 : vector<24x16xf32>
    %cst_261 = arith.constant 1.400000e+00 : f32
    %743 = vector.broadcast %cst_261 : f32 to vector<24x16xf32>
    %744 = arith.subf %743, %389 : vector<24x16xf32>
    %cst_262 = arith.constant 0.833333313 : f32
    %745 = vector.broadcast %cst_262 : f32 to vector<24x16xf32>
    %746 = arith.mulf %744, %745 : vector<24x16xf32>
    %747 = arith.mulf %746, %660 : vector<24x16xf32>
    %748 = arith.addf %742, %747 : vector<24x16xf32>
    %cst_263 = arith.constant 2.000000e-01 : f32
    %749 = vector.broadcast %cst_263 : f32 to vector<24x16xf32>
    %750 = arith.subf %389, %749 : vector<24x16xf32>
    %cst_264 = arith.constant 0.833333313 : f32
    %751 = vector.broadcast %cst_264 : f32 to vector<24x16xf32>
    %752 = arith.mulf %750, %751 : vector<24x16xf32>
    %753 = arith.mulf %752, %660 : vector<24x16xf32>
    %cst_265 = arith.constant 1.800000e+00 : f32
    %754 = vector.broadcast %cst_265 : f32 to vector<24x16xf32>
    %755 = arith.subf %754, %389 : vector<24x16xf32>
    %cst_266 = arith.constant 0.833333313 : f32
    %756 = vector.broadcast %cst_266 : f32 to vector<24x16xf32>
    %757 = arith.mulf %755, %756 : vector<24x16xf32>
    %758 = arith.mulf %757, %671 : vector<24x16xf32>
    %759 = arith.addf %753, %758 : vector<24x16xf32>
    %cst_267 = arith.constant 6.000000e-01 : f32
    %760 = vector.broadcast %cst_267 : f32 to vector<24x16xf32>
    %761 = arith.subf %389, %760 : vector<24x16xf32>
    %cst_268 = arith.constant 0.833333313 : f32
    %762 = vector.broadcast %cst_268 : f32 to vector<24x16xf32>
    %763 = arith.mulf %761, %762 : vector<24x16xf32>
    %764 = arith.mulf %763, %671 : vector<24x16xf32>
    %cst_269 = arith.constant 2.200000e+00 : f32
    %765 = vector.broadcast %cst_269 : f32 to vector<24x16xf32>
    %766 = arith.subf %765, %389 : vector<24x16xf32>
    %cst_270 = arith.constant 0.833333313 : f32
    %767 = vector.broadcast %cst_270 : f32 to vector<24x16xf32>
    %768 = arith.mulf %766, %767 : vector<24x16xf32>
    %769 = arith.mulf %768, %682 : vector<24x16xf32>
    %770 = arith.addf %764, %769 : vector<24x16xf32>
    %771 = tpu.concatenate %396, %693, %704, %715, %726, %737, %748, %759, %770 in 1 : vector<24x16xf32>, vector<24x16xf32>, vector<24x16xf32>, vector<24x16xf32>, vector<24x16xf32>, vector<24x16xf32>, vector<24x16xf32>, vector<24x16xf32>, vector<24x16xf32> -> vector<24x144xf32>
    %cst_271 = arith.constant dense<0.000000e+00> : vector<24x16xf32>
    %772 = tpu.matmul %771, %390, %cst_271 {dimension_numbers = #tpu.dot_dimension_numbers<[1], [0], [0], [1], [0, 0, 1, 1], [], []>} : vector<24x144xf32>, vector<144x16xf32>, vector<24x16xf32> -> vector<24x16xf32>
    %c0_272 = arith.constant 0 : index
    %c0_273 = arith.constant 0 : index
    %773 = vector.load %arg6[%c0_272, %c0_273] : memref<1x16xf32, #tpu.memory_space<vmem>>, vector<1x16xf32>
    %774 = vector.broadcast %773 : vector<1x16xf32> to vector<24x16xf32>
    %775 = arith.mulf %772, %774 : vector<24x16xf32>
    %c0_274 = arith.constant 0 : index
    %c0_275 = arith.constant 0 : index
    %776 = vector.load %arg7[%c0_274, %c0_275] : memref<1x16xf32, #tpu.memory_space<vmem>>, vector<1x16xf32>
    %777 = vector.broadcast %776 : vector<1x16xf32> to vector<24x16xf32>
    %778 = arith.addf %775, %777 : vector<24x16xf32>
    %779 = arith.addf %0, %778 : vector<24x16xf32>
    %c0_276 = arith.constant 0 : index
    %c0_277 = arith.constant 0 : index
    %780 = vector.load %arg8[%c0_276, %c0_277] : memref<144x16xf32, #tpu.memory_space<vmem>>, vector<144x16xf32>
    %781 = arith.negf %779 : vector<24x16xf32>
    %782 = math.exp %781 : vector<24x16xf32>
    %cst_278 = arith.constant 1.000000e+00 : f32
    %783 = vector.broadcast %cst_278 : f32 to vector<24x16xf32>
    %784 = arith.addf %783, %782 : vector<24x16xf32>
    %785 = arith.divf %783, %784 : vector<24x16xf32>
    %786 = arith.mulf %779, %785 : vector<24x16xf32>
    %cst_279 = arith.constant -2.200000e+00 : f32
    %787 = vector.broadcast %cst_279 : f32 to vector<24x16xf32>
    %788 = arith.cmpf oge, %779, %787 : vector<24x16xf32>
    %cst_280 = arith.constant -1.800000e+00 : f32
    %789 = vector.broadcast %cst_280 : f32 to vector<24x16xf32>
    %790 = arith.cmpf olt, %779, %789 : vector<24x16xf32>
    %791 = arith.andi %788, %790 : vector<24x16xi1>
    %792 = arith.extui %791 : vector<24x16xi1> to vector<24x16xi32>
    %793 = arith.sitofp %792 : vector<24x16xi32> to vector<24x16xf32>
    %cst_281 = arith.constant -1.800000e+00 : f32
    %794 = vector.broadcast %cst_281 : f32 to vector<24x16xf32>
    %795 = arith.cmpf oge, %779, %794 : vector<24x16xf32>
    %cst_282 = arith.constant -1.400000e+00 : f32
    %796 = vector.broadcast %cst_282 : f32 to vector<24x16xf32>
    %797 = arith.cmpf olt, %779, %796 : vector<24x16xf32>
    %798 = arith.andi %795, %797 : vector<24x16xi1>
    %799 = arith.extui %798 : vector<24x16xi1> to vector<24x16xi32>
    %800 = arith.sitofp %799 : vector<24x16xi32> to vector<24x16xf32>
    %cst_283 = arith.constant -1.400000e+00 : f32
    %801 = vector.broadcast %cst_283 : f32 to vector<24x16xf32>
    %802 = arith.cmpf oge, %779, %801 : vector<24x16xf32>
    %cst_284 = arith.constant -1.000000e+00 : f32
    %803 = vector.broadcast %cst_284 : f32 to vector<24x16xf32>
    %804 = arith.cmpf olt, %779, %803 : vector<24x16xf32>
    %805 = arith.andi %802, %804 : vector<24x16xi1>
    %806 = arith.extui %805 : vector<24x16xi1> to vector<24x16xi32>
    %807 = arith.sitofp %806 : vector<24x16xi32> to vector<24x16xf32>
    %cst_285 = arith.constant -1.000000e+00 : f32
    %808 = vector.broadcast %cst_285 : f32 to vector<24x16xf32>
    %809 = arith.cmpf oge, %779, %808 : vector<24x16xf32>
    %cst_286 = arith.constant -6.000000e-01 : f32
    %810 = vector.broadcast %cst_286 : f32 to vector<24x16xf32>
    %811 = arith.cmpf olt, %779, %810 : vector<24x16xf32>
    %812 = arith.andi %809, %811 : vector<24x16xi1>
    %813 = arith.extui %812 : vector<24x16xi1> to vector<24x16xi32>
    %814 = arith.sitofp %813 : vector<24x16xi32> to vector<24x16xf32>
    %cst_287 = arith.constant -6.000000e-01 : f32
    %815 = vector.broadcast %cst_287 : f32 to vector<24x16xf32>
    %816 = arith.cmpf oge, %779, %815 : vector<24x16xf32>
    %cst_288 = arith.constant -2.000000e-01 : f32
    %817 = vector.broadcast %cst_288 : f32 to vector<24x16xf32>
    %818 = arith.cmpf olt, %779, %817 : vector<24x16xf32>
    %819 = arith.andi %816, %818 : vector<24x16xi1>
    %820 = arith.extui %819 : vector<24x16xi1> to vector<24x16xi32>
    %821 = arith.sitofp %820 : vector<24x16xi32> to vector<24x16xf32>
    %cst_289 = arith.constant -2.000000e-01 : f32
    %822 = vector.broadcast %cst_289 : f32 to vector<24x16xf32>
    %823 = arith.cmpf oge, %779, %822 : vector<24x16xf32>
    %cst_290 = arith.constant 2.000000e-01 : f32
    %824 = vector.broadcast %cst_290 : f32 to vector<24x16xf32>
    %825 = arith.cmpf olt, %779, %824 : vector<24x16xf32>
    %826 = arith.andi %823, %825 : vector<24x16xi1>
    %827 = arith.extui %826 : vector<24x16xi1> to vector<24x16xi32>
    %828 = arith.sitofp %827 : vector<24x16xi32> to vector<24x16xf32>
    %cst_291 = arith.constant 2.000000e-01 : f32
    %829 = vector.broadcast %cst_291 : f32 to vector<24x16xf32>
    %830 = arith.cmpf oge, %779, %829 : vector<24x16xf32>
    %cst_292 = arith.constant 6.000000e-01 : f32
    %831 = vector.broadcast %cst_292 : f32 to vector<24x16xf32>
    %832 = arith.cmpf olt, %779, %831 : vector<24x16xf32>
    %833 = arith.andi %830, %832 : vector<24x16xi1>
    %834 = arith.extui %833 : vector<24x16xi1> to vector<24x16xi32>
    %835 = arith.sitofp %834 : vector<24x16xi32> to vector<24x16xf32>
    %cst_293 = arith.constant 6.000000e-01 : f32
    %836 = vector.broadcast %cst_293 : f32 to vector<24x16xf32>
    %837 = arith.cmpf oge, %779, %836 : vector<24x16xf32>
    %cst_294 = arith.constant 1.000000e+00 : f32
    %838 = vector.broadcast %cst_294 : f32 to vector<24x16xf32>
    %839 = arith.cmpf olt, %779, %838 : vector<24x16xf32>
    %840 = arith.andi %837, %839 : vector<24x16xi1>
    %841 = arith.extui %840 : vector<24x16xi1> to vector<24x16xi32>
    %842 = arith.sitofp %841 : vector<24x16xi32> to vector<24x16xf32>
    %cst_295 = arith.constant 1.000000e+00 : f32
    %843 = vector.broadcast %cst_295 : f32 to vector<24x16xf32>
    %844 = arith.cmpf oge, %779, %843 : vector<24x16xf32>
    %cst_296 = arith.constant 1.400000e+00 : f32
    %845 = vector.broadcast %cst_296 : f32 to vector<24x16xf32>
    %846 = arith.cmpf olt, %779, %845 : vector<24x16xf32>
    %847 = arith.andi %844, %846 : vector<24x16xi1>
    %848 = arith.extui %847 : vector<24x16xi1> to vector<24x16xi32>
    %849 = arith.sitofp %848 : vector<24x16xi32> to vector<24x16xf32>
    %cst_297 = arith.constant 1.400000e+00 : f32
    %850 = vector.broadcast %cst_297 : f32 to vector<24x16xf32>
    %851 = arith.cmpf oge, %779, %850 : vector<24x16xf32>
    %cst_298 = arith.constant 1.800000e+00 : f32
    %852 = vector.broadcast %cst_298 : f32 to vector<24x16xf32>
    %853 = arith.cmpf olt, %779, %852 : vector<24x16xf32>
    %854 = arith.andi %851, %853 : vector<24x16xi1>
    %855 = arith.extui %854 : vector<24x16xi1> to vector<24x16xi32>
    %856 = arith.sitofp %855 : vector<24x16xi32> to vector<24x16xf32>
    %cst_299 = arith.constant 1.800000e+00 : f32
    %857 = vector.broadcast %cst_299 : f32 to vector<24x16xf32>
    %858 = arith.cmpf oge, %779, %857 : vector<24x16xf32>
    %cst_300 = arith.constant 2.200000e+00 : f32
    %859 = vector.broadcast %cst_300 : f32 to vector<24x16xf32>
    %860 = arith.cmpf olt, %779, %859 : vector<24x16xf32>
    %861 = arith.andi %858, %860 : vector<24x16xi1>
    %862 = arith.extui %861 : vector<24x16xi1> to vector<24x16xi32>
    %863 = arith.sitofp %862 : vector<24x16xi32> to vector<24x16xf32>
    %cst_301 = arith.constant -2.200000e+00 : f32
    %864 = vector.broadcast %cst_301 : f32 to vector<24x16xf32>
    %865 = arith.subf %779, %864 : vector<24x16xf32>
    %cst_302 = arith.constant 2.500000e+00 : f32
    %866 = vector.broadcast %cst_302 : f32 to vector<24x16xf32>
    %867 = arith.mulf %865, %866 : vector<24x16xf32>
    %868 = arith.mulf %867, %793 : vector<24x16xf32>
    %cst_303 = arith.constant -1.400000e+00 : f32
    %869 = vector.broadcast %cst_303 : f32 to vector<24x16xf32>
    %870 = arith.subf %869, %779 : vector<24x16xf32>
    %cst_304 = arith.constant 2.500000e+00 : f32
    %871 = vector.broadcast %cst_304 : f32 to vector<24x16xf32>
    %872 = arith.mulf %870, %871 : vector<24x16xf32>
    %873 = arith.mulf %872, %800 : vector<24x16xf32>
    %874 = arith.addf %868, %873 : vector<24x16xf32>
    %cst_305 = arith.constant -1.800000e+00 : f32
    %875 = vector.broadcast %cst_305 : f32 to vector<24x16xf32>
    %876 = arith.subf %779, %875 : vector<24x16xf32>
    %cst_306 = arith.constant 2.500000e+00 : f32
    %877 = vector.broadcast %cst_306 : f32 to vector<24x16xf32>
    %878 = arith.mulf %876, %877 : vector<24x16xf32>
    %879 = arith.mulf %878, %800 : vector<24x16xf32>
    %cst_307 = arith.constant -1.000000e+00 : f32
    %880 = vector.broadcast %cst_307 : f32 to vector<24x16xf32>
    %881 = arith.subf %880, %779 : vector<24x16xf32>
    %cst_308 = arith.constant 2.500000e+00 : f32
    %882 = vector.broadcast %cst_308 : f32 to vector<24x16xf32>
    %883 = arith.mulf %881, %882 : vector<24x16xf32>
    %884 = arith.mulf %883, %807 : vector<24x16xf32>
    %885 = arith.addf %879, %884 : vector<24x16xf32>
    %cst_309 = arith.constant -1.400000e+00 : f32
    %886 = vector.broadcast %cst_309 : f32 to vector<24x16xf32>
    %887 = arith.subf %779, %886 : vector<24x16xf32>
    %cst_310 = arith.constant 2.500000e+00 : f32
    %888 = vector.broadcast %cst_310 : f32 to vector<24x16xf32>
    %889 = arith.mulf %887, %888 : vector<24x16xf32>
    %890 = arith.mulf %889, %807 : vector<24x16xf32>
    %cst_311 = arith.constant -6.000000e-01 : f32
    %891 = vector.broadcast %cst_311 : f32 to vector<24x16xf32>
    %892 = arith.subf %891, %779 : vector<24x16xf32>
    %cst_312 = arith.constant 2.500000e+00 : f32
    %893 = vector.broadcast %cst_312 : f32 to vector<24x16xf32>
    %894 = arith.mulf %892, %893 : vector<24x16xf32>
    %895 = arith.mulf %894, %814 : vector<24x16xf32>
    %896 = arith.addf %890, %895 : vector<24x16xf32>
    %cst_313 = arith.constant -1.000000e+00 : f32
    %897 = vector.broadcast %cst_313 : f32 to vector<24x16xf32>
    %898 = arith.subf %779, %897 : vector<24x16xf32>
    %cst_314 = arith.constant 2.500000e+00 : f32
    %899 = vector.broadcast %cst_314 : f32 to vector<24x16xf32>
    %900 = arith.mulf %898, %899 : vector<24x16xf32>
    %901 = arith.mulf %900, %814 : vector<24x16xf32>
    %cst_315 = arith.constant -2.000000e-01 : f32
    %902 = vector.broadcast %cst_315 : f32 to vector<24x16xf32>
    %903 = arith.subf %902, %779 : vector<24x16xf32>
    %cst_316 = arith.constant 2.500000e+00 : f32
    %904 = vector.broadcast %cst_316 : f32 to vector<24x16xf32>
    %905 = arith.mulf %903, %904 : vector<24x16xf32>
    %906 = arith.mulf %905, %821 : vector<24x16xf32>
    %907 = arith.addf %901, %906 : vector<24x16xf32>
    %cst_317 = arith.constant -6.000000e-01 : f32
    %908 = vector.broadcast %cst_317 : f32 to vector<24x16xf32>
    %909 = arith.subf %779, %908 : vector<24x16xf32>
    %cst_318 = arith.constant 2.500000e+00 : f32
    %910 = vector.broadcast %cst_318 : f32 to vector<24x16xf32>
    %911 = arith.mulf %909, %910 : vector<24x16xf32>
    %912 = arith.mulf %911, %821 : vector<24x16xf32>
    %cst_319 = arith.constant 2.000000e-01 : f32
    %913 = vector.broadcast %cst_319 : f32 to vector<24x16xf32>
    %914 = arith.subf %913, %779 : vector<24x16xf32>
    %cst_320 = arith.constant 2.500000e+00 : f32
    %915 = vector.broadcast %cst_320 : f32 to vector<24x16xf32>
    %916 = arith.mulf %914, %915 : vector<24x16xf32>
    %917 = arith.mulf %916, %828 : vector<24x16xf32>
    %918 = arith.addf %912, %917 : vector<24x16xf32>
    %cst_321 = arith.constant -2.000000e-01 : f32
    %919 = vector.broadcast %cst_321 : f32 to vector<24x16xf32>
    %920 = arith.subf %779, %919 : vector<24x16xf32>
    %cst_322 = arith.constant 2.500000e+00 : f32
    %921 = vector.broadcast %cst_322 : f32 to vector<24x16xf32>
    %922 = arith.mulf %920, %921 : vector<24x16xf32>
    %923 = arith.mulf %922, %828 : vector<24x16xf32>
    %cst_323 = arith.constant 6.000000e-01 : f32
    %924 = vector.broadcast %cst_323 : f32 to vector<24x16xf32>
    %925 = arith.subf %924, %779 : vector<24x16xf32>
    %cst_324 = arith.constant 2.500000e+00 : f32
    %926 = vector.broadcast %cst_324 : f32 to vector<24x16xf32>
    %927 = arith.mulf %925, %926 : vector<24x16xf32>
    %928 = arith.mulf %927, %835 : vector<24x16xf32>
    %929 = arith.addf %923, %928 : vector<24x16xf32>
    %cst_325 = arith.constant 2.000000e-01 : f32
    %930 = vector.broadcast %cst_325 : f32 to vector<24x16xf32>
    %931 = arith.subf %779, %930 : vector<24x16xf32>
    %cst_326 = arith.constant 2.500000e+00 : f32
    %932 = vector.broadcast %cst_326 : f32 to vector<24x16xf32>
    %933 = arith.mulf %931, %932 : vector<24x16xf32>
    %934 = arith.mulf %933, %835 : vector<24x16xf32>
    %cst_327 = arith.constant 1.000000e+00 : f32
    %935 = vector.broadcast %cst_327 : f32 to vector<24x16xf32>
    %936 = arith.subf %935, %779 : vector<24x16xf32>
    %cst_328 = arith.constant 2.500000e+00 : f32
    %937 = vector.broadcast %cst_328 : f32 to vector<24x16xf32>
    %938 = arith.mulf %936, %937 : vector<24x16xf32>
    %939 = arith.mulf %938, %842 : vector<24x16xf32>
    %940 = arith.addf %934, %939 : vector<24x16xf32>
    %cst_329 = arith.constant 6.000000e-01 : f32
    %941 = vector.broadcast %cst_329 : f32 to vector<24x16xf32>
    %942 = arith.subf %779, %941 : vector<24x16xf32>
    %cst_330 = arith.constant 2.500000e+00 : f32
    %943 = vector.broadcast %cst_330 : f32 to vector<24x16xf32>
    %944 = arith.mulf %942, %943 : vector<24x16xf32>
    %945 = arith.mulf %944, %842 : vector<24x16xf32>
    %cst_331 = arith.constant 1.400000e+00 : f32
    %946 = vector.broadcast %cst_331 : f32 to vector<24x16xf32>
    %947 = arith.subf %946, %779 : vector<24x16xf32>
    %cst_332 = arith.constant 2.500000e+00 : f32
    %948 = vector.broadcast %cst_332 : f32 to vector<24x16xf32>
    %949 = arith.mulf %947, %948 : vector<24x16xf32>
    %950 = arith.mulf %949, %849 : vector<24x16xf32>
    %951 = arith.addf %945, %950 : vector<24x16xf32>
    %cst_333 = arith.constant 1.000000e+00 : f32
    %952 = vector.broadcast %cst_333 : f32 to vector<24x16xf32>
    %953 = arith.subf %779, %952 : vector<24x16xf32>
    %cst_334 = arith.constant 2.500000e+00 : f32
    %954 = vector.broadcast %cst_334 : f32 to vector<24x16xf32>
    %955 = arith.mulf %953, %954 : vector<24x16xf32>
    %956 = arith.mulf %955, %849 : vector<24x16xf32>
    %cst_335 = arith.constant 1.800000e+00 : f32
    %957 = vector.broadcast %cst_335 : f32 to vector<24x16xf32>
    %958 = arith.subf %957, %779 : vector<24x16xf32>
    %cst_336 = arith.constant 2.500000e+00 : f32
    %959 = vector.broadcast %cst_336 : f32 to vector<24x16xf32>
    %960 = arith.mulf %958, %959 : vector<24x16xf32>
    %961 = arith.mulf %960, %856 : vector<24x16xf32>
    %962 = arith.addf %956, %961 : vector<24x16xf32>
    %cst_337 = arith.constant 1.400000e+00 : f32
    %963 = vector.broadcast %cst_337 : f32 to vector<24x16xf32>
    %964 = arith.subf %779, %963 : vector<24x16xf32>
    %cst_338 = arith.constant 2.500000e+00 : f32
    %965 = vector.broadcast %cst_338 : f32 to vector<24x16xf32>
    %966 = arith.mulf %964, %965 : vector<24x16xf32>
    %967 = arith.mulf %966, %856 : vector<24x16xf32>
    %cst_339 = arith.constant 2.200000e+00 : f32
    %968 = vector.broadcast %cst_339 : f32 to vector<24x16xf32>
    %969 = arith.subf %968, %779 : vector<24x16xf32>
    %cst_340 = arith.constant 2.500000e+00 : f32
    %970 = vector.broadcast %cst_340 : f32 to vector<24x16xf32>
    %971 = arith.mulf %969, %970 : vector<24x16xf32>
    %972 = arith.mulf %971, %863 : vector<24x16xf32>
    %973 = arith.addf %967, %972 : vector<24x16xf32>
    %cst_341 = arith.constant -2.200000e+00 : f32
    %974 = vector.broadcast %cst_341 : f32 to vector<24x16xf32>
    %975 = arith.subf %779, %974 : vector<24x16xf32>
    %cst_342 = arith.constant 1.250000e+00 : f32
    %976 = vector.broadcast %cst_342 : f32 to vector<24x16xf32>
    %977 = arith.mulf %975, %976 : vector<24x16xf32>
    %978 = arith.mulf %977, %874 : vector<24x16xf32>
    %cst_343 = arith.constant -1.000000e+00 : f32
    %979 = vector.broadcast %cst_343 : f32 to vector<24x16xf32>
    %980 = arith.subf %979, %779 : vector<24x16xf32>
    %cst_344 = arith.constant 1.250000e+00 : f32
    %981 = vector.broadcast %cst_344 : f32 to vector<24x16xf32>
    %982 = arith.mulf %980, %981 : vector<24x16xf32>
    %983 = arith.mulf %982, %885 : vector<24x16xf32>
    %984 = arith.addf %978, %983 : vector<24x16xf32>
    %cst_345 = arith.constant -1.800000e+00 : f32
    %985 = vector.broadcast %cst_345 : f32 to vector<24x16xf32>
    %986 = arith.subf %779, %985 : vector<24x16xf32>
    %cst_346 = arith.constant 1.250000e+00 : f32
    %987 = vector.broadcast %cst_346 : f32 to vector<24x16xf32>
    %988 = arith.mulf %986, %987 : vector<24x16xf32>
    %989 = arith.mulf %988, %885 : vector<24x16xf32>
    %cst_347 = arith.constant -6.000000e-01 : f32
    %990 = vector.broadcast %cst_347 : f32 to vector<24x16xf32>
    %991 = arith.subf %990, %779 : vector<24x16xf32>
    %cst_348 = arith.constant 1.250000e+00 : f32
    %992 = vector.broadcast %cst_348 : f32 to vector<24x16xf32>
    %993 = arith.mulf %991, %992 : vector<24x16xf32>
    %994 = arith.mulf %993, %896 : vector<24x16xf32>
    %995 = arith.addf %989, %994 : vector<24x16xf32>
    %cst_349 = arith.constant -1.400000e+00 : f32
    %996 = vector.broadcast %cst_349 : f32 to vector<24x16xf32>
    %997 = arith.subf %779, %996 : vector<24x16xf32>
    %cst_350 = arith.constant 1.250000e+00 : f32
    %998 = vector.broadcast %cst_350 : f32 to vector<24x16xf32>
    %999 = arith.mulf %997, %998 : vector<24x16xf32>
    %1000 = arith.mulf %999, %896 : vector<24x16xf32>
    %cst_351 = arith.constant -2.000000e-01 : f32
    %1001 = vector.broadcast %cst_351 : f32 to vector<24x16xf32>
    %1002 = arith.subf %1001, %779 : vector<24x16xf32>
    %cst_352 = arith.constant 1.250000e+00 : f32
    %1003 = vector.broadcast %cst_352 : f32 to vector<24x16xf32>
    %1004 = arith.mulf %1002, %1003 : vector<24x16xf32>
    %1005 = arith.mulf %1004, %907 : vector<24x16xf32>
    %1006 = arith.addf %1000, %1005 : vector<24x16xf32>
    %cst_353 = arith.constant -1.000000e+00 : f32
    %1007 = vector.broadcast %cst_353 : f32 to vector<24x16xf32>
    %1008 = arith.subf %779, %1007 : vector<24x16xf32>
    %cst_354 = arith.constant 1.250000e+00 : f32
    %1009 = vector.broadcast %cst_354 : f32 to vector<24x16xf32>
    %1010 = arith.mulf %1008, %1009 : vector<24x16xf32>
    %1011 = arith.mulf %1010, %907 : vector<24x16xf32>
    %cst_355 = arith.constant 2.000000e-01 : f32
    %1012 = vector.broadcast %cst_355 : f32 to vector<24x16xf32>
    %1013 = arith.subf %1012, %779 : vector<24x16xf32>
    %cst_356 = arith.constant 1.250000e+00 : f32
    %1014 = vector.broadcast %cst_356 : f32 to vector<24x16xf32>
    %1015 = arith.mulf %1013, %1014 : vector<24x16xf32>
    %1016 = arith.mulf %1015, %918 : vector<24x16xf32>
    %1017 = arith.addf %1011, %1016 : vector<24x16xf32>
    %cst_357 = arith.constant -6.000000e-01 : f32
    %1018 = vector.broadcast %cst_357 : f32 to vector<24x16xf32>
    %1019 = arith.subf %779, %1018 : vector<24x16xf32>
    %cst_358 = arith.constant 1.250000e+00 : f32
    %1020 = vector.broadcast %cst_358 : f32 to vector<24x16xf32>
    %1021 = arith.mulf %1019, %1020 : vector<24x16xf32>
    %1022 = arith.mulf %1021, %918 : vector<24x16xf32>
    %cst_359 = arith.constant 6.000000e-01 : f32
    %1023 = vector.broadcast %cst_359 : f32 to vector<24x16xf32>
    %1024 = arith.subf %1023, %779 : vector<24x16xf32>
    %cst_360 = arith.constant 1.250000e+00 : f32
    %1025 = vector.broadcast %cst_360 : f32 to vector<24x16xf32>
    %1026 = arith.mulf %1024, %1025 : vector<24x16xf32>
    %1027 = arith.mulf %1026, %929 : vector<24x16xf32>
    %1028 = arith.addf %1022, %1027 : vector<24x16xf32>
    %cst_361 = arith.constant -2.000000e-01 : f32
    %1029 = vector.broadcast %cst_361 : f32 to vector<24x16xf32>
    %1030 = arith.subf %779, %1029 : vector<24x16xf32>
    %cst_362 = arith.constant 1.250000e+00 : f32
    %1031 = vector.broadcast %cst_362 : f32 to vector<24x16xf32>
    %1032 = arith.mulf %1030, %1031 : vector<24x16xf32>
    %1033 = arith.mulf %1032, %929 : vector<24x16xf32>
    %cst_363 = arith.constant 1.000000e+00 : f32
    %1034 = vector.broadcast %cst_363 : f32 to vector<24x16xf32>
    %1035 = arith.subf %1034, %779 : vector<24x16xf32>
    %cst_364 = arith.constant 1.250000e+00 : f32
    %1036 = vector.broadcast %cst_364 : f32 to vector<24x16xf32>
    %1037 = arith.mulf %1035, %1036 : vector<24x16xf32>
    %1038 = arith.mulf %1037, %940 : vector<24x16xf32>
    %1039 = arith.addf %1033, %1038 : vector<24x16xf32>
    %cst_365 = arith.constant 2.000000e-01 : f32
    %1040 = vector.broadcast %cst_365 : f32 to vector<24x16xf32>
    %1041 = arith.subf %779, %1040 : vector<24x16xf32>
    %cst_366 = arith.constant 1.250000e+00 : f32
    %1042 = vector.broadcast %cst_366 : f32 to vector<24x16xf32>
    %1043 = arith.mulf %1041, %1042 : vector<24x16xf32>
    %1044 = arith.mulf %1043, %940 : vector<24x16xf32>
    %cst_367 = arith.constant 1.400000e+00 : f32
    %1045 = vector.broadcast %cst_367 : f32 to vector<24x16xf32>
    %1046 = arith.subf %1045, %779 : vector<24x16xf32>
    %cst_368 = arith.constant 1.250000e+00 : f32
    %1047 = vector.broadcast %cst_368 : f32 to vector<24x16xf32>
    %1048 = arith.mulf %1046, %1047 : vector<24x16xf32>
    %1049 = arith.mulf %1048, %951 : vector<24x16xf32>
    %1050 = arith.addf %1044, %1049 : vector<24x16xf32>
    %cst_369 = arith.constant 6.000000e-01 : f32
    %1051 = vector.broadcast %cst_369 : f32 to vector<24x16xf32>
    %1052 = arith.subf %779, %1051 : vector<24x16xf32>
    %cst_370 = arith.constant 1.250000e+00 : f32
    %1053 = vector.broadcast %cst_370 : f32 to vector<24x16xf32>
    %1054 = arith.mulf %1052, %1053 : vector<24x16xf32>
    %1055 = arith.mulf %1054, %951 : vector<24x16xf32>
    %cst_371 = arith.constant 1.800000e+00 : f32
    %1056 = vector.broadcast %cst_371 : f32 to vector<24x16xf32>
    %1057 = arith.subf %1056, %779 : vector<24x16xf32>
    %cst_372 = arith.constant 1.250000e+00 : f32
    %1058 = vector.broadcast %cst_372 : f32 to vector<24x16xf32>
    %1059 = arith.mulf %1057, %1058 : vector<24x16xf32>
    %1060 = arith.mulf %1059, %962 : vector<24x16xf32>
    %1061 = arith.addf %1055, %1060 : vector<24x16xf32>
    %cst_373 = arith.constant 1.000000e+00 : f32
    %1062 = vector.broadcast %cst_373 : f32 to vector<24x16xf32>
    %1063 = arith.subf %779, %1062 : vector<24x16xf32>
    %cst_374 = arith.constant 1.250000e+00 : f32
    %1064 = vector.broadcast %cst_374 : f32 to vector<24x16xf32>
    %1065 = arith.mulf %1063, %1064 : vector<24x16xf32>
    %1066 = arith.mulf %1065, %962 : vector<24x16xf32>
    %cst_375 = arith.constant 2.200000e+00 : f32
    %1067 = vector.broadcast %cst_375 : f32 to vector<24x16xf32>
    %1068 = arith.subf %1067, %779 : vector<24x16xf32>
    %cst_376 = arith.constant 1.250000e+00 : f32
    %1069 = vector.broadcast %cst_376 : f32 to vector<24x16xf32>
    %1070 = arith.mulf %1068, %1069 : vector<24x16xf32>
    %1071 = arith.mulf %1070, %973 : vector<24x16xf32>
    %1072 = arith.addf %1066, %1071 : vector<24x16xf32>
    %cst_377 = arith.constant -2.200000e+00 : f32
    %1073 = vector.broadcast %cst_377 : f32 to vector<24x16xf32>
    %1074 = arith.subf %779, %1073 : vector<24x16xf32>
    %cst_378 = arith.constant 0.833333313 : f32
    %1075 = vector.broadcast %cst_378 : f32 to vector<24x16xf32>
    %1076 = arith.mulf %1074, %1075 : vector<24x16xf32>
    %1077 = arith.mulf %1076, %984 : vector<24x16xf32>
    %cst_379 = arith.constant -6.000000e-01 : f32
    %1078 = vector.broadcast %cst_379 : f32 to vector<24x16xf32>
    %1079 = arith.subf %1078, %779 : vector<24x16xf32>
    %cst_380 = arith.constant 0.833333313 : f32
    %1080 = vector.broadcast %cst_380 : f32 to vector<24x16xf32>
    %1081 = arith.mulf %1079, %1080 : vector<24x16xf32>
    %1082 = arith.mulf %1081, %995 : vector<24x16xf32>
    %1083 = arith.addf %1077, %1082 : vector<24x16xf32>
    %cst_381 = arith.constant -1.800000e+00 : f32
    %1084 = vector.broadcast %cst_381 : f32 to vector<24x16xf32>
    %1085 = arith.subf %779, %1084 : vector<24x16xf32>
    %cst_382 = arith.constant 0.833333313 : f32
    %1086 = vector.broadcast %cst_382 : f32 to vector<24x16xf32>
    %1087 = arith.mulf %1085, %1086 : vector<24x16xf32>
    %1088 = arith.mulf %1087, %995 : vector<24x16xf32>
    %cst_383 = arith.constant -2.000000e-01 : f32
    %1089 = vector.broadcast %cst_383 : f32 to vector<24x16xf32>
    %1090 = arith.subf %1089, %779 : vector<24x16xf32>
    %cst_384 = arith.constant 0.833333313 : f32
    %1091 = vector.broadcast %cst_384 : f32 to vector<24x16xf32>
    %1092 = arith.mulf %1090, %1091 : vector<24x16xf32>
    %1093 = arith.mulf %1092, %1006 : vector<24x16xf32>
    %1094 = arith.addf %1088, %1093 : vector<24x16xf32>
    %cst_385 = arith.constant -1.400000e+00 : f32
    %1095 = vector.broadcast %cst_385 : f32 to vector<24x16xf32>
    %1096 = arith.subf %779, %1095 : vector<24x16xf32>
    %cst_386 = arith.constant 0.833333313 : f32
    %1097 = vector.broadcast %cst_386 : f32 to vector<24x16xf32>
    %1098 = arith.mulf %1096, %1097 : vector<24x16xf32>
    %1099 = arith.mulf %1098, %1006 : vector<24x16xf32>
    %cst_387 = arith.constant 2.000000e-01 : f32
    %1100 = vector.broadcast %cst_387 : f32 to vector<24x16xf32>
    %1101 = arith.subf %1100, %779 : vector<24x16xf32>
    %cst_388 = arith.constant 0.833333313 : f32
    %1102 = vector.broadcast %cst_388 : f32 to vector<24x16xf32>
    %1103 = arith.mulf %1101, %1102 : vector<24x16xf32>
    %1104 = arith.mulf %1103, %1017 : vector<24x16xf32>
    %1105 = arith.addf %1099, %1104 : vector<24x16xf32>
    %cst_389 = arith.constant -1.000000e+00 : f32
    %1106 = vector.broadcast %cst_389 : f32 to vector<24x16xf32>
    %1107 = arith.subf %779, %1106 : vector<24x16xf32>
    %cst_390 = arith.constant 0.833333313 : f32
    %1108 = vector.broadcast %cst_390 : f32 to vector<24x16xf32>
    %1109 = arith.mulf %1107, %1108 : vector<24x16xf32>
    %1110 = arith.mulf %1109, %1017 : vector<24x16xf32>
    %cst_391 = arith.constant 6.000000e-01 : f32
    %1111 = vector.broadcast %cst_391 : f32 to vector<24x16xf32>
    %1112 = arith.subf %1111, %779 : vector<24x16xf32>
    %cst_392 = arith.constant 0.833333313 : f32
    %1113 = vector.broadcast %cst_392 : f32 to vector<24x16xf32>
    %1114 = arith.mulf %1112, %1113 : vector<24x16xf32>
    %1115 = arith.mulf %1114, %1028 : vector<24x16xf32>
    %1116 = arith.addf %1110, %1115 : vector<24x16xf32>
    %cst_393 = arith.constant -6.000000e-01 : f32
    %1117 = vector.broadcast %cst_393 : f32 to vector<24x16xf32>
    %1118 = arith.subf %779, %1117 : vector<24x16xf32>
    %cst_394 = arith.constant 0.833333313 : f32
    %1119 = vector.broadcast %cst_394 : f32 to vector<24x16xf32>
    %1120 = arith.mulf %1118, %1119 : vector<24x16xf32>
    %1121 = arith.mulf %1120, %1028 : vector<24x16xf32>
    %cst_395 = arith.constant 1.000000e+00 : f32
    %1122 = vector.broadcast %cst_395 : f32 to vector<24x16xf32>
    %1123 = arith.subf %1122, %779 : vector<24x16xf32>
    %cst_396 = arith.constant 0.833333313 : f32
    %1124 = vector.broadcast %cst_396 : f32 to vector<24x16xf32>
    %1125 = arith.mulf %1123, %1124 : vector<24x16xf32>
    %1126 = arith.mulf %1125, %1039 : vector<24x16xf32>
    %1127 = arith.addf %1121, %1126 : vector<24x16xf32>
    %cst_397 = arith.constant -2.000000e-01 : f32
    %1128 = vector.broadcast %cst_397 : f32 to vector<24x16xf32>
    %1129 = arith.subf %779, %1128 : vector<24x16xf32>
    %cst_398 = arith.constant 0.833333313 : f32
    %1130 = vector.broadcast %cst_398 : f32 to vector<24x16xf32>
    %1131 = arith.mulf %1129, %1130 : vector<24x16xf32>
    %1132 = arith.mulf %1131, %1039 : vector<24x16xf32>
    %cst_399 = arith.constant 1.400000e+00 : f32
    %1133 = vector.broadcast %cst_399 : f32 to vector<24x16xf32>
    %1134 = arith.subf %1133, %779 : vector<24x16xf32>
    %cst_400 = arith.constant 0.833333313 : f32
    %1135 = vector.broadcast %cst_400 : f32 to vector<24x16xf32>
    %1136 = arith.mulf %1134, %1135 : vector<24x16xf32>
    %1137 = arith.mulf %1136, %1050 : vector<24x16xf32>
    %1138 = arith.addf %1132, %1137 : vector<24x16xf32>
    %cst_401 = arith.constant 2.000000e-01 : f32
    %1139 = vector.broadcast %cst_401 : f32 to vector<24x16xf32>
    %1140 = arith.subf %779, %1139 : vector<24x16xf32>
    %cst_402 = arith.constant 0.833333313 : f32
    %1141 = vector.broadcast %cst_402 : f32 to vector<24x16xf32>
    %1142 = arith.mulf %1140, %1141 : vector<24x16xf32>
    %1143 = arith.mulf %1142, %1050 : vector<24x16xf32>
    %cst_403 = arith.constant 1.800000e+00 : f32
    %1144 = vector.broadcast %cst_403 : f32 to vector<24x16xf32>
    %1145 = arith.subf %1144, %779 : vector<24x16xf32>
    %cst_404 = arith.constant 0.833333313 : f32
    %1146 = vector.broadcast %cst_404 : f32 to vector<24x16xf32>
    %1147 = arith.mulf %1145, %1146 : vector<24x16xf32>
    %1148 = arith.mulf %1147, %1061 : vector<24x16xf32>
    %1149 = arith.addf %1143, %1148 : vector<24x16xf32>
    %cst_405 = arith.constant 6.000000e-01 : f32
    %1150 = vector.broadcast %cst_405 : f32 to vector<24x16xf32>
    %1151 = arith.subf %779, %1150 : vector<24x16xf32>
    %cst_406 = arith.constant 0.833333313 : f32
    %1152 = vector.broadcast %cst_406 : f32 to vector<24x16xf32>
    %1153 = arith.mulf %1151, %1152 : vector<24x16xf32>
    %1154 = arith.mulf %1153, %1061 : vector<24x16xf32>
    %cst_407 = arith.constant 2.200000e+00 : f32
    %1155 = vector.broadcast %cst_407 : f32 to vector<24x16xf32>
    %1156 = arith.subf %1155, %779 : vector<24x16xf32>
    %cst_408 = arith.constant 0.833333313 : f32
    %1157 = vector.broadcast %cst_408 : f32 to vector<24x16xf32>
    %1158 = arith.mulf %1156, %1157 : vector<24x16xf32>
    %1159 = arith.mulf %1158, %1072 : vector<24x16xf32>
    %1160 = arith.addf %1154, %1159 : vector<24x16xf32>
    %1161 = tpu.concatenate %786, %1083, %1094, %1105, %1116, %1127, %1138, %1149, %1160 in 1 : vector<24x16xf32>, vector<24x16xf32>, vector<24x16xf32>, vector<24x16xf32>, vector<24x16xf32>, vector<24x16xf32>, vector<24x16xf32>, vector<24x16xf32>, vector<24x16xf32> -> vector<24x144xf32>
    %cst_409 = arith.constant dense<0.000000e+00> : vector<24x16xf32>
    %1162 = tpu.matmul %1161, %780, %cst_409 {dimension_numbers = #tpu.dot_dimension_numbers<[1], [0], [0], [1], [0, 0, 1, 1], [], []>} : vector<24x144xf32>, vector<144x16xf32>, vector<24x16xf32> -> vector<24x16xf32>
    %c0_410 = arith.constant 0 : index
    %c0_411 = arith.constant 0 : index
    %1163 = vector.load %arg9[%c0_410, %c0_411] : memref<1x16xf32, #tpu.memory_space<vmem>>, vector<1x16xf32>
    %1164 = vector.broadcast %1163 : vector<1x16xf32> to vector<24x16xf32>
    %1165 = arith.mulf %1162, %1164 : vector<24x16xf32>
    %c0_412 = arith.constant 0 : index
    %c0_413 = arith.constant 0 : index
    %1166 = vector.load %arg10[%c0_412, %c0_413] : memref<1x16xf32, #tpu.memory_space<vmem>>, vector<1x16xf32>
    %1167 = vector.broadcast %1166 : vector<1x16xf32> to vector<24x16xf32>
    %1168 = arith.addf %1165, %1167 : vector<24x16xf32>
    %c0_414 = arith.constant 0 : index
    %c0_415 = arith.constant 0 : index
    %1169 = vector.load %arg11[%c0_414, %c0_415] : memref<144x16xf32, #tpu.memory_space<vmem>>, vector<144x16xf32>
    %1170 = arith.negf %1168 : vector<24x16xf32>
    %1171 = math.exp %1170 : vector<24x16xf32>
    %cst_416 = arith.constant 1.000000e+00 : f32
    %1172 = vector.broadcast %cst_416 : f32 to vector<24x16xf32>
    %1173 = arith.addf %1172, %1171 : vector<24x16xf32>
    %1174 = arith.divf %1172, %1173 : vector<24x16xf32>
    %1175 = arith.mulf %1168, %1174 : vector<24x16xf32>
    %cst_417 = arith.constant -2.200000e+00 : f32
    %1176 = vector.broadcast %cst_417 : f32 to vector<24x16xf32>
    %1177 = arith.cmpf oge, %1168, %1176 : vector<24x16xf32>
    %cst_418 = arith.constant -1.800000e+00 : f32
    %1178 = vector.broadcast %cst_418 : f32 to vector<24x16xf32>
    %1179 = arith.cmpf olt, %1168, %1178 : vector<24x16xf32>
    %1180 = arith.andi %1177, %1179 : vector<24x16xi1>
    %1181 = arith.extui %1180 : vector<24x16xi1> to vector<24x16xi32>
    %1182 = arith.sitofp %1181 : vector<24x16xi32> to vector<24x16xf32>
    %cst_419 = arith.constant -1.800000e+00 : f32
    %1183 = vector.broadcast %cst_419 : f32 to vector<24x16xf32>
    %1184 = arith.cmpf oge, %1168, %1183 : vector<24x16xf32>
    %cst_420 = arith.constant -1.400000e+00 : f32
    %1185 = vector.broadcast %cst_420 : f32 to vector<24x16xf32>
    %1186 = arith.cmpf olt, %1168, %1185 : vector<24x16xf32>
    %1187 = arith.andi %1184, %1186 : vector<24x16xi1>
    %1188 = arith.extui %1187 : vector<24x16xi1> to vector<24x16xi32>
    %1189 = arith.sitofp %1188 : vector<24x16xi32> to vector<24x16xf32>
    %cst_421 = arith.constant -1.400000e+00 : f32
    %1190 = vector.broadcast %cst_421 : f32 to vector<24x16xf32>
    %1191 = arith.cmpf oge, %1168, %1190 : vector<24x16xf32>
    %cst_422 = arith.constant -1.000000e+00 : f32
    %1192 = vector.broadcast %cst_422 : f32 to vector<24x16xf32>
    %1193 = arith.cmpf olt, %1168, %1192 : vector<24x16xf32>
    %1194 = arith.andi %1191, %1193 : vector<24x16xi1>
    %1195 = arith.extui %1194 : vector<24x16xi1> to vector<24x16xi32>
    %1196 = arith.sitofp %1195 : vector<24x16xi32> to vector<24x16xf32>
    %cst_423 = arith.constant -1.000000e+00 : f32
    %1197 = vector.broadcast %cst_423 : f32 to vector<24x16xf32>
    %1198 = arith.cmpf oge, %1168, %1197 : vector<24x16xf32>
    %cst_424 = arith.constant -6.000000e-01 : f32
    %1199 = vector.broadcast %cst_424 : f32 to vector<24x16xf32>
    %1200 = arith.cmpf olt, %1168, %1199 : vector<24x16xf32>
    %1201 = arith.andi %1198, %1200 : vector<24x16xi1>
    %1202 = arith.extui %1201 : vector<24x16xi1> to vector<24x16xi32>
    %1203 = arith.sitofp %1202 : vector<24x16xi32> to vector<24x16xf32>
    %cst_425 = arith.constant -6.000000e-01 : f32
    %1204 = vector.broadcast %cst_425 : f32 to vector<24x16xf32>
    %1205 = arith.cmpf oge, %1168, %1204 : vector<24x16xf32>
    %cst_426 = arith.constant -2.000000e-01 : f32
    %1206 = vector.broadcast %cst_426 : f32 to vector<24x16xf32>
    %1207 = arith.cmpf olt, %1168, %1206 : vector<24x16xf32>
    %1208 = arith.andi %1205, %1207 : vector<24x16xi1>
    %1209 = arith.extui %1208 : vector<24x16xi1> to vector<24x16xi32>
    %1210 = arith.sitofp %1209 : vector<24x16xi32> to vector<24x16xf32>
    %cst_427 = arith.constant -2.000000e-01 : f32
    %1211 = vector.broadcast %cst_427 : f32 to vector<24x16xf32>
    %1212 = arith.cmpf oge, %1168, %1211 : vector<24x16xf32>
    %cst_428 = arith.constant 2.000000e-01 : f32
    %1213 = vector.broadcast %cst_428 : f32 to vector<24x16xf32>
    %1214 = arith.cmpf olt, %1168, %1213 : vector<24x16xf32>
    %1215 = arith.andi %1212, %1214 : vector<24x16xi1>
    %1216 = arith.extui %1215 : vector<24x16xi1> to vector<24x16xi32>
    %1217 = arith.sitofp %1216 : vector<24x16xi32> to vector<24x16xf32>
    %cst_429 = arith.constant 2.000000e-01 : f32
    %1218 = vector.broadcast %cst_429 : f32 to vector<24x16xf32>
    %1219 = arith.cmpf oge, %1168, %1218 : vector<24x16xf32>
    %cst_430 = arith.constant 6.000000e-01 : f32
    %1220 = vector.broadcast %cst_430 : f32 to vector<24x16xf32>
    %1221 = arith.cmpf olt, %1168, %1220 : vector<24x16xf32>
    %1222 = arith.andi %1219, %1221 : vector<24x16xi1>
    %1223 = arith.extui %1222 : vector<24x16xi1> to vector<24x16xi32>
    %1224 = arith.sitofp %1223 : vector<24x16xi32> to vector<24x16xf32>
    %cst_431 = arith.constant 6.000000e-01 : f32
    %1225 = vector.broadcast %cst_431 : f32 to vector<24x16xf32>
    %1226 = arith.cmpf oge, %1168, %1225 : vector<24x16xf32>
    %cst_432 = arith.constant 1.000000e+00 : f32
    %1227 = vector.broadcast %cst_432 : f32 to vector<24x16xf32>
    %1228 = arith.cmpf olt, %1168, %1227 : vector<24x16xf32>
    %1229 = arith.andi %1226, %1228 : vector<24x16xi1>
    %1230 = arith.extui %1229 : vector<24x16xi1> to vector<24x16xi32>
    %1231 = arith.sitofp %1230 : vector<24x16xi32> to vector<24x16xf32>
    %cst_433 = arith.constant 1.000000e+00 : f32
    %1232 = vector.broadcast %cst_433 : f32 to vector<24x16xf32>
    %1233 = arith.cmpf oge, %1168, %1232 : vector<24x16xf32>
    %cst_434 = arith.constant 1.400000e+00 : f32
    %1234 = vector.broadcast %cst_434 : f32 to vector<24x16xf32>
    %1235 = arith.cmpf olt, %1168, %1234 : vector<24x16xf32>
    %1236 = arith.andi %1233, %1235 : vector<24x16xi1>
    %1237 = arith.extui %1236 : vector<24x16xi1> to vector<24x16xi32>
    %1238 = arith.sitofp %1237 : vector<24x16xi32> to vector<24x16xf32>
    %cst_435 = arith.constant 1.400000e+00 : f32
    %1239 = vector.broadcast %cst_435 : f32 to vector<24x16xf32>
    %1240 = arith.cmpf oge, %1168, %1239 : vector<24x16xf32>
    %cst_436 = arith.constant 1.800000e+00 : f32
    %1241 = vector.broadcast %cst_436 : f32 to vector<24x16xf32>
    %1242 = arith.cmpf olt, %1168, %1241 : vector<24x16xf32>
    %1243 = arith.andi %1240, %1242 : vector<24x16xi1>
    %1244 = arith.extui %1243 : vector<24x16xi1> to vector<24x16xi32>
    %1245 = arith.sitofp %1244 : vector<24x16xi32> to vector<24x16xf32>
    %cst_437 = arith.constant 1.800000e+00 : f32
    %1246 = vector.broadcast %cst_437 : f32 to vector<24x16xf32>
    %1247 = arith.cmpf oge, %1168, %1246 : vector<24x16xf32>
    %cst_438 = arith.constant 2.200000e+00 : f32
    %1248 = vector.broadcast %cst_438 : f32 to vector<24x16xf32>
    %1249 = arith.cmpf olt, %1168, %1248 : vector<24x16xf32>
    %1250 = arith.andi %1247, %1249 : vector<24x16xi1>
    %1251 = arith.extui %1250 : vector<24x16xi1> to vector<24x16xi32>
    %1252 = arith.sitofp %1251 : vector<24x16xi32> to vector<24x16xf32>
    %cst_439 = arith.constant -2.200000e+00 : f32
    %1253 = vector.broadcast %cst_439 : f32 to vector<24x16xf32>
    %1254 = arith.subf %1168, %1253 : vector<24x16xf32>
    %cst_440 = arith.constant 2.500000e+00 : f32
    %1255 = vector.broadcast %cst_440 : f32 to vector<24x16xf32>
    %1256 = arith.mulf %1254, %1255 : vector<24x16xf32>
    %1257 = arith.mulf %1256, %1182 : vector<24x16xf32>
    %cst_441 = arith.constant -1.400000e+00 : f32
    %1258 = vector.broadcast %cst_441 : f32 to vector<24x16xf32>
    %1259 = arith.subf %1258, %1168 : vector<24x16xf32>
    %cst_442 = arith.constant 2.500000e+00 : f32
    %1260 = vector.broadcast %cst_442 : f32 to vector<24x16xf32>
    %1261 = arith.mulf %1259, %1260 : vector<24x16xf32>
    %1262 = arith.mulf %1261, %1189 : vector<24x16xf32>
    %1263 = arith.addf %1257, %1262 : vector<24x16xf32>
    %cst_443 = arith.constant -1.800000e+00 : f32
    %1264 = vector.broadcast %cst_443 : f32 to vector<24x16xf32>
    %1265 = arith.subf %1168, %1264 : vector<24x16xf32>
    %cst_444 = arith.constant 2.500000e+00 : f32
    %1266 = vector.broadcast %cst_444 : f32 to vector<24x16xf32>
    %1267 = arith.mulf %1265, %1266 : vector<24x16xf32>
    %1268 = arith.mulf %1267, %1189 : vector<24x16xf32>
    %cst_445 = arith.constant -1.000000e+00 : f32
    %1269 = vector.broadcast %cst_445 : f32 to vector<24x16xf32>
    %1270 = arith.subf %1269, %1168 : vector<24x16xf32>
    %cst_446 = arith.constant 2.500000e+00 : f32
    %1271 = vector.broadcast %cst_446 : f32 to vector<24x16xf32>
    %1272 = arith.mulf %1270, %1271 : vector<24x16xf32>
    %1273 = arith.mulf %1272, %1196 : vector<24x16xf32>
    %1274 = arith.addf %1268, %1273 : vector<24x16xf32>
    %cst_447 = arith.constant -1.400000e+00 : f32
    %1275 = vector.broadcast %cst_447 : f32 to vector<24x16xf32>
    %1276 = arith.subf %1168, %1275 : vector<24x16xf32>
    %cst_448 = arith.constant 2.500000e+00 : f32
    %1277 = vector.broadcast %cst_448 : f32 to vector<24x16xf32>
    %1278 = arith.mulf %1276, %1277 : vector<24x16xf32>
    %1279 = arith.mulf %1278, %1196 : vector<24x16xf32>
    %cst_449 = arith.constant -6.000000e-01 : f32
    %1280 = vector.broadcast %cst_449 : f32 to vector<24x16xf32>
    %1281 = arith.subf %1280, %1168 : vector<24x16xf32>
    %cst_450 = arith.constant 2.500000e+00 : f32
    %1282 = vector.broadcast %cst_450 : f32 to vector<24x16xf32>
    %1283 = arith.mulf %1281, %1282 : vector<24x16xf32>
    %1284 = arith.mulf %1283, %1203 : vector<24x16xf32>
    %1285 = arith.addf %1279, %1284 : vector<24x16xf32>
    %cst_451 = arith.constant -1.000000e+00 : f32
    %1286 = vector.broadcast %cst_451 : f32 to vector<24x16xf32>
    %1287 = arith.subf %1168, %1286 : vector<24x16xf32>
    %cst_452 = arith.constant 2.500000e+00 : f32
    %1288 = vector.broadcast %cst_452 : f32 to vector<24x16xf32>
    %1289 = arith.mulf %1287, %1288 : vector<24x16xf32>
    %1290 = arith.mulf %1289, %1203 : vector<24x16xf32>
    %cst_453 = arith.constant -2.000000e-01 : f32
    %1291 = vector.broadcast %cst_453 : f32 to vector<24x16xf32>
    %1292 = arith.subf %1291, %1168 : vector<24x16xf32>
    %cst_454 = arith.constant 2.500000e+00 : f32
    %1293 = vector.broadcast %cst_454 : f32 to vector<24x16xf32>
    %1294 = arith.mulf %1292, %1293 : vector<24x16xf32>
    %1295 = arith.mulf %1294, %1210 : vector<24x16xf32>
    %1296 = arith.addf %1290, %1295 : vector<24x16xf32>
    %cst_455 = arith.constant -6.000000e-01 : f32
    %1297 = vector.broadcast %cst_455 : f32 to vector<24x16xf32>
    %1298 = arith.subf %1168, %1297 : vector<24x16xf32>
    %cst_456 = arith.constant 2.500000e+00 : f32
    %1299 = vector.broadcast %cst_456 : f32 to vector<24x16xf32>
    %1300 = arith.mulf %1298, %1299 : vector<24x16xf32>
    %1301 = arith.mulf %1300, %1210 : vector<24x16xf32>
    %cst_457 = arith.constant 2.000000e-01 : f32
    %1302 = vector.broadcast %cst_457 : f32 to vector<24x16xf32>
    %1303 = arith.subf %1302, %1168 : vector<24x16xf32>
    %cst_458 = arith.constant 2.500000e+00 : f32
    %1304 = vector.broadcast %cst_458 : f32 to vector<24x16xf32>
    %1305 = arith.mulf %1303, %1304 : vector<24x16xf32>
    %1306 = arith.mulf %1305, %1217 : vector<24x16xf32>
    %1307 = arith.addf %1301, %1306 : vector<24x16xf32>
    %cst_459 = arith.constant -2.000000e-01 : f32
    %1308 = vector.broadcast %cst_459 : f32 to vector<24x16xf32>
    %1309 = arith.subf %1168, %1308 : vector<24x16xf32>
    %cst_460 = arith.constant 2.500000e+00 : f32
    %1310 = vector.broadcast %cst_460 : f32 to vector<24x16xf32>
    %1311 = arith.mulf %1309, %1310 : vector<24x16xf32>
    %1312 = arith.mulf %1311, %1217 : vector<24x16xf32>
    %cst_461 = arith.constant 6.000000e-01 : f32
    %1313 = vector.broadcast %cst_461 : f32 to vector<24x16xf32>
    %1314 = arith.subf %1313, %1168 : vector<24x16xf32>
    %cst_462 = arith.constant 2.500000e+00 : f32
    %1315 = vector.broadcast %cst_462 : f32 to vector<24x16xf32>
    %1316 = arith.mulf %1314, %1315 : vector<24x16xf32>
    %1317 = arith.mulf %1316, %1224 : vector<24x16xf32>
    %1318 = arith.addf %1312, %1317 : vector<24x16xf32>
    %cst_463 = arith.constant 2.000000e-01 : f32
    %1319 = vector.broadcast %cst_463 : f32 to vector<24x16xf32>
    %1320 = arith.subf %1168, %1319 : vector<24x16xf32>
    %cst_464 = arith.constant 2.500000e+00 : f32
    %1321 = vector.broadcast %cst_464 : f32 to vector<24x16xf32>
    %1322 = arith.mulf %1320, %1321 : vector<24x16xf32>
    %1323 = arith.mulf %1322, %1224 : vector<24x16xf32>
    %cst_465 = arith.constant 1.000000e+00 : f32
    %1324 = vector.broadcast %cst_465 : f32 to vector<24x16xf32>
    %1325 = arith.subf %1324, %1168 : vector<24x16xf32>
    %cst_466 = arith.constant 2.500000e+00 : f32
    %1326 = vector.broadcast %cst_466 : f32 to vector<24x16xf32>
    %1327 = arith.mulf %1325, %1326 : vector<24x16xf32>
    %1328 = arith.mulf %1327, %1231 : vector<24x16xf32>
    %1329 = arith.addf %1323, %1328 : vector<24x16xf32>
    %cst_467 = arith.constant 6.000000e-01 : f32
    %1330 = vector.broadcast %cst_467 : f32 to vector<24x16xf32>
    %1331 = arith.subf %1168, %1330 : vector<24x16xf32>
    %cst_468 = arith.constant 2.500000e+00 : f32
    %1332 = vector.broadcast %cst_468 : f32 to vector<24x16xf32>
    %1333 = arith.mulf %1331, %1332 : vector<24x16xf32>
    %1334 = arith.mulf %1333, %1231 : vector<24x16xf32>
    %cst_469 = arith.constant 1.400000e+00 : f32
    %1335 = vector.broadcast %cst_469 : f32 to vector<24x16xf32>
    %1336 = arith.subf %1335, %1168 : vector<24x16xf32>
    %cst_470 = arith.constant 2.500000e+00 : f32
    %1337 = vector.broadcast %cst_470 : f32 to vector<24x16xf32>
    %1338 = arith.mulf %1336, %1337 : vector<24x16xf32>
    %1339 = arith.mulf %1338, %1238 : vector<24x16xf32>
    %1340 = arith.addf %1334, %1339 : vector<24x16xf32>
    %cst_471 = arith.constant 1.000000e+00 : f32
    %1341 = vector.broadcast %cst_471 : f32 to vector<24x16xf32>
    %1342 = arith.subf %1168, %1341 : vector<24x16xf32>
    %cst_472 = arith.constant 2.500000e+00 : f32
    %1343 = vector.broadcast %cst_472 : f32 to vector<24x16xf32>
    %1344 = arith.mulf %1342, %1343 : vector<24x16xf32>
    %1345 = arith.mulf %1344, %1238 : vector<24x16xf32>
    %cst_473 = arith.constant 1.800000e+00 : f32
    %1346 = vector.broadcast %cst_473 : f32 to vector<24x16xf32>
    %1347 = arith.subf %1346, %1168 : vector<24x16xf32>
    %cst_474 = arith.constant 2.500000e+00 : f32
    %1348 = vector.broadcast %cst_474 : f32 to vector<24x16xf32>
    %1349 = arith.mulf %1347, %1348 : vector<24x16xf32>
    %1350 = arith.mulf %1349, %1245 : vector<24x16xf32>
    %1351 = arith.addf %1345, %1350 : vector<24x16xf32>
    %cst_475 = arith.constant 1.400000e+00 : f32
    %1352 = vector.broadcast %cst_475 : f32 to vector<24x16xf32>
    %1353 = arith.subf %1168, %1352 : vector<24x16xf32>
    %cst_476 = arith.constant 2.500000e+00 : f32
    %1354 = vector.broadcast %cst_476 : f32 to vector<24x16xf32>
    %1355 = arith.mulf %1353, %1354 : vector<24x16xf32>
    %1356 = arith.mulf %1355, %1245 : vector<24x16xf32>
    %cst_477 = arith.constant 2.200000e+00 : f32
    %1357 = vector.broadcast %cst_477 : f32 to vector<24x16xf32>
    %1358 = arith.subf %1357, %1168 : vector<24x16xf32>
    %cst_478 = arith.constant 2.500000e+00 : f32
    %1359 = vector.broadcast %cst_478 : f32 to vector<24x16xf32>
    %1360 = arith.mulf %1358, %1359 : vector<24x16xf32>
    %1361 = arith.mulf %1360, %1252 : vector<24x16xf32>
    %1362 = arith.addf %1356, %1361 : vector<24x16xf32>
    %cst_479 = arith.constant -2.200000e+00 : f32
    %1363 = vector.broadcast %cst_479 : f32 to vector<24x16xf32>
    %1364 = arith.subf %1168, %1363 : vector<24x16xf32>
    %cst_480 = arith.constant 1.250000e+00 : f32
    %1365 = vector.broadcast %cst_480 : f32 to vector<24x16xf32>
    %1366 = arith.mulf %1364, %1365 : vector<24x16xf32>
    %1367 = arith.mulf %1366, %1263 : vector<24x16xf32>
    %cst_481 = arith.constant -1.000000e+00 : f32
    %1368 = vector.broadcast %cst_481 : f32 to vector<24x16xf32>
    %1369 = arith.subf %1368, %1168 : vector<24x16xf32>
    %cst_482 = arith.constant 1.250000e+00 : f32
    %1370 = vector.broadcast %cst_482 : f32 to vector<24x16xf32>
    %1371 = arith.mulf %1369, %1370 : vector<24x16xf32>
    %1372 = arith.mulf %1371, %1274 : vector<24x16xf32>
    %1373 = arith.addf %1367, %1372 : vector<24x16xf32>
    %cst_483 = arith.constant -1.800000e+00 : f32
    %1374 = vector.broadcast %cst_483 : f32 to vector<24x16xf32>
    %1375 = arith.subf %1168, %1374 : vector<24x16xf32>
    %cst_484 = arith.constant 1.250000e+00 : f32
    %1376 = vector.broadcast %cst_484 : f32 to vector<24x16xf32>
    %1377 = arith.mulf %1375, %1376 : vector<24x16xf32>
    %1378 = arith.mulf %1377, %1274 : vector<24x16xf32>
    %cst_485 = arith.constant -6.000000e-01 : f32
    %1379 = vector.broadcast %cst_485 : f32 to vector<24x16xf32>
    %1380 = arith.subf %1379, %1168 : vector<24x16xf32>
    %cst_486 = arith.constant 1.250000e+00 : f32
    %1381 = vector.broadcast %cst_486 : f32 to vector<24x16xf32>
    %1382 = arith.mulf %1380, %1381 : vector<24x16xf32>
    %1383 = arith.mulf %1382, %1285 : vector<24x16xf32>
    %1384 = arith.addf %1378, %1383 : vector<24x16xf32>
    %cst_487 = arith.constant -1.400000e+00 : f32
    %1385 = vector.broadcast %cst_487 : f32 to vector<24x16xf32>
    %1386 = arith.subf %1168, %1385 : vector<24x16xf32>
    %cst_488 = arith.constant 1.250000e+00 : f32
    %1387 = vector.broadcast %cst_488 : f32 to vector<24x16xf32>
    %1388 = arith.mulf %1386, %1387 : vector<24x16xf32>
    %1389 = arith.mulf %1388, %1285 : vector<24x16xf32>
    %cst_489 = arith.constant -2.000000e-01 : f32
    %1390 = vector.broadcast %cst_489 : f32 to vector<24x16xf32>
    %1391 = arith.subf %1390, %1168 : vector<24x16xf32>
    %cst_490 = arith.constant 1.250000e+00 : f32
    %1392 = vector.broadcast %cst_490 : f32 to vector<24x16xf32>
    %1393 = arith.mulf %1391, %1392 : vector<24x16xf32>
    %1394 = arith.mulf %1393, %1296 : vector<24x16xf32>
    %1395 = arith.addf %1389, %1394 : vector<24x16xf32>
    %cst_491 = arith.constant -1.000000e+00 : f32
    %1396 = vector.broadcast %cst_491 : f32 to vector<24x16xf32>
    %1397 = arith.subf %1168, %1396 : vector<24x16xf32>
    %cst_492 = arith.constant 1.250000e+00 : f32
    %1398 = vector.broadcast %cst_492 : f32 to vector<24x16xf32>
    %1399 = arith.mulf %1397, %1398 : vector<24x16xf32>
    %1400 = arith.mulf %1399, %1296 : vector<24x16xf32>
    %cst_493 = arith.constant 2.000000e-01 : f32
    %1401 = vector.broadcast %cst_493 : f32 to vector<24x16xf32>
    %1402 = arith.subf %1401, %1168 : vector<24x16xf32>
    %cst_494 = arith.constant 1.250000e+00 : f32
    %1403 = vector.broadcast %cst_494 : f32 to vector<24x16xf32>
    %1404 = arith.mulf %1402, %1403 : vector<24x16xf32>
    %1405 = arith.mulf %1404, %1307 : vector<24x16xf32>
    %1406 = arith.addf %1400, %1405 : vector<24x16xf32>
    %cst_495 = arith.constant -6.000000e-01 : f32
    %1407 = vector.broadcast %cst_495 : f32 to vector<24x16xf32>
    %1408 = arith.subf %1168, %1407 : vector<24x16xf32>
    %cst_496 = arith.constant 1.250000e+00 : f32
    %1409 = vector.broadcast %cst_496 : f32 to vector<24x16xf32>
    %1410 = arith.mulf %1408, %1409 : vector<24x16xf32>
    %1411 = arith.mulf %1410, %1307 : vector<24x16xf32>
    %cst_497 = arith.constant 6.000000e-01 : f32
    %1412 = vector.broadcast %cst_497 : f32 to vector<24x16xf32>
    %1413 = arith.subf %1412, %1168 : vector<24x16xf32>
    %cst_498 = arith.constant 1.250000e+00 : f32
    %1414 = vector.broadcast %cst_498 : f32 to vector<24x16xf32>
    %1415 = arith.mulf %1413, %1414 : vector<24x16xf32>
    %1416 = arith.mulf %1415, %1318 : vector<24x16xf32>
    %1417 = arith.addf %1411, %1416 : vector<24x16xf32>
    %cst_499 = arith.constant -2.000000e-01 : f32
    %1418 = vector.broadcast %cst_499 : f32 to vector<24x16xf32>
    %1419 = arith.subf %1168, %1418 : vector<24x16xf32>
    %cst_500 = arith.constant 1.250000e+00 : f32
    %1420 = vector.broadcast %cst_500 : f32 to vector<24x16xf32>
    %1421 = arith.mulf %1419, %1420 : vector<24x16xf32>
    %1422 = arith.mulf %1421, %1318 : vector<24x16xf32>
    %cst_501 = arith.constant 1.000000e+00 : f32
    %1423 = vector.broadcast %cst_501 : f32 to vector<24x16xf32>
    %1424 = arith.subf %1423, %1168 : vector<24x16xf32>
    %cst_502 = arith.constant 1.250000e+00 : f32
    %1425 = vector.broadcast %cst_502 : f32 to vector<24x16xf32>
    %1426 = arith.mulf %1424, %1425 : vector<24x16xf32>
    %1427 = arith.mulf %1426, %1329 : vector<24x16xf32>
    %1428 = arith.addf %1422, %1427 : vector<24x16xf32>
    %cst_503 = arith.constant 2.000000e-01 : f32
    %1429 = vector.broadcast %cst_503 : f32 to vector<24x16xf32>
    %1430 = arith.subf %1168, %1429 : vector<24x16xf32>
    %cst_504 = arith.constant 1.250000e+00 : f32
    %1431 = vector.broadcast %cst_504 : f32 to vector<24x16xf32>
    %1432 = arith.mulf %1430, %1431 : vector<24x16xf32>
    %1433 = arith.mulf %1432, %1329 : vector<24x16xf32>
    %cst_505 = arith.constant 1.400000e+00 : f32
    %1434 = vector.broadcast %cst_505 : f32 to vector<24x16xf32>
    %1435 = arith.subf %1434, %1168 : vector<24x16xf32>
    %cst_506 = arith.constant 1.250000e+00 : f32
    %1436 = vector.broadcast %cst_506 : f32 to vector<24x16xf32>
    %1437 = arith.mulf %1435, %1436 : vector<24x16xf32>
    %1438 = arith.mulf %1437, %1340 : vector<24x16xf32>
    %1439 = arith.addf %1433, %1438 : vector<24x16xf32>
    %cst_507 = arith.constant 6.000000e-01 : f32
    %1440 = vector.broadcast %cst_507 : f32 to vector<24x16xf32>
    %1441 = arith.subf %1168, %1440 : vector<24x16xf32>
    %cst_508 = arith.constant 1.250000e+00 : f32
    %1442 = vector.broadcast %cst_508 : f32 to vector<24x16xf32>
    %1443 = arith.mulf %1441, %1442 : vector<24x16xf32>
    %1444 = arith.mulf %1443, %1340 : vector<24x16xf32>
    %cst_509 = arith.constant 1.800000e+00 : f32
    %1445 = vector.broadcast %cst_509 : f32 to vector<24x16xf32>
    %1446 = arith.subf %1445, %1168 : vector<24x16xf32>
    %cst_510 = arith.constant 1.250000e+00 : f32
    %1447 = vector.broadcast %cst_510 : f32 to vector<24x16xf32>
    %1448 = arith.mulf %1446, %1447 : vector<24x16xf32>
    %1449 = arith.mulf %1448, %1351 : vector<24x16xf32>
    %1450 = arith.addf %1444, %1449 : vector<24x16xf32>
    %cst_511 = arith.constant 1.000000e+00 : f32
    %1451 = vector.broadcast %cst_511 : f32 to vector<24x16xf32>
    %1452 = arith.subf %1168, %1451 : vector<24x16xf32>
    %cst_512 = arith.constant 1.250000e+00 : f32
    %1453 = vector.broadcast %cst_512 : f32 to vector<24x16xf32>
    %1454 = arith.mulf %1452, %1453 : vector<24x16xf32>
    %1455 = arith.mulf %1454, %1351 : vector<24x16xf32>
    %cst_513 = arith.constant 2.200000e+00 : f32
    %1456 = vector.broadcast %cst_513 : f32 to vector<24x16xf32>
    %1457 = arith.subf %1456, %1168 : vector<24x16xf32>
    %cst_514 = arith.constant 1.250000e+00 : f32
    %1458 = vector.broadcast %cst_514 : f32 to vector<24x16xf32>
    %1459 = arith.mulf %1457, %1458 : vector<24x16xf32>
    %1460 = arith.mulf %1459, %1362 : vector<24x16xf32>
    %1461 = arith.addf %1455, %1460 : vector<24x16xf32>
    %cst_515 = arith.constant -2.200000e+00 : f32
    %1462 = vector.broadcast %cst_515 : f32 to vector<24x16xf32>
    %1463 = arith.subf %1168, %1462 : vector<24x16xf32>
    %cst_516 = arith.constant 0.833333313 : f32
    %1464 = vector.broadcast %cst_516 : f32 to vector<24x16xf32>
    %1465 = arith.mulf %1463, %1464 : vector<24x16xf32>
    %1466 = arith.mulf %1465, %1373 : vector<24x16xf32>
    %cst_517 = arith.constant -6.000000e-01 : f32
    %1467 = vector.broadcast %cst_517 : f32 to vector<24x16xf32>
    %1468 = arith.subf %1467, %1168 : vector<24x16xf32>
    %cst_518 = arith.constant 0.833333313 : f32
    %1469 = vector.broadcast %cst_518 : f32 to vector<24x16xf32>
    %1470 = arith.mulf %1468, %1469 : vector<24x16xf32>
    %1471 = arith.mulf %1470, %1384 : vector<24x16xf32>
    %1472 = arith.addf %1466, %1471 : vector<24x16xf32>
    %cst_519 = arith.constant -1.800000e+00 : f32
    %1473 = vector.broadcast %cst_519 : f32 to vector<24x16xf32>
    %1474 = arith.subf %1168, %1473 : vector<24x16xf32>
    %cst_520 = arith.constant 0.833333313 : f32
    %1475 = vector.broadcast %cst_520 : f32 to vector<24x16xf32>
    %1476 = arith.mulf %1474, %1475 : vector<24x16xf32>
    %1477 = arith.mulf %1476, %1384 : vector<24x16xf32>
    %cst_521 = arith.constant -2.000000e-01 : f32
    %1478 = vector.broadcast %cst_521 : f32 to vector<24x16xf32>
    %1479 = arith.subf %1478, %1168 : vector<24x16xf32>
    %cst_522 = arith.constant 0.833333313 : f32
    %1480 = vector.broadcast %cst_522 : f32 to vector<24x16xf32>
    %1481 = arith.mulf %1479, %1480 : vector<24x16xf32>
    %1482 = arith.mulf %1481, %1395 : vector<24x16xf32>
    %1483 = arith.addf %1477, %1482 : vector<24x16xf32>
    %cst_523 = arith.constant -1.400000e+00 : f32
    %1484 = vector.broadcast %cst_523 : f32 to vector<24x16xf32>
    %1485 = arith.subf %1168, %1484 : vector<24x16xf32>
    %cst_524 = arith.constant 0.833333313 : f32
    %1486 = vector.broadcast %cst_524 : f32 to vector<24x16xf32>
    %1487 = arith.mulf %1485, %1486 : vector<24x16xf32>
    %1488 = arith.mulf %1487, %1395 : vector<24x16xf32>
    %cst_525 = arith.constant 2.000000e-01 : f32
    %1489 = vector.broadcast %cst_525 : f32 to vector<24x16xf32>
    %1490 = arith.subf %1489, %1168 : vector<24x16xf32>
    %cst_526 = arith.constant 0.833333313 : f32
    %1491 = vector.broadcast %cst_526 : f32 to vector<24x16xf32>
    %1492 = arith.mulf %1490, %1491 : vector<24x16xf32>
    %1493 = arith.mulf %1492, %1406 : vector<24x16xf32>
    %1494 = arith.addf %1488, %1493 : vector<24x16xf32>
    %cst_527 = arith.constant -1.000000e+00 : f32
    %1495 = vector.broadcast %cst_527 : f32 to vector<24x16xf32>
    %1496 = arith.subf %1168, %1495 : vector<24x16xf32>
    %cst_528 = arith.constant 0.833333313 : f32
    %1497 = vector.broadcast %cst_528 : f32 to vector<24x16xf32>
    %1498 = arith.mulf %1496, %1497 : vector<24x16xf32>
    %1499 = arith.mulf %1498, %1406 : vector<24x16xf32>
    %cst_529 = arith.constant 6.000000e-01 : f32
    %1500 = vector.broadcast %cst_529 : f32 to vector<24x16xf32>
    %1501 = arith.subf %1500, %1168 : vector<24x16xf32>
    %cst_530 = arith.constant 0.833333313 : f32
    %1502 = vector.broadcast %cst_530 : f32 to vector<24x16xf32>
    %1503 = arith.mulf %1501, %1502 : vector<24x16xf32>
    %1504 = arith.mulf %1503, %1417 : vector<24x16xf32>
    %1505 = arith.addf %1499, %1504 : vector<24x16xf32>
    %cst_531 = arith.constant -6.000000e-01 : f32
    %1506 = vector.broadcast %cst_531 : f32 to vector<24x16xf32>
    %1507 = arith.subf %1168, %1506 : vector<24x16xf32>
    %cst_532 = arith.constant 0.833333313 : f32
    %1508 = vector.broadcast %cst_532 : f32 to vector<24x16xf32>
    %1509 = arith.mulf %1507, %1508 : vector<24x16xf32>
    %1510 = arith.mulf %1509, %1417 : vector<24x16xf32>
    %cst_533 = arith.constant 1.000000e+00 : f32
    %1511 = vector.broadcast %cst_533 : f32 to vector<24x16xf32>
    %1512 = arith.subf %1511, %1168 : vector<24x16xf32>
    %cst_534 = arith.constant 0.833333313 : f32
    %1513 = vector.broadcast %cst_534 : f32 to vector<24x16xf32>
    %1514 = arith.mulf %1512, %1513 : vector<24x16xf32>
    %1515 = arith.mulf %1514, %1428 : vector<24x16xf32>
    %1516 = arith.addf %1510, %1515 : vector<24x16xf32>
    %cst_535 = arith.constant -2.000000e-01 : f32
    %1517 = vector.broadcast %cst_535 : f32 to vector<24x16xf32>
    %1518 = arith.subf %1168, %1517 : vector<24x16xf32>
    %cst_536 = arith.constant 0.833333313 : f32
    %1519 = vector.broadcast %cst_536 : f32 to vector<24x16xf32>
    %1520 = arith.mulf %1518, %1519 : vector<24x16xf32>
    %1521 = arith.mulf %1520, %1428 : vector<24x16xf32>
    %cst_537 = arith.constant 1.400000e+00 : f32
    %1522 = vector.broadcast %cst_537 : f32 to vector<24x16xf32>
    %1523 = arith.subf %1522, %1168 : vector<24x16xf32>
    %cst_538 = arith.constant 0.833333313 : f32
    %1524 = vector.broadcast %cst_538 : f32 to vector<24x16xf32>
    %1525 = arith.mulf %1523, %1524 : vector<24x16xf32>
    %1526 = arith.mulf %1525, %1439 : vector<24x16xf32>
    %1527 = arith.addf %1521, %1526 : vector<24x16xf32>
    %cst_539 = arith.constant 2.000000e-01 : f32
    %1528 = vector.broadcast %cst_539 : f32 to vector<24x16xf32>
    %1529 = arith.subf %1168, %1528 : vector<24x16xf32>
    %cst_540 = arith.constant 0.833333313 : f32
    %1530 = vector.broadcast %cst_540 : f32 to vector<24x16xf32>
    %1531 = arith.mulf %1529, %1530 : vector<24x16xf32>
    %1532 = arith.mulf %1531, %1439 : vector<24x16xf32>
    %cst_541 = arith.constant 1.800000e+00 : f32
    %1533 = vector.broadcast %cst_541 : f32 to vector<24x16xf32>
    %1534 = arith.subf %1533, %1168 : vector<24x16xf32>
    %cst_542 = arith.constant 0.833333313 : f32
    %1535 = vector.broadcast %cst_542 : f32 to vector<24x16xf32>
    %1536 = arith.mulf %1534, %1535 : vector<24x16xf32>
    %1537 = arith.mulf %1536, %1450 : vector<24x16xf32>
    %1538 = arith.addf %1532, %1537 : vector<24x16xf32>
    %cst_543 = arith.constant 6.000000e-01 : f32
    %1539 = vector.broadcast %cst_543 : f32 to vector<24x16xf32>
    %1540 = arith.subf %1168, %1539 : vector<24x16xf32>
    %cst_544 = arith.constant 0.833333313 : f32
    %1541 = vector.broadcast %cst_544 : f32 to vector<24x16xf32>
    %1542 = arith.mulf %1540, %1541 : vector<24x16xf32>
    %1543 = arith.mulf %1542, %1450 : vector<24x16xf32>
    %cst_545 = arith.constant 2.200000e+00 : f32
    %1544 = vector.broadcast %cst_545 : f32 to vector<24x16xf32>
    %1545 = arith.subf %1544, %1168 : vector<24x16xf32>
    %cst_546 = arith.constant 0.833333313 : f32
    %1546 = vector.broadcast %cst_546 : f32 to vector<24x16xf32>
    %1547 = arith.mulf %1545, %1546 : vector<24x16xf32>
    %1548 = arith.mulf %1547, %1461 : vector<24x16xf32>
    %1549 = arith.addf %1543, %1548 : vector<24x16xf32>
    %1550 = tpu.concatenate %1175, %1472, %1483, %1494, %1505, %1516, %1527, %1538, %1549 in 1 : vector<24x16xf32>, vector<24x16xf32>, vector<24x16xf32>, vector<24x16xf32>, vector<24x16xf32>, vector<24x16xf32>, vector<24x16xf32>, vector<24x16xf32>, vector<24x16xf32> -> vector<24x144xf32>
    %cst_547 = arith.constant dense<0.000000e+00> : vector<24x16xf32>
    %1551 = tpu.matmul %1550, %1169, %cst_547 {dimension_numbers = #tpu.dot_dimension_numbers<[1], [0], [0], [1], [0, 0, 1, 1], [], []>} : vector<24x144xf32>, vector<144x16xf32>, vector<24x16xf32> -> vector<24x16xf32>
    %c0_548 = arith.constant 0 : index
    %c0_549 = arith.constant 0 : index
    %1552 = vector.load %arg12[%c0_548, %c0_549] : memref<1x16xf32, #tpu.memory_space<vmem>>, vector<1x16xf32>
    %1553 = vector.broadcast %1552 : vector<1x16xf32> to vector<24x16xf32>
    %1554 = arith.mulf %1551, %1553 : vector<24x16xf32>
    %c0_550 = arith.constant 0 : index
    %c0_551 = arith.constant 0 : index
    %1555 = vector.load %arg13[%c0_550, %c0_551] : memref<1x16xf32, #tpu.memory_space<vmem>>, vector<1x16xf32>
    %1556 = vector.broadcast %1555 : vector<1x16xf32> to vector<24x16xf32>
    %1557 = arith.addf %1554, %1556 : vector<24x16xf32>
    %1558 = arith.addf %779, %1557 : vector<24x16xf32>
    %c0_552 = arith.constant 0 : index
    %c0_553 = arith.constant 0 : index
    %1559 = vector.load %arg14[%c0_552, %c0_553] : memref<24x16xf32, #tpu.memory_space<vmem>>, vector<24x16xf32>
    tpu.vector_store %arg14[%c0_552, %c0_553], %1558 {strides = array<i32>} : memref<24x16xf32, #tpu.memory_space<vmem>>, vector<24x16xf32>,
    return
  }
  func.func @transform_0(%arg0: i32) -> (i32, i32) {
    %c0_i32 = arith.constant 0 : i32
    %c0_i32_0 = arith.constant 0 : i32
    return %arg0, %c0_i32 : i32, i32
  }
  func.func @transform_1(%arg0: i32) -> (i32, i32) {
    %c0_i32 = arith.constant 0 : i32
    %c0_i32_0 = arith.constant 0 : i32
    %c0_i32_1 = arith.constant 0 : i32
    return %c0_i32, %c0_i32_0 : i32, i32
  }
  func.func @transform_2(%arg0: i32) -> (i32, i32) {
    %c0_i32 = arith.constant 0 : i32
    %c0_i32_0 = arith.constant 0 : i32
    %c0_i32_1 = arith.constant 0 : i32
    return %c0_i32, %c0_i32_0 : i32, i32
  }
  func.func @transform_3(%arg0: i32) -> (i32, i32) {
    %c0_i32 = arith.constant 0 : i32
    %c0_i32_0 = arith.constant 0 : i32
    %c0_i32_1 = arith.constant 0 : i32
    return %c0_i32, %c0_i32_0 : i32, i32
  }
  func.func @transform_4(%arg0: i32) -> (i32, i32) {
    %c0_i32 = arith.constant 0 : i32
    %c0_i32_0 = arith.constant 0 : i32
    %c0_i32_1 = arith.constant 0 : i32
    return %c0_i32, %c0_i32_0 : i32, i32
  }
  func.func @transform_5(%arg0: i32) -> (i32, i32) {
    %c0_i32 = arith.constant 0 : i32
    %c0_i32_0 = arith.constant 0 : i32
    %c0_i32_1 = arith.constant 0 : i32
    return %c0_i32, %c0_i32_0 : i32, i32
  }
  func.func @transform_6(%arg0: i32) -> (i32, i32) {
    %c0_i32 = arith.constant 0 : i32
    %c0_i32_0 = arith.constant 0 : i32
    %c0_i32_1 = arith.constant 0 : i32
    return %c0_i32, %c0_i32_0 : i32, i32
  }
  func.func @transform_7(%arg0: i32) -> (i32, i32) {
    %c0_i32 = arith.constant 0 : i32
    %c0_i32_0 = arith.constant 0 : i32
    %c0_i32_1 = arith.constant 0 : i32
    return %c0_i32, %c0_i32_0 : i32, i32
  }
  func.func @transform_8(%arg0: i32) -> (i32, i32) {
    %c0_i32 = arith.constant 0 : i32
    %c0_i32_0 = arith.constant 0 : i32
    %c0_i32_1 = arith.constant 0 : i32
    return %c0_i32, %c0_i32_0 : i32, i32
  }
  func.func @transform_9(%arg0: i32) -> (i32, i32) {
    %c0_i32 = arith.constant 0 : i32
    %c0_i32_0 = arith.constant 0 : i32
    %c0_i32_1 = arith.constant 0 : i32
    return %c0_i32, %c0_i32_0 : i32, i32
  }
  func.func @transform_10(%arg0: i32) -> (i32, i32) {
    %c0_i32 = arith.constant 0 : i32
    %c0_i32_0 = arith.constant 0 : i32
    %c0_i32_1 = arith.constant 0 : i32
    return %c0_i32, %c0_i32_0 : i32, i32
  }
  func.func @transform_11(%arg0: i32) -> (i32, i32) {
    %c0_i32 = arith.constant 0 : i32
    %c0_i32_0 = arith.constant 0 : i32
    %c0_i32_1 = arith.constant 0 : i32
    return %c0_i32, %c0_i32_0 : i32, i32
  }
  func.func @transform_12(%arg0: i32) -> (i32, i32) {
    %c0_i32 = arith.constant 0 : i32
    %c0_i32_0 = arith.constant 0 : i32
    %c0_i32_1 = arith.constant 0 : i32
    return %c0_i32, %c0_i32_0 : i32, i32
  }
  func.func @transform_13(%arg0: i32) -> (i32, i32) {
    %c0_i32 = arith.constant 0 : i32
    %c0_i32_0 = arith.constant 0 : i32
    return %arg0, %c0_i32 : i32, i32
  }
}

</mosaic_0001>

<bundles_post_ra>
// kernel: tpu_custom_call.1
= control target key start
LH: loop header
LB: loop body
LE: loop exit
PB: predicated region body
PF: predicated region fallthrough
CT: control target
= control target key end

     0   :  { %v4193_v2 = vmov 0.0   ;;  %s4194_s29 = smov 16   ;;  %s4195_s30 = smov 48   ;;  %s6237_s0 = inlined_call_operand.vmem [shape: f32[24,16], index: 0, kind: input, shape index: {}]   ;;  %s6238_s1 = inlined_call_operand.vmem [shape: f32[144,16], index: 1, kind: input, shape index: {}]   ;;  %s6239_s2 = inlined_call_operand.vmem [shape: f32[1,16], index: 2, kind: input, shape index: {}]   ;;  %s6240_s3 = inlined_call_operand.vmem [shape: f32[1,16], index: 3, kind: input, shape index: {}]   ;;  %s6241_s4 = inlined_call_operand.vmem [shape: f32[144,16], index: 4, kind: input, shape index: {}]   ;;  %s6242_s5 = inlined_call_operand.vmem [shape: f32[1,16], index: 5, kind: input, shape index: {}]   ;;  %s6243_s6 = inlined_call_operand.vmem [shape: f32[1,16], index: 6, kind: input, shape index: {}]   ;;  %s6244_s7 = inlined_call_operand.vmem [shape: f32[144,16], index: 7, kind: input, shape index: {}]   ;;  %s6245_s8 = inlined_call_operand.vmem [shape: f32[1,16], index: 8, kind: input, shape index: {}]   ;;  %s6246_s9 = inlined_call_operand.vmem [shape: f32[1,16], index: 9, kind: input, shape index: {}]   ;;  %s6247_s10 = inlined_call_operand.vmem [shape: f32[144,16], index: 10, kind: input, shape index: {}]   ;;  %s6248_s11 = inlined_call_operand.vmem [shape: f32[1,16], index: 11, kind: input, shape index: {}]   ;;  %s6249_s12 = inlined_call_operand.vmem [shape: f32[1,16], index: 12, kind: input, shape index: {}]   ;;  %s6250_s13 = inlined_call_operand.vmem [shape: f32[24,16], index: 13, kind: output, shape index: {}]  }
   0x1   :  { %v4275_v0 = vld [vmem:[%s6237_s0] sm:$0xff]  ;;  %v4280_v1 = vld [vmem:[%s6237_s0 + $0x8] sm:$0xff]  ;;  %s4196_s14 = smov 32   ;;  %s4197_s15 = smov 64  }
   0x2   :  { %vm86_vm0 = vcmp.ge.f32.partialorder %v4275_v0, -2.2  ;;  %vm87_vm1 = vcmp.ge.f32.partialorder %v4280_v1, -2.2  ;;  %vm89_vm2 = vcmp.lt.f32.partialorder %v4275_v0, -1.8 }
   0x3   :  { %vm90_vm3 = vcmp.lt.f32.partialorder %v4280_v1, -1.8  ;;  %vm92_vm4 = vmand %vm86_vm0, %vm89_vm2  ;;  %vm101_vm5 = vcmp.ge.f32.partialorder %v4275_v0, -1.8  ;;  %vm102_vm6 = vcmp.ge.f32.partialorder %v4280_v1, -1.8 }
   0x4   :  { %vm93_vm7 = vmand %vm87_vm1, %vm90_vm3  ;;  %v3602_v3 = vsel %vm92_vm4, 1.0, %v4193_v2  ;;  %vm104_vm8 = vcmp.lt.f32.partialorder %v4275_v0, -1.4  ;;  %vm105_vm9 = vcmp.lt.f32.partialorder %v4280_v1, -1.4  ;;  %vm119_vm10 = vcmp.lt.f32.partialorder %v4275_v0, -1.0 }
   0x5   :  { %v3603_v4 = vsel %vm93_vm7, 1.0, %v4193_v2  ;;  %vm107_vm11 = vmand %vm101_vm5, %vm104_vm8  ;;  %vm116_vm12 = vcmp.ge.f32.partialorder %v4275_v0, -1.4  ;;  %vm117_vm13 = vcmp.ge.f32.partialorder %v4280_v1, -1.4  ;;  %vm120_vm14 = vcmp.lt.f32.partialorder %v4280_v1, -1.0 }
   0x6   :  { %vm108_vm15 = vmand %vm102_vm6, %vm105_vm9  ;;  %v3605_v5 = vsel %vm107_vm11, 1.0, %v4193_v2  ;;  %vm131_vm0 = vcmp.ge.f32.partialorder %v4275_v0, -1.0  ;;  %vm132_vm1 = vcmp.ge.f32.partialorder %v4280_v1, -1.0  ;;  %vm134_vm2 = vcmp.lt.f32.partialorder %v4275_v0, -0.6  ;;  %s4198_s16 = smov 80  }
   0x7   :  { %v3606_v6 = vsel %vm108_vm15, 1.0, %v4193_v2  ;;  %vm122_vm3 = vmand %vm116_vm12, %vm119_vm10  ;;  %vm135_vm4 = vcmp.lt.f32.partialorder %v4280_v1, -0.6  ;;  %v4303_v7 = vadd.f32 2.2, %v4275_v0  ;;  %v281_v8 = vsub.f32 -1.0, %v4275_v0 }
   0x8   :  { %vm123_vm5 = vmand %vm117_vm13, %vm120_vm14  ;;  %v3608_v9 = vsel %vm122_vm3, 1.0, %v4193_v2  ;;  %v4308_v10 = vadd.f32 2.2, %v4280_v1  ;;  %v260_v11 = vsub.f32 -1.4, %v4275_v0  ;;  %v282_v12 = vsub.f32 -1.0, %v4280_v1 }
   0x9   :  { %v3609_v13 = vsel %vm123_vm5, 1.0, %v4193_v2  ;;  %vm137_vm6 = vmand %vm131_vm0, %vm134_vm2  ;;  %v254_v14 = vmul.f32 2.5, %v4303_v7  ;;  %v261_v15 = vsub.f32 -1.4, %v4280_v1  ;;  %v4316_v16 = vadd.f32 1.8, %v4275_v0 }
   0xa   :  { %vm138_vm7 = vmand %vm132_vm1, %vm135_vm4  ;;  %v4321_v17 = vsel %vm137_vm6, 1.0, %v4193_v2  ;;  %v255_v18 = vmul.f32 2.5, %v4308_v10  ;;  %v263_v19 = vmul.f32 2.5, %v260_v11  ;;  %v4325_v20 = vadd.f32 1.8, %v4280_v1  ;;  %s4199_s19 = smov 96  }
   0xb   :  { %v4328_v21 = vsel %vm138_vm7, 1.0, %v4193_v2  ;;  %v257_v22 = vmul.f32 %v3602_v3, %v254_v14  ;;  %v264_v23 = vmul.f32 2.5, %v261_v15  ;;  %v275_v24 = vmul.f32 2.5, %v4316_v16  ;;  %s4200_s20 = smov 112  }
   0xc   :  { %v258_v25 = vmul.f32 %v3603_v4, %v255_v18  ;;  %v266_v26 = vmul.f32 %v3605_v5, %v263_v19  ;;  %v276_v27 = vmul.f32 2.5, %v4325_v20  ;;  %v284_v28 = vmul.f32 2.5, %v281_v8 }
   0xd   :  { %v267_v29 = vmul.f32 %v3606_v6, %v264_v23  ;;  %v278_v30 = vmul.f32 %v3605_v5, %v275_v24  ;;  %v285_v31 = vmul.f32 2.5, %v282_v12  ;;  %v4333_v32 = vadd.f32 1.4, %v4275_v0 }
   0xe   :  { %v269_v33 = vadd.f32 %v266_v26, %v257_v22  ;;  %v279_v34 = vmul.f32 %v3606_v6, %v276_v27  ;;  %v287_v35 = vmul.f32 %v3608_v9, %v284_v28  ;;  %v4336_v36 = vadd.f32 1.4, %v4280_v1 }
   0xf   :  { %v270_v37 = vadd.f32 %v267_v29, %v258_v25  ;;  %v288_v38 = vmul.f32 %v3609_v13, %v285_v31  ;;  %v296_v39 = vmul.f32 2.5, %v4333_v32  ;;  %v302_v40 = vsub.f32 -0.6, %v4275_v0 }
  0x10   :  { %v290_v41 = vadd.f32 %v287_v35, %v278_v30  ;;  %v297_v42 = vmul.f32 2.5, %v4336_v36  ;;  %v303_v43 = vsub.f32 -0.6, %v4280_v1  ;;  %v461_v44 = vmul.f32 1.25, %v4303_v7 }
  0x11   :  { %v291_v45 = vadd.f32 %v288_v38, %v279_v34  ;;  %v299_v46 = vmul.f32 %v3608_v9, %v296_v39  ;;  %v305_v47 = vmul.f32 2.5, %v302_v40  ;;  %v462_v48 = vmul.f32 1.25, %v4308_v10 }
  0x12   :  { %v300_v49 = vmul.f32 %v3609_v13, %v297_v42  ;;  %v306_v50 = vmul.f32 2.5, %v303_v43  ;;  %v464_v51 = vmul.f32 %v461_v44, %v269_v33  ;;  %v467_v52 = vmul.f32 1.25, %v281_v8 }
  0x13   :  { %v308_v53 = vmul.f32 %v4321_v17, %v305_v47  ;;  %v465_v54 = vmul.f32 %v462_v48, %v270_v37  ;;  %v468_v55 = vmul.f32 1.25, %v282_v12  ;;  %v476_v56 = vmul.f32 1.25, %v4316_v16 }
  0x14   :  { %v309_v57 = vmul.f32 %v4328_v21, %v306_v50  ;;  %v470_v58 = vmul.f32 %v467_v52, %v290_v41  ;;  %v477_v59 = vmul.f32 1.25, %v4325_v20  ;;  %v482_v60 = vmul.f32 1.25, %v302_v40 }
  0x15   :  { %v4348_v61 = vadd.f32 %v308_v53, %v299_v46  ;;  %v471_v62 = vmul.f32 %v468_v55, %v291_v45  ;;  %v479_v63 = vmul.f32 %v476_v56, %v290_v41  ;;  %v483_v3 = vmul.f32 1.25, %v303_v43 }
  0x16   :  { %v4350_v4 = vadd.f32 %v309_v57, %v300_v49  ;;  %v473_v5 = vadd.f32 %v470_v58, %v464_v51  ;;  %v480_v6 = vmul.f32 %v477_v59, %v291_v45  ;;  %v596_v8 = vmul.f32 0.8333333, %v4303_v7 }
  0x17   :  { %v474_v9 = vadd.f32 %v471_v62, %v465_v54  ;;  %v485_v11 = vmul.f32 %v482_v60, %v4348_v61  ;;  %v597_v12 = vmul.f32 0.8333333, %v4308_v10  ;;  %v602_v13 = vmul.f32 0.8333333, %v302_v40 }
  0x18   :  { %v486_v14 = vmul.f32 %v483_v3, %v4350_v4  ;;  %v599_v15 = vmul.f32 %v596_v8, %v473_v5  ;;  %v603_v18 = vmul.f32 0.8333333, %v303_v43  ;;  %vm146_vm8 = vcmp.ge.f32.partialorder %v4275_v0, -0.6 }
  0x19   :  { %v4357_v19 = vadd.f32 %v485_v11, %v479_v63  ;;  %v600_v22 = vmul.f32 %v597_v12, %v474_v9  ;;  %vm147_vm9 = vcmp.ge.f32.partialorder %v4280_v1, -0.6  ;;  %vm149_vm10 = vcmp.lt.f32.partialorder %v4275_v0, -0.2 }
  0x1a   :  { %v4361_v7 = vadd.f32 %v486_v14, %v480_v6  ;;  %vm150_vm11 = vcmp.lt.f32.partialorder %v4280_v1, -0.2  ;;  %vm152_vm12 = vmand %vm146_vm8, %vm149_vm10  ;;  %vm161_vm13 = vcmp.ge.f32.partialorder %v4275_v0, -0.2  ;;  %vm162_vm14 = vcmp.ge.f32.partialorder %v4280_v1, -0.2 }
  0x1b   :  { %v605_v10 = vmul.f32 %v602_v13, %v4357_v19  ;;  %vm153_vm15 = vmand %vm147_vm9, %vm150_vm11  ;;  %v3614_v23 = vsel %vm152_vm12, 1.0, %v4193_v2  ;;  %vm164_vm0 = vcmp.lt.f32.partialorder %v4275_v0, 0.2  ;;  %vm165_vm1 = vcmp.lt.f32.partialorder %v4280_v1, 0.2 }
  0x1c   :  { %v606_v24 = vmul.f32 %v603_v18, %v4361_v7  ;;  %v3615_v25 = vsel %vm153_vm15, 1.0, %v4193_v2  ;;  %vm167_vm2 = vmand %vm161_vm13, %vm164_vm0  ;;  %v4373_v26 = vadd.f32 1.0, %v4275_v0  ;;  %v4376_v27 = vadd.f32 1.0, %v4280_v1 }
  0x1d   :  { %v608_v28 = vadd.f32 %v605_v10, %v599_v15  ;;  %vm168_vm3 = vmand %vm162_vm14, %vm165_vm1  ;;  %v3617_v29 = vsel %vm167_vm2, 1.0, %v4193_v2  ;;  %v4380_v30 = vsub.f32 -0.2, %v4275_v0  ;;  %v4383_v31 = vsub.f32 -0.2, %v4280_v1 }
  0x1e   :  { %v609_v33 = vadd.f32 %v606_v24, %v600_v22  ;;  %v3618_v34 = vsel %vm168_vm3, 1.0, %v4193_v2  ;;  %v317_v35 = vmul.f32 2.5, %v4373_v26  ;;  %v318_v37 = vmul.f32 2.5, %v4376_v27 }
  0x1f   :  { %v326_v38 = vmul.f32 2.5, %v4380_v30  ;;  %v327_v39 = vmul.f32 2.5, %v4383_v31  ;;  %v4391_v40 = vadd.f32 0.6, %v4275_v0  ;;  %v4394_v41 = vadd.f32 0.6, %v4280_v1 }
  0x20   :  { %v4000_v42 = vpack.i.bf16 %v609_v33, %v608_v28  ;;  %v320_v43 = vmul.f32 %v4321_v17, %v317_v35  ;;  %v321_v44 = vmul.f32 %v4328_v21, %v318_v37  ;;  %v344_v45 = vsub.f32 0.2, %v4275_v0 }
  0x21   :  { %v329_v46 = vmul.f32 %v3614_v23, %v326_v38  ;;  %v330_v47 = vmul.f32 %v3615_v25, %v327_v39  ;;  %v338_v48 = vmul.f32 2.5, %v4391_v40  ;;  %v339_v49 = vmul.f32 2.5, %v4394_v41 }
  0x22   :  { %4001 = vrot.lane.b32.xlu0 %v4000_v42, %s4194_s29  ;;  %v345_v50 = vsub.f32 0.2, %v4280_v1  ;;  %v347_v51 = vmul.f32 2.5, %v344_v45  ;;  %v4404_v52 = vadd.f32 0.2, %v4275_v0  ;;  %v491_v17 = vmul.f32 1.25, %v4333_v32 }
  0x23   :  { %v332_v21 = vadd.f32 %v329_v46, %v320_v43  ;;  %v333_v53 = vadd.f32 %v330_v47, %v321_v44  ;;  %v341_v54 = vmul.f32 %v3614_v23, %v338_v48  ;;  %v342_v55 = vmul.f32 %v3615_v25, %v339_v49 }
  0x24   :  { %v348_v56 = vmul.f32 2.5, %v345_v50  ;;  %v350_v57 = vmul.f32 %v3617_v29, %v347_v51  ;;  %v4408_v58 = vadd.f32 0.2, %v4280_v1  ;;  %v359_v59 = vmul.f32 2.5, %v4404_v52 }
  0x25   :  { %v492_v60 = vmul.f32 1.25, %v4336_v36  ;;  %v494_v62 = vmul.f32 %v491_v17, %v4348_v61  ;;  %v497_v63 = vmul.f32 1.25, %v4380_v30  ;;  %v498_v3 = vmul.f32 1.25, %v4383_v31 }
  0x26   :  { %v351_v5 = vmul.f32 %v3618_v34, %v348_v56  ;;  %v353_v6 = vadd.f32 %v350_v57, %v341_v54  ;;  %v360_v8 = vmul.f32 2.5, %v4408_v58  ;;  %v4416_v9 = vmul.f32 %v3617_v29, %v359_v59 }
  0x27   :  { %v495_v11 = vmul.f32 %v492_v60, %v4350_v4  ;;  %v500_v12 = vmul.f32 %v497_v63, %v332_v21  ;;  %v501_v13 = vmul.f32 %v498_v3, %v333_v53  ;;  %v506_v14 = vmul.f32 1.25, %v4373_v26 }
  0x28   :  { %v354_v15 = vadd.f32 %v351_v5, %v342_v55  ;;  %v363_v18 = vmul.f32 %v3618_v34, %v360_v8  ;;  %v507_v61 = vmul.f32 1.25, %v4376_v27  ;;  %v512_v22 = vmul.f32 1.25, %v344_v45 }
  0x29   :  { %v503_v10 = vadd.f32 %v500_v12, %v494_v62  ;;  %v504_v23 = vadd.f32 %v501_v13, %v495_v11  ;;  %v509_v24 = vmul.f32 %v506_v14, %v332_v21  ;;  %v513_v25 = vmul.f32 1.25, %v345_v50 }
  0x2a   :  { %v510_v28 = vmul.f32 %v507_v61, %v333_v53  ;;  %v515_v33 = vmul.f32 %v512_v22, %v353_v6  ;;  %v626_v29 = vmul.f32 0.8333333, %v4333_v32  ;;  %v627_v35 = vmul.f32 0.8333333, %v4336_v36 }
  0x2b   :  { %v516_v4 = vmul.f32 %v513_v25, %v354_v15  ;;  %v632_v37 = vmul.f32 0.8333333, %v344_v45  ;;  %v633_v38 = vmul.f32 0.8333333, %v345_v50  ;;  %v611_v39 = vmul.f32 0.8333333, %v4316_v16 }
  0x2c   :  { %v518_v42 = vadd.f32 %v515_v33, %v509_v24  ;;  %v629_v34 = vmul.f32 %v626_v29, %v503_v10  ;;  %v630_v43 = vmul.f32 %v627_v35, %v504_v23  ;;  %v612_v44 = vmul.f32 0.8333333, %v4325_v20 }
  0x2d   :  { %v519_v46 = vadd.f32 %v516_v4, %v510_v28  ;;  %v614_v47 = vmul.f32 %v611_v39, %v4357_v19  ;;  %v617_v48 = vmul.f32 0.8333333, %v4380_v30  ;;  %v618_v49 = vmul.f32 0.8333333, %v4383_v31 }
  0x2e   :  { %v635_v32 = vmul.f32 %v632_v37, %v518_v42  ;;  %v615_v36 = vmul.f32 %v612_v44, %v4361_v7  ;;  %vm176_vm4 = vcmp.ge.f32.partialorder %v4275_v0, 0.2  ;;  %vm177_vm5 = vcmp.ge.f32.partialorder %v4280_v1, 0.2 }
  0x2f   :  { %v636_v16 = vmul.f32 %v633_v38, %v519_v46  ;;  %v620_v45 = vmul.f32 %v617_v48, %v503_v10  ;;  %v621_v50 = vmul.f32 %v618_v49, %v504_v23  ;;  %vm179_vm6 = vcmp.lt.f32.partialorder %v4275_v0, 0.6 }
  0x30   :  { %v638_v20 = vadd.f32 %v635_v32, %v629_v34  ;;  %vm180_vm7 = vcmp.lt.f32.partialorder %v4280_v1, 0.6  ;;  %vm182_vm8 = vmand %vm176_vm4, %vm179_vm6  ;;  %v365_v19 = vsub.f32 0.6, %v4275_v0  ;;  %v366_v30 = vsub.f32 0.6, %v4280_v1 }
  0x31   :  { %v639_v31 = vadd.f32 %v636_v16, %v630_v43  ;;  %v623_v51 = vadd.f32 %v620_v45, %v614_v47  ;;  %v624_v7 = vadd.f32 %v621_v50, %v615_v36  ;;  %vm183_vm9 = vmand %vm177_vm5, %vm180_vm7  ;;  %v3620_v17 = vsel %vm182_vm8, 1.0, %v4193_v2 }
  0x32   :  { %v3621_v21 = vsel %vm183_vm9, 1.0, %v4193_v2  ;;  %v368_v53 = vmul.f32 2.5, %v365_v19  ;;  %v369_v54 = vmul.f32 2.5, %v366_v30  ;;  %v521_v55 = vmul.f32 1.25, %v4391_v40 }
  0x33   :  { %v4010_v56 = vpack.i.bf16 %v639_v31, %v638_v20  ;;  %v4005_v57 = vpack.i.bf16 %v624_v7, %v623_v51  ;;  %v522_v59 = vmul.f32 1.25, %v4394_v41  ;;  %v527_v60 = vmul.f32 1.25, %v365_v19 }
  0x34   :  { %v371_v62 = vmul.f32 %v3620_v17, %v368_v53  ;;  %v372_v63 = vmul.f32 %v3621_v21, %v369_v54  ;;  %v524_v3 = vmul.f32 %v521_v55, %v353_v6  ;;  %v528_v5 = vmul.f32 1.25, %v366_v30 }
  0x35   :  { %4011 = vrot.lane.b32.xlu1 %v4010_v56, %s4195_s30  ;;  %4006 = vrot.lane.b32.xlu0 %v4005_v57, %s4196_s14  ;;  %v525_v8 = vmul.f32 %v522_v59, %v354_v15  ;;  %v641_v11 = vmul.f32 0.8333333, %v4373_v26  ;;  %v642_v12 = vmul.f32 0.8333333, %v4376_v27  ;;  %v647_v13 = vmul.f32 0.8333333, %v365_v19 }
  0x36   :  { %v374_v14 = vadd.f32 %v371_v62, %v4416_v9  ;;  %v375_v61 = vadd.f32 %v372_v63, %v363_v18  ;;  %v648_v22 = vmul.f32 0.8333333, %v366_v30  ;;  %vm191_vm10 = vcmp.ge.f32.partialorder %v4275_v0, 0.6 }
  0x37   :  { %v644_v6 = vmul.f32 %v641_v11, %v518_v42  ;;  %v645_v10 = vmul.f32 %v642_v12, %v519_v46  ;;  %vm192_vm11 = vcmp.ge.f32.partialorder %v4280_v1, 0.6  ;;  %vm194_vm12 = vcmp.lt.f32.partialorder %v4275_v0, 1.0 }
  0x38   :  { %v530_v23 = vmul.f32 %v527_v60, %v374_v14  ;;  %v531_v24 = vmul.f32 %v528_v5, %v375_v61  ;;  %vm195_vm13 = vcmp.lt.f32.partialorder %v4280_v1, 1.0  ;;  %vm197_vm14 = vmand %vm191_vm10, %vm194_vm12  ;;  %v4449_v26 = vadd.f32 -0.2, %v4275_v0 }
  0x39   :  { %vm198_vm15 = vmand %vm192_vm11, %vm195_vm13  ;;  %v3623_v27 = vsel %vm197_vm14, 1.0, %v4193_v2  ;;  %v4453_v9 = vadd.f32 -0.2, %v4280_v1  ;;  %v386_v15 = vsub.f32 1.0, %v4275_v0  ;;  %v387_v18 = vsub.f32 1.0, %v4280_v1 }
  0x3a   :  { %v533_v25 = vadd.f32 %v530_v23, %v524_v3  ;;  %v534_v28 = vadd.f32 %v531_v24, %v525_v8  ;;  %v3624_v33 = vsel %vm198_vm15, 1.0, %v4193_v2  ;;  %v380_v29 = vmul.f32 2.5, %v4449_v26 }
  0x3b   :  { %v381_v35 = vmul.f32 2.5, %v4453_v9  ;;  %v389_v4 = vmul.f32 2.5, %v386_v15  ;;  %v390_v37 = vmul.f32 2.5, %v387_v18  ;;  %v536_v38 = vmul.f32 1.25, %v4404_v52 }
  0x3c   :  { %v650_v39 = vmul.f32 %v647_v13, %v533_v25  ;;  %v651_v42 = vmul.f32 %v648_v22, %v534_v28  ;;  %v383_v34 = vmul.f32 %v3620_v17, %v380_v29  ;;  %v537_v43 = vmul.f32 1.25, %v4408_v58 }
  0x3d   :  { %v384_v44 = vmul.f32 %v3621_v21, %v381_v35  ;;  %v392_v46 = vmul.f32 %v3623_v27, %v389_v4  ;;  %v393_v47 = vmul.f32 %v3624_v33, %v390_v37  ;;  %v539_v48 = vmul.f32 %v536_v38, %v374_v14 }
  0x3e   :  { %v653_v49 = vadd.f32 %v650_v39, %v644_v6  ;;  %v654_v32 = vadd.f32 %v651_v42, %v645_v10  ;;  %v540_v36 = vmul.f32 %v537_v43, %v375_v61  ;;  %v542_v16 = vmul.f32 1.25, %v386_v15 }
  0x3f   :  { %v395_v45 = vadd.f32 %v392_v46, %v383_v34  ;;  %v396_v50 = vadd.f32 %v393_v47, %v384_v44  ;;  %v543_v20 = vmul.f32 1.25, %v387_v18  ;;  %v656_v19 = vmul.f32 0.8333333, %v4391_v40 }
  0x40   :  { %v4015_v30 = vpack.i.bf16 %v654_v32, %v653_v49  ;;  %v657_v31 = vmul.f32 0.8333333, %v4394_v41  ;;  %v662_v51 = vmul.f32 0.8333333, %v386_v15  ;;  %v663_v7 = vmul.f32 0.8333333, %v387_v18 }
  0x41   :  { %v545_v17 = vmul.f32 %v542_v16, %v395_v45  ;;  %v546_v53 = vmul.f32 %v543_v20, %v396_v50  ;;  %v659_v21 = vmul.f32 %v656_v19, %v533_v25  ;;  %vm206_vm0 = vcmp.ge.f32.partialorder %v4275_v0, 1.0 }
  0x42   :  { %4016 = vrot.lane.b32.xlu1 %v4015_v30, %s4197_s15  ;;  %v660_v54 = vmul.f32 %v657_v31, %v534_v28  ;;  %vm207_vm1 = vcmp.ge.f32.partialorder %v4280_v1, 1.0  ;;  %vm209_vm2 = vcmp.lt.f32.partialorder %v4275_v0, 1.4  ;;  %vm210_vm3 = vcmp.lt.f32.partialorder %v4280_v1, 1.4 }
  0x43   :  { %v548_v40 = vadd.f32 %v545_v17, %v539_v48  ;;  %v549_v55 = vadd.f32 %v546_v53, %v540_v36  ;;  %vm212_vm4 = vmand %vm206_vm0, %vm209_vm2  ;;  %v4470_v41 = vadd.f32 -0.6, %v4275_v0  ;;  %v4473_v56 = vadd.f32 -0.6, %v4280_v1 }
  0x44   :  { %vm213_vm5 = vmand %vm207_vm1, %vm210_vm3  ;;  %v3626_v57 = vsel %vm212_vm4, 1.0, %v4193_v2  ;;  %v407_v59 = vsub.f32 1.4, %v4275_v0  ;;  %v408_v60 = vsub.f32 1.4, %v4280_v1  ;;  %v551_v62 = vmul.f32 1.25, %v4449_v26 }
  0x45   :  { %v665_v63 = vmul.f32 %v662_v51, %v548_v40  ;;  %v666_v3 = vmul.f32 %v663_v7, %v549_v55  ;;  %v3627_v5 = vsel %vm213_vm5, 1.0, %v4193_v2  ;;  %v401_v8 = vmul.f32 2.5, %v4470_v41 }
  0x46   :  { %v402_v11 = vmul.f32 2.5, %v4473_v56  ;;  %v410_v12 = vmul.f32 2.5, %v407_v59  ;;  %v411_v13 = vmul.f32 2.5, %v408_v60  ;;  %v552_v14 = vmul.f32 1.25, %v4453_v9 }
  0x47   :  { %v668_v61 = vadd.f32 %v665_v63, %v659_v21  ;;  %v669_v22 = vadd.f32 %v666_v3, %v660_v54  ;;  %v404_v6 = vmul.f32 %v3623_v27, %v401_v8  ;;  %v554_v10 = vmul.f32 %v551_v62, %v395_v45  ;;  %v4513_v54 = vld [vmem:[%s6237_s0 + $0x10] sm:$0xff] }
  0x48   :  { %v405_v23 = vmul.f32 %v3624_v33, %v402_v11  ;;  %v413_v24 = vmul.f32 %v3626_v57, %v410_v12  ;;  %v414_v15 = vmul.f32 %v3627_v5, %v411_v13  ;;  %v555_v18 = vmul.f32 %v552_v14, %v396_v50 }
  0x49   :  { %v4020_v25 = vpack.i.bf16 %v669_v22, %v668_v61  ;;  %v557_v28 = vmul.f32 1.25, %v407_v59  ;;  %v558_v29 = vmul.f32 1.25, %v408_v60  ;;  %v671_v35 = vmul.f32 0.8333333, %v4404_v52 }
  0x4a   :  { %v416_v4 = vadd.f32 %v413_v24, %v404_v6  ;;  %v417_v37 = vadd.f32 %v414_v15, %v405_v23  ;;  %v672_v38 = vmul.f32 0.8333333, %v4408_v58  ;;  %v677_v39 = vmul.f32 0.8333333, %v407_v59 }
  0x4b   :  { %4021 = vrot.lane.b32.xlu0 %v4020_v25, %s4198_s16  ;;  %v674_v42 = vmul.f32 %v671_v35, %v548_v40  ;;  %v678_v27 = vmul.f32 0.8333333, %v408_v60  ;;  %vm221_vm6 = vcmp.ge.f32.partialorder %v4275_v0, 1.4  ;;  %vm222_vm7 = vcmp.ge.f32.partialorder %v4280_v1, 1.4 }
  0x4c   :  { %v560_v33 = vmul.f32 %v557_v28, %v416_v4  ;;  %v561_v34 = vmul.f32 %v558_v29, %v417_v37  ;;  %v675_v43 = vmul.f32 %v672_v38, %v549_v55  ;;  %vm224_vm8 = vcmp.lt.f32.partialorder %v4275_v0, 1.8 }
  0x4d   :  { %vm225_vm9 = vcmp.lt.f32.partialorder %v4280_v1, 1.8  ;;  %vm227_vm10 = vmand %vm221_vm6, %vm224_vm8  ;;  %v4491_v52 = vadd.f32 -1.0, %v4275_v0  ;;  %v4494_v58 = vadd.f32 -1.0, %v4280_v1  ;;  %v428_v44 = vsub.f32 1.8, %v4275_v0 }
  0x4e   :  { %v563_v46 = vadd.f32 %v560_v33, %v554_v10  ;;  %v564_v47 = vadd.f32 %v561_v34, %v555_v18  ;;  %vm228_vm11 = vmand %vm222_vm7, %vm225_vm9  ;;  %v4498_v48 = vsel %vm227_vm10, 1.0, %v4193_v2  ;;  %v429_v49 = vsub.f32 1.8, %v4280_v1 }
  0x4f   :  { %v4502_v32 = vsel %vm228_vm11, 1.0, %v4193_v2  ;;  %v422_v36 = vmul.f32 2.5, %v4491_v52  ;;  %v423_v16 = vmul.f32 2.5, %v4494_v58  ;;  %v431_v45 = vmul.f32 2.5, %v428_v44 }
  0x50   :  { %v680_v50 = vmul.f32 %v677_v39, %v563_v46  ;;  %v681_v20 = vmul.f32 %v678_v27, %v564_v47  ;;  %v432_v19 = vmul.f32 2.5, %v429_v49  ;;  %v566_v0 = vmul.f32 1.25, %v4470_v41 }
  0x51   :  { %v425_v30 = vmul.f32 %v3626_v57, %v422_v36  ;;  %v426_v31 = vmul.f32 %v3627_v5, %v423_v16  ;;  %v434_v51 = vmul.f32 %v4498_v48, %v431_v45  ;;  %v567_v7 = vmul.f32 1.25, %v4473_v56 }
  0x52   :  { %v683_v1 = vadd.f32 %v680_v50, %v674_v42  ;;  %v684_v17 = vadd.f32 %v681_v20, %v675_v43  ;;  %v435_v53 = vmul.f32 %v4502_v32, %v432_v19  ;;  %v569_v21 = vmul.f32 %v566_v0, %v416_v4 }
  0x53   :  { %v4515_v40 = vadd.f32 %v434_v51, %v425_v30  ;;  %v570_v55 = vmul.f32 %v567_v7, %v417_v37  ;;  %v572_v59 = vmul.f32 1.25, %v428_v44  ;;  %v573_v57 = vmul.f32 1.25, %v429_v49 }
  0x54   :  { %v4025_v60 = vpack.i.bf16 %v684_v17, %v683_v1  ;;  %v4517_v62 = vadd.f32 %v435_v53, %v426_v31  ;;  %v686_v63 = vmul.f32 0.8333333, %v4449_v26  ;;  %v687_v3 = vmul.f32 0.8333333, %v4453_v9 }
  0x55   :  { %v575_v5 = vmul.f32 %v572_v59, %v4515_v40  ;;  %v692_v8 = vmul.f32 0.8333333, %v428_v44  ;;  %v693_v11 = vmul.f32 0.8333333, %v429_v49  ;;  %vm88_vm12 = vcmp.ge.f32.partialorder %v4513_v54, -2.2 }
  0x56   :  { %4026 = vrot.lane.b32.xlu1 %v4025_v60, %s4199_s19  ;;  %v576_v12 = vmul.f32 %v573_v57, %v4517_v62  ;;  %v689_v13 = vmul.f32 %v686_v63, %v563_v46  ;;  %v690_v14 = vmul.f32 %v687_v3, %v564_v47  ;;  %vm91_vm13 = vcmp.lt.f32.partialorder %v4513_v54, -1.8 }
  0x57   :  { %v4526_v61 = vadd.f32 %v575_v5, %v569_v21  ;;  %vm94_vm14 = vmand %vm88_vm12, %vm91_vm13  ;;  %vm103_vm15 = vcmp.ge.f32.partialorder %v4513_v54, -1.8  ;;  %vm106_vm0 = vcmp.lt.f32.partialorder %v4513_v54, -1.4  ;;  %vm118_vm1 = vcmp.ge.f32.partialorder %v4513_v54, -1.4 }
  0x58   :  { %v4531_v26 = vadd.f32 %v576_v12, %v570_v55  ;;  %v3604_v9 = vsel %vm94_vm14, 1.0, %v4193_v2  ;;  %vm109_vm2 = vmand %vm103_vm15, %vm106_vm0  ;;  %vm121_vm3 = vcmp.lt.f32.partialorder %v4513_v54, -1.0  ;;  %vm133_vm4 = vcmp.ge.f32.partialorder %v4513_v54, -1.0 }
  0x59   :  { %v695_v22 = vmul.f32 %v692_v8, %v4526_v61  ;;  %v3607_v6 = vsel %vm109_vm2, 1.0, %v4193_v2  ;;  %vm124_vm5 = vmand %vm118_vm1, %vm121_vm3  ;;  %vm136_vm6 = vcmp.lt.f32.partialorder %v4513_v54, -0.6  ;;  %v3637_v10 = vadd.f32 2.2, %v4513_v54 }
  0x5a   :  { %v696_v23 = vmul.f32 %v693_v11, %v4531_v26  ;;  %v3610_v24 = vsel %vm124_vm5, 1.0, %v4193_v2  ;;  %vm139_vm7 = vmand %vm133_vm4, %vm136_vm6  ;;  %v262_v15 = vsub.f32 -1.4, %v4513_v54  ;;  %v3640_v18 = vadd.f32 1.8, %v4513_v54 }
  0x5b   :  { %v698_v25 = vadd.f32 %v695_v22, %v689_v13  ;;  %v3613_v28 = vsel %vm139_vm7, 1.0, %v4193_v2  ;;  %v256_v29 = vmul.f32 2.5, %v3637_v10  ;;  %v283_v35 = vsub.f32 -1.0, %v4513_v54 }
  0x5c   :  { %v699_v4 = vadd.f32 %v696_v23, %v690_v14  ;;  %v265_v37 = vmul.f32 2.5, %v262_v15  ;;  %v277_v38 = vmul.f32 2.5, %v3640_v18  ;;  %v4547_v39 = vadd.f32 1.4, %v4513_v54 }
  0x5d   :  { %v259_v42 = vmul.f32 %v3604_v9, %v256_v29  ;;  %v286_v27 = vmul.f32 2.5, %v283_v35  ;;  %v304_v33 = vsub.f32 -0.6, %v4513_v54  ;;  %v463_v34 = vmul.f32 1.25, %v3637_v10 }
  0x5e   :  { %v4030_v43 = vpack.i.bf16 %v699_v4, %v698_v25  ;;  %v268_v44 = vmul.f32 %v3607_v6, %v265_v37  ;;  %v280_v46 = vmul.f32 %v3607_v6, %v277_v38  ;;  %v298_v47 = vmul.f32 2.5, %v4547_v39 }
  0x5f   :  { %v289_v49 = vmul.f32 %v3610_v24, %v286_v27  ;;  %v307_v36 = vmul.f32 2.5, %v304_v33  ;;  %v469_v16 = vmul.f32 1.25, %v283_v35  ;;  %v478_v45 = vmul.f32 1.25, %v3640_v18 }
  0x60   :  { %4031 = vrot.lane.b32.xlu0 %v4030_v43, %s4200_s20  ;;  %v271_v50 = vadd.f32 %v268_v44, %v259_v42  ;;  %v301_v20 = vmul.f32 %v3610_v24, %v298_v47  ;;  %v484_v30 = vmul.f32 1.25, %v304_v33  ;;  %vm148_vm8 = vcmp.ge.f32.partialorder %v4513_v54, -0.6 }
  0x61   :  { %v292_v19 = vadd.f32 %v289_v49, %v280_v46  ;;  %v310_v0 = vmul.f32 %v3613_v28, %v307_v36  ;;  %vm151_vm9 = vcmp.lt.f32.partialorder %v4513_v54, -0.2  ;;  %v3646_v51 = vadd.f32 1.0, %v4513_v54 }
  0x62   :  { %v466_v31 = vmul.f32 %v463_v34, %v271_v50  ;;  %v325_v7 = vsub.f32 -0.2, %v4513_v54  ;;  %v598_v21 = vmul.f32 0.8333333, %v3637_v10  ;;  %vm154_vm10 = vmand %vm148_vm8, %vm151_vm9  ;;  %v493_v60 = vmul.f32 1.25, %v4547_v39 }
  0x63   :  { %v313_v1 = vadd.f32 %v310_v0, %v301_v20  ;;  %v472_v17 = vmul.f32 %v469_v16, %v292_v19  ;;  %v481_v53 = vmul.f32 %v478_v45, %v292_v19  ;;  %v3616_v55 = vsel %vm154_vm10, 1.0, %v4193_v2 }
  0x64   :  { %v319_v59 = vmul.f32 2.5, %v3646_v51  ;;  %v328_v57 = vmul.f32 2.5, %v325_v7  ;;  %v604_v5 = vmul.f32 0.8333333, %v304_v33  ;;  %v499_v8 = vmul.f32 1.25, %v325_v7 }
  0x65   :  { %v475_v63 = vadd.f32 %v472_v17, %v466_v31  ;;  %v487_v3 = vmul.f32 %v484_v30, %v313_v1  ;;  %v613_v13 = vmul.f32 0.8333333, %v3640_v18  ;;  %vm163_vm11 = vcmp.ge.f32.partialorder %v4513_v54, -0.2 }
  0x66   :  { %v322_v11 = vmul.f32 %v3613_v28, %v319_v59  ;;  %v331_v12 = vmul.f32 %v3616_v55, %v328_v57  ;;  %vm166_vm12 = vcmp.lt.f32.partialorder %v4513_v54, 0.2  ;;  %v3649_v22 = vadd.f32 0.6, %v4513_v54 }
  0x67   :  { %v490_v14 = vadd.f32 %v487_v3, %v481_v53  ;;  %v601_v9 = vmul.f32 %v598_v21, %v475_v63  ;;  %v496_v10 = vmul.f32 %v493_v60, %v313_v1  ;;  %vm169_vm13 = vmand %vm163_vm11, %vm166_vm12  ;;  %v346_v23 = vsub.f32 0.2, %v4513_v54 }
  0x68   :  { %v334_v6 = vadd.f32 %v331_v12, %v322_v11  ;;  %v3619_v15 = vsel %vm169_vm13, 1.0, %v4193_v2  ;;  %v340_v25 = vmul.f32 2.5, %v3649_v22  ;;  %v508_v28 = vmul.f32 1.25, %v3646_v51 }
  0x69   :  { %v607_v24 = vmul.f32 %v604_v5, %v490_v14  ;;  %v616_v18 = vmul.f32 %v613_v13, %v490_v14  ;;  %v619_v35 = vmul.f32 0.8333333, %v325_v7  ;;  %v349_v4 = vmul.f32 2.5, %v346_v23 }
  0x6a   :  { %v502_v29 = vmul.f32 %v499_v8, %v334_v6  ;;  %v343_v38 = vmul.f32 %v3616_v55, %v340_v25  ;;  %v514_v42 = vmul.f32 1.25, %v346_v23  ;;  %vm178_vm14 = vcmp.ge.f32.partialorder %v4513_v54, 0.2 }
  0x6b   :  { %v610_v37 = vadd.f32 %v607_v24, %v601_v9  ;;  %v352_v33 = vmul.f32 %v3619_v15, %v349_v4  ;;  %vm181_vm15 = vcmp.lt.f32.partialorder %v4513_v54, 0.6  ;;  %v4566_v34 = vadd.f32 0.2, %v4513_v54 }
  0x6c   :  { %v505_v27 = vadd.f32 %v502_v29, %v496_v10  ;;  %v511_v43 = vmul.f32 %v508_v28, %v334_v6  ;;  %v628_v44 = vmul.f32 0.8333333, %v4547_v39  ;;  %vm184_vm0 = vmand %vm178_vm14, %vm181_vm15  ;;  %v367_v46 = vsub.f32 0.6, %v4513_v54 }
  0x6d   :  { %723 = vrot.lane.b32.xlu1 %v610_v37, %s4194_s29  ;;  %v523_v47 = vmul.f32 1.25, %v3649_v22  ;;  %v355_v36 = vadd.f32 %v352_v33, %v343_v38  ;;  %v3622_v16 = vsel %vm184_vm0, 1.0, %v4193_v2  ;;  %vm196_vm1 = vcmp.lt.f32.partialorder %v4513_v54, 1.0 }
  0x6e   :  { %v622_v49 = vmul.f32 %v619_v35, %v505_v27  ;;  %v634_v45 = vmul.f32 0.8333333, %v346_v23  ;;  %v361_v50 = vmul.f32 2.5, %v4566_v34  ;;  %v370_v20 = vmul.f32 2.5, %v367_v46 }
  0x6f   :  { %v643_v19 = vmul.f32 0.8333333, %v3646_v51  ;;  %v517_v30 = vmul.f32 %v514_v42, %v355_v36  ;;  %v529_v31 = vmul.f32 1.25, %v367_v46  ;;  %vm193_vm2 = vcmp.ge.f32.partialorder %v4513_v54, 0.6 }
  0x70   :  { %v625_v0 = vadd.f32 %v622_v49, %v616_v18  ;;  %v364_v39 = vmul.f32 %v3619_v15, %v361_v50  ;;  %v373_v7 = vmul.f32 %v3622_v16, %v370_v20  ;;  %vm199_vm3 = vmand %vm193_vm2, %vm196_vm1  ;;  %v4576_v1 = vadd.f32 -0.2, %v4513_v54 }
  0x71   :  { %v388_v17 = vsub.f32 1.0, %v4513_v54  ;;  %v520_v53 = vadd.f32 %v517_v30, %v511_v43  ;;  %v631_v21 = vmul.f32 %v628_v44, %v505_v27  ;;  %v526_v55 = vmul.f32 %v523_v47, %v355_v36 }
  0x72   :  { %735 = vrot.lane.b32.xlu0 %v625_v0, %s4196_s14  ;;  %v3625_v51 = vsel %vm199_vm3, 1.0, %v4193_v2  ;;  %v376_v59 = vadd.f32 %v373_v7, %v364_v39  ;;  %v382_v57 = vmul.f32 2.5, %v4576_v1  ;;  %v538_v63 = vmul.f32 1.25, %v4566_v34  ;;  %v48_v39 = vld [vmem:[%s6238_s1 + $0x8] sm:$0xff] }
  0x73   :  { %v391_v60 = vmul.f32 2.5, %v388_v17  ;;  %v637_v3 = vmul.f32 %v634_v45, %v520_v53  ;;  %v649_v5 = vmul.f32 0.8333333, %v367_v46  ;;  %v658_v8 = vmul.f32 0.8333333, %v3649_v22 }
  0x74   :  { %vm208_vm4 = vcmp.ge.f32.partialorder %v4513_v54, 1.0  ;;  %v532_v11 = vmul.f32 %v529_v31, %v376_v59  ;;  %v385_v12 = vmul.f32 %v3622_v16, %v382_v57  ;;  %v544_v14 = vmul.f32 1.25, %v388_v17  ;;  %v50_v57 = vld [vmem:[%s6238_s1 + $0x18] sm:$0xff] }
  0x75   :  { %v394_v13 = vmul.f32 %v3625_v51, %v391_v60  ;;  %v640_v9 = vadd.f32 %v637_v3, %v631_v21  ;;  %vm211_vm5 = vcmp.lt.f32.partialorder %v4513_v54, 1.4  ;;  %v4586_v6 = vadd.f32 -0.6, %v4513_v54 }
  0x76   :  { %v409_v10 = vsub.f32 1.4, %v4513_v54  ;;  %v535_v23 = vadd.f32 %v532_v11, %v526_v55  ;;  %v646_v24 = vmul.f32 %v643_v19, %v520_v53  ;;  %v541_v25 = vmul.f32 %v538_v63, %v376_v59  ;;  %vm214_vm6 = vmand %vm208_vm4, %vm211_vm5  ;;  %v49_v59 = vld [vmem:[%s6238_s1 + $0x10] sm:$0xff] }
  0x77   :  { %v397_v15 = vadd.f32 %v394_v13, %v385_v12  ;;  %747 = vrot.lane.b32.xlu1 %v640_v9, %s4195_s30  ;;  %v3628_v22 = vsel %vm214_vm6, 1.0, %v4193_v2  ;;  %v403_v28 = vmul.f32 2.5, %v4586_v6  ;;  %v553_v18 = vmul.f32 1.25, %v4576_v1 }
  0x78   :  { %v412_v29 = vmul.f32 2.5, %v409_v10  ;;  %v652_v35 = vmul.f32 %v649_v5, %v535_v23  ;;  %v664_v37 = vmul.f32 0.8333333, %v388_v17  ;;  %v559_v38 = vmul.f32 1.25, %v409_v10 }
  0x79   :  { %v547_v4 = vmul.f32 %v544_v14, %v397_v15  ;;  %v661_v42 = vmul.f32 %v658_v8, %v535_v23  ;;  %v406_v27 = vmul.f32 %v3625_v51, %v403_v28  ;;  %vm223_vm7 = vcmp.ge.f32.partialorder %v4513_v54, 1.4 }
  0x7a   :  { %v415_v33 = vmul.f32 %v3628_v22, %v412_v29  ;;  %v655_v43 = vadd.f32 %v652_v35, %v646_v24  ;;  %vm226_vm8 = vcmp.lt.f32.partialorder %v4513_v54, 1.8  ;;  %v4596_v46 = vadd.f32 -1.0, %v4513_v54  ;;  %v53_v29 = vld [vmem:[%s6238_s1 + $0x30] sm:$0xff] }
  0x7b   :  { %v550_v44 = vadd.f32 %v547_v4, %v541_v25  ;;  %v556_v49 = vmul.f32 %v553_v18, %v397_v15  ;;  %v673_v36 = vmul.f32 0.8333333, %v4566_v34  ;;  %vm229_vm9 = vmand %vm223_vm7, %vm226_vm8  ;;  %v430_v16 = vsub.f32 1.8, %v4513_v54  ;;  %v47_v34 = vld [vmem:[%s6238_s1] sm:$0xff]  ;;  %v54_v18 = vld [vmem:[%s6238_s1 + $0x38] sm:$0xff] }
  0x7c   :  { %v418_v47 = vadd.f32 %v415_v33, %v406_v27  ;;  %759 = vrot.lane.b32.xlu0 %v655_v43, %s4197_s15  ;;  %v4602_v50 = vsel %vm229_vm9, 1.0, %v4193_v2  ;;  %v424_v20 = vmul.f32 2.5, %v4596_v46  ;;  %v679_v0 = vmul.f32 0.8333333, %v409_v10  ;;  %v51_v10 = vld [vmem:[%s6238_s1 + $0x20] sm:$0xff] }
  0x7d   :  { %v667_v45 = vmul.f32 %v664_v37, %v550_v44  ;;  %v433_v30 = vmul.f32 2.5, %v430_v16  ;;  %v568_v31 = vmul.f32 1.25, %v4586_v6  ;;  %v676_v21 = vmul.f32 %v673_v36, %v550_v44 }
  0x7e   :  { %v562_v19 = vmul.f32 %v559_v38, %v418_v47  ;;  %v427_v17 = vmul.f32 %v3628_v22, %v424_v20  ;;  %v574_v51 = vmul.f32 1.25, %v430_v16  ;;  %v3884_v60 = vpack.c.bf16 %v48_v39, %v47_v34  ;;  %v4640_v22 = vld [vmem:[%s6237_s0] sm:$0xff] }
  0x7f   :  { %v670_v7 = vadd.f32 %v667_v45, %v661_v42  ;;  %v436_v55 = vmul.f32 %v4602_v50, %v433_v30  ;;  %v571_v5 = vmul.f32 %v568_v31, %v418_v47  ;;  %v688_v8 = vmul.f32 0.8333333, %v4576_v1  ;;  %v52_v1 = vld [vmem:[%s6238_s1 + $0x28] sm:$0xff]  ;;  %v55_v47 = vld [vmem:[%s6238_s1 + $0x40] sm:$0xff] }
  0x80   :  { %v565_v53 = vadd.f32 %v562_v19, %v556_v49  ;;  %v4201_v11 = vmov 0.0|0.0   ;;  %v3887_v12 = vpack.c.bf16 %v50_v57, %v49_v59  ;;  %v694_v9 = vmul.f32 0.8333333, %v430_v16  ;;  %v56_v49 = vld [vmem:[%s6238_s1 + $0x48] sm:$0xff] }
  0x81   :  { %771 = vrot.lane.b32.xlu1 %v670_v7, %s4198_s16  ;;  %v4620_v3 = vadd.f32 %v436_v55, %v427_v17  ;;  %3883 = vmatprep.subr.bf16.mxu0 %v4201_v11  ;;  %v3664_v15 = vadd.f32 -1.4, %v4513_v54  ;;  %v3890_v25 = vpack.c.bf16 %v52_v1, %v51_v10  ;;  %vm236_vm10 = vcmp.ge.f32.partialorder %v4640_v22, 1.8 }
  0x82   :  { %v682_v63 = vmul.f32 %v679_v0, %v565_v53  ;;  %3885 = vmatpush1.bf16.msra.mxu0 %v3884_v60  ;;  %3910 = vmatprep.subr.bf16.mxu1 %v4201_v11  ;;  %v691_v24 = vmul.f32 %v688_v8, %v565_v53  ;;  %vm239_vm11 = vcmp.lt.f32.partialorder %v4640_v22, 2.2  ;;  %v3662_v35 = vadd.f32 -1.4, %v4640_v22  ;;  %v57_v0 = vld [vmem:[%s6238_s1 + $0x50] sm:$0xff] }
  0x83   :  { %v577_v14 = vmul.f32 %v574_v51, %v4620_v3  ;;  %3886 = vmatprep.subr.bf16.mxu0 %v4201_v11  ;;  %vm242_vm12 = vmand %vm236_vm10, %vm239_vm11  ;;  %v449_v4 = vsub.f32 2.2, %v4640_v22  ;;  %v581_v33 = vmul.f32 1.25, %v4491_v52  ;;  %v445_v43 = vmul.f32 2.5, %v3664_v15  ;;  %v4668_v52 = vld [vmem:[%s6237_s0 + $0x8] sm:$0xff] }
  0x84   :  { %v685_v13 = vadd.f32 %v682_v63, %v676_v21  ;;  %v3632_v37 = vsel %vm242_vm12, 1.0, %v4193_v2  ;;  %v443_v42 = vmul.f32 2.5, %v3662_v35  ;;  %v3893_v44 = vpack.c.bf16 %v54_v18, %v53_v29  ;;  %v61_v35 = vld [vmem:[%s6238_s1 + $0x70] sm:$0xff] }
  0x85   :  { %v4634_v23 = vadd.f32 %v577_v14, %v571_v5  ;;  %v452_v27 = vmul.f32 2.5, %v449_v4  ;;  %v587_v45 = vmul.f32 1.25, %v449_v4  ;;  %vm237_vm13 = vcmp.ge.f32.partialorder %v4668_v52, 1.8  ;;  %v60_v14 = vld [vmem:[%s6238_s1 + $0x68] sm:$0xff] }
  0x86   :  { %783 = vrot.lane.b32.xlu0 %v685_v13, %s4199_s19  ;;  %3888 = vmatpush1.bf16.msra.mxu0 %v3887_v12  ;;  %v446_v36 = vmul.f32 %v4498_v48, %v443_v42  ;;  %vm240_vm14 = vcmp.lt.f32.partialorder %v4668_v52, 2.2  ;;  %v3663_v20 = vadd.f32 -1.4, %v4668_v52  ;;  %v450_v19 = vsub.f32 2.2, %v4668_v52 }
  0x87   :  { %v697_v28 = vmul.f32 %v694_v9, %v4634_v23  ;;  %3889 = vmatprep.subr.bf16.mxu0 %v4201_v11  ;;  %v455_v16 = vmul.f32 %v3632_v37, %v452_v27  ;;  %v58_v48 = vld [vmem:[%s6238_s1 + $0x58] sm:$0xff]  ;;  %v584_v31 = vmul.f32 %v581_v33, %v4515_v40  ;;  %v701_v34 = vmul.f32 0.8333333, %v4470_v41  ;;  %vm243_vm15 = vmand %vm237_vm13, %vm240_vm14  ;;  %v64_v33 = vld [vmem:[%s6238_s1 + $0x88] sm:$0xff] }
  0x88   :  { %v582_v39 = vmul.f32 1.25, %v4494_v58  ;;  %v3896_v7 = vpack.c.bf16 %v56_v49, %v55_v47  ;;  %v3633_v17 = vsel %vm243_vm15, 1.0, %v4193_v2  ;;  %v444_v53 = vmul.f32 2.5, %v3663_v20 }
  0x89   :  { %v700_v38 = vadd.f32 %v697_v28, %v691_v24  ;;  %v458_v30 = vadd.f32 %v455_v16, %v446_v36  ;;  %v453_v21 = vmul.f32 2.5, %v450_v19  ;;  %v707_v51 = vmul.f32 0.8333333, %v449_v4 }
  0x8a   :  { %3891 = vmatpush1.bf16.msra.mxu0 %v3890_v25  ;;  %v585_v59 = vmul.f32 %v582_v39, %v4517_v62  ;;  %vm238_vm0 = vcmp.ge.f32.partialorder %v4513_v54, 1.8  ;;  %v3899_v40 = vpack.c.bf16 %v58_v48, %v57_v0  ;;  %v447_v41 = vmul.f32 %v4502_v32, %v444_v53 }
  0x8b   :  { %795 = vrot.lane.b32.xlu1 %v700_v38, %s4200_s20  ;;  %3892 = vmatprep.subr.bf16.mxu0 %v4201_v11  ;;  %v590_v55 = vmul.f32 %v587_v45, %v458_v30  ;;  %v456_v57 = vmul.f32 %v3633_v17, %v453_v21  ;;  %v588_v60 = vmul.f32 1.25, %v450_v19  ;;  %v704_v63 = vmul.f32 %v701_v34, %v4526_v61  ;;  %v59_v61 = vld [vmem:[%s6238_s1 + $0x60] sm:$0xff] }
  0x8c   :  { %vm241_vm1 = vcmp.lt.f32.partialorder %v4513_v54, 2.2  ;;  %v451_v5 = vsub.f32 2.2, %v4513_v54  ;;  %v702_v12 = vmul.f32 0.8333333, %v4473_v56  ;;  %v448_v32 = vmul.f32 %v4602_v50, %v445_v43 }
  0x8d   :  { %v593_v58 = vadd.f32 %v590_v55, %v584_v31  ;;  %v459_v8 = vadd.f32 %v456_v57, %v447_v41  ;;  %vm244_vm2 = vmand %vm238_vm0, %vm241_vm1  ;;  %v583_v62 = vmul.f32 1.25, %v4596_v46  ;;  %v703_v13 = vmul.f32 0.8333333, %v4586_v6 }
  0x8e   :  { %3894 = vmatpush1.bf16.msra.mxu0 %v3893_v44  ;;  %v3634_v56 = vsel %vm244_vm2, 1.0, %v4193_v2  ;;  %v454_v10 = vmul.f32 2.5, %v451_v5  ;;  %v708_v46 = vmul.f32 0.8333333, %v450_v19  ;;  %vm800_vm3 = vcmask 130048  }
  0x8f   :  { %3895 = vmatprep.subr.bf16.mxu0 %v4201_v11  ;;  %v710_v9 = vmul.f32 %v707_v51, %v593_v58  ;;  %v591_v1 = vmul.f32 %v588_v60, %v459_v8  ;;  %v586_v6 = vmul.f32 %v583_v62, %v4620_v3  ;;  %v589_v15 = vmul.f32 1.25, %v451_v5  ;;  %v62_v3 = vld [vmem:[%s6238_s1 + $0x78] sm:$0xff] }
  0x90   :  { %v457_v24 = vmul.f32 %v3634_v56, %v454_v10  ;;  %v3902_v25 = vpack.c.bf16 %v60_v14, %v59_v61  ;;  %v705_v29 = vmul.f32 %v702_v12, %v4531_v26  ;;  %v706_v18 = vmul.f32 %v703_v13, %v4634_v23  ;;  %v63_v23 = vld [vmem:[%s6238_s1 + $0x80] sm:$0xff] }
  0x91   :  { %v713_v50 = vadd.f32 %v710_v9, %v704_v63  ;;  %v594_v28 = vadd.f32 %v591_v1, %v585_v59  ;;  %v709_v42 = vmul.f32 0.8333333, %v451_v5  ;;  %v3905_v26 = vpack.c.bf16 %v62_v3, %v61_v35 }
  0x92   :  { %3897 = vmatpush1.bf16.msra.mxu0 %v3896_v7  ;;  %v460_v4 = vadd.f32 %v457_v24, %v448_v32  ;;  %v3908_v47 = vpack.c.bf16 %v64_v33, %v63_v23  ;;  %v3599_v36 = vmul.f32 -1.442695, %v4640_v22  ;;  %v3600_v16 = vmul.f32 -1.442695, %v4668_v52 }
  0x93   :  { %3898 = vmatprep.subr.bf16.mxu0 %v4201_v11  ;;  %3665 = vmatprep.mubr.msk.f32.mxu0 %vm800_vm3, %v713_v50  ;;  %v711_v37 = vmul.f32 %v708_v46, %v594_v28  ;;  %vm804_vm4 = vcmask 261120   ;;  %vm6255_vm5 = vcmask 392192   ;;  %vm6254_vm6 = vcmask 523264  }
  0x94   :  { %v592_v38 = vmul.f32 %v589_v15, %v460_v4  ;;  %4140 = vpow2.f32 %v3599_v36  ;;  %v4002_v48 = vpop.permute.xlu0 %4001  ;;  %vm6253_vm7 = vcmask 654336   ;;  %vm6252_vm8 = vcmask 785408  }
  0x95   :  { %v4714_v27 = vadd.f32 %v711_v37, %v705_v29  ;;  %4142 = vpow2.f32 %v3600_v16  ;;  %v4003_v39 = vunpack.i.l.bf16 %v4002_v48  ;;  %v4004_v55 = vunpack.i.h.bf16 %v4002_v48 }
  0x96   :  { %3900 = vmatpush1.bf16.msra.mxu0 %v3899_v40  ;;  %v595_v43 = vadd.f32 %v592_v38, %v586_v6  ;;  %v3601_v40 = vmul.f32 -1.442695, %v4513_v54  ;;  %vm6251_vm9 = vcmask 916480  }
  0x97   :  { %3901 = vmatprep.subr.bf16.mxu0 %v4201_v11 }
  0x98   :  { %v712_v44 = vmul.f32 %v709_v42, %v595_v43 }
  0x9a   :  { %3903 = vmatpush1.bf16.msra.mxu0 %v3902_v25  ;;  %v4724_v49 = vadd.f32 %v712_v44, %v706_v18 }
  0x9b   :  { %3904 = vmatprep.subr.bf16.mxu0 %v4201_v11 }
  0x9e   :  { %3906 = vmatpush1.bf16.msra.mxu0 %v3905_v26  ;;  %v4141_v45 = vpop.eup %4140 }
  0x9f   :  { %3907 = vmatprep.subr.bf16.mxu0 %v4201_v11  ;;  %v74_v20 = vadd.f32 1.0, %v4141_v45  ;;  %v4143_v19 = vpop.eup %4142  ;;  %v4761_v45 = vld [vmem:[%s6239_s2] ss:$0 sm:$0xff] }
  0xa0   :  { %v75_v0 = vadd.f32 1.0, %v4143_v19  ;;  %v4766_v19 = vld [vmem:[%s6240_s3] ss:$0 sm:$0xff] }
  0xa1   :  { %4144 = vrcp.f32 %v74_v20 }
  0xa2   :  { %3909 = vmatpush1.bf16.msra.mxu0 %v3908_v47  ;;  %4146 = vrcp.f32 %v75_v0 }
  0xa3   :  { %3937 = vmatprep.subr.bf16.mxu0 %v4201_v11  ;;  %4148 = vpow2.f32 %v3601_v40 }
  0xa7   :  { %v4012_v31 = vpop.permute.xlu1 %4011  ;;  %v4007_v34 = vpop.permute.xlu0 %4006 }
  0xa8   :  { %v4008_v53 = vunpack.i.l.bf16 %v4007_v34  ;;  %v4009_v41 = vunpack.i.h.bf16 %v4007_v34  ;;  %v4013_v60 = vunpack.i.l.bf16 %v4012_v31  ;;  %v4014_v8 = vunpack.i.h.bf16 %v4012_v31 }
  0xab   :  { %v4145_v30 = vpop.eup %4144 }
  0xac   :  { %v83_v7 = vmul.f32 %v4640_v22, %v4145_v30  ;;  %v4147_v17 = vpop.eup %4146 }
  0xad   :  { %v84_v21 = vmul.f32 %v4668_v52, %v4147_v17  ;;  %v4149_v24 = vpop.eup %4148 }
  0xae   :  { %v801_v51 = vsel %vm800_vm3, %v83_v7, %v4003_v39  ;;  %v76_v29 = vadd.f32 1.0, %v4149_v24 }
  0xaf   :  { %v805_v57 = vsel %vm804_vm4, %v801_v51, %v4008_v53  ;;  %v802_v22 = vsel %vm800_vm3, %v84_v21, %v4004_v55 }
  0xb0   :  { %v809_v5 = vsel %vm6255_vm5, %v805_v57, %v4013_v60  ;;  %v806_v52 = vsel %vm804_vm4, %v802_v22, %v4009_v41  ;;  %4150 = vrcp.f32 %v76_v29 }
  0xb1   :  { %v810_v61 = vsel %vm6255_vm5, %v806_v52, %v4014_v8 }
  0xb4   :  { %v4017_v59 = vpop.permute.xlu1 %4016 }
  0xb5   :  { %v4018_v58 = vunpack.i.l.bf16 %v4017_v59  ;;  %v4019_v13 = vunpack.i.h.bf16 %v4017_v59 }
  0xb7   :  { %v813_v32 = vsel %vm6254_vm6, %v809_v5, %v4018_v58  ;;  %v814_v10 = vsel %vm6254_vm6, %v810_v61, %v4019_v13 }
  0xba   :  { %v4151_v3 = vpop.eup %4150 }
  0xbb   :  { %v85_v4 = vmul.f32 %v4151_v3, %v4513_v54 }
  0xbd   :  { %v4022_v63 = vpop.permute.xlu0 %4021 }
  0xbe   :  { %v4023_v12 = vunpack.i.l.bf16 %v4022_v63  ;;  %v4024_v9 = vunpack.i.h.bf16 %v4022_v63 }
  0xc0   :  { %v817_v56 = vsel %vm6253_vm7, %v813_v32, %v4023_v12  ;;  %v818_v28 = vsel %vm6253_vm7, %v814_v10, %v4024_v9 }
  0xc8   :  { %v4027_v62 = vpop.permute.xlu1 %4026 }
  0xc9   :  { %v4028_v14 = vunpack.i.l.bf16 %v4027_v62  ;;  %v4029_v6 = vunpack.i.h.bf16 %v4027_v62 }
  0xcb   :  { %v821_v50 = vsel %vm6252_vm8, %v817_v56, %v4028_v14  ;;  %v822_v18 = vsel %vm6252_vm8, %v818_v28, %v4029_v6 }
  0xd2   :  { %v4032_v1 = vpop.permute.xlu0 %4031 }
  0xd3   :  { %v4033_v46 = vunpack.i.l.bf16 %v4032_v1  ;;  %v4034_v15 = vunpack.i.h.bf16 %v4032_v1 }
  0xd5   :  { %v825_v25 = vsel %vm6251_vm9, %v821_v50, %v4033_v46  ;;  %v826_v35 = vsel %vm6251_vm9, %v822_v18, %v4034_v15 }
  0xd6   :  { %902 = vmatmul.mubr.f32.vlgmr.msra.gmra.mrb[0].mxu0 %v825_v25 }
  0xd7   :  { %3666 = vmatprep.mubr.msk.f32.mxu0 %vm800_vm3, %v4714_v27 }
  0xda   :  { %907 = vmatmul.mubr.f32.gmra.mrb[2].mxu0 %v826_v35 }
  0xdb   :  { %3667 = vmatprep.mubr.msk.f32.mxu0 %vm800_vm3, %v4724_v49 }
  0xdf   :  { %v724_v37 = vpop.permute.xlu1 %723 }
  0xe0   :  { %v803_v38 = vsel %vm800_vm3, %v85_v4, %v724_v37 }
  0xe4   :  { %v736_v42 = vpop.permute.xlu0 %735 }
  0xe5   :  { %v807_v26 = vsel %vm804_vm4, %v803_v38, %v736_v42 }
  0xe9   :  { %v748_v27 = vpop.permute.xlu1 %747 }
  0xea   :  { %v811_v23 = vsel %vm6255_vm5, %v807_v26, %v748_v27 }
  0xee   :  { %v760_v33 = vpop.permute.xlu0 %759 }
  0xef   :  { %v815_v43 = vsel %vm6254_vm6, %v811_v23, %v760_v33 }
  0xf3   :  { %v772_v44 = vpop.permute.xlu1 %771 }
  0xf4   :  { %v819_v47 = vsel %vm6253_vm7, %v815_v43, %v772_v44 }
  0xf8   :  { %v784_v49 = vpop.permute.xlu0 %783 }
  0xf9   :  { %v823_v36 = vsel %vm6252_vm8, %v819_v47, %v784_v49 }
  0xfd   :  { %v796_v16 = vpop.permute.xlu1 %795 }
  0xfe   :  { %v827_v54 = vsel %vm6251_vm9, %v823_v36, %v796_v16 }
  0xff   :  { %912 = vmatmul.mubr.f32.gmra.mrb[4].mxu0 %v827_v54 }
 0x1a9   :  { %v903_v20 = vpop.f32.mrb[0].mxu0 }
 0x1aa   :  { %v924_v0 = vmul.f32 %v4761_v45, %v903_v20  ;;  %v905_v48 = vpop.f32.mrb[1].mxu0 }
 0x1ac   :  { %v4770_v30 = vadd.f32 %v4766_v19, %v924_v0 }
 0x1ad   :  { %v908_v31 = vpop.f32.mrb[2].mxu0 }
 0x1ae   :  { %v925_v34 = vmul.f32 %v4761_v45, %v908_v31  ;;  %v910_v39 = vpop.f32.mrb[3].mxu0  ;;  %vm1081_vm10 = vcmp.ge.f32.partialorder %v4770_v30, 0.6  ;;  %vm1084_vm11 = vcmp.lt.f32.partialorder %v4770_v30, 1.0  ;;  %vm1096_vm12 = vcmp.ge.f32.partialorder %v4770_v30, 1.0 }
 0x1af   :  { %vm1087_vm13 = vmand %vm1081_vm10, %vm1084_vm11  ;;  %vm1099_vm14 = vcmp.lt.f32.partialorder %v4770_v30, 1.4  ;;  %vm1111_vm15 = vcmp.ge.f32.partialorder %v4770_v30, 1.4  ;;  %vm1114_vm0 = vcmp.lt.f32.partialorder %v4770_v30, 1.8 }
 0x1b0   :  { %v4780_v7 = vadd.f32 %v4766_v19, %v925_v34  ;;  %vm1102_vm1 = vmand %vm1096_vm12, %vm1099_vm14  ;;  %vm1126_vm2 = vcmp.ge.f32.partialorder %v4770_v30, 1.8  ;;  %vm1129_vm9 = vcmp.lt.f32.partialorder %v4770_v30, 2.2  ;;  %v3694_v17 = vsel %vm1087_vm13, 1.0, %v4193_v2 }
 0x1b1   :  { %vm1117_vm8 = vmand %vm1111_vm15, %vm1114_vm0  ;;  %v4786_v53 = vsub.f32 1.0, %v4770_v30  ;;  %v3727_v21 = vadd.f32 -0.6, %v4770_v30  ;;  %v4790_v55 = vsub.f32 1.4, %v4770_v30  ;;  %v3697_v51 = vsel %vm1102_vm1, 1.0, %v4193_v2 }
 0x1b2   :  { %vm1132_vm10 = vmand %vm1126_vm2, %vm1129_vm9  ;;  %v3730_v59 = vadd.f32 -1.0, %v4770_v30  ;;  %v1318_v40 = vsub.f32 1.8, %v4770_v30  ;;  %v3733_v41 = vadd.f32 -1.4, %v4770_v30  ;;  %v3700_v57 = vsel %vm1117_vm8, 1.0, %v4193_v2 }
 0x1b3   :  { %v1279_v60 = vmul.f32 2.5, %v4786_v53  ;;  %v1291_v58 = vmul.f32 2.5, %v3727_v21  ;;  %v1300_v63 = vmul.f32 2.5, %v4790_v55  ;;  %v1339_v8 = vsub.f32 2.2, %v4770_v30 }
 0x1b4   :  { %v1312_v22 = vmul.f32 2.5, %v3730_v59  ;;  %v1321_v5 = vmul.f32 2.5, %v1318_v40  ;;  %v1333_v52 = vmul.f32 2.5, %v3733_v41  ;;  %v3703_v12 = vsel %vm1132_vm10, 1.0, %v4193_v2 }
 0x1b5   :  { %v4801_v62 = vmul.f32 %v3694_v17, %v1279_v60  ;;  %v1294_v13 = vmul.f32 %v3694_v17, %v1291_v58  ;;  %v1303_v32 = vmul.f32 %v3697_v51, %v1300_v63  ;;  %v1342_v56 = vmul.f32 2.5, %v1339_v8 }
 0x1b6   :  { %v1315_v61 = vmul.f32 %v3697_v51, %v1312_v22  ;;  %v1324_v14 = vmul.f32 %v3700_v57, %v1321_v5  ;;  %v1336_v9 = vmul.f32 %v3700_v57, %v1333_v52  ;;  %v1447_v1 = vmul.f32 1.25, %v4790_v55 }
 0x1b7   :  { %v1306_v10 = vadd.f32 %v1303_v32, %v1294_v13  ;;  %v1456_v46 = vmul.f32 1.25, %v3727_v21  ;;  %v1462_v6 = vmul.f32 1.25, %v1318_v40  ;;  %v1345_v24 = vmul.f32 %v3703_v12, %v1342_v56 }
 0x1b8   :  { %v1327_v50 = vadd.f32 %v1324_v14, %v1315_v61  ;;  %v1471_v15 = vmul.f32 1.25, %v3730_v59  ;;  %v1477_v25 = vmul.f32 1.25, %v1339_v8  ;;  %v1582_v29 = vmul.f32 0.8333333, %v1318_v40 }
 0x1b9   :  { %v1459_v28 = vmul.f32 %v1456_v46, %v1306_v10  ;;  %v1591_v18 = vmul.f32 0.8333333, %v3727_v21  ;;  %v1597_v35 = vmul.f32 0.8333333, %v1339_v8  ;;  %v1348_v3 = vadd.f32 %v1345_v24, %v1336_v9 }
 0x1ba   :  { %v1465_v4 = vmul.f32 %v1462_v6, %v1327_v50  ;;  %v1474_v37 = vmul.f32 %v1471_v15, %v1327_v50  ;;  %vm991_vm8 = vcmp.ge.f32.partialorder %v4770_v30, -1.8  ;;  %v4805_v38 = vmul.f32 %v1447_v1, %v1306_v10 }
 0x1bb   :  { %vm992_vm9 = vcmp.ge.f32.partialorder %v4780_v7, -1.8  ;;  %vm994_vm11 = vcmp.lt.f32.partialorder %v4770_v30, -1.4  ;;  %vm995_vm12 = vcmp.lt.f32.partialorder %v4780_v7, -1.4  ;;  %v1480_v26 = vmul.f32 %v1477_v25, %v1348_v3 }
 0x1bc   :  { %v1468_v42 = vadd.f32 %v1465_v4, %v1459_v28  ;;  %vm997_vm13 = vmand %vm991_vm8, %vm994_vm11  ;;  %vm1006_vm14 = vcmp.ge.f32.partialorder %v4770_v30, -1.4  ;;  %vm1007_vm15 = vcmp.ge.f32.partialorder %v4780_v7, -1.4  ;;  %vm1009_vm1 = vcmp.lt.f32.partialorder %v4770_v30, -1.0 }
 0x1bd   :  { %vm998_vm0 = vmand %vm992_vm9, %vm995_vm12  ;;  %v4813_v27 = vsel %vm997_vm13, 1.0, %v4193_v2  ;;  %vm1010_vm2 = vcmp.lt.f32.partialorder %v4780_v7, -1.0  ;;  %vm1021_vm10 = vcmp.ge.f32.partialorder %v4770_v30, -1.0  ;;  %v1483_v23 = vadd.f32 %v1480_v26, %v1474_v37 }
 0x1be   :  { %v4818_v33 = vmul.f32 %v1582_v29, %v1468_v42  ;;  %v1594_v43 = vmul.f32 %v1591_v18, %v1468_v42  ;;  %v4821_v44 = vsel %vm998_vm0, 1.0, %v4193_v2  ;;  %vm1012_vm8 = vmand %vm1006_vm14, %vm1009_vm1  ;;  %vm1022_vm9 = vcmp.ge.f32.partialorder %v4780_v7, -1.0 }
 0x1bf   :  { %vm1013_vm11 = vmand %vm1007_vm15, %vm1010_vm2  ;;  %v3679_v47 = vsel %vm1012_vm8, 1.0, %v4193_v2  ;;  %vm1024_vm12 = vcmp.lt.f32.partialorder %v4770_v30, -0.6  ;;  %vm1025_vm13 = vcmp.lt.f32.partialorder %v4780_v7, -0.6  ;;  %v1600_v49 = vmul.f32 %v1597_v35, %v1483_v23 }
 0x1c0   :  { %v3680_v36 = vsel %vm1013_vm11, 1.0, %v4193_v2  ;;  %vm1027_vm7 = vmand %vm1021_vm10, %vm1024_vm12  ;;  %vm1036_vm6 = vcmp.ge.f32.partialorder %v4770_v30, -0.6  ;;  %vm1037_vm5 = vcmp.ge.f32.partialorder %v4780_v7, -0.6  ;;  %v1171_v54 = vsub.f32 -1.0, %v4770_v30 }
 0x1c1   :  { %vm1028_vm0 = vmand %vm1022_vm9, %vm1025_vm13  ;;  %v3682_v16 = vsel %vm1027_vm7, 1.0, %v4193_v2  ;;  %vm1039_vm14 = vcmp.lt.f32.partialorder %v4770_v30, -0.2  ;;  %vm1040_vm15 = vcmp.lt.f32.partialorder %v4780_v7, -0.2  ;;  %v1603_v20 = vadd.f32 %v1600_v49, %v1594_v43 }
 0x1c2   :  { %v3683_v0 = vsel %vm1028_vm0, 1.0, %v4193_v2  ;;  %vm1042_vm1 = vmand %vm1036_vm6, %vm1039_vm14  ;;  %v3709_v48 = vadd.f32 1.8, %v4770_v30  ;;  %v3710_v31 = vadd.f32 1.8, %v4780_v7  ;;  %v1172_v39 = vsub.f32 -1.0, %v4780_v7 }
 0x1c3   :  { %vm1043_vm2 = vmand %vm1037_vm5, %vm1040_vm15  ;;  %v4838_v34 = vsel %vm1042_vm1, 1.0, %v4193_v2  ;;  %v1174_v17 = vmul.f32 2.5, %v1171_v54  ;;  %v4844_v21 = vadd.f32 1.4, %v4770_v30  ;;  %3736 = vmatprep.mubr.msk.f32.mxu1 %vm800_vm3, %v1603_v20  ;;  %v4851_v41 = vadd.f32 1.4, %v4780_v7 }
 0x1c4   :  { %v4848_v51 = vsel %vm1043_vm2, 1.0, %v4193_v2  ;;  %v1165_v59 = vmul.f32 2.5, %v3709_v48  ;;  %v1166_v40 = vmul.f32 2.5, %v3710_v31  ;;  %v1175_v57 = vmul.f32 2.5, %v1172_v39 }
 0x1c5   :  { %v1177_v60 = vmul.f32 %v3679_v47, %v1174_v17  ;;  %v1186_v58 = vmul.f32 2.5, %v4844_v21  ;;  %v4857_v63 = vsub.f32 -0.6, %v4770_v30  ;;  %v1187_v52 = vmul.f32 2.5, %v4851_v41 }
 0x1c6   :  { %v1168_v22 = vmul.f32 %v4813_v27, %v1165_v59  ;;  %v1169_v5 = vmul.f32 %v4821_v44, %v1166_v40  ;;  %v4863_v8 = vsub.f32 -0.6, %v4780_v7  ;;  %v1178_v12 = vmul.f32 %v3680_v36, %v1175_v57 }
 0x1c7   :  { %v1189_v13 = vmul.f32 %v3679_v47, %v1186_v58  ;;  %v1195_v32 = vmul.f32 2.5, %v4857_v63  ;;  %v4867_v61 = vadd.f32 1.0, %v4770_v30  ;;  %v1190_v9 = vmul.f32 %v3680_v36, %v1187_v52 }
 0x1c8   :  { %v4869_v14 = vadd.f32 %v1177_v60, %v1168_v22  ;;  %v1196_v56 = vmul.f32 2.5, %v4863_v8  ;;  %v4873_v10 = vadd.f32 1.0, %v4780_v7  ;;  %v4875_v1 = vadd.f32 %v1178_v12, %v1169_v5 }
 0x1c9   :  { %v1198_v46 = vmul.f32 %v3682_v16, %v1195_v32  ;;  %v1207_v6 = vmul.f32 2.5, %v4867_v61  ;;  %v1213_v50 = vsub.f32 -0.2, %v4770_v30  ;;  %v1214_v25 = vsub.f32 -0.2, %v4780_v7 }
 0x1ca   :  { %v1199_v24 = vmul.f32 %v3683_v0, %v1196_v56  ;;  %v1208_v15 = vmul.f32 2.5, %v4873_v10  ;;  %v1366_v28 = vmul.f32 1.25, %v3709_v48  ;;  %v1367_v3 = vmul.f32 1.25, %v3710_v31 }
 0x1cb   :  { %v1201_v29 = vadd.f32 %v1198_v46, %v1189_v13  ;;  %v1210_v18 = vmul.f32 %v3682_v16, %v1207_v6  ;;  %v1216_v35 = vmul.f32 2.5, %v1213_v50  ;;  %v1217_v42 = vmul.f32 2.5, %v1214_v25 }
 0x1cc   :  { %v1202_v4 = vadd.f32 %v1199_v24, %v1190_v9  ;;  %v1211_v37 = vmul.f32 %v3683_v0, %v1208_v15  ;;  %v1369_v26 = vmul.f32 %v1366_v28, %v4869_v14  ;;  %v1370_v43 = vmul.f32 %v1367_v3, %v4875_v1 }
 0x1cd   :  { %v1219_v23 = vmul.f32 %v4838_v34, %v1216_v35  ;;  %v1372_v47 = vmul.f32 1.25, %v4857_v63  ;;  %v1373_v49 = vmul.f32 1.25, %v4863_v8  ;;  %v1220_v36 = vmul.f32 %v4848_v51, %v1217_v42 }
 0x1ce   :  { %v1381_v20 = vmul.f32 1.25, %v4844_v21  ;;  %v1382_v16 = vmul.f32 1.25, %v4851_v41  ;;  %v1387_v17 = vmul.f32 1.25, %v1213_v50  ;;  %v1388_v57 = vmul.f32 1.25, %v1214_v25 }
 0x1cf   :  { %v4889_v59 = vadd.f32 %v1219_v23, %v1210_v18  ;;  %v1375_v0 = vmul.f32 %v1372_v47, %v1201_v29  ;;  %v1376_v40 = vmul.f32 %v1373_v49, %v1202_v4  ;;  %v4891_v60 = vadd.f32 %v1220_v36, %v1211_v37 }
 0x1d0   :  { %v1384_v58 = vmul.f32 %v1381_v20, %v1201_v29  ;;  %v1385_v22 = vmul.f32 %v1382_v16, %v1202_v4  ;;  %v1501_v5 = vmul.f32 0.8333333, %v3709_v48  ;;  %v1502_v32 = vmul.f32 0.8333333, %v3710_v31 }
 0x1d1   :  { %v1378_v52 = vadd.f32 %v1375_v0, %v1369_v26  ;;  %v1379_v12 = vadd.f32 %v1376_v40, %v1370_v43  ;;  %v1390_v13 = vmul.f32 %v1387_v17, %v4889_v59  ;;  %v1391_v9 = vmul.f32 %v1388_v57, %v4891_v60 }
 0x1d2   :  { %v1507_v56 = vmul.f32 0.8333333, %v1213_v50  ;;  %v1508_v46 = vmul.f32 0.8333333, %v1214_v25  ;;  %vm976_vm5 = vcmp.ge.f32.partialorder %v4770_v30, -2.2 }
 0x1d3   :  { %v913_v6 = vpop.f32.mrb[4].mxu0  ;;  %v4896_v24 = vadd.f32 %v1390_v13, %v1384_v58  ;;  %v1504_v15 = vmul.f32 %v1501_v5, %v1378_v52  ;;  %v1505_v28 = vmul.f32 %v1502_v32, %v1379_v12  ;;  %vm977_vm6 = vcmp.ge.f32.partialorder %v4780_v7, -2.2 }
 0x1d4   :  { %v926_v48 = vmul.f32 %v4761_v45, %v913_v6  ;;  %v4900_v29 = vadd.f32 %v1391_v9, %v1385_v22  ;;  %vm979_vm7 = vcmp.lt.f32.partialorder %v4770_v30, -1.8  ;;  %vm980_vm10 = vcmp.lt.f32.partialorder %v4780_v7, -1.8  ;;  %v915_v31 = vpop.f32.mrb[5].mxu0 }
 0x1d5   :  { %v1510_v50 = vmul.f32 %v1507_v56, %v4896_v24  ;;  %vm982_vm8 = vmand %vm976_vm5, %vm979_vm7  ;;  %v3706_v25 = vadd.f32 2.2, %v4770_v30  ;;  %v3707_v18 = vadd.f32 2.2, %v4780_v7  ;;  %v1150_v35 = vsub.f32 -1.4, %v4770_v30 }
 0x1d6   :  { %v4909_v3 = vadd.f32 %v4766_v19, %v926_v48  ;;  %v1511_v45 = vmul.f32 %v1508_v46, %v4900_v29  ;;  %vm983_vm11 = vmand %vm977_vm6, %vm980_vm10  ;;  %v3673_v4 = vsel %vm982_vm8, 1.0, %v4193_v2  ;;  %v1151_v37 = vsub.f32 -1.4, %v4780_v7 }
 0x1d7   :  { %v1513_v42 = vadd.f32 %v1510_v50, %v1504_v15  ;;  %v3674_v26 = vsel %vm983_vm11, 1.0, %v4193_v2  ;;  %v1144_v23 = vmul.f32 2.5, %v3706_v25  ;;  %v1145_v43 = vmul.f32 2.5, %v3707_v18 }
 0x1d8   :  { %v1514_v47 = vadd.f32 %v1511_v45, %v1505_v28  ;;  %v1153_v49 = vmul.f32 2.5, %v1150_v35  ;;  %v1154_v36 = vmul.f32 2.5, %v1151_v37  ;;  %v1351_v20 = vmul.f32 1.25, %v3706_v25 }
 0x1d9   :  { %v1147_v16 = vmul.f32 %v3673_v4, %v1144_v23  ;;  %v1148_v17 = vmul.f32 %v3674_v26, %v1145_v43  ;;  %v1352_v19 = vmul.f32 1.25, %v3707_v18  ;;  %v1357_v0 = vmul.f32 1.25, %v1171_v54 }
 0x1da   :  { %v4040_v40 = vpack.i.bf16 %v1514_v47, %v1513_v42  ;;  %v1156_v57 = vmul.f32 %v4813_v27, %v1153_v49  ;;  %v1157_v58 = vmul.f32 %v4821_v44, %v1154_v36  ;;  %v1358_v22 = vmul.f32 1.25, %v1172_v39 }
 0x1db   :  { %v1360_v5 = vmul.f32 %v1357_v0, %v4869_v14  ;;  %v1486_v13 = vmul.f32 0.8333333, %v3706_v25  ;;  %v1487_v32 = vmul.f32 0.8333333, %v3707_v18  ;;  %v1492_v9 = vmul.f32 0.8333333, %v4857_v63 }
 0x1dc   :  { %4041 = vrot.lane.b32.xlu1 %v4040_v40, %s4196_s14  ;;  %v1159_v56 = vadd.f32 %v1156_v57, %v1147_v16  ;;  %v1160_v46 = vadd.f32 %v1157_v58, %v1148_v17  ;;  %v1361_v54 = vmul.f32 %v1358_v22, %v4875_v1  ;;  %v1493_v6 = vmul.f32 0.8333333, %v4863_v8 }
 0x1dd   :  { %v1495_v27 = vmul.f32 %v1492_v9, %v1378_v52  ;;  %vm1051_vm9 = vcmp.ge.f32.partialorder %v4770_v30, -0.2  ;;  %vm1052_vm12 = vcmp.ge.f32.partialorder %v4780_v7, -0.2  ;;  %vm1054_vm13 = vcmp.lt.f32.partialorder %v4770_v30, 0.2 }
 0x1de   :  { %v1354_v44 = vmul.f32 %v1351_v20, %v1159_v56  ;;  %v1355_v39 = vmul.f32 %v1352_v19, %v1160_v46  ;;  %v1496_v14 = vmul.f32 %v1493_v6, %v1379_v12  ;;  %vm1055_vm0 = vcmp.lt.f32.partialorder %v4780_v7, 0.2  ;;  %vm1057_vm14 = vmand %vm1051_vm9, %vm1054_vm13 }
 0x1df   :  { %vm1058_vm15 = vmand %vm1052_vm12, %vm1055_vm0  ;;  %v3688_v63 = vsel %vm1057_vm14, 1.0, %v4193_v2  ;;  %vm1066_vm1 = vcmp.ge.f32.partialorder %v4770_v30, 0.2  ;;  %vm1067_vm2 = vcmp.ge.f32.partialorder %v4780_v7, 0.2  ;;  %v1396_v8 = vmul.f32 1.25, %v4867_v61 }
 0x1e0   :  { %v1363_v1 = vadd.f32 %v1360_v5, %v1354_v44  ;;  %v1364_v52 = vadd.f32 %v1361_v54, %v1355_v39  ;;  %v3689_v15 = vsel %vm1058_vm15, 1.0, %v4193_v2  ;;  %vm1069_vm5 = vcmp.lt.f32.partialorder %v4770_v30, 0.6 }
 0x1e1   :  { %vm1070_vm6 = vcmp.lt.f32.partialorder %v4780_v7, 0.6  ;;  %vm1072_vm7 = vmand %vm1066_vm1, %vm1069_vm5  ;;  %v4938_v12 = vadd.f32 0.6, %v4770_v30  ;;  %v4941_v28 = vadd.f32 0.6, %v4780_v7  ;;  %v1399_v48 = vmul.f32 %v1396_v8, %v4889_v59 }
 0x1e2   :  { %v1489_v31 = vmul.f32 %v1486_v13, %v1363_v1  ;;  %v1490_v50 = vmul.f32 %v1487_v32, %v1364_v52  ;;  %vm1073_vm10 = vmand %vm1067_vm2, %vm1070_vm6  ;;  %v4945_v25 = vsel %vm1072_vm7, 1.0, %v4193_v2  ;;  %v1234_v18 = vsub.f32 0.2, %v4770_v30 }
 0x1e3   :  { %v4949_v35 = vsel %vm1073_vm10, 1.0, %v4193_v2  ;;  %v1228_v45 = vmul.f32 2.5, %v4938_v12  ;;  %v1229_v4 = vmul.f32 2.5, %v4941_v28  ;;  %v1235_v37 = vsub.f32 0.2, %v4780_v7 }
 0x1e4   :  { %v1498_v42 = vadd.f32 %v1495_v27, %v1489_v31  ;;  %v1499_v26 = vadd.f32 %v1496_v14, %v1490_v50  ;;  %v1237_v59 = vmul.f32 2.5, %v1234_v18  ;;  %v4955_v23 = vadd.f32 0.2, %v4770_v30 }
 0x1e5   :  { %v1231_v43 = vmul.f32 %v4838_v34, %v1228_v45  ;;  %v1232_v47 = vmul.f32 %v4848_v51, %v1229_v4  ;;  %v1238_v49 = vmul.f32 2.5, %v1235_v37  ;;  %v4960_v36 = vadd.f32 0.2, %v4780_v7 }
 0x1e6   :  { %v4035_v20 = vpack.i.bf16 %v1499_v26, %v1498_v42  ;;  %v1240_v16 = vmul.f32 %v3688_v63, %v1237_v59  ;;  %v1249_v17 = vmul.f32 2.5, %v4955_v23  ;;  %v1255_v19 = vsub.f32 0.6, %v4770_v30 }
 0x1e7   :  { %v1241_v0 = vmul.f32 %v3689_v15, %v1238_v49  ;;  %v1250_v40 = vmul.f32 2.5, %v4960_v36  ;;  %v1256_v57 = vsub.f32 0.6, %v4780_v7  ;;  %v1397_v58 = vmul.f32 1.25, %v4873_v10 }
 0x1e8   :  { %4036 = vrot.lane.b32.xlu0 %v4035_v20, %s4194_s29  ;;  %v1243_v34 = vadd.f32 %v1240_v16, %v1231_v43  ;;  %v1252_v51 = vmul.f32 %v3688_v63, %v1249_v17  ;;  %v1258_v22 = vmul.f32 2.5, %v1255_v19  ;;  %v1402_v5 = vmul.f32 1.25, %v1234_v18 }
 0x1e9   :  { %v1244_v13 = vadd.f32 %v1241_v0, %v1232_v47  ;;  %v1253_v32 = vmul.f32 %v3689_v15, %v1250_v40  ;;  %v1259_v9 = vmul.f32 2.5, %v1256_v57  ;;  %v1400_v56 = vmul.f32 %v1397_v58, %v4891_v60 }
 0x1ea   :  { %v1261_v46 = vmul.f32 %v4945_v25, %v1258_v22  ;;  %v1403_v54 = vmul.f32 1.25, %v1235_v37  ;;  %v1405_v6 = vmul.f32 %v1402_v5, %v1243_v34  ;;  %v1411_v27 = vmul.f32 1.25, %v4938_v12 }
 0x1eb   :  { %v1262_v44 = vmul.f32 %v4949_v35, %v1259_v9  ;;  %v1412_v39 = vmul.f32 1.25, %v4941_v28  ;;  %v1417_v14 = vmul.f32 1.25, %v1255_v19  ;;  %v1418_v8 = vmul.f32 1.25, %v1256_v57 }
 0x1ec   :  { %v1264_v63 = vadd.f32 %v1261_v46, %v1252_v51  ;;  %v1406_v1 = vmul.f32 %v1403_v54, %v1244_v13  ;;  %v1408_v52 = vadd.f32 %v1405_v6, %v1399_v48  ;;  %v1414_v31 = vmul.f32 %v1411_v27, %v1243_v34 }
 0x1ed   :  { %v1265_v15 = vadd.f32 %v1262_v44, %v1253_v32  ;;  %v1415_v50 = vmul.f32 %v1412_v39, %v1244_v13  ;;  %v1531_v60 = vmul.f32 0.8333333, %v4867_v61  ;;  %v1532_v45 = vmul.f32 0.8333333, %v4873_v10 }
 0x1ee   :  { %v1409_v4 = vadd.f32 %v1406_v1, %v1400_v56  ;;  %v1420_v42 = vmul.f32 %v1417_v14, %v1264_v63  ;;  %v1537_v26 = vmul.f32 0.8333333, %v1255_v19  ;;  %v1538_v59 = vmul.f32 0.8333333, %v1256_v57 }
 0x1ef   :  { %v1421_v43 = vmul.f32 %v1418_v8, %v1265_v15  ;;  %v1534_v47 = vmul.f32 %v1531_v60, %v1408_v52  ;;  %v1516_v49 = vmul.f32 0.8333333, %v4844_v21  ;;  %v1517_v20 = vmul.f32 0.8333333, %v4851_v41 }
 0x1f0   :  { %v4977_v16 = vadd.f32 %v1420_v42, %v1414_v31  ;;  %v1535_v48 = vmul.f32 %v1532_v45, %v1409_v4  ;;  %v1522_v17 = vmul.f32 0.8333333, %v1234_v18  ;;  %v1523_v0 = vmul.f32 0.8333333, %v1235_v37 }
 0x1f1   :  { %v4979_v40 = vadd.f32 %v1421_v43, %v1415_v50  ;;  %v1519_v61 = vmul.f32 %v1516_v49, %v4896_v24  ;;  %v1520_v10 = vmul.f32 %v1517_v20, %v4900_v29  ;;  %vm1082_vm8 = vcmp.ge.f32.partialorder %v4780_v7, 0.6 }
 0x1f2   :  { %v1540_v19 = vmul.f32 %v1537_v26, %v4977_v16  ;;  %v1525_v57 = vmul.f32 %v1522_v17, %v1408_v52  ;;  %v1526_v58 = vmul.f32 %v1523_v0, %v1409_v4  ;;  %vm1085_vm11 = vcmp.lt.f32.partialorder %v4780_v7, 1.0 }
 0x1f3   :  { %v1541_v21 = vmul.f32 %v1538_v59, %v4979_v40  ;;  %vm1088_vm9 = vmand %vm1082_vm8, %vm1085_vm11  ;;  %vm1097_vm12 = vcmp.ge.f32.partialorder %v4780_v7, 1.0  ;;  %vm1100_vm13 = vcmp.lt.f32.partialorder %v4780_v7, 1.4  ;;  %v4990_v41 = vadd.f32 -0.2, %v4770_v30 }
 0x1f4   :  { %v1543_v24 = vadd.f32 %v1540_v19, %v1534_v47  ;;  %v1528_v29 = vadd.f32 %v1525_v57, %v1519_v61  ;;  %v1529_v18 = vadd.f32 %v1526_v58, %v1520_v10  ;;  %v3695_v37 = vsel %vm1088_vm9, 1.0, %v4193_v2  ;;  %vm1103_vm0 = vmand %vm1097_vm12, %vm1100_vm13 }
 0x1f5   :  { %v1544_v34 = vadd.f32 %v1541_v21, %v1535_v48  ;;  %v4994_v51 = vsel %vm1103_vm0, 1.0, %v4193_v2  ;;  %v4997_v22 = vadd.f32 -0.2, %v4780_v7  ;;  %v1270_v5 = vmul.f32 2.5, %v4990_v41 }
 0x1f6   :  { %v4045_v13 = vpack.i.bf16 %v1529_v18, %v1528_v29  ;;  %v1277_v32 = vsub.f32 1.0, %v4780_v7  ;;  %v5002_v9 = vadd.f32 -0.6, %v4780_v7  ;;  %v1298_v56 = vsub.f32 1.4, %v4780_v7 }
 0x1f7   :  { %v4050_v46 = vpack.i.bf16 %v1544_v34, %v1543_v24  ;;  %v1271_v54 = vmul.f32 2.5, %v4997_v22  ;;  %v1273_v6 = vmul.f32 %v4945_v25, %v1270_v5  ;;  %v1426_v27 = vmul.f32 1.25, %v4955_v23 }
 0x1f8   :  { %4046 = vrot.lane.b32.xlu0 %v4045_v13, %s4195_s30  ;;  %v1280_v44 = vmul.f32 2.5, %v1277_v32  ;;  %v1292_v39 = vmul.f32 2.5, %v5002_v9  ;;  %v1301_v14 = vmul.f32 2.5, %v1298_v56  ;;  %v1427_v8 = vmul.f32 1.25, %v4960_v36 }
 0x1f9   :  { %4051 = vrot.lane.b32.xlu1 %v4050_v46, %s4197_s15  ;;  %v1274_v1 = vmul.f32 %v4949_v35, %v1271_v54  ;;  %v1285_v52 = vadd.f32 %v4801_v62, %v1273_v6  ;;  %v1429_v31 = vmul.f32 %v1426_v27, %v1264_v63  ;;  %v1432_v50 = vmul.f32 1.25, %v4786_v53 }
 0x1fa   :  { %v1283_v25 = vmul.f32 %v3695_v37, %v1280_v44  ;;  %v1295_v60 = vmul.f32 %v3695_v37, %v1292_v39  ;;  %v1304_v45 = vmul.f32 %v4994_v51, %v1301_v14  ;;  %v1430_v4 = vmul.f32 %v1427_v8, %v1265_v15 }
 0x1fb   :  { %v1433_v42 = vmul.f32 1.25, %v1277_v32  ;;  %v1435_v26 = vmul.f32 %v1432_v50, %v1285_v52  ;;  %v1441_v59 = vmul.f32 1.25, %v4990_v41  ;;  %v1442_v43 = vmul.f32 1.25, %v4997_v22 }
 0x1fc   :  { %v1286_v47 = vadd.f32 %v1283_v25, %v1274_v1  ;;  %v1307_v49 = vadd.f32 %v1304_v45, %v1295_v60  ;;  %v1448_v20 = vmul.f32 1.25, %v1298_v56  ;;  %v1561_v35 = vmul.f32 0.8333333, %v4955_v23 }
 0x1fd   :  { %v1438_v62 = vadd.f32 %v1435_v26, %v1429_v31  ;;  %v1444_v63 = vmul.f32 %v1441_v59, %v1285_v52  ;;  %v1562_v48 = vmul.f32 0.8333333, %v4960_v36  ;;  %v1567_v17 = vmul.f32 0.8333333, %v4790_v55 }
 0x1fe   :  { %v1436_v0 = vmul.f32 %v1433_v42, %v1286_v47  ;;  %v1445_v61 = vmul.f32 %v1442_v43, %v1286_v47  ;;  %v1451_v15 = vmul.f32 %v1448_v20, %v1307_v49  ;;  %v1568_v10 = vmul.f32 0.8333333, %v1298_v56 }
 0x1ff   :  { %v1453_v19 = vadd.f32 %v4805_v38, %v1444_v63  ;;  %v1564_v57 = vmul.f32 %v1561_v35, %v1438_v62  ;;  %v1546_v58 = vmul.f32 0.8333333, %v4938_v12  ;;  %v1547_v21 = vmul.f32 0.8333333, %v4941_v28 }
 0x200   :  { %v1439_v24 = vadd.f32 %v1436_v0, %v1430_v4  ;;  %v1454_v29 = vadd.f32 %v1451_v15, %v1445_v61  ;;  %v1552_v23 = vmul.f32 0.8333333, %v4786_v53  ;;  %v1553_v18 = vmul.f32 0.8333333, %v1277_v32 }
 0x201   :  { %v1570_v37 = vmul.f32 %v1567_v17, %v1453_v19  ;;  %v1549_v36 = vmul.f32 %v1546_v58, %v4977_v16  ;;  %v1550_v55 = vmul.f32 %v1547_v21, %v4979_v40  ;;  %vm1112_vm14 = vcmp.ge.f32.partialorder %v4780_v7, 1.4 }
 0x202   :  { %v1565_v34 = vmul.f32 %v1562_v48, %v1439_v24  ;;  %v1571_v5 = vmul.f32 %v1568_v10, %v1454_v29  ;;  %v1555_v38 = vmul.f32 %v1552_v23, %v1438_v62  ;;  %v1556_v13 = vmul.f32 %v1553_v18, %v1439_v24 }
 0x203   :  { %v1573_v56 = vadd.f32 %v1570_v37, %v1564_v57  ;;  %vm1115_vm15 = vcmp.lt.f32.partialorder %v4780_v7, 1.8  ;;  %v5030_v12 = vadd.f32 -1.0, %v4780_v7  ;;  %v1319_v53 = vsub.f32 1.8, %v4780_v7 }
 0x204   :  { %v1574_v28 = vadd.f32 %v1571_v5, %v1565_v34  ;;  %v1558_v32 = vadd.f32 %v1555_v38, %v1549_v36  ;;  %v1559_v46 = vadd.f32 %v1556_v13, %v1550_v55  ;;  %vm1118_vm1 = vmand %vm1112_vm14, %vm1115_vm15  ;;  %v1457_v16 = vmul.f32 1.25, %v5002_v9 }
 0x205   :  { %v5035_v40 = vsel %vm1118_vm1, 1.0, %v4193_v2  ;;  %v1313_v54 = vmul.f32 2.5, %v5030_v12  ;;  %v1322_v6 = vmul.f32 2.5, %v1319_v53  ;;  %v1463_v27 = vmul.f32 1.25, %v1319_v53 }
 0x206   :  { %v4060_v44 = vpack.i.bf16 %v1574_v28, %v1573_v56  ;;  %v4055_v39 = vpack.i.bf16 %v1559_v46, %v1558_v32  ;;  %v1460_v14 = vmul.f32 %v1457_v16, %v1307_v49  ;;  %v1576_v8 = vmul.f32 0.8333333, %v4990_v41 }
 0x207   :  { %v1316_v1 = vmul.f32 %v4994_v51, %v1313_v54  ;;  %v1325_v52 = vmul.f32 %v5035_v40, %v1322_v6  ;;  %v1577_v31 = vmul.f32 0.8333333, %v4997_v22  ;;  %v1583_v50 = vmul.f32 0.8333333, %v1319_v53 }
 0x208   :  { %4061 = vrot.lane.b32.xlu1 %v4060_v44, %s4199_s19  ;;  %4056 = vrot.lane.b32.xlu0 %v4055_v39, %s4198_s16  ;;  %v1579_v25 = vmul.f32 %v1576_v8, %v1453_v19  ;;  %vm978_vm2 = vcmp.ge.f32.partialorder %v4909_v3, -2.2  ;;  %vm981_vm5 = vcmp.lt.f32.partialorder %v4909_v3, -1.8  ;;  %vm993_vm6 = vcmp.ge.f32.partialorder %v4909_v3, -1.8 }
 0x209   :  { %v5047_v60 = vadd.f32 %v1325_v52, %v1316_v1  ;;  %v1580_v41 = vmul.f32 %v1577_v31, %v1454_v29  ;;  %vm984_vm7 = vmand %vm978_vm2, %vm981_vm5  ;;  %vm996_vm10 = vcmp.lt.f32.partialorder %v4909_v3, -1.4  ;;  %vm1008_vm8 = vcmp.ge.f32.partialorder %v4909_v3, -1.4 }
 0x20a   :  { %v1588_v51 = vadd.f32 %v4818_v33, %v1579_v25  ;;  %v3675_v22 = vsel %vm984_vm7, 1.0, %v4193_v2  ;;  %vm999_vm11 = vmand %vm993_vm6, %vm996_vm10  ;;  %vm1011_vm9 = vcmp.lt.f32.partialorder %v4909_v3, -1.0  ;;  %vm1023_vm12 = vcmp.ge.f32.partialorder %v4909_v3, -1.0 }
 0x20b   :  { %v1466_v45 = vmul.f32 %v1463_v27, %v5047_v60  ;;  %v3678_v4 = vsel %vm999_vm11, 1.0, %v4193_v2  ;;  %vm1014_vm13 = vmand %vm1008_vm8, %vm1011_vm9  ;;  %vm1026_vm0 = vcmp.lt.f32.partialorder %v4909_v3, -0.6  ;;  %v3708_v42 = vadd.f32 2.2, %v4909_v3 }
 0x20c   :  { %v3681_v26 = vsel %vm1014_vm13, 1.0, %v4193_v2  ;;  %vm1029_vm14 = vmand %vm1023_vm12, %vm1026_vm0  ;;  %v1152_v33 = vsub.f32 -1.4, %v4909_v3  ;;  %v3711_v59 = vadd.f32 1.8, %v4909_v3  ;;  %v1173_v43 = vsub.f32 -1.0, %v4909_v3 }
 0x20d   :  { %v5063_v47 = vadd.f32 %v1466_v45, %v1460_v14  ;;  %v3684_v49 = vsel %vm1029_vm14, 1.0, %v4193_v2  ;;  %v1146_v20 = vmul.f32 2.5, %v3708_v42  ;;  %v3714_v35 = vadd.f32 1.4, %v4909_v3 }
 0x20e   :  { %v1155_v62 = vmul.f32 2.5, %v1152_v33  ;;  %v1167_v63 = vmul.f32 2.5, %v3711_v59  ;;  %v1176_v48 = vmul.f32 2.5, %v1173_v43  ;;  %v1194_v17 = vsub.f32 -0.6, %v4909_v3 }
 0x20f   :  { %v1586_v0 = vmul.f32 %v1583_v50, %v5063_v47  ;;  %v1149_v61 = vmul.f32 %v3675_v22, %v1146_v20  ;;  %v1188_v15 = vmul.f32 2.5, %v3714_v35  ;;  %v1353_v10 = vmul.f32 1.25, %v3708_v42 }
 0x210   :  { %v1158_v19 = vmul.f32 %v3678_v4, %v1155_v62  ;;  %v1170_v57 = vmul.f32 %v3678_v4, %v1167_v63  ;;  %v1179_v58 = vmul.f32 %v3681_v26, %v1176_v48  ;;  %v1197_v21 = vmul.f32 2.5, %v1194_v17 }
 0x211   :  { %v1589_v24 = vadd.f32 %v1586_v0, %v1580_v41  ;;  %v1191_v29 = vmul.f32 %v3681_v26, %v1188_v15  ;;  %v1359_v23 = vmul.f32 1.25, %v1173_v43  ;;  %v1368_v18 = vmul.f32 1.25, %v3711_v59 }
 0x212   :  { %v1161_v37 = vadd.f32 %v1158_v19, %v1149_v61  ;;  %v1182_v36 = vadd.f32 %v1179_v58, %v1170_v57  ;;  %v1200_v55 = vmul.f32 %v3684_v49, %v1197_v21  ;;  %v1374_v34 = vmul.f32 1.25, %v1194_v17 }
 0x213   :  { %v4065_v5 = vpack.i.bf16 %v1589_v24, %v1588_v51  ;;  %v1488_v38 = vmul.f32 0.8333333, %v3708_v42  ;;  %vm1038_vm15 = vcmp.ge.f32.partialorder %v4909_v3, -0.6  ;;  %vm1041_vm1 = vcmp.lt.f32.partialorder %v4909_v3, -0.2 }
 0x214   :  { %v1203_v13 = vadd.f32 %v1200_v55, %v1191_v29  ;;  %v1356_v56 = vmul.f32 %v1353_v10, %v1161_v37  ;;  %v1362_v53 = vmul.f32 %v1359_v23, %v1182_v36  ;;  %v1371_v28 = vmul.f32 %v1368_v18, %v1182_v36  ;;  %vm1044_vm2 = vmand %vm1038_vm15, %vm1041_vm1 }
 0x215   :  { %4066 = vrot.lane.b32.xlu0 %v4065_v5, %s4200_s20  ;;  %v3717_v32 = vadd.f32 1.0, %v4909_v3  ;;  %v1215_v46 = vsub.f32 -0.2, %v4909_v3  ;;  %v1494_v6 = vmul.f32 0.8333333, %v1194_v17  ;;  %v1383_v27 = vmul.f32 1.25, %v3714_v35 }
 0x216   :  { %v1365_v16 = vadd.f32 %v1362_v53, %v1356_v56  ;;  %v1377_v54 = vmul.f32 %v1374_v34, %v1203_v13  ;;  %v3687_v44 = vsel %vm1044_vm2, 1.0, %v4193_v2  ;;  %vm1053_vm5 = vcmp.ge.f32.partialorder %v4909_v3, -0.2 }
 0x217   :  { %v1209_v39 = vmul.f32 2.5, %v3717_v32  ;;  %v1218_v14 = vmul.f32 2.5, %v1215_v46  ;;  %v1389_v52 = vmul.f32 1.25, %v1215_v46  ;;  %v1503_v31 = vmul.f32 0.8333333, %v3711_v59 }
 0x218   :  { %v1380_v8 = vadd.f32 %v1377_v54, %v1371_v28  ;;  %v1491_v1 = vmul.f32 %v1488_v38, %v1365_v16  ;;  %vm1056_vm6 = vcmp.lt.f32.partialorder %v4909_v3, 0.2  ;;  %v3720_v41 = vadd.f32 0.6, %v4909_v3 }
 0x219   :  { %v1212_v50 = vmul.f32 %v3684_v49, %v1209_v39  ;;  %v1221_v25 = vmul.f32 %v3687_v44, %v1218_v14  ;;  %v1386_v22 = vmul.f32 %v1383_v27, %v1203_v13  ;;  %v1509_v45 = vmul.f32 0.8333333, %v1215_v46  ;;  %vm1059_vm7 = vmand %vm1053_vm5, %vm1056_vm6 }
 0x21a   :  { %v1497_v51 = vmul.f32 %v1494_v6, %v1380_v8  ;;  %v1236_v4 = vsub.f32 0.2, %v4909_v3  ;;  %v3690_v26 = vsel %vm1059_vm7, 1.0, %v4193_v2  ;;  %v1230_v33 = vmul.f32 2.5, %v3720_v41 }
 0x21b   :  { %v1224_v42 = vadd.f32 %v1221_v25, %v1212_v50  ;;  %v1398_v43 = vmul.f32 1.25, %v3717_v32  ;;  %v1506_v62 = vmul.f32 %v1503_v31, %v1380_v8  ;;  %v1518_v49 = vmul.f32 0.8333333, %v3714_v35 }
 0x21c   :  { %v1500_v20 = vadd.f32 %v1497_v51, %v1491_v1  ;;  %v1239_v59 = vmul.f32 2.5, %v1236_v4  ;;  %v1233_v48 = vmul.f32 %v3687_v44, %v1230_v33  ;;  %v1404_v17 = vmul.f32 1.25, %v1236_v4 }
 0x21d   :  { %v1392_v63 = vmul.f32 %v1389_v52, %v1224_v42  ;;  %vm1068_vm10 = vcmp.ge.f32.partialorder %v4909_v3, 0.2  ;;  %vm1071_vm8 = vcmp.lt.f32.partialorder %v4909_v3, 0.6  ;;  %v5084_v61 = vadd.f32 0.2, %v4909_v3 }
 0x21e   :  { %1613 = vrot.lane.b32.xlu1 %v1500_v20, %s4194_s29  ;;  %v1242_v0 = vmul.f32 %v3690_v26, %v1239_v59  ;;  %v1257_v15 = vsub.f32 0.6, %v4909_v3  ;;  %v1401_v19 = vmul.f32 %v1398_v43, %v1224_v42  ;;  %v1524_v57 = vmul.f32 0.8333333, %v1236_v4  ;;  %vm1074_vm11 = vmand %vm1068_vm10, %vm1071_vm8 }
 0x21f   :  { %v1395_v10 = vadd.f32 %v1392_v63, %v1386_v22  ;;  %v1413_v35 = vmul.f32 1.25, %v3720_v41  ;;  %v3693_v21 = vsel %vm1074_vm11, 1.0, %v4193_v2  ;;  %v1251_v24 = vmul.f32 2.5, %v5084_v61  ;;  %v938_v63 = vld [vmem:[%s6241_s4 + $0x8] sm:$0xff] }
 0x220   :  { %v1245_v58 = vadd.f32 %v1242_v0, %v1233_v48  ;;  %v1260_v29 = vmul.f32 2.5, %v1257_v15  ;;  %v1533_v37 = vmul.f32 0.8333333, %v3717_v32  ;;  %vm1083_vm9 = vcmp.ge.f32.partialorder %v4909_v3, 0.6 }
 0x221   :  { %v1512_v23 = vmul.f32 %v1509_v45, %v1395_v10  ;;  %v1521_v18 = vmul.f32 %v1518_v49, %v1395_v10  ;;  %v1254_v55 = vmul.f32 %v3690_v26, %v1251_v24  ;;  %v1419_v5 = vmul.f32 1.25, %v1257_v15  ;;  %v937_v49 = vld [vmem:[%s6241_s4] sm:$0xff] }
 0x222   :  { %v1407_v36 = vmul.f32 %v1404_v17, %v1245_v58  ;;  %v1263_v34 = vmul.f32 %v3693_v21, %v1260_v29  ;;  %vm1086_vm12 = vcmp.lt.f32.partialorder %v4909_v3, 1.0  ;;  %v5092_v13 = vadd.f32 -0.2, %v4909_v3 }
 0x223   :  { %v1515_v38 = vadd.f32 %v1512_v23, %v1506_v62  ;;  %v1278_v56 = vsub.f32 1.0, %v4909_v3  ;;  %v1416_v46 = vmul.f32 %v1413_v35, %v1245_v58  ;;  %v1539_v16 = vmul.f32 0.8333333, %v1257_v15  ;;  %vm1089_vm13 = vmand %vm1083_vm9, %vm1086_vm12 }
 0x224   :  { %v1410_v53 = vadd.f32 %v1407_v36, %v1401_v19  ;;  %v1266_v28 = vadd.f32 %v1263_v34, %v1254_v55  ;;  %v3696_v32 = vsel %vm1089_vm13, 1.0, %v4193_v2  ;;  %v1272_v54 = vmul.f32 2.5, %v5092_v13  ;;  %v939_v55 = vld [vmem:[%s6241_s4 + $0x10] sm:$0xff] }
 0x225   :  { %1625 = vrot.lane.b32.xlu0 %v1515_v38, %s4196_s14  ;;  %v1281_v6 = vmul.f32 2.5, %v1278_v56  ;;  %v1428_v27 = vmul.f32 1.25, %v5084_v61  ;;  %v1434_v14 = vmul.f32 1.25, %v1278_v56  ;;  %v1548_v8 = vmul.f32 0.8333333, %v3720_v41 }
 0x226   :  { %v1527_v44 = vmul.f32 %v1524_v57, %v1410_v53  ;;  %v1422_v39 = vmul.f32 %v1419_v5, %v1266_v28  ;;  %v1536_v1 = vmul.f32 %v1533_v37, %v1410_v53  ;;  %v1275_v52 = vmul.f32 %v3693_v21, %v1272_v54 }
 0x227   :  { %v1284_v31 = vmul.f32 %v3696_v32, %v1281_v6  ;;  %vm1098_vm0 = vcmp.ge.f32.partialorder %v4909_v3, 1.0  ;;  %vm1101_vm14 = vcmp.lt.f32.partialorder %v4909_v3, 1.4  ;;  %v5102_v51 = vadd.f32 -0.6, %v4909_v3 }
 0x228   :  { %v1530_v50 = vadd.f32 %v1527_v44, %v1521_v18  ;;  %v1425_v25 = vadd.f32 %v1422_v39, %v1416_v46  ;;  %v1431_v45 = vmul.f32 %v1428_v27, %v1266_v28  ;;  %vm1104_vm15 = vmand %vm1098_vm0, %vm1101_vm14  ;;  %v1299_v4 = vsub.f32 1.4, %v4909_v3  ;;  %v941_v46 = vld [vmem:[%s6241_s4 + $0x20] sm:$0xff] }
 0x229   :  { %v1287_v22 = vadd.f32 %v1284_v31, %v1275_v52  ;;  %v1554_v42 = vmul.f32 0.8333333, %v1278_v56  ;;  %v3699_v26 = vsel %vm1104_vm15, 1.0, %v4193_v2  ;;  %v1293_v33 = vmul.f32 2.5, %v5102_v51 }
 0x22a   :  { %1637 = vrot.lane.b32.xlu1 %v1530_v50, %s4195_s30  ;;  %v1542_v41 = vmul.f32 %v1539_v16, %v1425_v25  ;;  %v1551_v20 = vmul.f32 %v1548_v8, %v1425_v25  ;;  %v1302_v62 = vmul.f32 2.5, %v1299_v4  ;;  %v1443_v59 = vmul.f32 1.25, %v5092_v13  ;;  %v942_v16 = vld [vmem:[%s6241_s4 + $0x28] sm:$0xff]  ;;  %v943_v50 = vld [vmem:[%s6241_s4 + $0x30] sm:$0xff]  ;;  %v944_v25 = vld [vmem:[%s6241_s4 + $0x38] sm:$0xff] }
 0x22b   :  { %v1437_v43 = vmul.f32 %v1434_v14, %v1287_v22  ;;  %v1296_v17 = vmul.f32 %v3696_v32, %v1293_v33  ;;  %v1449_v0 = vmul.f32 1.25, %v1299_v4  ;;  %vm1113_vm1 = vcmp.ge.f32.partialorder %v4909_v3, 1.4  ;;  %v946_v33 = vld [vmem:[%s6241_s4 + $0x48] sm:$0xff] }
 0x22c   :  { %v1545_v48 = vadd.f32 %v1542_v41, %v1536_v1  ;;  %v1305_v10 = vmul.f32 %v3699_v26, %v1302_v62  ;;  %vm1116_vm2 = vcmp.lt.f32.partialorder %v4909_v3, 1.8  ;;  %v3732_v19 = vadd.f32 -1.0, %v4909_v3 }
 0x22d   :  { %v1440_v15 = vadd.f32 %v1437_v43, %v1431_v45  ;;  %v1563_v57 = vmul.f32 0.8333333, %v5084_v61  ;;  %vm1119_vm5 = vmand %vm1113_vm1, %vm1116_vm2  ;;  %v1320_v35 = vsub.f32 1.8, %v4909_v3  ;;  %v3911_v58 = vpack.c.bf16 %v938_v63, %v937_v49  ;;  %v940_v61 = vld [vmem:[%s6241_s4 + $0x18] sm:$0xff] }
 0x22e   :  { %1649 = vrot.lane.b32.xlu0 %v1545_v48, %s4197_s15  ;;  %v1308_v24 = vadd.f32 %v1305_v10, %v1296_v17  ;;  %v1446_v29 = vmul.f32 %v1443_v59, %v1287_v22  ;;  %v5122_v23 = vsel %vm1119_vm5, 1.0, %v4193_v2  ;;  %v1314_v18 = vmul.f32 2.5, %v3732_v19 }
 0x22f   :  { %v1557_v21 = vmul.f32 %v1554_v42, %v1440_v15  ;;  %v1323_v37 = vmul.f32 2.5, %v1320_v35  ;;  %v1458_v36 = vmul.f32 1.25, %v5102_v51  ;;  %3912 = vmatpush1.bf16.msra.mxu1 %v3911_v58  ;;  %v1569_v38 = vmul.f32 0.8333333, %v1299_v4 }
 0x230   :  { %v1452_v5 = vmul.f32 %v1449_v0, %v1308_v24  ;;  %3913 = vmatprep.subr.bf16.mxu1 %v4201_v11  ;;  %v1317_v56 = vmul.f32 %v3699_v26, %v1314_v18  ;;  %v1464_v28 = vmul.f32 1.25, %v1320_v35  ;;  %v1566_v54 = vmul.f32 %v1563_v57, %v1440_v15  ;;  %v945_v26 = vld [vmem:[%s6241_s4 + $0x40] sm:$0xff] }
 0x231   :  { %v1560_v34 = vadd.f32 %v1557_v21, %v1551_v20  ;;  %v1326_v53 = vmul.f32 %v5122_v23, %v1323_v37  ;;  %v3735_v6 = vadd.f32 -1.4, %v4909_v3  ;;  %v3914_v27 = vpack.c.bf16 %v940_v61, %v939_v55 }
 0x232   :  { %v1455_v32 = vadd.f32 %v1452_v5, %v1446_v29  ;;  %v1461_v39 = vmul.f32 %v1458_v36, %v1308_v24  ;;  %v1578_v14 = vmul.f32 0.8333333, %v5092_v13  ;;  %v3917_v1 = vpack.c.bf16 %v942_v16, %v941_v46 }
 0x233   :  { %1661 = vrot.lane.b32.xlu1 %v1560_v34, %s4198_s16  ;;  %v1329_v44 = vadd.f32 %v1326_v53, %v1317_v56  ;;  %3915 = vmatpush1.bf16.msra.mxu1 %v3914_v27  ;;  %v1584_v31 = vmul.f32 0.8333333, %v1320_v35  ;;  %v1335_v45 = vmul.f32 2.5, %v3735_v6  ;;  %vm1127_vm6 = vcmp.ge.f32.partialorder %v4780_v7, 1.8  ;;  %v952_v6 = vld [vmem:[%s6241_s4 + $0x78] sm:$0xff] }
 0x234   :  { %v1572_v8 = vmul.f32 %v1569_v38, %v1455_v32  ;;  %3916 = vmatprep.subr.bf16.mxu1 %v4201_v11  ;;  %v1581_v4 = vmul.f32 %v1578_v14, %v1455_v32  ;;  %vm1130_vm7 = vcmp.lt.f32.partialorder %v4780_v7, 2.2  ;;  %v3734_v41 = vadd.f32 -1.4, %v4780_v7  ;;  %v953_v14 = vld [vmem:[%s6241_s4 + $0x80] sm:$0xff] }
 0x235   :  { %v1467_v52 = vmul.f32 %v1464_v28, %v1329_v44  ;;  %v3920_v42 = vpack.c.bf16 %v944_v25, %v943_v50  ;;  %vm1133_vm10 = vmand %vm1127_vm6, %vm1130_vm7  ;;  %v1340_v43 = vsub.f32 2.2, %v4780_v7  ;;  %v1472_v20 = vmul.f32 1.25, %v5030_v12  ;;  %v947_v12 = vld [vmem:[%s6241_s4 + $0x50] sm:$0xff] }
 0x236   :  { %v1575_v22 = vadd.f32 %v1572_v8, %v1566_v54  ;;  %v1473_v62 = vmul.f32 1.25, %v3732_v19  ;;  %v3704_v49 = vsel %vm1133_vm10, 1.0, %v4193_v2  ;;  %v1334_v63 = vmul.f32 2.5, %v3734_v41  ;;  %v948_v19 = vld [vmem:[%s6241_s4 + $0x58] sm:$0xff]  ;;  %v951_v54 = vld [vmem:[%s6241_s4 + $0x70] sm:$0xff]  ;;  %v954_v8 = vld [vmem:[%s6241_s4 + $0x88] sm:$0xff] }
 0x237   :  { %v1470_v13 = vadd.f32 %v1467_v52, %v1461_v39  ;;  %3918 = vmatpush1.bf16.msra.mxu1 %v3917_v1  ;;  %vm1128_vm8 = vcmp.ge.f32.partialorder %v4909_v3, 1.8  ;;  %v1343_v48 = vmul.f32 2.5, %v1340_v43  ;;  %v1475_v17 = vmul.f32 %v1472_v20, %v5047_v60 }
 0x238   :  { %1673 = vrot.lane.b32.xlu0 %v1575_v22, %s4199_s19  ;;  %3919 = vmatprep.subr.bf16.mxu1 %v4201_v11  ;;  %v3923_v15 = vpack.c.bf16 %v946_v33, %v945_v26  ;;  %v1337_v10 = vmul.f32 %v5035_v40, %v1334_v63  ;;  %vm1131_vm11 = vcmp.lt.f32.partialorder %v4909_v3, 2.2  ;;  %v1341_v35 = vsub.f32 2.2, %v4909_v3 }
 0x239   :  { %v1587_v59 = vmul.f32 %v1584_v31, %v1470_v13  ;;  %v1346_v57 = vmul.f32 %v3704_v49, %v1343_v48  ;;  %vm1134_vm9 = vmand %vm1128_vm8, %vm1131_vm11  ;;  %v1476_v60 = vmul.f32 %v1473_v62, %v1329_v44  ;;  %v1593_v58 = vmul.f32 0.8333333, %v5102_v51  ;;  %v949_v51 = vld [vmem:[%s6241_s4 + $0x60] sm:$0xff] }
 0x23a   :  { %v1338_v40 = vmul.f32 %v5122_v23, %v1335_v45  ;;  %v3705_v21 = vsel %vm1134_vm9, 1.0, %v4193_v2  ;;  %v1478_v29 = vmul.f32 1.25, %v1340_v43  ;;  %v1344_v18 = vmul.f32 2.5, %v1341_v35  ;;  %v950_v23 = vld [vmem:[%s6241_s4 + $0x68] sm:$0xff] }
 0x23b   :  { %v1590_v0 = vadd.f32 %v1587_v59, %v1581_v4  ;;  %3921 = vmatpush1.bf16.msra.mxu1 %v3920_v42  ;;  %v1349_v24 = vadd.f32 %v1346_v57, %v1337_v10  ;;  %v1596_v37 = vmul.f32 %v1593_v58, %v1470_v13  ;;  %v3926_v36 = vpack.c.bf16 %v948_v19, %v947_v12 }
 0x23c   :  { %3922 = vmatprep.subr.bf16.mxu1 %v4201_v11  ;;  %v1592_v61 = vmul.f32 0.8333333, %v5002_v9  ;;  %v1347_v34 = vmul.f32 %v3705_v21, %v1344_v18  ;;  %v1479_v5 = vmul.f32 1.25, %v1341_v35  ;;  %v1598_v53 = vmul.f32 0.8333333, %v1340_v43 }
 0x23d   :  { %1685 = vrot.lane.b32.xlu1 %v1590_v0, %s4200_s20  ;;  %v1481_v55 = vmul.f32 %v1478_v29, %v1349_v24  ;;  %v3929_v46 = vpack.c.bf16 %v950_v23, %v949_v51  ;;  %v1599_v32 = vmul.f32 0.8333333, %v1341_v35  ;;  %v3932_v44 = vpack.c.bf16 %v952_v6, %v951_v54 }
 0x23e   :  { %v1595_v56 = vmul.f32 %v1592_v61, %v5063_v47  ;;  %v1350_v28 = vadd.f32 %v1347_v34, %v1338_v40  ;;  %v3935_v52 = vpack.c.bf16 %v954_v8, %v953_v14  ;;  %v3670_v31 = vmul.f32 -1.442695, %v4770_v30 }
 0x23f   :  { %3924 = vmatpush1.bf16.msra.mxu1 %v3923_v15  ;;  %v1484_v38 = vadd.f32 %v1481_v55, %v1475_v17  ;;  %v3671_v50 = vmul.f32 -1.442695, %v4780_v7  ;;  %v3672_v15 = vmul.f32 -1.442695, %v4909_v3  ;;  %vm6256_vm12 = vcmask 392192  }
 0x240   :  { %3925 = vmatprep.subr.bf16.mxu1 %v4201_v11  ;;  %v1482_v16 = vmul.f32 %v1479_v5, %v1350_v28  ;;  %4152 = vpow2.f32 %v3670_v31  ;;  %vm6257_vm13 = vcmask 523264   ;;  %vm6258_vm0 = vmmov %vm6256_vm12  ;;  %vm6259_vm14 = vcmask 654336  }
 0x241   :  { %v1601_v9 = vmul.f32 %v1598_v53, %v1484_v38  ;;  %4154 = vpow2.f32 %v3671_v50  ;;  %vm6260_vm15 = vcmask 785408   ;;  %vm6261_vm1 = vmmov %vm6257_vm13  ;;  %vm6262_vm2 = vcmask 916480  }
 0x242   :  { %v1485_v47 = vadd.f32 %v1482_v16, %v1476_v60  ;;  %vm6263_vm5 = vmmov %vm6259_vm14 }
 0x243   :  { %3927 = vmatpush1.bf16.msra.mxu1 %v3926_v36  ;;  %v5195_v27 = vadd.f32 %v1601_v9, %v1595_v56  ;;  %vm6264_vm6 = vmmov %vm6260_vm15 }
 0x244   :  { %3928 = vmatprep.subr.bf16.mxu1 %v4201_v11  ;;  %v1602_v39 = vmul.f32 %v1599_v32, %v1485_v47  ;;  %vm6265_vm7 = vmmov %vm6262_vm2 }
 0x245   :  { %vm6266_vm10 = vmmov %vm6258_vm0 }
 0x246   :  { %v1605_v1 = vadd.f32 %v1602_v39, %v1596_v37  ;;  %vm6267_vm8 = vmmov %vm6261_vm1 }
 0x247   :  { %3930 = vmatpush1.bf16.msra.mxu1 %v3929_v46  ;;  %vm6268_vm11 = vmmov %vm6263_vm5 }
 0x248   :  { %3931 = vmatprep.subr.bf16.mxu1 %v4201_v11  ;;  %vm6269_vm9 = vmmov %vm6264_vm6 }
 0x24a   :  { %v4153_v25 = vpop.eup %4152 }
 0x24b   :  { %3933 = vmatpush1.bf16.msra.mxu1 %v3932_v44  ;;  %v964_v22 = vadd.f32 1.0, %v4153_v25  ;;  %v4155_v45 = vpop.eup %4154 }
 0x24c   :  { %3934 = vmatprep.subr.bf16.mxu1 %v4201_v11  ;;  %v965_v13 = vadd.f32 1.0, %v4155_v45  ;;  %v5244_v45 = vld [vmem:[%s6243_s6] ss:$0 sm:$0xff] }
 0x24d   :  { %4156 = vrcp.f32 %v964_v22 }
 0x24e   :  { %4158 = vrcp.f32 %v965_v13  ;;  %v4042_v41 = vpop.permute.xlu1 %4041 }
 0x24f   :  { %3936 = vmatpush1.bf16.msra.mxu1 %v3935_v52  ;;  %v4043_v59 = vunpack.i.l.bf16 %v4042_v41  ;;  %v4044_v10 = vunpack.i.h.bf16 %v4042_v41  ;;  %4160 = vpow2.f32 %v3672_v15 }
 0x250   :  { %3964 = vmatprep.subr.bf16.mxu1 %v4201_v11 }
 0x257   :  { %v4157_v42 = vpop.eup %4156 }
 0x258   :  { %v973_v43 = vmul.f32 %v4157_v42, %v4770_v30  ;;  %v4159_v62 = vpop.eup %4158 }
 0x259   :  { %v974_v0 = vmul.f32 %v4159_v62, %v4780_v7  ;;  %v4161_v53 = vpop.eup %4160 }
 0x25a   :  { %v4037_v4 = vpop.permute.xlu0 %4036  ;;  %v966_v46 = vadd.f32 1.0, %v4161_v53 }
 0x25b   :  { %v4038_v33 = vunpack.i.l.bf16 %v4037_v4  ;;  %v4039_v49 = vunpack.i.h.bf16 %v4037_v4 }
 0x25c   :  { %4162 = vrcp.f32 %v966_v46 }
 0x25d   :  { %v1690_v63 = vsel %vm800_vm3, %v973_v43, %v4038_v33  ;;  %v1691_v57 = vsel %vm800_vm3, %v974_v0, %v4039_v49 }
 0x25e   :  { %v1693_v19 = vsel %vm804_vm4, %v1690_v63, %v4043_v59  ;;  %v1694_v21 = vsel %vm804_vm4, %v1691_v57, %v4044_v10  ;;  %v4191_v59 = vld [vmem:[%s6237_s0 + $0x8] sm:$0xff] }
 0x266   :  { %v4163_v32 = vpop.eup %4162 }
 0x267   :  { %v975_v54 = vmul.f32 %v4163_v32, %v4909_v3  ;;  %v5239_v3 = vld [vmem:[%s6242_s5] ss:$0 sm:$0xff] }
 0x26a   :  { %v4047_v26 = vpop.permute.xlu0 %4046 }
 0x26b   :  { %v4052_v20 = vpop.permute.xlu1 %4051  ;;  %v4048_v48 = vunpack.i.l.bf16 %v4047_v26  ;;  %v4049_v35 = vunpack.i.h.bf16 %v4047_v26  ;;  %v4190_v26 = vld [vmem:[%s6237_s0] sm:$0xff] }
 0x26c   :  { %v4053_v12 = vunpack.i.l.bf16 %v4052_v20  ;;  %v4054_v40 = vunpack.i.h.bf16 %v4052_v20 }
 0x26d   :  { %v1696_v30 = vsel %vm6256_vm12, %v1693_v19, %v4048_v48  ;;  %v1697_v29 = vsel %vm6258_vm0, %v1694_v21, %v4049_v35  ;;  %vm6270_vm12 = vmmov %vm6262_vm2 }
 0x26e   :  { %v1699_v7 = vsel %vm6257_vm13, %v1696_v30, %v4053_v12  ;;  %v1700_v5 = vsel %vm6261_vm1, %v1697_v29, %v4054_v40 }
 0x27a   :  { %v4057_v17 = vpop.permute.xlu0 %4056  ;;  %v4062_v60 = vpop.permute.xlu1 %4061 }
 0x27b   :  { %v4058_v58 = vunpack.i.l.bf16 %v4057_v17  ;;  %v4063_v24 = vunpack.i.l.bf16 %v4062_v60  ;;  %v4059_v18 = vunpack.i.h.bf16 %v4057_v17  ;;  %v4064_v61 = vunpack.i.h.bf16 %v4062_v60 }
 0x27d   :  { %v1702_v37 = vsel %vm6259_vm14, %v1699_v7, %v4058_v58  ;;  %v1703_v38 = vsel %vm6263_vm5, %v1700_v5, %v4059_v18 }
 0x27e   :  { %v1705_v34 = vsel %vm6260_vm15, %v1702_v37, %v4063_v24  ;;  %v1706_v56 = vsel %vm6264_vm6, %v1703_v38, %v4064_v61 }
 0x287   :  { %v4067_v36 = vpop.permute.xlu0 %4066 }
 0x288   :  { %v4068_v55 = vunpack.i.l.bf16 %v4067_v36  ;;  %v4069_v51 = vunpack.i.h.bf16 %v4067_v36 }
 0x28a   :  { %v1708_v23 = vsel %vm6262_vm2, %v1705_v34, %v4068_v55  ;;  %v1709_v28 = vsel %vm6265_vm7, %v1706_v56, %v4069_v51 }
 0x28b   :  { %1785 = vmatmul.mubr.f32.vlgmr.msra.gmra.mrb[0].mxu1 %v1708_v23 }
 0x28c   :  { %3737 = vmatprep.mubr.msk.f32.mxu1 %vm800_vm3, %v5195_v27 }
 0x28f   :  { %1790 = vmatmul.mubr.f32.gmra.mrb[2].mxu1 %v1709_v28 }
 0x290   :  { %3738 = vmatprep.mubr.msk.f32.mxu1 %vm800_vm3, %v1605_v1  ;;  %v1614_v9 = vpop.permute.xlu1 %1613 }
 0x291   :  { %v1692_v47 = vsel %vm800_vm3, %v975_v54, %v1614_v9 }
 0x297   :  { %v1626_v16 = vpop.permute.xlu0 %1625 }
 0x298   :  { %v1695_v27 = vsel %vm804_vm4, %v1692_v47, %v1626_v16 }
 0x29c   :  { %v1638_v6 = vpop.permute.xlu1 %1637 }
 0x29d   :  { %v1698_v39 = vsel %vm6266_vm10, %v1695_v27, %v1638_v6 }
 0x2a0   :  { %v1650_v44 = vpop.permute.xlu0 %1649 }
 0x2a1   :  { %v1701_v14 = vsel %vm6267_vm8, %v1698_v39, %v1650_v44 }
 0x2a5   :  { %v1662_v8 = vpop.permute.xlu1 %1661 }
 0x2a6   :  { %v1704_v1 = vsel %vm6268_vm11, %v1701_v14, %v1662_v8 }
 0x2aa   :  { %v1674_v52 = vpop.permute.xlu0 %1673 }
 0x2ab   :  { %v1707_v31 = vsel %vm6269_vm9, %v1704_v1, %v1674_v52 }
 0x2af   :  { %v1686_v50 = vpop.permute.xlu1 %1685 }
 0x2b0   :  { %v1710_v25 = vsel %vm6270_vm12, %v1707_v31, %v1686_v50 }
 0x2b1   :  { %1795 = vmatmul.mubr.f32.gmra.mrb[4].mxu1 %v1710_v25 }
 0x35e   :  { %v1786_v22 = vpop.f32.mrb[0].mxu1 }
 0x35f   :  { %v1807_v13 = vmul.f32 %v5239_v3, %v1786_v22  ;;  %v1788_v4 = vpop.f32.mrb[1].mxu1 }
 0x361   :  { %v1817_v41 = vadd.f32 %v5244_v45, %v1807_v13 }
 0x362   :  { %v1791_v42 = vpop.f32.mrb[2].mxu1 }
 0x363   :  { %v5251_v33 = vadd.f32 %v4190_v26, %v1817_v41  ;;  %v1808_v43 = vmul.f32 %v5239_v3, %v1791_v42  ;;  %v1793_v20 = vpop.f32.mrb[3].mxu1 }
 0x365   :  { %v1818_v62 = vadd.f32 %v5244_v45, %v1808_v43  ;;  %vm1967_vm13 = vcmp.ge.f32.partialorder %v5251_v33, 0.6  ;;  %vm1970_vm0 = vcmp.lt.f32.partialorder %v5251_v33, 1.0  ;;  %vm1982_vm14 = vcmp.ge.f32.partialorder %v5251_v33, 1.0 }
 0x366   :  { %vm1973_vm15 = vmand %vm1967_vm13, %vm1970_vm0  ;;  %vm1985_vm1 = vcmp.lt.f32.partialorder %v5251_v33, 1.4  ;;  %vm1997_vm2 = vcmp.ge.f32.partialorder %v5251_v33, 1.4  ;;  %vm2000_vm5 = vcmp.lt.f32.partialorder %v5251_v33, 1.8 }
 0x367   :  { %v5264_v49 = vadd.f32 %v4191_v59, %v1818_v62  ;;  %vm1988_vm6 = vmand %vm1982_vm14, %vm1985_vm1  ;;  %vm2012_vm7 = vcmp.ge.f32.partialorder %v5251_v33, 1.8  ;;  %vm2015_vm10 = vcmp.lt.f32.partialorder %v5251_v33, 2.2  ;;  %v5269_v63 = vsel %vm1973_vm15, 1.0, %v4193_v2 }
 0x368   :  { %vm2003_vm8 = vmand %vm1997_vm2, %vm2000_vm5  ;;  %v3798_v48 = vadd.f32 -0.6, %v5251_v33  ;;  %v5273_v17 = vsub.f32 1.4, %v5251_v33  ;;  %v3801_v0 = vadd.f32 -1.0, %v5251_v33  ;;  %v3768_v15 = vsel %vm1988_vm6, 1.0, %v4193_v2 }
 0x369   :  { %v3771_v10 = vsel %vm2003_vm8, 1.0, %v4193_v2  ;;  %vm2018_vm11 = vmand %vm2012_vm7, %vm2015_vm10  ;;  %v5279_v12 = vsub.f32 1.8, %v5251_v33  ;;  %v3804_v19 = vadd.f32 -1.4, %v5251_v33  ;;  %vm1895_vm9 = vcmp.lt.f32.partialorder %v5251_v33, -1.0 }
 0x36a   :  { %v3774_v57 = vsel %vm2018_vm11, 1.0, %v4193_v2  ;;  %v2177_v35 = vmul.f32 2.5, %v3798_v48  ;;  %v2186_v30 = vmul.f32 2.5, %v5273_v17  ;;  %v2198_v60 = vmul.f32 2.5, %v3801_v0 }
 0x36b   :  { %v2207_v58 = vmul.f32 2.5, %v5279_v12  ;;  %v2219_v40 = vmul.f32 2.5, %v3804_v19  ;;  %v2225_v21 = vsub.f32 2.2, %v5251_v33  ;;  %v2342_v24 = vmul.f32 1.25, %v3798_v48 }
 0x36c   :  { %v2180_v7 = vmul.f32 %v5269_v63, %v2177_v35  ;;  %v2189_v29 = vmul.f32 %v3768_v15, %v2186_v30  ;;  %v2201_v18 = vmul.f32 %v3768_v15, %v2198_v60  ;;  %v2348_v37 = vmul.f32 1.25, %v5279_v12 }
 0x36d   :  { %v2210_v36 = vmul.f32 %v3771_v10, %v2207_v58  ;;  %v2222_v55 = vmul.f32 %v3771_v10, %v2219_v40  ;;  %v2228_v61 = vmul.f32 2.5, %v2225_v21  ;;  %v2357_v34 = vmul.f32 1.25, %v3801_v0 }
 0x36e   :  { %v5289_v5 = vadd.f32 %v2189_v29, %v2180_v7  ;;  %v2363_v51 = vmul.f32 1.25, %v2225_v21  ;;  %v2477_v23 = vmul.f32 0.8333333, %v3798_v48  ;;  %v2483_v38 = vmul.f32 0.8333333, %v2225_v21 }
 0x36f   :  { %v2213_v56 = vadd.f32 %v2210_v36, %v2201_v18  ;;  %v2231_v53 = vmul.f32 %v3774_v57, %v2228_v61  ;;  %vm1862_vm12 = vcmp.ge.f32.partialorder %v5251_v33, -2.2  ;;  %vm1863_vm13 = vcmp.ge.f32.partialorder %v5264_v49, -2.2 }
 0x370   :  { %v2345_v28 = vmul.f32 %v2342_v24, %v5289_v5  ;;  %vm1865_vm0 = vcmp.lt.f32.partialorder %v5251_v33, -1.8  ;;  %vm1866_vm14 = vcmp.lt.f32.partialorder %v5264_v49, -1.8  ;;  %vm1877_vm15 = vcmp.ge.f32.partialorder %v5251_v33, -1.8 }
 0x371   :  { %v2234_v46 = vadd.f32 %v2231_v53, %v2222_v55  ;;  %v2351_v9 = vmul.f32 %v2348_v37, %v2213_v56  ;;  %v2360_v16 = vmul.f32 %v2357_v34, %v2213_v56  ;;  %vm1868_vm1 = vmand %vm1862_vm12, %vm1865_vm0  ;;  %vm1878_vm2 = vcmp.ge.f32.partialorder %v5264_v49, -1.8 }
 0x372   :  { %vm1869_vm5 = vmand %vm1863_vm13, %vm1866_vm14  ;;  %v3744_v32 = vsel %vm1868_vm1, 1.0, %v4193_v2  ;;  %vm1880_vm6 = vcmp.lt.f32.partialorder %v5251_v33, -1.4  ;;  %vm1881_vm7 = vcmp.lt.f32.partialorder %v5264_v49, -1.4  ;;  %vm1896_vm10 = vcmp.lt.f32.partialorder %v5264_v49, -1.0 }
 0x373   :  { %v5302_v54 = vadd.f32 %v2351_v9, %v2345_v28  ;;  %v2366_v6 = vmul.f32 %v2363_v51, %v2234_v46  ;;  %v3745_v47 = vsel %vm1869_vm5, 1.0, %v4193_v2  ;;  %vm1883_vm8 = vmand %vm1877_vm15, %vm1880_vm6  ;;  %vm1892_vm11 = vcmp.ge.f32.partialorder %v5251_v33, -1.4 }
 0x374   :  { %vm1884_vm12 = vmand %vm1878_vm2, %vm1881_vm7  ;;  %v3747_v44 = vsel %vm1883_vm8, 1.0, %v4193_v2  ;;  %vm1893_vm13 = vcmp.ge.f32.partialorder %v5264_v49, -1.4  ;;  %vm1907_vm0 = vcmp.ge.f32.partialorder %v5251_v33, -1.0  ;;  %vm1908_vm14 = vcmp.ge.f32.partialorder %v5264_v49, -1.0 }
 0x375   :  { %v2369_v27 = vadd.f32 %v2366_v6, %v2360_v16  ;;  %v2480_v39 = vmul.f32 %v2477_v23, %v5302_v54  ;;  %v3748_v14 = vsel %vm1884_vm12, 1.0, %v4193_v2  ;;  %vm1898_vm1 = vmand %vm1892_vm11, %vm1895_vm9  ;;  %vm1910_vm15 = vcmp.lt.f32.partialorder %v5251_v33, -0.6 }
 0x376   :  { %vm1899_vm2 = vmand %vm1893_vm13, %vm1896_vm10  ;;  %v3750_v8 = vsel %vm1898_vm1, 1.0, %v4193_v2  ;;  %vm1911_vm5 = vcmp.lt.f32.partialorder %v5264_v49, -0.6  ;;  %v5320_v52 = vadd.f32 2.2, %v5251_v33  ;;  %v2057_v1 = vsub.f32 -1.0, %v5251_v33 }
 0x377   :  { %v2486_v31 = vmul.f32 %v2483_v38, %v2369_v27  ;;  %v3751_v50 = vsel %vm1899_vm2, 1.0, %v4193_v2  ;;  %vm1913_vm6 = vmand %vm1907_vm0, %vm1910_vm15  ;;  %v5325_v25 = vadd.f32 2.2, %v5264_v49  ;;  %v2036_v22 = vsub.f32 -1.4, %v5251_v33 }
 0x378   :  { %vm1914_vm9 = vmand %vm1908_vm14, %vm1911_vm5  ;;  %v5331_v13 = vsel %vm1913_vm6, 1.0, %v4193_v2  ;;  %v2030_v4 = vmul.f32 2.5, %v5320_v52  ;;  %v2037_v41 = vsub.f32 -1.4, %v5264_v49  ;;  %v5336_v42 = vadd.f32 1.8, %v5251_v33 }
 0x379   :  { %v2489_v26 = vadd.f32 %v2486_v31, %v2480_v39  ;;  %v5339_v43 = vsel %vm1914_vm9, 1.0, %v4193_v2  ;;  %v2031_v20 = vmul.f32 2.5, %v5325_v25  ;;  %v2039_v62 = vmul.f32 2.5, %v2036_v22 }
 0x37a   :  { %v2033_v59 = vmul.f32 %v3744_v32, %v2030_v4  ;;  %v2040_v48 = vmul.f32 2.5, %v2037_v41  ;;  %v5343_v0 = vadd.f32 1.8, %v5264_v49  ;;  %v2051_v15 = vmul.f32 2.5, %v5336_v42 }
 0x37b   :  { %3807 = vmatprep.mubr.msk.f32.mxu0 %vm800_vm3, %v2489_v26  ;;  %v2034_v10 = vmul.f32 %v3745_v47, %v2031_v20  ;;  %v2042_v19 = vmul.f32 %v3747_v44, %v2039_v62  ;;  %v2058_v57 = vsub.f32 -1.0, %v5264_v49  ;;  %v2060_v35 = vmul.f32 2.5, %v2057_v1 }
 0x37c   :  { %v2043_v30 = vmul.f32 %v3748_v14, %v2040_v48  ;;  %v2052_v60 = vmul.f32 2.5, %v5343_v0  ;;  %v2054_v58 = vmul.f32 %v3747_v44, %v2051_v15  ;;  %v5350_v40 = vadd.f32 1.4, %v5251_v33 }
 0x37d   :  { %v2045_v21 = vadd.f32 %v2042_v19, %v2033_v59  ;;  %v2061_v24 = vmul.f32 2.5, %v2058_v57  ;;  %v2063_v7 = vmul.f32 %v3750_v8, %v2060_v35  ;;  %v5353_v29 = vadd.f32 1.4, %v5264_v49 }
 0x37e   :  { %v2046_v18 = vadd.f32 %v2043_v30, %v2034_v10  ;;  %v2055_v37 = vmul.f32 %v3748_v14, %v2052_v60  ;;  %v2072_v36 = vmul.f32 2.5, %v5350_v40  ;;  %v2078_v55 = vsub.f32 -0.6, %v5251_v33 }
 0x37f   :  { %v2064_v61 = vmul.f32 %v3751_v50, %v2061_v24  ;;  %v2066_v34 = vadd.f32 %v2063_v7, %v2054_v58  ;;  %v2073_v51 = vmul.f32 2.5, %v5353_v29  ;;  %v2079_v23 = vsub.f32 -0.6, %v5264_v49 }
 0x380   :  { %v2075_v38 = vmul.f32 %v3750_v8, %v2072_v36  ;;  %v2081_v56 = vmul.f32 2.5, %v2078_v55  ;;  %v2237_v53 = vmul.f32 1.25, %v5320_v52  ;;  %v2238_v28 = vmul.f32 1.25, %v5325_v25 }
 0x381   :  { %v2067_v46 = vadd.f32 %v2064_v61, %v2055_v37  ;;  %v2076_v9 = vmul.f32 %v3751_v50, %v2073_v51  ;;  %v2082_v16 = vmul.f32 2.5, %v2079_v23  ;;  %v2243_v32 = vmul.f32 1.25, %v2057_v1 }
 0x382   :  { %v2084_v6 = vmul.f32 %v5331_v13, %v2081_v56  ;;  %v2240_v47 = vmul.f32 %v2237_v53, %v2045_v21  ;;  %v2241_v44 = vmul.f32 %v2238_v28, %v2046_v18  ;;  %v2244_v27 = vmul.f32 1.25, %v2058_v57 }
 0x383   :  { %v2085_v39 = vmul.f32 %v5339_v43, %v2082_v16  ;;  %v2246_v14 = vmul.f32 %v2243_v32, %v2066_v34  ;;  %v2252_v31 = vmul.f32 1.25, %v5336_v42  ;;  %v2253_v8 = vmul.f32 1.25, %v5343_v0 }
 0x384   :  { %v2087_v22 = vadd.f32 %v2084_v6, %v2075_v38  ;;  %v2247_v4 = vmul.f32 %v2244_v27, %v2067_v46  ;;  %v2258_v41 = vmul.f32 1.25, %v2078_v55  ;;  %v2259_v26 = vmul.f32 1.25, %v2079_v23  ;;  %v1796_v20 = vpop.f32.mrb[4].mxu1 }
 0x385   :  { %v2088_v50 = vadd.f32 %v2085_v39, %v2076_v9  ;;  %v2249_v62 = vadd.f32 %v2246_v14, %v2240_v47  ;;  %v2255_v1 = vmul.f32 %v2252_v31, %v2066_v34  ;;  %v2256_v59 = vmul.f32 %v2253_v8, %v2067_v46  ;;  %v1798_v15 = vpop.f32.mrb[5].mxu1 }
 0x386   :  { %v1809_v48 = vmul.f32 %v5239_v3, %v1796_v20  ;;  %v2250_v10 = vadd.f32 %v2247_v4, %v2241_v44  ;;  %v2261_v19 = vmul.f32 %v2258_v41, %v2087_v22  ;;  %v2372_v57 = vmul.f32 0.8333333, %v5320_v52 }
 0x387   :  { %v2262_v35 = vmul.f32 %v2259_v26, %v2088_v50  ;;  %v2373_v30 = vmul.f32 0.8333333, %v5325_v25  ;;  %v2378_v60 = vmul.f32 0.8333333, %v2078_v55  ;;  %v2379_v58 = vmul.f32 0.8333333, %v2079_v23 }
 0x388   :  { %v5369_v21 = vadd.f32 %v5244_v45, %v1809_v48  ;;  %v2264_v24 = vadd.f32 %v2261_v19, %v2255_v1  ;;  %v2375_v7 = vmul.f32 %v2372_v57, %v2249_v62  ;;  %vm1922_vm7 = vcmp.ge.f32.partialorder %v5251_v33, -0.6 }
 0x389   :  { %v2265_v18 = vadd.f32 %v2262_v35, %v2256_v59  ;;  %v2376_v37 = vmul.f32 %v2373_v30, %v2250_v10  ;;  %vm1923_vm10 = vcmp.ge.f32.partialorder %v5264_v49, -0.6  ;;  %vm1925_vm8 = vcmp.lt.f32.partialorder %v5251_v33, -0.2 }
 0x38a   :  { %v2381_v3 = vmul.f32 %v2378_v60, %v2264_v24  ;;  %vm1926_vm11 = vcmp.lt.f32.partialorder %v5264_v49, -0.2  ;;  %vm1928_vm12 = vmand %vm1922_vm7, %vm1925_vm8  ;;  %v5376_v52 = vadd.f32 1.0, %v5251_v33  ;;  %v5380_v36 = vadd.f32 1.0, %v5264_v49 }
 0x38b   :  { %v2382_v25 = vmul.f32 %v2379_v58, %v2265_v18  ;;  %vm1929_vm13 = vmand %vm1923_vm10, %vm1926_vm11  ;;  %v3756_v45 = vsel %vm1928_vm12, 1.0, %v4193_v2  ;;  %v2099_v55 = vsub.f32 -0.2, %v5251_v33  ;;  %v2100_v23 = vsub.f32 -0.2, %v5264_v49 }
 0x38c   :  { %v2384_v61 = vadd.f32 %v2381_v3, %v2375_v7  ;;  %v3757_v34 = vsel %vm1929_vm13, 1.0, %v4193_v2  ;;  %v2093_v51 = vmul.f32 2.5, %v5376_v52  ;;  %v2094_v56 = vmul.f32 2.5, %v5380_v36 }
 0x38d   :  { %v2385_v38 = vadd.f32 %v2382_v25, %v2376_v37  ;;  %v2102_v53 = vmul.f32 2.5, %v2099_v55  ;;  %v2267_v28 = vmul.f32 1.25, %v5350_v40  ;;  %v2103_v9 = vmul.f32 2.5, %v2100_v23 }
 0x38e   :  { %v2096_v46 = vmul.f32 %v5331_v13, %v2093_v51  ;;  %v2268_v16 = vmul.f32 1.25, %v5353_v29  ;;  %v2273_v32 = vmul.f32 1.25, %v2099_v55  ;;  %v2097_v47 = vmul.f32 %v5339_v43, %v2094_v56 }
 0x38f   :  { %v4070_v6 = vpack.i.bf16 %v2385_v38, %v2384_v61  ;;  %v2105_v44 = vmul.f32 %v3756_v45, %v2102_v53  ;;  %v2270_v27 = vmul.f32 %v2267_v28, %v2087_v22  ;;  %v2106_v39 = vmul.f32 %v3757_v34, %v2103_v9 }
 0x390   :  { %v2271_v14 = vmul.f32 %v2268_v16, %v2088_v50  ;;  %v2274_v31 = vmul.f32 1.25, %v2100_v23  ;;  %v2387_v8 = vmul.f32 0.8333333, %v5336_v42  ;;  %v2388_v41 = vmul.f32 0.8333333, %v5343_v0 }
 0x391   :  { %4071 = vrot.lane.b32.xlu0 %v4070_v6, %s4194_s29  ;;  %v2108_v4 = vadd.f32 %v2105_v44, %v2096_v46  ;;  %v2393_v13 = vmul.f32 0.8333333, %v2099_v55  ;;  %v2394_v26 = vmul.f32 0.8333333, %v2100_v23  ;;  %v2109_v20 = vadd.f32 %v2106_v39, %v2097_v47 }
 0x392   :  { %v2390_v62 = vmul.f32 %v2387_v8, %v2264_v24  ;;  %vm1937_vm0 = vcmp.ge.f32.partialorder %v5251_v33, -0.2  ;;  %vm1938_vm14 = vcmp.ge.f32.partialorder %v5264_v49, -0.2  ;;  %v2391_v22 = vmul.f32 %v2388_v41, %v2265_v18 }
 0x393   :  { %v2276_v43 = vmul.f32 %v2273_v32, %v2108_v4  ;;  %vm1940_vm1 = vcmp.lt.f32.partialorder %v5251_v33, 0.2  ;;  %vm1941_vm15 = vcmp.lt.f32.partialorder %v5264_v49, 0.2  ;;  %v2277_v42 = vmul.f32 %v2274_v31, %v2109_v20 }
 0x394   :  { %vm1943_vm2 = vmand %vm1937_vm0, %vm1940_vm1  ;;  %v5399_v50 = vadd.f32 0.6, %v5251_v33  ;;  %v5402_v0 = vadd.f32 0.6, %v5264_v49  ;;  %v2120_v1 = vsub.f32 0.2, %v5251_v33 }
 0x395   :  { %v2279_v59 = vadd.f32 %v2276_v43, %v2270_v27  ;;  %vm1944_vm5 = vmand %vm1938_vm14, %vm1941_vm15  ;;  %v3759_v48 = vsel %vm1943_vm2, 1.0, %v4193_v2  ;;  %v2121_v15 = vsub.f32 0.2, %v5264_v49  ;;  %v2282_v10 = vmul.f32 1.25, %v5376_v52 }
 0x396   :  { %v2280_v19 = vadd.f32 %v2277_v42, %v2271_v14  ;;  %v3760_v57 = vsel %vm1944_vm5, 1.0, %v4193_v2  ;;  %v2114_v35 = vmul.f32 2.5, %v5399_v50  ;;  %v2115_v30 = vmul.f32 2.5, %v5402_v0 }
 0x397   :  { %v2396_v60 = vmul.f32 %v2393_v13, %v2279_v59  ;;  %v2123_v58 = vmul.f32 2.5, %v2120_v1  ;;  %v2124_v24 = vmul.f32 2.5, %v2121_v15  ;;  %v2283_v7 = vmul.f32 1.25, %v5380_v36 }
 0x398   :  { %v2397_v18 = vmul.f32 %v2394_v26, %v2280_v19  ;;  %v2117_v37 = vmul.f32 %v3756_v45, %v2114_v35  ;;  %v2118_v3 = vmul.f32 %v3757_v34, %v2115_v30  ;;  %v2285_v25 = vmul.f32 %v2282_v10, %v2108_v4  ;;  %v1823_v45 = vld [vmem:[%s6244_s7] sm:$0xff]  ;;  %v1824_v34 = vld [vmem:[%s6244_s7 + $0x8] sm:$0xff] }
 0x399   :  { %v2399_v55 = vadd.f32 %v2396_v60, %v2390_v62  ;;  %v2126_v61 = vmul.f32 %v3759_v48, %v2123_v58  ;;  %v2127_v51 = vmul.f32 %v3760_v57, %v2124_v24  ;;  %v2286_v23 = vmul.f32 %v2283_v7, %v2109_v20 }
 0x39a   :  { %v2400_v38 = vadd.f32 %v2397_v18, %v2391_v22  ;;  %v2288_v56 = vmul.f32 1.25, %v2120_v1  ;;  %v2289_v53 = vmul.f32 1.25, %v2121_v15  ;;  %v2402_v28 = vmul.f32 0.8333333, %v5350_v40 }
 0x39b   :  { %v2129_v46 = vadd.f32 %v2126_v61, %v2117_v37  ;;  %v2130_v9 = vadd.f32 %v2127_v51, %v2118_v3  ;;  %v2403_v16 = vmul.f32 0.8333333, %v5353_v29  ;;  %v2408_v32 = vmul.f32 0.8333333, %v2120_v1 }
 0x39c   :  { %v4075_v6 = vpack.i.bf16 %v2400_v38, %v2399_v55  ;;  %v2405_v47 = vmul.f32 %v2402_v28, %v2279_v59  ;;  %v2409_v44 = vmul.f32 0.8333333, %v2121_v15  ;;  %vm1952_vm6 = vcmp.ge.f32.partialorder %v5251_v33, 0.2 }
 0x39d   :  { %v2291_v27 = vmul.f32 %v2288_v56, %v2129_v46  ;;  %v2292_v40 = vmul.f32 %v2289_v53, %v2130_v9  ;;  %v2406_v39 = vmul.f32 %v2403_v16, %v2280_v19  ;;  %vm1953_vm9 = vcmp.ge.f32.partialorder %v5264_v49, 0.2 }
 0x39e   :  { %4076 = vrot.lane.b32.xlu1 %v4075_v6, %s4196_s14  ;;  %vm1955_vm7 = vcmp.lt.f32.partialorder %v5251_v33, 0.6  ;;  %vm1956_vm10 = vcmp.lt.f32.partialorder %v5264_v49, 0.6  ;;  %v5426_v29 = vadd.f32 0.2, %v5251_v33  ;;  %v3938_v14 = vpack.c.bf16 %v1824_v34, %v1823_v45 }
 0x39f   :  { %v2294_v31 = vadd.f32 %v2291_v27, %v2285_v25  ;;  %v2295_v8 = vadd.f32 %v2292_v40, %v2286_v23  ;;  %vm1958_vm8 = vmand %vm1952_vm6, %vm1955_vm7  ;;  %v5429_v4 = vadd.f32 0.2, %v5264_v49  ;;  %v2141_v41 = vsub.f32 0.6, %v5251_v33 }
 0x3a0   :  { %vm1959_vm11 = vmand %vm1953_vm9, %vm1956_vm10  ;;  %v3762_v13 = vsel %vm1958_vm8, 1.0, %v4193_v2  ;;  %v2135_v26 = vmul.f32 2.5, %v5426_v29  ;;  %v2142_v20 = vsub.f32 0.6, %v5264_v49  ;;  %v2297_v62 = vmul.f32 1.25, %v5399_v50  ;;  %3939 = vmatpush1.bf16.msra.mxu0 %v3938_v14 }
 0x3a1   :  { %v2411_v43 = vmul.f32 %v2408_v32, %v2294_v31  ;;  %v2412_v22 = vmul.f32 %v2409_v44, %v2295_v8  ;;  %v3763_v42 = vsel %vm1959_vm11, 1.0, %v4193_v2  ;;  %v2136_v1 = vmul.f32 2.5, %v5429_v4  ;;  %3940 = vmatprep.subr.bf16.mxu0 %v4201_v11 }
 0x3a2   :  { %v2138_v59 = vmul.f32 %v3759_v48, %v2135_v26  ;;  %v2144_v15 = vmul.f32 2.5, %v2141_v41  ;;  %v2145_v10 = vmul.f32 2.5, %v2142_v20  ;;  %v2298_v19 = vmul.f32 1.25, %v5402_v0 }
 0x3a3   :  { %v2414_v35 = vadd.f32 %v2411_v43, %v2405_v47  ;;  %v2415_v30 = vadd.f32 %v2412_v22, %v2406_v39  ;;  %v2139_v60 = vmul.f32 %v3760_v57, %v2136_v1  ;;  %v2300_v7 = vmul.f32 %v2297_v62, %v2129_v46 }
 0x3a4   :  { %v2147_v58 = vmul.f32 %v3762_v13, %v2144_v15  ;;  %v2148_v24 = vmul.f32 %v3763_v42, %v2145_v10  ;;  %v2301_v18 = vmul.f32 %v2298_v19, %v2130_v9  ;;  %v2303_v3 = vmul.f32 1.25, %v2141_v41 }
 0x3a5   :  { %v4080_v37 = vpack.i.bf16 %v2415_v30, %v2414_v35  ;;  %v2304_v25 = vmul.f32 1.25, %v2142_v20  ;;  %v2417_v55 = vmul.f32 0.8333333, %v5376_v52  ;;  %v2418_v48 = vmul.f32 0.8333333, %v5380_v36 }
 0x3a6   :  { %v2150_v61 = vadd.f32 %v2147_v58, %v2138_v59  ;;  %v2151_v51 = vadd.f32 %v2148_v24, %v2139_v60  ;;  %v2423_v23 = vmul.f32 0.8333333, %v2141_v41  ;;  %v2424_v56 = vmul.f32 0.8333333, %v2142_v20 }
 0x3a7   :  { %4081 = vrot.lane.b32.xlu0 %v4080_v37, %s4195_s30  ;;  %v2420_v38 = vmul.f32 %v2417_v55, %v2294_v31  ;;  %vm1968_vm12 = vcmp.ge.f32.partialorder %v5264_v49, 0.6  ;;  %vm1971_vm13 = vcmp.lt.f32.partialorder %v5264_v49, 1.0  ;;  %v5446_v28 = vadd.f32 -0.2, %v5251_v33 }
 0x3a8   :  { %v2306_v57 = vmul.f32 %v2303_v3, %v2150_v61  ;;  %v2307_v53 = vmul.f32 %v2304_v25, %v2151_v51  ;;  %vm1974_vm0 = vmand %vm1968_vm12, %vm1971_vm13  ;;  %v5449_v52 = vadd.f32 -0.2, %v5264_v49  ;;  %v2421_v46 = vmul.f32 %v2418_v48, %v2295_v8 }
 0x3a9   :  { %v3766_v36 = vsel %vm1974_vm0, 1.0, %v4193_v2  ;;  %v2162_v9 = vsub.f32 1.0, %v5251_v33  ;;  %v2163_v16 = vsub.f32 1.0, %v5264_v49  ;;  %v2156_v34 = vmul.f32 2.5, %v5446_v28 }
 0x3aa   :  { %v2309_v32 = vadd.f32 %v2306_v57, %v2300_v7  ;;  %v2310_v45 = vadd.f32 %v2307_v53, %v2301_v18  ;;  %v2157_v6 = vmul.f32 2.5, %v5449_v52  ;;  %v2312_v27 = vmul.f32 1.25, %v5426_v29 }
 0x3ab   :  { %v2165_v47 = vmul.f32 2.5, %v2162_v9  ;;  %v2166_v44 = vmul.f32 2.5, %v2163_v16  ;;  %v2313_v40 = vmul.f32 1.25, %v5429_v4  ;;  %v2159_v31 = vmul.f32 %v3762_v13, %v2156_v34 }
 0x3ac   :  { %v2426_v39 = vmul.f32 %v2423_v23, %v2309_v32  ;;  %v2427_v14 = vmul.f32 %v2424_v56, %v2310_v45  ;;  %v2160_v8 = vmul.f32 %v3763_v42, %v2157_v6  ;;  %v2315_v20 = vmul.f32 %v2312_v27, %v2150_v61  ;;  %v4192_v23 = vld [vmem:[%s6237_s0 + $0x10] sm:$0xff] }
 0x3ad   :  { %v2168_v41 = vmul.f32 %v5269_v63, %v2165_v47  ;;  %v2169_v26 = vmul.f32 %v3766_v36, %v2166_v44  ;;  %v2316_v62 = vmul.f32 %v2313_v40, %v2151_v51  ;;  %v2318_v1 = vmul.f32 1.25, %v2162_v9 }
 0x3ae   :  { %v2429_v43 = vadd.f32 %v2426_v39, %v2420_v38  ;;  %v2430_v22 = vadd.f32 %v2427_v14, %v2421_v46  ;;  %v2432_v59 = vmul.f32 0.8333333, %v5399_v50  ;;  %v2319_v19 = vmul.f32 1.25, %v2163_v16 }
 0x3af   :  { %v2171_v15 = vadd.f32 %v2168_v41, %v2159_v31  ;;  %v2172_v10 = vadd.f32 %v2169_v26, %v2160_v8  ;;  %v2433_v35 = vmul.f32 0.8333333, %v5402_v0  ;;  %v2438_v58 = vmul.f32 0.8333333, %v2162_v9 }
 0x3b0   :  { %v4085_v30 = vpack.i.bf16 %v2430_v22, %v2429_v43  ;;  %v2435_v60 = vmul.f32 %v2432_v59, %v2309_v32  ;;  %vm1983_vm14 = vcmp.ge.f32.partialorder %v5264_v49, 1.0  ;;  %v2439_v42 = vmul.f32 0.8333333, %v2163_v16 }
 0x3b1   :  { %v2321_v13 = vmul.f32 %v2318_v1, %v2171_v15  ;;  %v2322_v63 = vmul.f32 %v2319_v19, %v2172_v10  ;;  %vm1986_vm1 = vcmp.lt.f32.partialorder %v5264_v49, 1.4  ;;  %v2436_v24 = vmul.f32 %v2433_v35, %v2310_v45 }
 0x3b2   :  { %4086 = vrot.lane.b32.xlu1 %v4085_v30, %s4197_s15  ;;  %vm1989_vm15 = vmand %vm1983_vm14, %vm1986_vm1  ;;  %v5465_v50 = vadd.f32 -0.6, %v5264_v49  ;;  %v2184_v7 = vsub.f32 1.4, %v5264_v49  ;;  %v2327_v0 = vmul.f32 1.25, %v5446_v28  ;;  %v2333_v25 = vmul.f32 1.25, %v5273_v17 }
 0x3b3   :  { %v2324_v18 = vadd.f32 %v2321_v13, %v2315_v20  ;;  %v2325_v37 = vadd.f32 %v2322_v63, %v2316_v62  ;;  %v3769_v3 = vsel %vm1989_vm15, 1.0, %v4193_v2  ;;  %v2328_v51 = vmul.f32 1.25, %v5449_v52 }
 0x3b4   :  { %v2178_v55 = vmul.f32 2.5, %v5465_v50  ;;  %v2187_v61 = vmul.f32 2.5, %v2184_v7  ;;  %v2330_v48 = vmul.f32 %v2327_v0, %v2171_v15  ;;  %v5477_v38 = vadd.f32 %v4192_v23, %v5369_v21 }
 0x3b5   :  { %v2441_v56 = vmul.f32 %v2438_v58, %v2324_v18  ;;  %v2442_v57 = vmul.f32 %v2439_v42, %v2325_v37  ;;  %v2336_v53 = vmul.f32 %v2333_v25, %v5289_v5  ;;  %v2331_v16 = vmul.f32 %v2328_v51, %v2172_v10 }
 0x3b6   :  { %v2181_v46 = vmul.f32 %v3766_v36, %v2178_v55  ;;  %v2190_v9 = vmul.f32 %v3769_v3, %v2187_v61  ;;  %v2447_v32 = vmul.f32 0.8333333, %v5426_v29  ;;  %v2453_v47 = vmul.f32 0.8333333, %v5273_v17 }
 0x3b7   :  { %v2444_v45 = vadd.f32 %v2441_v56, %v2435_v60  ;;  %v2445_v34 = vadd.f32 %v2442_v57, %v2436_v24  ;;  %v2339_v6 = vadd.f32 %v2336_v53, %v2330_v48  ;;  %v2334_v27 = vmul.f32 1.25, %v2184_v7 }
 0x3b8   :  { %v2193_v44 = vadd.f32 %v2190_v9, %v2181_v46  ;;  %v2448_v40 = vmul.f32 0.8333333, %v5429_v4  ;;  %v2450_v21 = vmul.f32 %v2447_v32, %v2324_v18  ;;  %vm1998_vm2 = vcmp.ge.f32.partialorder %v5264_v49, 1.4 }
 0x3b9   :  { %v4090_v39 = vpack.i.bf16 %v2445_v34, %v2444_v45  ;;  %v2456_v14 = vmul.f32 %v2453_v47, %v2339_v6  ;;  %vm2001_vm5 = vcmp.lt.f32.partialorder %v5264_v49, 1.8  ;;  %v5486_v29 = vadd.f32 -1.0, %v5264_v49 }
 0x3ba   :  { %v2337_v5 = vmul.f32 %v2334_v27, %v2193_v44  ;;  %v2451_v36 = vmul.f32 %v2448_v40, %v2325_v37  ;;  %vm2004_vm6 = vmand %vm1998_vm2, %vm2001_vm5  ;;  %v2205_v31 = vsub.f32 1.8, %v5264_v49  ;;  %v2454_v17 = vmul.f32 0.8333333, %v2184_v7 }
 0x3bb   :  { %4091 = vrot.lane.b32.xlu0 %v4090_v39, %s4198_s16  ;;  %v2459_v8 = vadd.f32 %v2456_v14, %v2450_v21  ;;  %v5491_v4 = vsel %vm2004_vm6, 1.0, %v4193_v2  ;;  %v2343_v41 = vmul.f32 1.25, %v5465_v50  ;;  %v2199_v20 = vmul.f32 2.5, %v5486_v29 }
 0x3bc   :  { %v2340_v26 = vadd.f32 %v2337_v5, %v2331_v16  ;;  %v2208_v62 = vmul.f32 2.5, %v2205_v31  ;;  %v2462_v43 = vmul.f32 0.8333333, %v5446_v28  ;;  %v2349_v1 = vmul.f32 1.25, %v2205_v31 }
 0x3bd   :  { %v2346_v22 = vmul.f32 %v2343_v41, %v2193_v44  ;;  %v2463_v59 = vmul.f32 0.8333333, %v5449_v52  ;;  %v2468_v15 = vmul.f32 0.8333333, %v5279_v12  ;;  %v2202_v19 = vmul.f32 %v3769_v3, %v2199_v20 }
 0x3be   :  { %v2457_v10 = vmul.f32 %v2454_v17, %v2340_v26  ;;  %v2211_v35 = vmul.f32 %v5491_v4, %v2208_v62  ;;  %v2469_v30 = vmul.f32 0.8333333, %v2205_v31  ;;  %v2465_v60 = vmul.f32 %v2462_v43, %v2339_v6 }
 0x3bf   :  { %vm1864_vm9 = vcmp.ge.f32.partialorder %v5477_v38, -2.2  ;;  %vm1867_vm7 = vcmp.lt.f32.partialorder %v5477_v38, -1.8  ;;  %vm1879_vm10 = vcmp.ge.f32.partialorder %v5477_v38, -1.8  ;;  %v2466_v12 = vmul.f32 %v2463_v59, %v2340_v26 }
 0x3c0   :  { %v2460_v58 = vadd.f32 %v2457_v10, %v2451_v36  ;;  %v5502_v28 = vadd.f32 %v2211_v35, %v2202_v19  ;;  %vm1870_vm8 = vmand %vm1864_vm9, %vm1867_vm7  ;;  %vm1882_vm11 = vcmp.lt.f32.partialorder %v5477_v38, -1.4  ;;  %vm1894_vm12 = vcmp.ge.f32.partialorder %v5477_v38, -1.4 }
 0x3c1   :  { %v2471_v52 = vmul.f32 %v2468_v15, %v5302_v54  ;;  %vm1885_vm13 = vmand %vm1879_vm10, %vm1882_vm11  ;;  %vm1897_vm0 = vcmp.lt.f32.partialorder %v5477_v38, -1.0  ;;  %vm1909_vm14 = vcmp.ge.f32.partialorder %v5477_v38, -1.0  ;;  %v3746_v42 = vsel %vm1870_vm8, 1.0, %v4193_v2 }
 0x3c2   :  { %v4095_v13 = vpack.i.bf16 %v2460_v58, %v2459_v8  ;;  %v2352_v63 = vmul.f32 %v2349_v1, %v5502_v28  ;;  %vm1900_vm1 = vmand %vm1894_vm12, %vm1897_vm0  ;;  %vm1912_vm15 = vcmp.lt.f32.partialorder %v5477_v38, -0.6  ;;  %v3749_v24 = vsel %vm1885_vm13, 1.0, %v4193_v2 }
 0x3c3   :  { %vm1915_vm2 = vmand %vm1909_vm14, %vm1912_vm15  ;;  %v3779_v7 = vadd.f32 2.2, %v5477_v38  ;;  %v2038_v54 = vsub.f32 -1.4, %v5477_v38  ;;  %v2059_v0 = vsub.f32 -1.0, %v5477_v38  ;;  %v3752_v37 = vsel %vm1900_vm1, 1.0, %v4193_v2 }
 0x3c4   :  { %4096 = vrot.lane.b32.xlu1 %v4095_v13, %s4199_s19  ;;  %v5517_v18 = vadd.f32 %v2352_v63, %v2346_v22  ;;  %v3782_v3 = vadd.f32 1.8, %v5477_v38  ;;  %v5522_v25 = vadd.f32 1.4, %v5477_v38  ;;  %v2080_v48 = vsub.f32 -0.6, %v5477_v38 }
 0x3c5   :  { %v2032_v55 = vmul.f32 2.5, %v3779_v7  ;;  %v2041_v61 = vmul.f32 2.5, %v2038_v54  ;;  %v2062_v51 = vmul.f32 2.5, %v2059_v0  ;;  %v3755_v56 = vsel %vm1915_vm2, 1.0, %v4193_v2 }
 0x3c6   :  { %v2472_v23 = vmul.f32 %v2469_v30, %v5517_v18  ;;  %v2053_v57 = vmul.f32 2.5, %v3782_v3  ;;  %v2074_v53 = vmul.f32 2.5, %v5522_v25  ;;  %v2083_v32 = vmul.f32 2.5, %v2080_v48 }
 0x3c7   :  { %v2035_v46 = vmul.f32 %v3746_v42, %v2032_v55  ;;  %v2044_v9 = vmul.f32 %v3749_v24, %v2041_v61  ;;  %v2065_v16 = vmul.f32 %v3752_v37, %v2062_v51  ;;  %v2474_v45 = vadd.f32 %v2471_v52, %v2465_v60 }
 0x3c8   :  { %v2475_v34 = vadd.f32 %v2472_v23, %v2466_v12  ;;  %v2056_v6 = vmul.f32 %v3749_v24, %v2053_v57  ;;  %v2077_v47 = vmul.f32 %v3752_v37, %v2074_v53  ;;  %v2086_v27 = vmul.f32 %v3755_v56, %v2083_v32 }
 0x3c9   :  { %v2047_v44 = vadd.f32 %v2044_v9, %v2035_v46  ;;  %v2239_v40 = vmul.f32 1.25, %v3779_v7  ;;  %v2245_v21 = vmul.f32 1.25, %v2059_v0  ;;  %v2254_v5 = vmul.f32 1.25, %v3782_v3 }
 0x3ca   :  { %v4100_v39 = vpack.i.bf16 %v2475_v34, %v2474_v45  ;;  %v2068_v14 = vadd.f32 %v2065_v16, %v2056_v6  ;;  %v2260_v36 = vmul.f32 1.25, %v2080_v48  ;;  %v2089_v31 = vadd.f32 %v2086_v27, %v2077_v47 }
 0x3cb   :  { %v2242_v17 = vmul.f32 %v2239_v40, %v2047_v44  ;;  %vm1924_vm5 = vcmp.ge.f32.partialorder %v5477_v38, -0.6  ;;  %vm1927_vm6 = vcmp.lt.f32.partialorder %v5477_v38, -0.2  ;;  %v5532_v26 = vadd.f32 1.0, %v5477_v38 }
 0x3cc   :  { %4101 = vrot.lane.b32.xlu0 %v4100_v39, %s4200_s20  ;;  %v2248_v8 = vmul.f32 %v2245_v21, %v2068_v14  ;;  %v2257_v41 = vmul.f32 %v2254_v5, %v2068_v14  ;;  %vm1930_vm9 = vmand %vm1924_vm5, %vm1927_vm6  ;;  %v2101_v20 = vsub.f32 -0.2, %v5477_v38  ;;  %v2263_v62 = vmul.f32 %v2260_v36, %v2089_v31 }
 0x3cd   :  { %v3758_v43 = vsel %vm1930_vm9, 1.0, %v4193_v2  ;;  %v2374_v1 = vmul.f32 0.8333333, %v3779_v7  ;;  %v2095_v59 = vmul.f32 2.5, %v5532_v26  ;;  %v2380_v19 = vmul.f32 0.8333333, %v2080_v48 }
 0x3ce   :  { %v2251_v22 = vadd.f32 %v2248_v8, %v2242_v17  ;;  %v2104_v15 = vmul.f32 2.5, %v2101_v20  ;;  %v2266_v10 = vadd.f32 %v2263_v62, %v2257_v41  ;;  %v2269_v35 = vmul.f32 1.25, %v5522_v25 }
 0x3cf   :  { %vm1939_vm7 = vcmp.ge.f32.partialorder %v5477_v38, -0.2  ;;  %v2098_v60 = vmul.f32 %v3755_v56, %v2095_v59  ;;  %vm1942_vm10 = vcmp.lt.f32.partialorder %v5477_v38, 0.2  ;;  %v5541_v52 = vadd.f32 0.6, %v5477_v38 }
 0x3d0   :  { %v2377_v30 = vmul.f32 %v2374_v1, %v2251_v22  ;;  %v2107_v58 = vmul.f32 %v3758_v43, %v2104_v15  ;;  %v2383_v12 = vmul.f32 %v2380_v19, %v2266_v10  ;;  %vm1945_vm8 = vmand %vm1939_vm7, %vm1942_vm10  ;;  %v2122_v13 = vsub.f32 0.2, %v5477_v38 }
 0x3d1   :  { %v2272_v42 = vmul.f32 %v2269_v35, %v2089_v31  ;;  %v2275_v24 = vmul.f32 1.25, %v2101_v20  ;;  %v3761_v7 = vsel %vm1945_vm8, 1.0, %v4193_v2  ;;  %v2389_v0 = vmul.f32 0.8333333, %v3782_v3 }
 0x3d2   :  { %v2110_v63 = vadd.f32 %v2107_v58, %v2098_v60  ;;  %v2386_v54 = vadd.f32 %v2383_v12, %v2377_v30  ;;  %v2116_v37 = vmul.f32 2.5, %v5541_v52  ;;  %v2125_v55 = vmul.f32 2.5, %v2122_v13 }
 0x3d3   :  { %v2395_v51 = vmul.f32 0.8333333, %v2101_v20  ;;  %v2284_v48 = vmul.f32 1.25, %v5532_v26  ;;  %vm1954_vm11 = vcmp.ge.f32.partialorder %v5477_v38, 0.2  ;;  %v2392_v3 = vmul.f32 %v2389_v0, %v2266_v10 }
 0x3d4   :  { %v2278_v61 = vmul.f32 %v2275_v24, %v2110_v63  ;;  %2499 = vrot.lane.b32.xlu1 %v2386_v54, %s4194_s29  ;;  %v2119_v23 = vmul.f32 %v3758_v43, %v2116_v37  ;;  %v2128_v56 = vmul.f32 %v3761_v7, %v2125_v55  ;;  %vm1957_vm12 = vcmp.lt.f32.partialorder %v5477_v38, 0.6 }
 0x3d5   :  { %v5551_v57 = vadd.f32 0.2, %v5477_v38  ;;  %v2290_v46 = vmul.f32 1.25, %v2122_v13  ;;  %vm1960_vm13 = vmand %vm1954_vm11, %vm1957_vm12  ;;  %v2143_v9 = vsub.f32 0.6, %v5477_v38  ;;  %v2287_v32 = vmul.f32 %v2284_v48, %v2110_v63 }
 0x3d6   :  { %v2281_v53 = vadd.f32 %v2278_v61, %v2272_v42  ;;  %v2131_v16 = vadd.f32 %v2128_v56, %v2119_v23  ;;  %v3764_v45 = vsel %vm1960_vm13, 1.0, %v4193_v2  ;;  %v2404_v47 = vmul.f32 0.8333333, %v5522_v25 }
 0x3d7   :  { %v2137_v34 = vmul.f32 2.5, %v5551_v57  ;;  %v2146_v44 = vmul.f32 2.5, %v2143_v9  ;;  %vm1969_vm0 = vcmp.ge.f32.partialorder %v5477_v38, 0.6  ;;  %v2410_v40 = vmul.f32 0.8333333, %v2122_v13 }
 0x3d8   :  { %v2398_v6 = vmul.f32 %v2395_v51, %v2281_v53  ;;  %v2293_v27 = vmul.f32 %v2290_v46, %v2131_v16  ;;  %v2299_v39 = vmul.f32 1.25, %v5541_v52  ;;  %vm1972_vm14 = vcmp.lt.f32.partialorder %v5477_v38, 1.0 }
 0x3d9   :  { %v2140_v21 = vmul.f32 %v3761_v7, %v2137_v34  ;;  %v2149_v5 = vmul.f32 %v3764_v45, %v2146_v44  ;;  %v5561_v36 = vadd.f32 -0.2, %v5477_v38  ;;  %v2407_v17 = vmul.f32 %v2404_v47, %v2281_v53  ;;  %vm1975_vm1 = vmand %vm1969_vm0, %vm1972_vm14 }
 0x3da   :  { %v2401_v14 = vadd.f32 %v2398_v6, %v2392_v3  ;;  %v2296_v31 = vadd.f32 %v2293_v27, %v2287_v32  ;;  %v2305_v8 = vmul.f32 1.25, %v2143_v9  ;;  %v2164_v25 = vsub.f32 1.0, %v5477_v38  ;;  %v1825_v27 = vld [vmem:[%s6244_s7 + $0x10] sm:$0xff] }
 0x3db   :  { %v2152_v41 = vadd.f32 %v2149_v5, %v2140_v21  ;;  %v2302_v20 = vmul.f32 %v2299_v39, %v2131_v16  ;;  %v3767_v62 = vsel %vm1975_vm1, 1.0, %v4193_v2  ;;  %v2158_v43 = vmul.f32 2.5, %v5561_v36 }
 0x3dc   :  { %2511 = vrot.lane.b32.xlu0 %v2401_v14, %s4196_s14  ;;  %v2413_v22 = vmul.f32 %v2410_v40, %v2296_v31  ;;  %v2419_v1 = vmul.f32 0.8333333, %v5532_v26  ;;  %v2167_v59 = vmul.f32 2.5, %v2164_v25  ;;  %vm1984_vm15 = vcmp.ge.f32.partialorder %v5477_v38, 1.0  ;;  %v1826_v40 = vld [vmem:[%s6244_s7 + $0x18] sm:$0xff] }
 0x3dd   :  { %v2308_v15 = vmul.f32 %v2305_v8, %v2152_v41  ;;  %v2425_v10 = vmul.f32 0.8333333, %v2143_v9  ;;  %v2161_v19 = vmul.f32 %v3764_v45, %v2158_v43  ;;  %v2314_v35 = vmul.f32 1.25, %v5551_v57 }
 0x3de   :  { %v2416_v30 = vadd.f32 %v2413_v22, %v2407_v17  ;;  %v2170_v60 = vmul.f32 %v3767_v62, %v2167_v59  ;;  %vm1987_vm2 = vcmp.lt.f32.partialorder %v5477_v38, 1.4  ;;  %v5572_v58 = vadd.f32 -0.6, %v5477_v38 }
 0x3df   :  { %v2311_v12 = vadd.f32 %v2308_v15, %v2302_v20  ;;  %v2422_v13 = vmul.f32 %v2419_v1, %v2296_v31  ;;  %v2320_v63 = vmul.f32 1.25, %v2164_v25  ;;  %vm1990_vm5 = vmand %vm1984_vm15, %vm1987_vm2  ;;  %v2185_v26 = vsub.f32 1.4, %v5477_v38 }
 0x3e0   :  { %2523 = vrot.lane.b32.xlu1 %v2416_v30, %s4195_s30  ;;  %v2173_v42 = vadd.f32 %v2170_v60, %v2161_v19  ;;  %v2317_v24 = vmul.f32 %v2314_v35, %v2152_v41  ;;  %v3770_v7 = vsel %vm1990_vm5, 1.0, %v4193_v2  ;;  %v2179_v54 = vmul.f32 2.5, %v5572_v58  ;;  %v1828_v41 = vld [vmem:[%s6244_s7 + $0x28] sm:$0xff]  ;;  %v1829_v30 = vld [vmem:[%s6244_s7 + $0x30] sm:$0xff]  ;;  %v1830_v60 = vld [vmem:[%s6244_s7 + $0x38] sm:$0xff] }
 0x3e1   :  { %v2428_v0 = vmul.f32 %v2425_v10, %v2311_v12  ;;  %v2434_v37 = vmul.f32 0.8333333, %v5541_v52  ;;  %v2188_v55 = vmul.f32 2.5, %v2185_v26  ;;  %vm1999_vm6 = vcmp.ge.f32.partialorder %v5477_v38, 1.4 }
 0x3e2   :  { %v2323_v61 = vmul.f32 %v2320_v63, %v2173_v42  ;;  %v2440_v51 = vmul.f32 0.8333333, %v2164_v25  ;;  %v2182_v48 = vmul.f32 %v3767_v62, %v2179_v54  ;;  %v2329_v23 = vmul.f32 1.25, %v5561_v36  ;;  %v1827_v25 = vld [vmem:[%s6244_s7 + $0x20] sm:$0xff]  ;;  %v1832_v54 = vld [vmem:[%s6244_s7 + $0x48] sm:$0xff] }
 0x3e3   :  { %v2431_v56 = vadd.f32 %v2428_v0, %v2422_v13  ;;  %v2191_v53 = vmul.f32 %v3770_v7, %v2188_v55  ;;  %vm2002_vm9 = vcmp.lt.f32.partialorder %v5477_v38, 1.8  ;;  %v5583_v3 = vadd.f32 -1.0, %v5477_v38 }
 0x3e4   :  { %v2326_v46 = vadd.f32 %v2323_v61, %v2317_v24  ;;  %v2437_v9 = vmul.f32 %v2434_v37, %v2311_v12  ;;  %v2335_v16 = vmul.f32 1.25, %v2185_v26  ;;  %vm2005_vm7 = vmand %vm1999_vm6, %vm2002_vm9  ;;  %v2206_v52 = vsub.f32 1.8, %v5477_v38 }
 0x3e5   :  { %2535 = vrot.lane.b32.xlu0 %v2431_v56, %s4197_s15  ;;  %v2194_v32 = vadd.f32 %v2191_v53, %v2182_v48  ;;  %v2332_v45 = vmul.f32 %v2329_v23, %v2173_v42  ;;  %v5588_v34 = vsel %vm2005_vm7, 1.0, %v4193_v2  ;;  %v2200_v6 = vmul.f32 2.5, %v5583_v3 }
 0x3e6   :  { %v2443_v47 = vmul.f32 %v2440_v51, %v2326_v46  ;;  %v2209_v44 = vmul.f32 2.5, %v2206_v52  ;;  %v2449_v39 = vmul.f32 0.8333333, %v5551_v57  ;;  %v2455_v31 = vmul.f32 0.8333333, %v2185_v26 }
 0x3e7   :  { %v2338_v21 = vmul.f32 %v2335_v16, %v2194_v32  ;;  %v2203_v14 = vmul.f32 %v3770_v7, %v2200_v6  ;;  %v2344_v8 = vmul.f32 1.25, %v5572_v58  ;;  %v3806_v43 = vadd.f32 -1.4, %v5477_v38 }
 0x3e8   :  { %v2446_v5 = vadd.f32 %v2443_v47, %v2437_v9  ;;  %v2212_v17 = vmul.f32 %v5588_v34, %v2209_v44  ;;  %v2452_v62 = vmul.f32 %v2449_v39, %v2326_v46  ;;  %v3941_v57 = vpack.c.bf16 %v1826_v40, %v1825_v27  ;;  %v1836_v39 = vld [vmem:[%s6244_s7 + $0x68] sm:$0xff] }
 0x3e9   :  { %v2341_v20 = vadd.f32 %v2338_v21, %v2332_v45  ;;  %v2347_v1 = vmul.f32 %v2344_v8, %v2194_v32  ;;  %v2350_v59 = vmul.f32 1.25, %v2206_v52  ;;  %v3944_v10 = vpack.c.bf16 %v1828_v41, %v1827_v25  ;;  %v1835_v21 = vld [vmem:[%s6244_s7 + $0x60] sm:$0xff] }
 0x3ea   :  { %2547 = vrot.lane.b32.xlu1 %v2446_v5, %s4198_s16  ;;  %v2215_v22 = vadd.f32 %v2212_v17, %v2203_v14  ;;  %3942 = vmatpush1.bf16.msra.mxu0 %v3941_v57  ;;  %v2464_v35 = vmul.f32 0.8333333, %v5561_v36  ;;  %v2221_v13 = vmul.f32 2.5, %v3806_v43  ;;  %v2470_v63 = vmul.f32 0.8333333, %v2206_v52  ;;  %v1831_v36 = vld [vmem:[%s6244_s7 + $0x40] sm:$0xff] }
 0x3eb   :  { %v2458_v15 = vmul.f32 %v2455_v31, %v2341_v20  ;;  %3943 = vmatprep.subr.bf16.mxu0 %v4201_v11  ;;  %vm2013_vm10 = vcmp.ge.f32.partialorder %v5264_v49, 1.8  ;;  %vm2016_vm8 = vcmp.lt.f32.partialorder %v5264_v49, 2.2  ;;  %v3805_v24 = vadd.f32 -1.4, %v5264_v49 }
 0x3ec   :  { %v2353_v19 = vmul.f32 %v2350_v59, %v2215_v22  ;;  %v2467_v42 = vmul.f32 %v2464_v35, %v2341_v20  ;;  %v3947_v7 = vpack.c.bf16 %v1830_v60, %v1829_v30  ;;  %vm2019_vm11 = vmand %vm2013_vm10, %vm2016_vm8  ;;  %v2226_v0 = vsub.f32 2.2, %v5264_v49  ;;  %v1837_v20 = vld [vmem:[%s6244_s7 + $0x70] sm:$0xff] }
 0x3ed   :  { %v2461_v12 = vadd.f32 %v2458_v15, %v2452_v62  ;;  %v2358_v37 = vmul.f32 1.25, %v5486_v29  ;;  %v2478_v55 = vmul.f32 0.8333333, %v5465_v50  ;;  %v3775_v51 = vsel %vm2019_vm11, 1.0, %v4193_v2  ;;  %v1838_v62 = vld [vmem:[%s6244_s7 + $0x78] sm:$0xff]  ;;  %v1839_v15 = vld [vmem:[%s6244_s7 + $0x80] sm:$0xff] }
 0x3ee   :  { %v2356_v26 = vadd.f32 %v2353_v19, %v2347_v1  ;;  %3945 = vmatpush1.bf16.msra.mxu0 %v3944_v10  ;;  %v2220_v48 = vmul.f32 2.5, %v3805_v24  ;;  %vm2014_vm12 = vcmp.ge.f32.partialorder %v5477_v38, 1.8  ;;  %v2229_v23 = vmul.f32 2.5, %v2226_v0  ;;  %v1840_v10 = vld [vmem:[%s6244_s7 + $0x88] sm:$0xff] }
 0x3ef   :  { %2559 = vrot.lane.b32.xlu0 %v2461_v12, %s4199_s19  ;;  %3946 = vmatprep.subr.bf16.mxu0 %v4201_v11  ;;  %v2361_v56 = vmul.f32 %v2358_v37, %v5502_v28  ;;  %v2481_v53 = vmul.f32 %v2478_v55, %v5517_v18  ;;  %v2359_v46 = vmul.f32 1.25, %v5583_v3  ;;  %v3950_v16 = vpack.c.bf16 %v1832_v54, %v1831_v36  ;;  %v1834_v18 = vld [vmem:[%s6244_s7 + $0x58] sm:$0xff] }
 0x3f0   :  { %v2473_v61 = vmul.f32 %v2470_v63, %v2356_v26  ;;  %v2223_v29 = vmul.f32 %v5491_v4, %v2220_v48  ;;  %vm2017_vm13 = vcmp.lt.f32.partialorder %v5477_v38, 2.2  ;;  %v2232_v50 = vmul.f32 %v3775_v51, %v2229_v23  ;;  %v1833_v4 = vld [vmem:[%s6244_s7 + $0x50] sm:$0xff] }
 0x3f1   :  { %vm2020_vm0 = vmand %vm2014_vm12, %vm2017_vm13  ;;  %v2227_v52 = vsub.f32 2.2, %v5477_v38  ;;  %v2362_v32 = vmul.f32 %v2359_v46, %v2215_v22  ;;  %v2479_v45 = vmul.f32 0.8333333, %v5572_v58  ;;  %v2224_v28 = vmul.f32 %v5588_v34, %v2221_v13 }
 0x3f2   :  { %v2476_v9 = vadd.f32 %v2473_v61, %v2467_v42  ;;  %3948 = vmatpush1.bf16.msra.mxu0 %v3947_v7  ;;  %v3776_v3 = vsel %vm2020_vm0, 1.0, %v4193_v2  ;;  %v2235_v6 = vadd.f32 %v2232_v50, %v2223_v29  ;;  %v2364_v47 = vmul.f32 1.25, %v2226_v0 }
 0x3f3   :  { %3949 = vmatprep.subr.bf16.mxu0 %v4201_v11  ;;  %v2230_v44 = vmul.f32 2.5, %v2227_v52  ;;  %v2482_v58 = vmul.f32 %v2479_v45, %v2356_v26  ;;  %v3953_v34 = vpack.c.bf16 %v1834_v18, %v1833_v4  ;;  %v2484_v5 = vmul.f32 0.8333333, %v2226_v0 }
 0x3f4   :  { %2571 = vrot.lane.b32.xlu1 %v2476_v9, %s4200_s20  ;;  %v2367_v27 = vmul.f32 %v2364_v47, %v2235_v6  ;;  %v2365_v17 = vmul.f32 1.25, %v2227_v52  ;;  %v3956_v8 = vpack.c.bf16 %v1836_v39, %v1835_v21  ;;  %v2485_v22 = vmul.f32 0.8333333, %v2227_v52 }
 0x3f5   :  { %v2233_v40 = vmul.f32 %v3776_v3, %v2230_v44  ;;  %v3959_v1 = vpack.c.bf16 %v1838_v62, %v1837_v20  ;;  %v3962_v35 = vpack.c.bf16 %v1840_v10, %v1839_v15  ;;  %v3741_v30 = vmul.f32 -1.442695, %v5251_v33 }
 0x3f6   :  { %3951 = vmatpush1.bf16.msra.mxu0 %v3950_v16  ;;  %v2370_v14 = vadd.f32 %v2367_v27, %v2361_v56  ;;  %v3742_v60 = vmul.f32 -1.442695, %v5264_v49  ;;  %v3743_v46 = vmul.f32 -1.442695, %v5477_v38  ;;  %vm6271_vm14 = vcmask 392192  }
 0x3f7   :  { %3952 = vmatprep.subr.bf16.mxu0 %v4201_v11  ;;  %v2236_v31 = vadd.f32 %v2233_v40, %v2224_v28  ;;  %4164 = vpow2.f32 %v3741_v30  ;;  %vm6272_vm1 = vcmask 523264   ;;  %vm6273_vm15 = vmmov %vm6271_vm14  ;;  %vm6274_vm2 = vcmask 654336  }
 0x3f8   :  { %v2487_v25 = vmul.f32 %v2484_v5, %v2370_v14  ;;  %4166 = vpow2.f32 %v3742_v60  ;;  %vm6275_vm5 = vmmov %vm6272_vm1  ;;  %vm6276_vm6 = vcmask 785408   ;;  %vm6277_vm9 = vcmask 916480  }
 0x3f9   :  { %v2368_v41 = vmul.f32 %v2365_v17, %v2236_v31  ;;  %vm6278_vm7 = vmmov %vm6274_vm2 }
 0x3fa   :  { %3954 = vmatpush1.bf16.msra.mxu0 %v3953_v34  ;;  %v5663_v43 = vadd.f32 %v2487_v25, %v2481_v53  ;;  %vm6279_vm10 = vmmov %vm6276_vm6 }
 0x3fb   :  { %3955 = vmatprep.subr.bf16.mxu0 %v4201_v11  ;;  %v2371_v57 = vadd.f32 %v2368_v41, %v2362_v32  ;;  %vm6280_vm8 = vmmov %vm6277_vm9 }
 0x3fc   :  { %vm6281_vm11 = vmmov %vm6271_vm14 }
 0x3fd   :  { %v2488_v59 = vmul.f32 %v2485_v22, %v2371_v57  ;;  %vm6282_vm12 = vmmov %vm6272_vm1 }
 0x3fe   :  { %3957 = vmatpush1.bf16.msra.mxu0 %v3956_v8  ;;  %vm6283_vm13 = vmmov %vm6274_vm2 }
 0x3ff   :  { %3958 = vmatprep.subr.bf16.mxu0 %v4201_v11  ;;  %v2491_v19 = vadd.f32 %v2488_v59, %v2482_v58  ;;  %vm6284_vm0 = vmmov %vm6276_vm6 }
 0x401   :  { %v4165_v12 = vpop.eup %4164 }
 0x402   :  { %3960 = vmatpush1.bf16.msra.mxu0 %v3959_v1  ;;  %v1850_v13 = vadd.f32 1.0, %v4165_v12  ;;  %v4167_v63 = vpop.eup %4166 }
 0x403   :  { %3961 = vmatprep.subr.bf16.mxu0 %v4201_v11  ;;  %v1851_v26 = vadd.f32 1.0, %v4167_v63  ;;  %v4072_v42 = vpop.permute.xlu0 %4071 }
 0x404   :  { %4168 = vrcp.f32 %v1850_v13  ;;  %v4073_v54 = vunpack.i.l.bf16 %v4072_v42  ;;  %v4074_v51 = vunpack.i.h.bf16 %v4072_v42 }
 0x405   :  { %4170 = vrcp.f32 %v1851_v26  ;;  %v5706_v26 = vld [vmem:[%s6245_s8] ss:$0 sm:$0xff] }
 0x406   :  { %3963 = vmatpush1.bf16.msra.mxu0 %v3962_v35  ;;  %4172 = vpow2.f32 %v3743_v46 }
 0x40e   :  { %v4169_v24 = vpop.eup %4168 }
 0x40f   :  { %v1859_v0 = vmul.f32 %v4169_v24, %v5251_v33  ;;  %v4171_v55 = vpop.eup %4170 }
 0x410   :  { %v4077_v36 = vpop.permute.xlu1 %4076  ;;  %v1860_v53 = vmul.f32 %v4171_v55, %v5264_v49  ;;  %v4173_v8 = vpop.eup %4172 }
 0x411   :  { %v4078_v61 = vunpack.i.l.bf16 %v4077_v36  ;;  %v2576_v48 = vsel %vm800_vm3, %v1859_v0, %v4073_v54  ;;  %v4079_v9 = vunpack.i.h.bf16 %v4077_v36  ;;  %v1852_v41 = vadd.f32 1.0, %v4173_v8  ;;  %v5711_v36 = vld [vmem:[%s6246_s9] ss:$0 sm:$0xff] }
 0x412   :  { %v2577_v50 = vsel %vm800_vm3, %v1860_v53, %v4074_v51 }
 0x413   :  { %v2579_v16 = vsel %vm804_vm4, %v2576_v48, %v4078_v61  ;;  %v2580_v4 = vsel %vm804_vm4, %v2577_v50, %v4079_v9  ;;  %4174 = vrcp.f32 %v1852_v41 }
 0x419   :  { %v4082_v7 = vpop.permute.xlu0 %4081 }
 0x41a   :  { %v4083_v23 = vunpack.i.l.bf16 %v4082_v7  ;;  %v4084_v52 = vunpack.i.h.bf16 %v4082_v7 }
 0x41c   :  { %v2582_v32 = vsel %vm6271_vm14, %v2579_v16, %v4083_v23  ;;  %v2583_v47 = vsel %vm6273_vm15, %v2580_v4, %v4084_v52  ;;  %vm6285_vm14 = vmmov %vm6280_vm8 }
 0x41d   :  { %v4175_v57 = vpop.eup %4174 }
 0x41e   :  { %v1861_v22 = vmul.f32 %v4175_v57, %v5477_v38 }
 0x424   :  { %v4087_v37 = vpop.permute.xlu1 %4086 }
 0x425   :  { %v4088_v29 = vunpack.i.l.bf16 %v4087_v37  ;;  %v4089_v18 = vunpack.i.h.bf16 %v4087_v37 }
 0x427   :  { %v2585_v3 = vsel %vm6272_vm1, %v2582_v32, %v4088_v29  ;;  %v2586_v40 = vsel %vm6275_vm5, %v2583_v47, %v4089_v18 }
 0x42d   :  { %v4092_v56 = vpop.permute.xlu0 %4091 }
 0x42e   :  { %v4093_v45 = vunpack.i.l.bf16 %v4092_v56  ;;  %v4094_v44 = vunpack.i.h.bf16 %v4092_v56 }
 0x430   :  { %v2588_v58 = vsel %vm6274_vm2, %v2585_v3, %v4093_v45  ;;  %v2589_v31 = vsel %vm6278_vm7, %v2586_v40, %v4094_v44 }
 0x436   :  { %v4097_v28 = vpop.permute.xlu1 %4096 }
 0x437   :  { %v4098_v6 = vunpack.i.l.bf16 %v4097_v28  ;;  %v4099_v21 = vunpack.i.h.bf16 %v4097_v28 }
 0x439   :  { %v2591_v39 = vsel %vm6276_vm6, %v2588_v58, %v4098_v6  ;;  %v2592_v17 = vsel %vm6279_vm10, %v2589_v31, %v4099_v21 }
 0x43e   :  { %v4102_v34 = vpop.permute.xlu0 %4101 }
 0x43f   :  { %v4103_v27 = vunpack.i.l.bf16 %v4102_v34  ;;  %v4104_v14 = vunpack.i.h.bf16 %v4102_v34 }
 0x441   :  { %v2594_v5 = vsel %vm6277_vm9, %v2591_v39, %v4103_v27  ;;  %v2595_v25 = vsel %vm6280_vm8, %v2592_v17, %v4104_v14 }
 0x442   :  { %2671 = vmatmul.mubr.f32.vlgmr.msra.gmra.mrb[6].mxu0 %v2594_v5 }
 0x443   :  { %3808 = vmatprep.mubr.msk.f32.mxu0 %vm800_vm3, %v5663_v43 }
 0x446   :  { %2676 = vmatmul.mubr.f32.gmra.mrb[8].mxu0 %v2595_v25  ;;  %v2500_v20 = vpop.permute.xlu1 %2499 }
 0x447   :  { %3809 = vmatprep.mubr.msk.f32.mxu0 %vm800_vm3, %v2491_v19  ;;  %v2578_v59 = vsel %vm800_vm3, %v1861_v22, %v2500_v20 }
 0x44e   :  { %v2512_v62 = vpop.permute.xlu0 %2511 }
 0x44f   :  { %v2581_v43 = vsel %vm804_vm4, %v2578_v59, %v2512_v62 }
 0x452   :  { %v2524_v1 = vpop.permute.xlu1 %2523 }
 0x453   :  { %v2584_v10 = vsel %vm6281_vm11, %v2581_v43, %v2524_v1 }
 0x457   :  { %v2536_v15 = vpop.permute.xlu0 %2535 }
 0x458   :  { %v2587_v35 = vsel %vm6282_vm12, %v2584_v10, %v2536_v15 }
 0x45c   :  { %v2548_v30 = vpop.permute.xlu1 %2547 }
 0x45d   :  { %v2590_v19 = vsel %vm6283_vm13, %v2587_v35, %v2548_v30 }
 0x461   :  { %v2560_v60 = vpop.permute.xlu0 %2559 }
 0x462   :  { %v2593_v12 = vsel %vm6284_vm0, %v2590_v19, %v2560_v60 }
 0x466   :  { %v2572_v13 = vpop.permute.xlu1 %2571 }
 0x467   :  { %v2596_v63 = vsel %vm6285_vm14, %v2593_v12, %v2572_v13 }
 0x468   :  { %2681 = vmatmul.mubr.f32.gmra.mrb[10].mxu0 %v2596_v63 }
 0x515   :  { %v2672_v42 = vpop.f32.mrb[6].mxu0 }
 0x516   :  { %v2693_v24 = vmul.f32 %v5706_v26, %v2672_v42  ;;  %v2674_v7 = vpop.f32.mrb[7].mxu0 }
 0x518   :  { %v5715_v54 = vadd.f32 %v5711_v36, %v2693_v24 }
 0x519   :  { %v2677_v0 = vpop.f32.mrb[8].mxu0 }
 0x51a   :  { %v2694_v37 = vmul.f32 %v5706_v26, %v2677_v0  ;;  %v2679_v55 = vpop.f32.mrb[9].mxu0  ;;  %vm2850_vm1 = vcmp.ge.f32.partialorder %v5715_v54, 0.6  ;;  %vm2853_vm15 = vcmp.lt.f32.partialorder %v5715_v54, 1.0  ;;  %vm2865_vm2 = vcmp.ge.f32.partialorder %v5715_v54, 1.0 }
 0x51b   :  { %vm2856_vm5 = vmand %vm2850_vm1, %vm2853_vm15  ;;  %vm2868_vm6 = vcmp.lt.f32.partialorder %v5715_v54, 1.4  ;;  %vm2880_vm9 = vcmp.ge.f32.partialorder %v5715_v54, 1.4  ;;  %vm2883_vm7 = vcmp.lt.f32.partialorder %v5715_v54, 1.8 }
 0x51c   :  { %v5725_v61 = vadd.f32 %v5711_v36, %v2694_v37  ;;  %v5728_v51 = vsel %vm2856_vm5, 1.0, %v4193_v2  ;;  %vm2871_vm10 = vmand %vm2865_vm2, %vm2868_vm6  ;;  %vm2895_vm8 = vcmp.ge.f32.partialorder %v5715_v54, 1.8  ;;  %vm2898_vm11 = vcmp.lt.f32.partialorder %v5715_v54, 2.2 }
 0x51d   :  { %v3839_v48 = vsel %vm2871_vm10, 1.0, %v4193_v2  ;;  %vm2886_vm12 = vmand %vm2880_vm9, %vm2883_vm7  ;;  %v3869_v23 = vadd.f32 -0.6, %v5715_v54  ;;  %v5735_v56 = vsub.f32 1.4, %v5715_v54  ;;  %v3872_v53 = vadd.f32 -1.0, %v5715_v54 }
 0x51e   :  { %v3842_v46 = vsel %vm2886_vm12, 1.0, %v4193_v2  ;;  %vm2901_vm13 = vmand %vm2895_vm8, %vm2898_vm11  ;;  %v5740_v9 = vsub.f32 1.8, %v5715_v54  ;;  %v3875_v16 = vadd.f32 -1.4, %v5715_v54  ;;  %vm2778_vm0 = vcmp.lt.f32.partialorder %v5715_v54, -1.0 }
 0x51f   :  { %v3845_v29 = vsel %vm2901_vm13, 1.0, %v4193_v2  ;;  %v3060_v50 = vmul.f32 2.5, %v3869_v23  ;;  %v3069_v52 = vmul.f32 2.5, %v5735_v56  ;;  %v3081_v32 = vmul.f32 2.5, %v3872_v53 }
 0x520   :  { %v3090_v45 = vmul.f32 2.5, %v5740_v9  ;;  %v3102_v28 = vmul.f32 2.5, %v3875_v16  ;;  %v3108_v4 = vsub.f32 2.2, %v5715_v54  ;;  %v3225_v18 = vmul.f32 1.25, %v3869_v23 }
 0x521   :  { %v3063_v3 = vmul.f32 %v5728_v51, %v3060_v50  ;;  %v3072_v6 = vmul.f32 %v3839_v48, %v3069_v52  ;;  %v3084_v47 = vmul.f32 %v3839_v48, %v3081_v32  ;;  %v3231_v44 = vmul.f32 1.25, %v5740_v9 }
 0x522   :  { %v3093_v58 = vmul.f32 %v3842_v46, %v3090_v45  ;;  %v3105_v34 = vmul.f32 %v3842_v46, %v3102_v28  ;;  %v3111_v27 = vmul.f32 2.5, %v3108_v4  ;;  %v3240_v40 = vmul.f32 1.25, %v3872_v53 }
 0x523   :  { %v5750_v21 = vadd.f32 %v3072_v6, %v3063_v3  ;;  %v3246_v39 = vmul.f32 1.25, %v3108_v4  ;;  %v3360_v14 = vmul.f32 0.8333333, %v3869_v23  ;;  %v3366_v5 = vmul.f32 0.8333333, %v3108_v4 }
 0x524   :  { %v3096_v31 = vadd.f32 %v3093_v58, %v3084_v47  ;;  %v3114_v17 = vmul.f32 %v3845_v29, %v3111_v27  ;;  %vm2760_vm14 = vcmp.ge.f32.partialorder %v5715_v54, -1.8  ;;  %vm2761_vm1 = vcmp.ge.f32.partialorder %v5725_v61, -1.8 }
 0x525   :  { %v3228_v8 = vmul.f32 %v3225_v18, %v5750_v21  ;;  %vm2763_vm15 = vcmp.lt.f32.partialorder %v5715_v54, -1.4  ;;  %vm2764_vm2 = vcmp.lt.f32.partialorder %v5725_v61, -1.4  ;;  %vm2775_vm5 = vcmp.ge.f32.partialorder %v5715_v54, -1.4 }
 0x526   :  { %v3117_v25 = vadd.f32 %v3114_v17, %v3105_v34  ;;  %v3234_v41 = vmul.f32 %v3231_v44, %v3096_v31  ;;  %v3243_v20 = vmul.f32 %v3240_v40, %v3096_v31  ;;  %vm2766_vm6 = vmand %vm2760_vm14, %vm2763_vm15  ;;  %vm2776_vm9 = vcmp.ge.f32.partialorder %v5725_v61, -1.4 }
 0x527   :  { %vm2767_vm7 = vmand %vm2761_vm1, %vm2764_vm2  ;;  %v5760_v62 = vsel %vm2766_vm6, 1.0, %v4193_v2  ;;  %vm2779_vm10 = vcmp.lt.f32.partialorder %v5725_v61, -1.0  ;;  %vm2790_vm8 = vcmp.ge.f32.partialorder %v5715_v54, -1.0  ;;  %vm2791_vm11 = vcmp.ge.f32.partialorder %v5725_v61, -1.0 }
 0x528   :  { %v5765_v57 = vadd.f32 %v3234_v41, %v3228_v8  ;;  %v3249_v22 = vmul.f32 %v3246_v39, %v3117_v25  ;;  %v5768_v1 = vsel %vm2767_vm7, 1.0, %v4193_v2  ;;  %vm2781_vm12 = vmand %vm2775_vm5, %vm2778_vm0  ;;  %vm2793_vm13 = vcmp.lt.f32.partialorder %v5715_v54, -0.6 }
 0x529   :  { %vm2782_vm14 = vmand %vm2776_vm9, %vm2779_vm10  ;;  %v3821_v59 = vsel %vm2781_vm12, 1.0, %v4193_v2  ;;  %vm2794_vm1 = vcmp.lt.f32.partialorder %v5725_v61, -0.6  ;;  %vm2805_vm15 = vcmp.ge.f32.partialorder %v5715_v54, -0.6  ;;  %v2940_v15 = vsub.f32 -1.0, %v5715_v54 }
 0x52a   :  { %v3252_v43 = vadd.f32 %v3249_v22, %v3243_v20  ;;  %v3363_v10 = vmul.f32 %v3360_v14, %v5765_v57  ;;  %v3822_v35 = vsel %vm2782_vm14, 1.0, %v4193_v2  ;;  %vm2796_vm2 = vmand %vm2790_vm8, %vm2793_vm13  ;;  %vm2806_vm0 = vcmp.ge.f32.partialorder %v5725_v61, -0.6 }
 0x52b   :  { %vm2797_vm5 = vmand %vm2791_vm11, %vm2794_vm1  ;;  %v3824_v30 = vsel %vm2796_vm2, 1.0, %v4193_v2  ;;  %vm2808_vm6 = vcmp.lt.f32.partialorder %v5715_v54, -0.2  ;;  %vm2809_vm9 = vcmp.lt.f32.partialorder %v5725_v61, -0.2  ;;  %v2941_v60 = vsub.f32 -1.0, %v5725_v61 }
 0x52c   :  { %v3369_v19 = vmul.f32 %v3366_v5, %v3252_v43  ;;  %v3825_v12 = vsel %vm2797_vm5, 1.0, %v4193_v2  ;;  %vm2811_vm7 = vmand %vm2805_vm15, %vm2808_vm6  ;;  %v3851_v13 = vadd.f32 1.8, %v5715_v54  ;;  %v3852_v63 = vadd.f32 1.8, %v5725_v61 }
 0x52d   :  { %vm2812_vm10 = vmand %vm2806_vm0, %vm2809_vm9  ;;  %v5792_v42 = vsel %vm2811_vm7, 1.0, %v4193_v2  ;;  %v2943_v24 = vmul.f32 2.5, %v2940_v15  ;;  %v2944_v7 = vmul.f32 2.5, %v2941_v60  ;;  %v5799_v0 = vadd.f32 1.4, %v5715_v54 }
 0x52e   :  { %v3372_v37 = vadd.f32 %v3369_v19, %v3363_v10  ;;  %v5802_v55 = vsel %vm2812_vm10, 1.0, %v4193_v2  ;;  %v2934_v48 = vmul.f32 2.5, %v3851_v13  ;;  %v2935_v23 = vmul.f32 2.5, %v3852_v63 }
 0x52f   :  { %v2946_v53 = vmul.f32 %v3821_v59, %v2943_v24  ;;  %v2947_v46 = vmul.f32 %v3822_v35, %v2944_v7  ;;  %v5805_v16 = vadd.f32 1.4, %v5725_v61  ;;  %v2955_v29 = vmul.f32 2.5, %v5799_v0 }
 0x530   :  { %3878 = vmatprep.mubr.msk.f32.mxu1 %vm800_vm3, %v3372_v37  ;;  %v2937_v50 = vmul.f32 %v5760_v62, %v2934_v48  ;;  %v2938_v52 = vmul.f32 %v5768_v1, %v2935_v23  ;;  %v5812_v32 = vsub.f32 -0.6, %v5715_v54  ;;  %v5815_v45 = vsub.f32 -0.6, %v5725_v61 }
 0x531   :  { %v2956_v28 = vmul.f32 2.5, %v5805_v16  ;;  %v2958_v4 = vmul.f32 %v3821_v59, %v2955_v29  ;;  %v5819_v18 = vadd.f32 1.0, %v5715_v54  ;;  %v5822_v3 = vadd.f32 1.0, %v5725_v61 }
 0x532   :  { %v5824_v6 = vadd.f32 %v2946_v53, %v2937_v50  ;;  %v5826_v47 = vadd.f32 %v2947_v46, %v2938_v52  ;;  %v2964_v44 = vmul.f32 2.5, %v5812_v32  ;;  %v2965_v58 = vmul.f32 2.5, %v5815_v45 }
 0x533   :  { %v2959_v34 = vmul.f32 %v3822_v35, %v2956_v28  ;;  %v2976_v27 = vmul.f32 2.5, %v5819_v18  ;;  %v2977_v40 = vmul.f32 2.5, %v5822_v3  ;;  %v2982_v39 = vsub.f32 -0.2, %v5715_v54 }
 0x534   :  { %v2967_v14 = vmul.f32 %v3824_v30, %v2964_v44  ;;  %v2968_v5 = vmul.f32 %v3825_v12, %v2965_v58  ;;  %v2983_v31 = vsub.f32 -0.2, %v5725_v61  ;;  %v3135_v17 = vmul.f32 1.25, %v3851_v13 }
 0x535   :  { %v2979_v8 = vmul.f32 %v3824_v30, %v2976_v27  ;;  %v2980_v25 = vmul.f32 %v3825_v12, %v2977_v40  ;;  %v2985_v41 = vmul.f32 2.5, %v2982_v39  ;;  %v3136_v20 = vmul.f32 1.25, %v3852_v63 }
 0x536   :  { %v2970_v22 = vadd.f32 %v2967_v14, %v2958_v4  ;;  %v2971_v59 = vadd.f32 %v2968_v5, %v2959_v34  ;;  %v2986_v43 = vmul.f32 2.5, %v2983_v31  ;;  %v3138_v10 = vmul.f32 %v3135_v17, %v5824_v6 }
 0x537   :  { %v2988_v35 = vmul.f32 %v5792_v42, %v2985_v41  ;;  %v3139_v19 = vmul.f32 %v3136_v20, %v5826_v47  ;;  %v3141_v24 = vmul.f32 1.25, %v5812_v32  ;;  %v3142_v7 = vmul.f32 1.25, %v5815_v45 }
 0x538   :  { %v2989_v37 = vmul.f32 %v5802_v55, %v2986_v43  ;;  %v3150_v30 = vmul.f32 1.25, %v5799_v0  ;;  %v3151_v12 = vmul.f32 1.25, %v5805_v16  ;;  %v3156_v48 = vmul.f32 1.25, %v2982_v39 }
 0x539   :  { %v5842_v23 = vadd.f32 %v2988_v35, %v2979_v8  ;;  %v3144_v53 = vmul.f32 %v3141_v24, %v2970_v22  ;;  %v3145_v46 = vmul.f32 %v3142_v7, %v2971_v59  ;;  %v3157_v29 = vmul.f32 1.25, %v2983_v31 }
 0x53a   :  { %v5844_v50 = vadd.f32 %v2989_v37, %v2980_v25  ;;  %v3153_v52 = vmul.f32 %v3150_v30, %v2970_v22  ;;  %v3154_v28 = vmul.f32 %v3151_v12, %v2971_v59  ;;  %v3270_v4 = vmul.f32 0.8333333, %v3851_v13 }
 0x53b   :  { %v3147_v44 = vadd.f32 %v3144_v53, %v3138_v10  ;;  %v3148_v58 = vadd.f32 %v3145_v46, %v3139_v19  ;;  %v3159_v34 = vmul.f32 %v3156_v48, %v5842_v23  ;;  %v3271_v27 = vmul.f32 0.8333333, %v3852_v63  ;;  %v2682_v40 = vpop.f32.mrb[10].mxu0 }
 0x53c   :  { %v3160_v14 = vmul.f32 %v3157_v29, %v5844_v50  ;;  %v3276_v5 = vmul.f32 0.8333333, %v2982_v39  ;;  %v3277_v17 = vmul.f32 0.8333333, %v2983_v31  ;;  %v3126_v8 = vmul.f32 1.25, %v2940_v15  ;;  %v2684_v25 = vpop.f32.mrb[11].mxu0 }
 0x53d   :  { %v2695_v41 = vmul.f32 %v5706_v26, %v2682_v40  ;;  %v5851_v20 = vadd.f32 %v3159_v34, %v3153_v52  ;;  %v3273_v22 = vmul.f32 %v3270_v4, %v3147_v44  ;;  %v3274_v13 = vmul.f32 %v3271_v27, %v3148_v58 }
 0x53e   :  { %v5853_v59 = vadd.f32 %v3160_v14, %v3154_v28  ;;  %vm2745_vm8 = vcmp.ge.f32.partialorder %v5715_v54, -2.2  ;;  %vm2746_vm11 = vcmp.ge.f32.partialorder %v5725_v61, -2.2  ;;  %vm2748_vm12 = vcmp.lt.f32.partialorder %v5715_v54, -1.8 }
 0x53f   :  { %v5859_v63 = vadd.f32 %v5711_v36, %v2695_v41  ;;  %v3279_v15 = vmul.f32 %v3276_v5, %v5851_v20  ;;  %vm2749_vm13 = vcmp.lt.f32.partialorder %v5725_v61, -1.8  ;;  %vm2751_vm14 = vmand %vm2745_vm8, %vm2748_vm12  ;;  %v3848_v26 = vadd.f32 2.2, %v5715_v54 }
 0x540   :  { %v3280_v39 = vmul.f32 %v3277_v17, %v5853_v59  ;;  %vm2752_vm1 = vmand %vm2746_vm11, %vm2749_vm13  ;;  %v3815_v31 = vsel %vm2751_vm14, 1.0, %v4193_v2  ;;  %v3849_v43 = vadd.f32 2.2, %v5725_v61  ;;  %v2919_v10 = vsub.f32 -1.4, %v5715_v54 }
 0x541   :  { %v3282_v35 = vadd.f32 %v3279_v15, %v3273_v22  ;;  %v3816_v36 = vsel %vm2752_vm1, 1.0, %v4193_v2  ;;  %v2913_v19 = vmul.f32 2.5, %v3848_v26  ;;  %v2920_v24 = vsub.f32 -1.4, %v5725_v61 }
 0x542   :  { %v3283_v7 = vadd.f32 %v3280_v39, %v3274_v13  ;;  %v2914_v37 = vmul.f32 2.5, %v3849_v43  ;;  %v2922_v30 = vmul.f32 2.5, %v2919_v10  ;;  %v3120_v12 = vmul.f32 1.25, %v3848_v26 }
 0x543   :  { %v2916_v48 = vmul.f32 %v3815_v31, %v2913_v19  ;;  %v2923_v53 = vmul.f32 2.5, %v2920_v24  ;;  %v3121_v46 = vmul.f32 1.25, %v3849_v43  ;;  %v3127_v29 = vmul.f32 1.25, %v2941_v60 }
 0x544   :  { %v4110_v52 = vpack.i.bf16 %v3283_v7, %v3282_v35  ;;  %v2917_v28 = vmul.f32 %v3816_v36, %v2914_v37  ;;  %v2925_v4 = vmul.f32 %v5760_v62, %v2922_v30  ;;  %v3129_v34 = vmul.f32 %v3126_v8, %v5824_v6 }
 0x545   :  { %v2926_v27 = vmul.f32 %v5768_v1, %v2923_v53  ;;  %v3130_v40 = vmul.f32 %v3127_v29, %v5826_v47  ;;  %v3255_v14 = vmul.f32 0.8333333, %v3848_v26  ;;  %v3256_v5 = vmul.f32 0.8333333, %v3849_v43 }
 0x546   :  { %4111 = vrot.lane.b32.xlu1 %v4110_v52, %s4196_s14  ;;  %v2928_v17 = vadd.f32 %v2925_v4, %v2916_v48  ;;  %v3261_v41 = vmul.f32 0.8333333, %v5812_v32  ;;  %v3262_v25 = vmul.f32 0.8333333, %v5815_v45  ;;  %vm2820_vm15 = vcmp.ge.f32.partialorder %v5715_v54, -0.2 }
 0x547   :  { %v2929_v60 = vadd.f32 %v2926_v27, %v2917_v28  ;;  %vm2821_vm2 = vcmp.ge.f32.partialorder %v5725_v61, -0.2  ;;  %vm2823_vm0 = vcmp.lt.f32.partialorder %v5715_v54, 0.2  ;;  %vm2824_vm5 = vcmp.lt.f32.partialorder %v5725_v61, 0.2 }
 0x548   :  { %v3123_v62 = vmul.f32 %v3120_v12, %v2928_v17  ;;  %v3264_v1 = vmul.f32 %v3261_v41, %v3147_v44  ;;  %v3265_v6 = vmul.f32 %v3262_v25, %v3148_v58  ;;  %vm2826_vm6 = vmand %vm2820_vm15, %vm2823_vm0  ;;  %vm2835_vm9 = vcmp.ge.f32.partialorder %v5715_v54, 0.2 }
 0x549   :  { %v3124_v47 = vmul.f32 %v3121_v46, %v2929_v60  ;;  %vm2827_vm7 = vmand %vm2821_vm2, %vm2824_vm5  ;;  %v3830_v32 = vsel %vm2826_vm6, 1.0, %v4193_v2  ;;  %vm2836_vm10 = vcmp.ge.f32.partialorder %v5725_v61, 0.2  ;;  %vm2838_vm8 = vcmp.lt.f32.partialorder %v5715_v54, 0.6 }
 0x54a   :  { %v3132_v45 = vadd.f32 %v3129_v34, %v3123_v62  ;;  %v3831_v8 = vsel %vm2827_vm7, 1.0, %v4193_v2  ;;  %vm2839_vm11 = vcmp.lt.f32.partialorder %v5725_v61, 0.6  ;;  %vm2841_vm12 = vmand %vm2835_vm9, %vm2838_vm8  ;;  %v5890_v44 = vadd.f32 0.6, %v5715_v54 }
 0x54b   :  { %v3133_v58 = vadd.f32 %v3130_v40, %v3124_v47  ;;  %vm2842_vm13 = vmand %vm2836_vm10, %vm2839_vm11  ;;  %v5893_v22 = vsel %vm2841_vm12, 1.0, %v4193_v2  ;;  %v5896_v13 = vadd.f32 0.6, %v5725_v61  ;;  %v3003_v15 = vsub.f32 0.2, %v5715_v54 }
 0x54c   :  { %v3258_v26 = vmul.f32 %v3255_v14, %v3132_v45  ;;  %v5900_v39 = vsel %vm2842_vm13, 1.0, %v4193_v2  ;;  %v2997_v31 = vmul.f32 2.5, %v5890_v44  ;;  %v3004_v43 = vsub.f32 0.2, %v5725_v61 }
 0x54d   :  { %v3259_v10 = vmul.f32 %v3256_v5, %v3133_v58  ;;  %v2998_v35 = vmul.f32 2.5, %v5896_v13  ;;  %v3006_v36 = vmul.f32 2.5, %v3003_v15  ;;  %v5906_v19 = vadd.f32 0.2, %v5715_v54 }
 0x54e   :  { %v3267_v24 = vadd.f32 %v3264_v1, %v3258_v26  ;;  %v3000_v7 = vmul.f32 %v5792_v42, %v2997_v31  ;;  %v3007_v37 = vmul.f32 2.5, %v3004_v43  ;;  %v5910_v30 = vadd.f32 0.2, %v5725_v61 }
 0x54f   :  { %v3268_v12 = vadd.f32 %v3265_v6, %v3259_v10  ;;  %v3001_v48 = vmul.f32 %v5802_v55, %v2998_v35  ;;  %v3009_v53 = vmul.f32 %v3830_v32, %v3006_v36  ;;  %v3018_v46 = vmul.f32 2.5, %v5906_v19 }
 0x550   :  { %v3010_v29 = vmul.f32 %v3831_v8, %v3007_v37  ;;  %v3019_v52 = vmul.f32 2.5, %v5910_v30  ;;  %v3024_v28 = vsub.f32 0.6, %v5715_v54  ;;  %v3025_v4 = vsub.f32 0.6, %v5725_v61 }
 0x551   :  { %v4105_v34 = vpack.i.bf16 %v3268_v12, %v3267_v24  ;;  %v3012_v27 = vadd.f32 %v3009_v53, %v3000_v7  ;;  %v3021_v42 = vmul.f32 %v3830_v32, %v3018_v46  ;;  %v3165_v40 = vmul.f32 1.25, %v5819_v18 }
 0x552   :  { %v3013_v14 = vadd.f32 %v3010_v29, %v3001_v48  ;;  %v3022_v5 = vmul.f32 %v3831_v8, %v3019_v52  ;;  %v3027_v17 = vmul.f32 2.5, %v3024_v28  ;;  %v3028_v41 = vmul.f32 2.5, %v3025_v4 }
 0x553   :  { %4106 = vrot.lane.b32.xlu0 %v4105_v34, %s4194_s29  ;;  %v3166_v55 = vmul.f32 1.25, %v5822_v3  ;;  %v3168_v25 = vmul.f32 %v3165_v40, %v5842_v23  ;;  %v3171_v60 = vmul.f32 1.25, %v3003_v15  ;;  %v3172_v62 = vmul.f32 1.25, %v3004_v43 }
 0x554   :  { %v3030_v1 = vmul.f32 %v5893_v22, %v3027_v17  ;;  %v3031_v6 = vmul.f32 %v5900_v39, %v3028_v41  ;;  %v3180_v47 = vmul.f32 1.25, %v5890_v44  ;;  %v3181_v32 = vmul.f32 1.25, %v5896_v13 }
 0x555   :  { %v3169_v45 = vmul.f32 %v3166_v55, %v5844_v50  ;;  %v3174_v8 = vmul.f32 %v3171_v60, %v3012_v27  ;;  %v3175_v58 = vmul.f32 %v3172_v62, %v3013_v14  ;;  %v3186_v26 = vmul.f32 1.25, %v3024_v28 }
 0x556   :  { %v5926_v31 = vadd.f32 %v3030_v1, %v3021_v42  ;;  %v5928_v10 = vadd.f32 %v3031_v6, %v3022_v5  ;;  %v3183_v23 = vmul.f32 %v3180_v47, %v3012_v27  ;;  %v3184_v35 = vmul.f32 %v3181_v32, %v3013_v14 }
 0x557   :  { %v3177_v36 = vadd.f32 %v3174_v8, %v3168_v25  ;;  %v3178_v24 = vadd.f32 %v3175_v58, %v3169_v45  ;;  %v3187_v7 = vmul.f32 1.25, %v3025_v4  ;;  %v3300_v37 = vmul.f32 0.8333333, %v5819_v18 }
 0x558   :  { %v3189_v12 = vmul.f32 %v3186_v26, %v5926_v31  ;;  %v3301_v48 = vmul.f32 0.8333333, %v5822_v3  ;;  %v3306_v53 = vmul.f32 0.8333333, %v3024_v28  ;;  %v3307_v50 = vmul.f32 0.8333333, %v3025_v4 }
 0x559   :  { %v3190_v46 = vmul.f32 %v3187_v7, %v5928_v10  ;;  %v3303_v29 = vmul.f32 %v3300_v37, %v3177_v36  ;;  %v3285_v52 = vmul.f32 0.8333333, %v5799_v0  ;;  %v3286_v34 = vmul.f32 0.8333333, %v5805_v16 }
 0x55a   :  { %v5936_v27 = vadd.f32 %v3189_v12, %v3183_v23  ;;  %v3304_v42 = vmul.f32 %v3301_v48, %v3178_v24  ;;  %v3291_v40 = vmul.f32 0.8333333, %v3003_v15  ;;  %v3292_v14 = vmul.f32 0.8333333, %v3004_v43 }
 0x55b   :  { %v5938_v5 = vadd.f32 %v3190_v46, %v3184_v35  ;;  %v3288_v18 = vmul.f32 %v3285_v52, %v5851_v20  ;;  %v3289_v3 = vmul.f32 %v3286_v34, %v5853_v59  ;;  %vm2851_vm14 = vcmp.ge.f32.partialorder %v5725_v61, 0.6 }
 0x55c   :  { %v3309_v28 = vmul.f32 %v3306_v53, %v5936_v27  ;;  %v3294_v4 = vmul.f32 %v3291_v40, %v3177_v36  ;;  %v3295_v17 = vmul.f32 %v3292_v14, %v3178_v24  ;;  %vm2854_vm1 = vcmp.lt.f32.partialorder %v5725_v61, 1.0 }
 0x55d   :  { %v3310_v0 = vmul.f32 %v3307_v50, %v5938_v5  ;;  %vm2857_vm15 = vmand %vm2851_vm14, %vm2854_vm1  ;;  %vm2866_vm2 = vcmp.ge.f32.partialorder %v5725_v61, 1.0  ;;  %vm2869_vm0 = vcmp.lt.f32.partialorder %v5725_v61, 1.4  ;;  %v5949_v16 = vadd.f32 -0.2, %v5715_v54 }
 0x55e   :  { %v3312_v20 = vadd.f32 %v3309_v28, %v3303_v29  ;;  %v3297_v59 = vadd.f32 %v3294_v4, %v3288_v18  ;;  %v3298_v15 = vadd.f32 %v3295_v17, %v3289_v3  ;;  %v3837_v43 = vsel %vm2857_vm15, 1.0, %v4193_v2  ;;  %vm2872_vm5 = vmand %vm2866_vm2, %vm2869_vm0 }
 0x55f   :  { %v3313_v41 = vadd.f32 %v3310_v0, %v3304_v42  ;;  %v5953_v55 = vsel %vm2872_vm5, 1.0, %v4193_v2  ;;  %v5956_v25 = vadd.f32 -0.2, %v5725_v61  ;;  %v3039_v60 = vmul.f32 2.5, %v5949_v16 }
 0x560   :  { %v4115_v62 = vpack.i.bf16 %v3298_v15, %v3297_v59  ;;  %v3045_v1 = vsub.f32 1.0, %v5715_v54  ;;  %v3046_v6 = vsub.f32 1.0, %v5725_v61  ;;  %v5962_v47 = vadd.f32 -0.6, %v5725_v61 }
 0x561   :  { %v4120_v32 = vpack.i.bf16 %v3313_v41, %v3312_v20  ;;  %v3040_v45 = vmul.f32 2.5, %v5956_v25  ;;  %v3042_v8 = vmul.f32 %v5893_v22, %v3039_v60  ;;  %v3067_v58 = vsub.f32 1.4, %v5725_v61 }
 0x562   :  { %4116 = vrot.lane.b32.xlu0 %v4115_v62, %s4195_s30  ;;  %v3048_v26 = vmul.f32 2.5, %v3045_v1  ;;  %v3049_v23 = vmul.f32 2.5, %v3046_v6  ;;  %v3061_v35 = vmul.f32 2.5, %v5962_v47  ;;  %v3195_v36 = vmul.f32 1.25, %v5906_v19 }
 0x563   :  { %4121 = vrot.lane.b32.xlu1 %v4120_v32, %s4197_s15  ;;  %v3043_v24 = vmul.f32 %v5900_v39, %v3040_v45  ;;  %v3070_v7 = vmul.f32 2.5, %v3067_v58  ;;  %v3196_v37 = vmul.f32 1.25, %v5910_v30  ;;  %v3201_v12 = vmul.f32 1.25, %v3045_v1 }
 0x564   :  { %v3051_v22 = vmul.f32 %v5728_v51, %v3048_v26  ;;  %v3052_v48 = vmul.f32 %v3837_v43, %v3049_v23  ;;  %v3064_v53 = vmul.f32 %v3837_v43, %v3061_v35  ;;  %v3198_v50 = vmul.f32 %v3195_v36, %v5926_v31 }
 0x565   :  { %v3073_v46 = vmul.f32 %v5953_v55, %v3070_v7  ;;  %v3199_v29 = vmul.f32 %v3196_v37, %v5928_v10  ;;  %v3202_v52 = vmul.f32 1.25, %v3046_v6  ;;  %v3210_v34 = vmul.f32 1.25, %v5949_v16 }
 0x566   :  { %v3054_v42 = vadd.f32 %v3051_v22, %v3042_v8  ;;  %v3055_v40 = vadd.f32 %v3052_v48, %v3043_v24  ;;  %v3211_v39 = vmul.f32 1.25, %v5956_v25  ;;  %v3216_v14 = vmul.f32 1.25, %v5735_v56 }
 0x567   :  { %v3076_v18 = vadd.f32 %v3073_v46, %v3064_v53  ;;  %v3217_v3 = vmul.f32 1.25, %v3067_v58  ;;  %v3330_v51 = vmul.f32 0.8333333, %v5906_v19  ;;  %v3331_v28 = vmul.f32 0.8333333, %v5910_v30 }
 0x568   :  { %v3204_v31 = vmul.f32 %v3201_v12, %v3054_v42  ;;  %v3205_v4 = vmul.f32 %v3202_v52, %v3055_v40  ;;  %v3213_v17 = vmul.f32 %v3210_v34, %v3054_v42  ;;  %v3214_v0 = vmul.f32 %v3211_v39, %v3055_v40 }
 0x569   :  { %v3219_v10 = vmul.f32 %v3216_v14, %v5750_v21  ;;  %v3220_v20 = vmul.f32 %v3217_v3, %v3076_v18  ;;  %v3336_v59 = vmul.f32 0.8333333, %v5735_v56  ;;  %v3337_v15 = vmul.f32 0.8333333, %v3067_v58 }
 0x56a   :  { %v3207_v43 = vadd.f32 %v3204_v31, %v3198_v50  ;;  %v3208_v41 = vadd.f32 %v3205_v4, %v3199_v29  ;;  %v3315_v60 = vmul.f32 0.8333333, %v5890_v44  ;;  %v3316_v62 = vmul.f32 0.8333333, %v5896_v13 }
 0x56b   :  { %v3222_v32 = vadd.f32 %v3219_v10, %v3213_v17  ;;  %v3223_v19 = vadd.f32 %v3220_v20, %v3214_v0  ;;  %v3321_v45 = vmul.f32 0.8333333, %v3045_v1  ;;  %v3322_v30 = vmul.f32 0.8333333, %v3046_v6 }
 0x56c   :  { %v3333_v8 = vmul.f32 %v3330_v51, %v3207_v43  ;;  %v3334_v26 = vmul.f32 %v3331_v28, %v3208_v41  ;;  %v3318_v23 = vmul.f32 %v3315_v60, %v5936_v27  ;;  %v3319_v21 = vmul.f32 %v3316_v62, %v5938_v5 }
 0x56d   :  { %v3339_v35 = vmul.f32 %v3336_v59, %v3222_v32  ;;  %v3340_v36 = vmul.f32 %v3337_v15, %v3223_v19  ;;  %v3324_v56 = vmul.f32 %v3321_v45, %v3207_v43  ;;  %v3325_v58 = vmul.f32 %v3322_v30, %v3208_v41 }
 0x56e   :  { %vm2881_vm6 = vcmp.ge.f32.partialorder %v5725_v61, 1.4  ;;  %vm2884_vm9 = vcmp.lt.f32.partialorder %v5725_v61, 1.8  ;;  %v5991_v44 = vadd.f32 -1.0, %v5725_v61  ;;  %v3226_v7 = vmul.f32 1.25, %v5962_v47 }
 0x56f   :  { %v3342_v13 = vadd.f32 %v3339_v35, %v3333_v8  ;;  %v3343_v1 = vadd.f32 %v3340_v36, %v3334_v26  ;;  %v3327_v6 = vadd.f32 %v3324_v56, %v3318_v23  ;;  %v3328_v24 = vadd.f32 %v3325_v58, %v3319_v21  ;;  %vm2887_vm7 = vmand %vm2881_vm6, %vm2884_vm9 }
 0x570   :  { %v3082_v27 = vmul.f32 2.5, %v5991_v44  ;;  %v3088_v5 = vsub.f32 1.8, %v5725_v61  ;;  %v5997_v22 = vsel %vm2887_vm7, 1.0, %v4193_v2  ;;  %v3345_v48 = vmul.f32 0.8333333, %v5949_v16 }
 0x571   :  { %v4130_v37 = vpack.i.bf16 %v3343_v1, %v3342_v13  ;;  %v4125_v12 = vpack.i.bf16 %v3328_v24, %v3327_v6  ;;  %v3229_v46 = vmul.f32 %v3226_v7, %v3076_v18  ;;  %v3346_v29 = vmul.f32 0.8333333, %v5956_v25 }
 0x572   :  { %v3085_v53 = vmul.f32 %v5953_v55, %v3082_v27  ;;  %v3091_v50 = vmul.f32 2.5, %v3088_v5  ;;  %v3232_v52 = vmul.f32 1.25, %v3088_v5  ;;  %v3348_v34 = vmul.f32 %v3345_v48, %v3222_v32 }
 0x573   :  { %4131 = vrot.lane.b32.xlu1 %v4130_v37, %s4199_s19  ;;  %4126 = vrot.lane.b32.xlu0 %v4125_v12, %s4198_s16  ;;  %v3351_v42 = vmul.f32 0.8333333, %v5740_v9  ;;  %vm2747_vm10 = vcmp.ge.f32.partialorder %v5859_v63, -2.2  ;;  %v3349_v39 = vmul.f32 %v3346_v29, %v3223_v19  ;;  %vm2750_vm8 = vcmp.lt.f32.partialorder %v5859_v63, -1.8 }
 0x574   :  { %v3094_v40 = vmul.f32 %v5997_v22, %v3091_v50  ;;  %vm2762_vm11 = vcmp.ge.f32.partialorder %v5859_v63, -1.8  ;;  %vm2753_vm12 = vmand %vm2747_vm10, %vm2750_vm8  ;;  %vm2765_vm13 = vcmp.lt.f32.partialorder %v5859_v63, -1.4  ;;  %vm2777_vm14 = vcmp.ge.f32.partialorder %v5859_v63, -1.4 }
 0x575   :  { %vm2780_vm1 = vcmp.lt.f32.partialorder %v5859_v63, -1.0  ;;  %vm2792_vm15 = vcmp.ge.f32.partialorder %v5859_v63, -1.0  ;;  %v3352_v9 = vmul.f32 0.8333333, %v3088_v5  ;;  %v3817_v55 = vsel %vm2753_vm12, 1.0, %v4193_v2  ;;  %vm2768_vm2 = vmand %vm2762_vm11, %vm2765_vm13 }
 0x576   :  { %v6013_v16 = vadd.f32 %v3094_v40, %v3085_v53  ;;  %vm2795_vm0 = vcmp.lt.f32.partialorder %v5859_v63, -0.6  ;;  %v3820_v25 = vsel %vm2768_vm2, 1.0, %v4193_v2  ;;  %vm2783_vm5 = vmand %vm2777_vm14, %vm2780_vm1  ;;  %v3850_v14 = vadd.f32 2.2, %v5859_v63 }
 0x577   :  { %v2921_v18 = vsub.f32 -1.4, %v5859_v63  ;;  %v2942_v3 = vsub.f32 -1.0, %v5859_v63  ;;  %v3823_v28 = vsel %vm2783_vm5, 1.0, %v4193_v2  ;;  %vm2798_vm6 = vmand %vm2792_vm15, %vm2795_vm0  ;;  %v3853_v31 = vadd.f32 1.8, %v5859_v63 }
 0x578   :  { %v3235_v51 = vmul.f32 %v3232_v52, %v6013_v16  ;;  %v6025_v4 = vadd.f32 1.4, %v5859_v63  ;;  %v3354_v17 = vmul.f32 %v3351_v42, %v5765_v57  ;;  %v2915_v0 = vmul.f32 2.5, %v3850_v14 }
 0x579   :  { %v2924_v10 = vmul.f32 2.5, %v2921_v18  ;;  %v2945_v20 = vmul.f32 2.5, %v2942_v3  ;;  %v2936_v15 = vmul.f32 2.5, %v3853_v31  ;;  %v2963_v41 = vsub.f32 -0.6, %v5859_v63 }
 0x57a   :  { %v6028_v59 = vadd.f32 %v3235_v51, %v3229_v46  ;;  %v2957_v43 = vmul.f32 2.5, %v6025_v4  ;;  %v3826_v60 = vsel %vm2798_vm6, 1.0, %v4193_v2  ;;  %v2918_v62 = vmul.f32 %v3817_v55, %v2915_v0 }
 0x57b   :  { %v2927_v32 = vmul.f32 %v3820_v25, %v2924_v10  ;;  %v2948_v19 = vmul.f32 %v3823_v28, %v2945_v20  ;;  %v2939_v30 = vmul.f32 %v3820_v25, %v2936_v15  ;;  %v2966_v57 = vmul.f32 2.5, %v2963_v41  ;;  %v2706_v15 = vld [vmem:[%s6247_s10] sm:$0xff] }
 0x57c   :  { %v3355_v45 = vmul.f32 %v3352_v9, %v6028_v59  ;;  %v2960_v8 = vmul.f32 %v3823_v28, %v2957_v43  ;;  %v3357_v26 = vadd.f32 %v3354_v17, %v3348_v34  ;;  %v3122_v21 = vmul.f32 1.25, %v3850_v14  ;;  %v2707_v43 = vld [vmem:[%s6247_s10 + $0x8] sm:$0xff] }
 0x57d   :  { %v2930_v23 = vadd.f32 %v2927_v32, %v2918_v62  ;;  %v3128_v35 = vmul.f32 1.25, %v2942_v3  ;;  %v2951_v56 = vadd.f32 %v2948_v19, %v2939_v30  ;;  %v2969_v58 = vmul.f32 %v3826_v60, %v2966_v57 }
 0x57e   :  { %v3358_v36 = vadd.f32 %v3355_v45, %v3349_v39  ;;  %v3137_v13 = vmul.f32 1.25, %v3853_v31  ;;  %v3143_v6 = vmul.f32 1.25, %v2963_v41  ;;  %vm2807_vm9 = vcmp.ge.f32.partialorder %v5859_v63, -0.6 }
 0x57f   :  { %v3125_v1 = vmul.f32 %v3122_v21, %v2930_v23  ;;  %vm2810_vm7 = vcmp.lt.f32.partialorder %v5859_v63, -0.2  ;;  %v2972_v27 = vadd.f32 %v2969_v58, %v2960_v8  ;;  %v3131_v5 = vmul.f32 %v3128_v35, %v2951_v56 }
 0x580   :  { %v4135_v24 = vpack.i.bf16 %v3358_v36, %v3357_v26  ;;  %v3140_v7 = vmul.f32 %v3137_v13, %v2951_v56  ;;  %vm2813_vm10 = vmand %vm2807_vm9, %vm2810_vm7  ;;  %v3257_v37 = vmul.f32 0.8333333, %v3850_v14  ;;  %v6037_v12 = vadd.f32 1.0, %v5859_v63 }
 0x581   :  { %v2984_v48 = vsub.f32 -0.2, %v5859_v63  ;;  %v3134_v53 = vadd.f32 %v3131_v5, %v3125_v1  ;;  %v3146_v50 = vmul.f32 %v3143_v6, %v2972_v27  ;;  %v3829_v46 = vsel %vm2813_vm10, 1.0, %v4193_v2 }
 0x582   :  { %4136 = vrot.lane.b32.xlu0 %v4135_v24, %s4200_s20  ;;  %vm2822_vm8 = vcmp.ge.f32.partialorder %v5859_v63, -0.2  ;;  %v3263_v29 = vmul.f32 0.8333333, %v2963_v41  ;;  %v2978_v52 = vmul.f32 2.5, %v6037_v12  ;;  %v3152_v39 = vmul.f32 1.25, %v6025_v4 }
 0x583   :  { %v2987_v34 = vmul.f32 2.5, %v2984_v48  ;;  %v3149_v42 = vadd.f32 %v3146_v50, %v3140_v7  ;;  %v3260_v40 = vmul.f32 %v3257_v37, %v3134_v53  ;;  %vm2825_vm11 = vcmp.lt.f32.partialorder %v5859_v63, 0.2 }
 0x584   :  { %v2981_v9 = vmul.f32 %v3826_v60, %v2978_v52  ;;  %vm2828_vm12 = vmand %vm2822_vm8, %vm2825_vm11  ;;  %v6047_v25 = vadd.f32 0.6, %v5859_v63  ;;  %v3005_v14 = vsub.f32 0.2, %v5859_v63  ;;  %v3155_v3 = vmul.f32 %v3152_v39, %v2972_v27 }
 0x585   :  { %v2990_v55 = vmul.f32 %v3829_v46, %v2987_v34  ;;  %v3266_v18 = vmul.f32 %v3263_v29, %v3149_v42  ;;  %v3272_v51 = vmul.f32 0.8333333, %v3853_v31  ;;  %v3832_v28 = vsel %vm2828_vm12, 1.0, %v4193_v2 }
 0x586   :  { %v3158_v0 = vmul.f32 1.25, %v2984_v48  ;;  %v2999_v10 = vmul.f32 2.5, %v6047_v25  ;;  %v3008_v20 = vmul.f32 2.5, %v3005_v14  ;;  %v3278_v62 = vmul.f32 0.8333333, %v2984_v48 }
 0x587   :  { %v2993_v17 = vadd.f32 %v2990_v55, %v2981_v9  ;;  %v3269_v41 = vadd.f32 %v3266_v18, %v3260_v40  ;;  %v3275_v60 = vmul.f32 %v3272_v51, %v3149_v42  ;;  %vm2837_vm13 = vcmp.ge.f32.partialorder %v5859_v63, 0.2 }
 0x588   :  { %v3002_v32 = vmul.f32 %v3829_v46, %v2999_v10  ;;  %v3011_v19 = vmul.f32 %v3832_v28, %v3008_v20  ;;  %v3167_v45 = vmul.f32 1.25, %v6037_v12  ;;  %vm2840_vm14 = vcmp.lt.f32.partialorder %v5859_v63, 0.6 }
 0x589   :  { %v3161_v31 = vmul.f32 %v3158_v0, %v2993_v17  ;;  %3382 = vrot.lane.b32.xlu1 %v3269_v41, %s4194_s29  ;;  %v6063_v30 = vadd.f32 0.2, %v5859_v63  ;;  %v3026_v8 = vsub.f32 0.6, %v5859_v63  ;;  %v3965_v57 = vpack.c.bf16 %v2707_v43, %v2706_v15  ;;  %vm2843_vm1 = vmand %vm2837_vm13, %vm2840_vm14 }
 0x58a   :  { %v3014_v23 = vadd.f32 %v3011_v19, %v3002_v32  ;;  %v3170_v21 = vmul.f32 %v3167_v45, %v2993_v17  ;;  %v3173_v35 = vmul.f32 1.25, %v3005_v14  ;;  %v3287_v36 = vmul.f32 0.8333333, %v6025_v4 }
 0x58b   :  { %v3164_v26 = vadd.f32 %v3161_v31, %v3155_v3  ;;  %v3835_v56 = vsel %vm2843_vm1, 1.0, %v4193_v2  ;;  %v3020_v58 = vmul.f32 2.5, %v6063_v30  ;;  %v3029_v13 = vmul.f32 2.5, %v3026_v8  ;;  %3966 = vmatpush1.bf16.msra.mxu1 %v3965_v57 }
 0x58c   :  { %v3176_v6 = vmul.f32 %v3173_v35, %v3014_v23  ;;  %v3293_v24 = vmul.f32 0.8333333, %v3005_v14  ;;  %v3182_v27 = vmul.f32 1.25, %v6047_v25  ;;  %3967 = vmatprep.subr.bf16.mxu1 %v4201_v11  ;;  %vm2852_vm15 = vcmp.ge.f32.partialorder %v5859_v63, 0.6 }
 0x58d   :  { %v3281_v1 = vmul.f32 %v3278_v62, %v3164_v26  ;;  %v3290_v5 = vmul.f32 %v3287_v36, %v3164_v26  ;;  %v3023_v7 = vmul.f32 %v3832_v28, %v3020_v58  ;;  %v3032_v37 = vmul.f32 %v3835_v56, %v3029_v13 }
 0x58e   :  { %v3179_v4 = vadd.f32 %v3176_v6, %v3170_v21  ;;  %vm2855_vm2 = vcmp.lt.f32.partialorder %v5859_v63, 1.0  ;;  %v6074_v53 = vadd.f32 -0.2, %v5859_v63  ;;  %v3185_v46 = vmul.f32 %v3182_v27, %v3014_v23  ;;  %v2709_v27 = vld [vmem:[%s6247_s10 + $0x18] sm:$0xff] }
 0x58f   :  { %v3284_v48 = vadd.f32 %v3281_v1, %v3275_v60  ;;  %v3035_v50 = vadd.f32 %v3032_v37, %v3023_v7  ;;  %v3188_v29 = vmul.f32 1.25, %v3026_v8  ;;  %vm2858_vm0 = vmand %vm2852_vm15, %vm2855_vm2  ;;  %v3047_v52 = vsub.f32 1.0, %v5859_v63 }
 0x590   :  { %v3296_v34 = vmul.f32 %v3293_v24, %v3179_v4  ;;  %v3302_v42 = vmul.f32 0.8333333, %v6037_v12  ;;  %v3838_v40 = vsel %vm2858_vm0, 1.0, %v4193_v2  ;;  %v3041_v39 = vmul.f32 2.5, %v6074_v53  ;;  %v2708_v24 = vld [vmem:[%s6247_s10 + $0x10] sm:$0xff] }
 0x591   :  { %3394 = vrot.lane.b32.xlu0 %v3284_v48, %s4196_s14  ;;  %v3191_v9 = vmul.f32 %v3188_v29, %v3035_v50  ;;  %v3308_v55 = vmul.f32 0.8333333, %v3026_v8  ;;  %v3050_v14 = vmul.f32 2.5, %v3047_v52  ;;  %v3197_v18 = vmul.f32 1.25, %v6063_v30 }
 0x592   :  { %v3299_v3 = vadd.f32 %v3296_v34, %v3290_v5  ;;  %v3305_v51 = vmul.f32 %v3302_v42, %v3179_v4  ;;  %v3044_v28 = vmul.f32 %v3835_v56, %v3041_v39  ;;  %vm2867_vm5 = vcmp.ge.f32.partialorder %v5859_v63, 1.0 }
 0x593   :  { %v3194_v17 = vadd.f32 %v3191_v9, %v3185_v46  ;;  %v3053_v0 = vmul.f32 %v3838_v40, %v3050_v14  ;;  %vm2870_vm6 = vcmp.lt.f32.partialorder %v5859_v63, 1.4  ;;  %v6085_v12 = vadd.f32 -0.6, %v5859_v63  ;;  %v2711_v46 = vld [vmem:[%s6247_s10 + $0x28] sm:$0xff] }
 0x594   :  { %3406 = vrot.lane.b32.xlu1 %v3299_v3, %s4195_s30  ;;  %v3200_v10 = vmul.f32 %v3197_v18, %v3035_v50  ;;  %vm2873_vm9 = vmand %vm2867_vm5, %vm2870_vm6  ;;  %v3068_v20 = vsub.f32 1.4, %v5859_v63  ;;  %v6090_v15 = vadd.f32 -1.0, %v5859_v63  ;;  %v3203_v60 = vmul.f32 1.25, %v3047_v52  ;;  %v2710_v50 = vld [vmem:[%s6247_s10 + $0x20] sm:$0xff]  ;;  %v2712_v3 = vld [vmem:[%s6247_s10 + $0x30] sm:$0xff] }
 0x595   :  { %v3311_v43 = vmul.f32 %v3308_v55, %v3194_v17  ;;  %v3056_v41 = vadd.f32 %v3053_v0, %v3044_v28  ;;  %v3841_v62 = vsel %vm2873_vm9, 1.0, %v4193_v2  ;;  %v3317_v31 = vmul.f32 0.8333333, %v6047_v25 }
 0x596   :  { %v3062_v32 = vmul.f32 2.5, %v6085_v12  ;;  %v3071_v19 = vmul.f32 2.5, %v3068_v20  ;;  %v3212_v57 = vmul.f32 1.25, %v6074_v53  ;;  %vm2882_vm7 = vcmp.ge.f32.partialorder %v5859_v63, 1.4 }
 0x597   :  { %v3314_v45 = vadd.f32 %v3311_v43, %v3305_v51  ;;  %v3206_v8 = vmul.f32 %v3203_v60, %v3056_v41  ;;  %vm2885_vm10 = vcmp.lt.f32.partialorder %v5859_v63, 1.8  ;;  %v3083_v21 = vmul.f32 2.5, %v6090_v15  ;;  %v2713_v51 = vld [vmem:[%s6247_s10 + $0x38] sm:$0xff] }
 0x598   :  { %v3065_v26 = vmul.f32 %v3838_v40, %v3062_v32  ;;  %v3074_v23 = vmul.f32 %v3841_v62, %v3071_v19  ;;  %v3320_v36 = vmul.f32 %v3317_v31, %v3194_v17  ;;  %v3323_v25 = vmul.f32 0.8333333, %v3047_v52  ;;  %vm2888_vm8 = vmand %vm2882_vm7, %vm2885_vm10  ;;  %v2714_v31 = vld [vmem:[%s6247_s10 + $0x40] sm:$0xff]  ;;  %v2715_v32 = vld [vmem:[%s6247_s10 + $0x48] sm:$0xff] }
 0x599   :  { %3418 = vrot.lane.b32.xlu0 %v3314_v45, %s4197_s15  ;;  %v3209_v35 = vadd.f32 %v3206_v8, %v3200_v10  ;;  %v3089_v56 = vsub.f32 1.8, %v5859_v63  ;;  %v3215_v13 = vmul.f32 %v3212_v57, %v3056_v41  ;;  %v3218_v1 = vmul.f32 1.25, %v3068_v20 }
 0x59a   :  { %v3077_v58 = vadd.f32 %v3074_v23, %v3065_v26  ;;  %v6102_v6 = vsel %vm2888_vm8, 1.0, %v4193_v2  ;;  %v3086_v7 = vmul.f32 %v3841_v62, %v3083_v21  ;;  %v3332_v4 = vmul.f32 0.8333333, %v6063_v30 }
 0x59b   :  { %v3326_v5 = vmul.f32 %v3323_v25, %v3209_v35  ;;  %v3092_v37 = vmul.f32 2.5, %v3089_v56  ;;  %v3227_v34 = vmul.f32 1.25, %v6085_v12  ;;  %v3968_v42 = vpack.c.bf16 %v2709_v27, %v2708_v24 }
 0x59c   :  { %v3221_v48 = vmul.f32 %v3218_v1, %v3077_v58  ;;  %v3335_v39 = vmul.f32 %v3332_v4, %v3209_v35  ;;  %v3338_v9 = vmul.f32 0.8333333, %v3068_v20  ;;  %v3233_v14 = vmul.f32 1.25, %v3089_v56 }
 0x59d   :  { %v3329_v29 = vadd.f32 %v3326_v5, %v3320_v36  ;;  %v3095_v52 = vmul.f32 %v6102_v6, %v3092_v37  ;;  %v3230_v55 = vmul.f32 %v3227_v34, %v3077_v58  ;;  %3969 = vmatpush1.bf16.msra.mxu1 %v3968_v42  ;;  %v3971_v18 = vpack.c.bf16 %v2711_v46, %v2710_v50 }
 0x59e   :  { %v3224_v40 = vadd.f32 %v3221_v48, %v3215_v13  ;;  %3970 = vmatprep.subr.bf16.mxu1 %v4201_v11  ;;  %v3877_v17 = vadd.f32 -1.4, %v5859_v63  ;;  %v3347_v10 = vmul.f32 0.8333333, %v6074_v53  ;;  %v3353_v20 = vmul.f32 0.8333333, %v3089_v56 }
 0x59f   :  { %3430 = vrot.lane.b32.xlu1 %v3329_v29, %s4198_s16  ;;  %v3098_v30 = vadd.f32 %v3095_v52, %v3086_v7  ;;  %v3974_v41 = vpack.c.bf16 %v2713_v51, %v2712_v3  ;;  %vm2896_vm11 = vcmp.ge.f32.partialorder %v5725_v61, 1.8  ;;  %vm2899_vm12 = vcmp.lt.f32.partialorder %v5725_v61, 2.2 }
 0x5a0   :  { %v3341_v28 = vmul.f32 %v3338_v9, %v3224_v40  ;;  %v3350_v62 = vmul.f32 %v3347_v10, %v3224_v40  ;;  %vm2902_vm13 = vmand %vm2896_vm11, %vm2899_vm12  ;;  %v3876_v53 = vadd.f32 -1.4, %v5725_v61  ;;  %v3109_v19 = vsub.f32 2.2, %v5725_v61 }
 0x5a1   :  { %v3236_v0 = vmul.f32 %v3233_v14, %v3098_v30  ;;  %3972 = vmatpush1.bf16.msra.mxu1 %v3971_v18  ;;  %v3846_v45 = vsel %vm2902_vm13, 1.0, %v4193_v2  ;;  %v3241_v8 = vmul.f32 1.25, %v5991_v44  ;;  %vm2897_vm14 = vcmp.ge.f32.partialorder %v5859_v63, 1.8  ;;  %v2716_v44 = vld [vmem:[%s6247_s10 + $0x50] sm:$0xff] }
 0x5a2   :  { %v3344_v43 = vadd.f32 %v3341_v28, %v3335_v39  ;;  %3973 = vmatprep.subr.bf16.mxu1 %v4201_v11  ;;  %v3104_v57 = vmul.f32 2.5, %v3877_v17  ;;  %v3103_v23 = vmul.f32 2.5, %v3876_v53  ;;  %v3112_v21 = vmul.f32 2.5, %v3109_v19  ;;  %v2722_v28 = vld [vmem:[%s6247_s10 + $0x80] sm:$0xff]  ;;  %v2723_v17 = vld [vmem:[%s6247_s10 + $0x88] sm:$0xff] }
 0x5a3   :  { %v3239_v60 = vadd.f32 %v3236_v0, %v3230_v55  ;;  %v3977_v35 = vpack.c.bf16 %v2715_v32, %v2714_v31  ;;  %v3244_v36 = vmul.f32 %v3241_v8, %v6013_v16  ;;  %vm2900_vm1 = vcmp.lt.f32.partialorder %v5859_v63, 2.2  ;;  %v2717_v16 = vld [vmem:[%s6247_s10 + $0x58] sm:$0xff] }
 0x5a4   :  { %3442 = vrot.lane.b32.xlu0 %v3344_v43, %s4199_s19  ;;  %v3106_v56 = vmul.f32 %v5997_v22, %v3103_v23  ;;  %v3115_v58 = vmul.f32 %v3846_v45, %v3112_v21  ;;  %vm2903_vm15 = vmand %vm2897_vm14, %vm2900_vm1  ;;  %v3110_v13 = vsub.f32 2.2, %v5859_v63  ;;  %v3242_v24 = vmul.f32 1.25, %v6090_v15  ;;  %v2721_v55 = vld [vmem:[%s6247_s10 + $0x78] sm:$0xff] }
 0x5a5   :  { %v3356_v26 = vmul.f32 %v3353_v20, %v3239_v60  ;;  %3975 = vmatpush1.bf16.msra.mxu1 %v3974_v41  ;;  %v3847_v1 = vsel %vm2903_vm15, 1.0, %v4193_v2  ;;  %v3362_v22 = vmul.f32 0.8333333, %v6085_v12  ;;  %v3107_v27 = vmul.f32 %v6102_v6, %v3104_v57  ;;  %v2718_v2 = vld [vmem:[%s6247_s10 + $0x60] sm:$0xff]  ;;  %v2719_v12 = vld [vmem:[%s6247_s10 + $0x68] sm:$0xff] }
 0x5a6   :  { %3976 = vmatprep.subr.bf16.mxu1 %v4201_v11  ;;  %v3118_v5 = vadd.f32 %v3115_v58, %v3106_v56  ;;  %v3247_v7 = vmul.f32 1.25, %v3109_v19  ;;  %v3113_v37 = vmul.f32 2.5, %v3110_v13  ;;  %v3361_v48 = vmul.f32 0.8333333, %v5962_v47 }
 0x5a7   :  { %v3359_v25 = vadd.f32 %v3356_v26, %v3350_v62  ;;  %v3245_v4 = vmul.f32 %v3242_v24, %v3098_v30  ;;  %v3365_v50 = vmul.f32 %v3362_v22, %v3239_v60  ;;  %v3980_v46 = vpack.c.bf16 %v2717_v16, %v2716_v44  ;;  %v2720_v30 = vld [vmem:[%s6247_s10 + $0x70] sm:$0xff] }
 0x5a8   :  { %v3250_v29 = vmul.f32 %v3247_v7, %v3118_v5  ;;  %v3116_v52 = vmul.f32 %v3847_v1, %v3113_v37  ;;  %v3364_v15 = vmul.f32 %v3361_v48, %v6028_v59  ;;  %v3367_v47 = vmul.f32 0.8333333, %v3109_v19 }
 0x5a9   :  { %3454 = vrot.lane.b32.xlu1 %v3359_v25, %s4200_s20  ;;  %3978 = vmatpush1.bf16.msra.mxu1 %v3977_v35  ;;  %v3248_v42 = vmul.f32 1.25, %v3110_v13  ;;  %v3983_v40 = vpack.c.bf16 %v2719_v12, %v2718_v2  ;;  %v3368_v18 = vmul.f32 0.8333333, %v3110_v13  ;;  %v3986_v3 = vpack.c.bf16 %v2721_v55, %v2720_v30 }
 0x5aa   :  { %3979 = vmatprep.subr.bf16.mxu1 %v4201_v11  ;;  %v3253_v6 = vadd.f32 %v3250_v29, %v3244_v36  ;;  %v3119_v34 = vadd.f32 %v3116_v52, %v3107_v27  ;;  %v3989_v10 = vpack.c.bf16 %v2723_v17, %v2722_v28  ;;  %v3812_v20 = vmul.f32 -1.442695, %v5715_v54 }
 0x5ab   :  { %v3813_v43 = vmul.f32 -1.442695, %v5725_v61  ;;  %v3814_v58 = vmul.f32 -1.442695, %v5859_v63  ;;  %vm6286_vm2 = vcmask 392192   ;;  %vm6287_vm0 = vcmask 523264  }
 0x5ac   :  { %v3370_v39 = vmul.f32 %v3367_v47, %v3253_v6  ;;  %v3251_v9 = vmul.f32 %v3248_v42, %v3119_v34  ;;  %4176 = vpow2.f32 %v3812_v20  ;;  %vm6288_vm5 = vmmov %vm6286_vm2  ;;  %vm6289_vm6 = vcmask 654336  }
 0x5ad   :  { %3981 = vmatpush1.bf16.msra.mxu1 %v3980_v46  ;;  %4178 = vpow2.f32 %v3813_v43  ;;  %vm6290_vm9 = vcmask 785408   ;;  %vm6291_vm7 = vmmov %vm6287_vm0  ;;  %vm6292_vm10 = vcmask 916480  }
 0x5ae   :  { %3982 = vmatprep.subr.bf16.mxu1 %v4201_v11  ;;  %v6176_v14 = vadd.f32 %v3370_v39, %v3364_v15  ;;  %v3254_v59 = vadd.f32 %v3251_v9, %v3245_v4  ;;  %vm6293_vm8 = vmmov %vm6289_vm6 }
 0x5af   :  { %vm6294_vm11 = vmmov %vm6290_vm9 }
 0x5b0   :  { %v3371_v51 = vmul.f32 %v3368_v18, %v3254_v59  ;;  %vm6295_vm12 = vmmov %vm6292_vm10 }
 0x5b1   :  { %3984 = vmatpush1.bf16.msra.mxu1 %v3983_v40  ;;  %vm6296_vm13 = vmmov %vm6286_vm2 }
 0x5b2   :  { %3985 = vmatprep.subr.bf16.mxu1 %v4201_v11  ;;  %v3374_v0 = vadd.f32 %v3371_v51, %v3365_v50  ;;  %vm6297_vm14 = vmmov %vm6287_vm0 }
 0x5b3   :  { %vm6298_vm1 = vmmov %vm6289_vm6 }
 0x5b4   :  { %vm6299_vm15 = vmmov %vm6290_vm9 }
 0x5b5   :  { %3987 = vmatpush1.bf16.msra.mxu1 %v3986_v3 }
 0x5b6   :  { %3988 = vmatprep.subr.bf16.mxu1 %v4201_v11  ;;  %v4177_v41 = vpop.eup %4176 }
 0x5b7   :  { %v2733_v60 = vadd.f32 1.0, %v4177_v41  ;;  %v4179_v62 = vpop.eup %4178 }
 0x5b8   :  { %v2734_v31 = vadd.f32 1.0, %v4179_v62  ;;  %v4112_v53 = vpop.permute.xlu1 %4111 }
 0x5b9   :  { %3990 = vmatpush1.bf16.msra.mxu1 %v3989_v10  ;;  %4180 = vrcp.f32 %v2733_v60  ;;  %v4113_v23 = vunpack.i.l.bf16 %v4112_v53  ;;  %v4114_v13 = vunpack.i.h.bf16 %v4112_v53 }
 0x5ba   :  { %4182 = vrcp.f32 %v2734_v31  ;;  %v3882_v31 = vld [vmem:[%s6249_s12] ss:$0 sm:$0xff] }
 0x5bb   :  { %4184 = vpow2.f32 %v3814_v58 }
 0x5c3   :  { %v4181_v19 = vpop.eup %4180 }
 0x5c4   :  { %v2742_v11 = vmul.f32 %v4181_v19, %v5715_v54  ;;  %v4183_v26 = vpop.eup %4182 }
 0x5c5   :  { %v4107_v32 = vpop.permute.xlu0 %4106  ;;  %v2743_v56 = vmul.f32 %v4183_v26, %v5725_v61  ;;  %v4185_v42 = vpop.eup %4184 }
 0x5c6   :  { %v4108_v8 = vunpack.i.l.bf16 %v4107_v32  ;;  %v4109_v21 = vunpack.i.h.bf16 %v4107_v32  ;;  %v2735_v39 = vadd.f32 1.0, %v4185_v42 }
 0x5c8   :  { %v3459_v35 = vsel %vm800_vm3, %v2742_v11, %v4108_v8  ;;  %v3460_v1 = vsel %vm800_vm3, %v2743_v56, %v4109_v21  ;;  %4186 = vrcp.f32 %v2735_v39 }
 0x5c9   :  { %v3462_v16 = vsel %vm804_vm4, %v3459_v35, %v4113_v23  ;;  %v3463_v7 = vsel %vm804_vm4, %v3460_v1, %v4114_v13 }
 0x5d2   :  { %v4187_v55 = vpop.eup %4186 }
 0x5d3   :  { %v2744_v59 = vmul.f32 %v4187_v55, %v5859_v63  ;;  %v3881_v63 = vld [vmem:[%s6248_s11] ss:$0 sm:$0xff] }
 0x5d4   :  { %v4117_v45 = vpop.permute.xlu0 %4116 }
 0x5d5   :  { %v4122_v57 = vpop.permute.xlu1 %4121  ;;  %v4118_v36 = vunpack.i.l.bf16 %v4117_v45  ;;  %v4119_v24 = vunpack.i.h.bf16 %v4117_v45 }
 0x5d6   :  { %v4123_v44 = vunpack.i.l.bf16 %v4122_v57  ;;  %v4124_v5 = vunpack.i.h.bf16 %v4122_v57 }
 0x5d7   :  { %v3465_v54 = vsel %vm6286_vm2, %v3462_v16, %v4118_v36  ;;  %v3466_v48 = vsel %vm6288_vm5, %v3463_v7, %v4119_v24  ;;  %vm6300_vm2 = vmmov %vm6292_vm10 }
 0x5d8   :  { %v3468_v61 = vsel %vm6287_vm0, %v3465_v54, %v4123_v44  ;;  %v3469_v12 = vsel %vm6291_vm7, %v3466_v48, %v4124_v5 }
 0x5e5   :  { %v4127_v25 = vpop.permute.xlu0 %4126  ;;  %v4132_v22 = vpop.permute.xlu1 %4131 }
 0x5e6   :  { %v4128_v27 = vunpack.i.l.bf16 %v4127_v25  ;;  %v4133_v37 = vunpack.i.l.bf16 %v4132_v22  ;;  %v4129_v4 = vunpack.i.h.bf16 %v4127_v25  ;;  %v4134_v52 = vunpack.i.h.bf16 %v4132_v22 }
 0x5e8   :  { %v3471_v50 = vsel %vm6289_vm6, %v3468_v61, %v4128_v27  ;;  %v3472_v47 = vsel %vm6293_vm8, %v3469_v12, %v4129_v4 }
 0x5e9   :  { %v3474_v2 = vsel %vm6290_vm9, %v3471_v50, %v4133_v37  ;;  %v3475_v34 = vsel %vm6294_vm11, %v3472_v47, %v4134_v52 }
 0x5f4   :  { %v4137_v46 = vpop.permute.xlu0 %4136 }
 0x5f5   :  { %v4138_v29 = vunpack.i.l.bf16 %v4137_v46  ;;  %v4139_v15 = vunpack.i.h.bf16 %v4137_v46 }
 0x5f7   :  { %v3477_v6 = vsel %vm6292_vm10, %v3474_v2, %v4138_v29  ;;  %v3478_v40 = vsel %vm6295_vm12, %v3475_v34, %v4139_v15 }
 0x5f8   :  { %3554 = vmatmul.mubr.f32.vlgmr.msra.gmra.mrb[6].mxu1 %v3477_v6 }
 0x5f9   :  { %3879 = vmatprep.mubr.msk.f32.mxu1 %vm800_vm3, %v6176_v14 }
 0x5fb   :  { %v3383_v9 = vpop.permute.xlu1 %3382 }
 0x5fc   :  { %3559 = vmatmul.mubr.f32.gmra.mrb[8].mxu1 %v3478_v40  ;;  %v3461_v3 = vsel %vm800_vm3, %v2744_v59, %v3383_v9 }
 0x5fd   :  { %3880 = vmatprep.mubr.msk.f32.mxu1 %vm800_vm3, %v3374_v0 }
 0x603   :  { %v3395_v30 = vpop.permute.xlu0 %3394 }
 0x604   :  { %v3464_v14 = vsel %vm804_vm4, %v3461_v3, %v3395_v30 }
 0x606   :  { %v3407_v18 = vpop.permute.xlu1 %3406 }
 0x607   :  { %v3467_v28 = vsel %vm6296_vm13, %v3464_v14, %v3407_v18 }
 0x60b   :  { %v3419_v51 = vpop.permute.xlu0 %3418 }
 0x60c   :  { %v3470_v17 = vsel %vm6297_vm14, %v3467_v28, %v3419_v51 }
 0x611   :  { %v3431_v10 = vpop.permute.xlu1 %3430 }
 0x612   :  { %v3473_v0 = vsel %vm6298_vm1, %v3470_v17, %v3431_v10 }
 0x616   :  { %v3443_v20 = vpop.permute.xlu0 %3442 }
 0x617   :  { %v3476_v43 = vsel %vm6299_vm15, %v3473_v0, %v3443_v20 }
 0x61b   :  { %v3455_v41 = vpop.permute.xlu1 %3454 }
 0x61c   :  { %v3479_v60 = vsel %vm6300_vm2, %v3476_v43, %v3455_v41 }
 0x61d   :  { %3564 = vmatmul.mubr.f32.gmra.mrb[10].mxu1 %v3479_v60 }
 0x6cb   :  { %v3555_v62 = vpop.f32.mrb[6].mxu1 }
 0x6cc   :  { %v3576_v32 = vmul.f32 %v3881_v63, %v3555_v62  ;;  %v3557_v53 = vpop.f32.mrb[7].mxu1 }
 0x6ce   :  { %v3586_v19 = vadd.f32 %v3882_v31, %v3576_v32 }
 0x6cf   :  { %v3560_v45 = vpop.f32.mrb[8].mxu1 }
 0x6d0   :  { %v3589_v8 = vadd.f32 %v3586_v19, %v5251_v33  ;;  %v3577_v11 = vmul.f32 %v3881_v63, %v3560_v45  ;;  %v3562_v57 = vpop.f32.mrb[9].mxu1 }
 0x6d2   :  { %3592 = vst.msk [vmem:[%s6250_s13] sm:$0xff] %vm800_vm3, %v3589_v8  ;;  %v3587_v26 = vadd.f32 %v3882_v31, %v3577_v11 }
 0x6d4   :  { %v3590_v23 = vadd.f32 %v3587_v26, %v5264_v49 }
 0x6d6   :  { %3593 = vst.msk [vmem:[%s6250_s13 + $0x8] sm:$0xff] %vm800_vm3, %v3590_v23 }
 0x6f0   :  { %v3565_v21 = vpop.f32.mrb[10].mxu1 }
 0x6f1   :  { %v3578_v35 = vmul.f32 %v3881_v63, %v3565_v21  ;;  %v3567_v36 = vpop.f32.mrb[11].mxu1 }
 0x6f3   :  { %v3588_v25 = vadd.f32 %v3882_v31, %v3578_v35 }
 0x6f5   :  { %v3591_v33 = vadd.f32 %v3588_v25, %v5477_v38 }
 0x6f7   :  { %3594 = vst.msk [vmem:[%s6250_s13 + $0x10] sm:$0xff] %vm800_vm3, %v3591_v33 }

</bundles_post_ra>
